<compile_context>
chip_gen: v5e
topology: v5e:2x2
jax: 0.10.0
libtpu: 0.0.40
codegen_flags: <defaults>
</compile_context>

<pallas_src>
import jax
import jax.numpy as jnp
from jax.experimental import pallas as pl
from jax.experimental.pallas import tpu as pltpu


def _conv1x1_kernel(w_ref, x_ref, o_ref):
    # w_ref: (tm, Cin)    current Cout-slab of the weights
    # x_ref: (Cin, P)     all pixels, lane-dim columns (resident across grid)
    # o_ref: (tm, P)      current Cout-slab of the output
    o_ref[...] = jnp.dot(
        w_ref[...],
        x_ref[...],
        preferred_element_type=jnp.float32,
        precision=jax.lax.Precision.HIGHEST,
    ).astype(o_ref.dtype)


def conv2d_1x1(x_nchw, weight_oi):
    """1x1 conv, stride 1, no bias.

    x_nchw:    (1, Cin, H, W)  float32
    weight_oi: (Cout, Cin)     float32  (squeezed 1x1 kernel)
    returns:   (1, Cout, H, W) float32
    """
    N, Cin, H, W = x_nchw.shape
    Cout = weight_oi.shape[0]
    assert N == 1, "module spec has batch size 1; zero-copy reshape assumes N == 1"
    P = H * W

    # Zero-copy view: NCHW with N == 1 -> (Cin, H*W). No HBM transpose traffic.
    x_kp = x_nchw.reshape(Cin, P)

    # 2-way Cout split: parallel across v7x's two TCs, pipelined (double
    # buffered) on single-TC chips.  Fall back to grid-less if it doesn't tile.
    if Cout % 2 == 0 and (Cout // 2) % 8 == 0:
        n_blocks = 2
    else:
        n_blocks = 1
    tm = Cout // n_blocks

    flops = 2 * Cout * Cin * P
    bytes_accessed = 4 * (Cout * Cin + Cin * P + Cout * P)

    out_cp = pl.pallas_call(
        _conv1x1_kernel,
        out_shape=jax.ShapeDtypeStruct((Cout, P), jnp.float32),
        grid_spec=pltpu.PrefetchScalarGridSpec(
            num_scalar_prefetch=0,
            grid=(n_blocks,),
            in_specs=[
                # Weight slab streams per grid step.
                pl.BlockSpec((tm, Cin), lambda i: (i, 0)),
                # X is small and stationary: same block every step -> resident.
                pl.BlockSpec((Cin, P), lambda i: (0, 0)),
            ],
            out_specs=pl.BlockSpec((tm, P), lambda i: (i, 0)),
        ),
        compiler_params=pltpu.CompilerParams(
            dimension_semantics=("parallel",),
        ),
        cost_estimate=pl.CostEstimate(
            flops=flops, transcendentals=0, bytes_accessed=bytes_accessed
        ),
    )(weight_oi, x_kp)

    # Zero-copy view back to NCHW.
    return out_cp.reshape(N, Cout, H, W)


if __name__ == "__main__":
    key = jax.random.PRNGKey(0)
    kx, kw = jax.random.split(key)

    # Shapes from the module: x240 ~ [1, 176, 14, 14], Conv2d(176 -> 1056, 1x1, no bias)
    N, Cin, H, W = 1, 176, 14, 14
    Cout = 1056

    x = jax.random.normal(kx, (N, Cin, H, W), dtype=jnp.float32)
    # Deterministic weight init (kaiming-uniform-ish scale, fixed by PRNGKey(0))
    bound = 1.0 / (Cin ** 0.5)
    weight = jax.random.uniform(
        kw, (Cout, Cin), minval=-bound, maxval=bound, dtype=jnp.float32
    )

    out = conv2d_1x1(x, weight)
    jax.block_until_ready(out)

    # Sanity check against plain-JAX reference (full f32 precision, matching
    # the kernel's precision=HIGHEST dot).
    ref = jnp.einsum(
        "nchw,oc->nohw", x, weight, precision=jax.lax.Precision.HIGHEST
    )
    assert out.shape == (N, Cout, H, W)
    assert jnp.allclose(out, ref, atol=1e-4, rtol=1e-4)

    print("KERNEL_OK")
</pallas_src>

<mosaic_0001>
module attributes {stable_mosaic.version = 11 : i64} {
  func.func @_conv1x1_kernel(%arg0: i32, %arg1: memref<528x176xf32, #tpu.memory_space<vmem>>, %arg2: memref<176x196xf32, #tpu.memory_space<vmem>>, %arg3: memref<528x196xf32, #tpu.memory_space<vmem>>) attributes {dimension_semantics = [#tpu.dimension_semantics<parallel>], iteration_bounds = array<i64: 2>, scalar_prefetch = 0 : i64, scratch_operands = 0 : i64, tpu.core_type = #tpu.core_type<tc>, window_params = [{transform_indices = @transform_0, window_bounds = array<i64: 528, 176>}, {pipeline_mode = #tpu.pipeline_mode<synchronous>, transform_indices = @transform_1, window_bounds = array<i64: 176, 196>}, {transform_indices = @transform_2, window_bounds = array<i64: 528, 196>}]} {
    %c0 = arith.constant 0 : index
    %c0_0 = arith.constant 0 : index
    %0 = vector.load %arg1[%c0, %c0_0] : memref<528x176xf32, #tpu.memory_space<vmem>>, vector<528x176xf32>
    %c0_1 = arith.constant 0 : index
    %c0_2 = arith.constant 0 : index
    %1 = vector.load %arg2[%c0_1, %c0_2] : memref<176x196xf32, #tpu.memory_space<vmem>>, vector<176x196xf32>
    %cst = arith.constant dense<0.000000e+00> : vector<528x196xf32>
    %2 = tpu.matmul %0, %1, %cst {dimension_numbers = #tpu.dot_dimension_numbers<[1], [0], [0], [1], [0, 0, 1, 1], [], []>, precision = #tpu.contract_precision<fp32>} : vector<528x176xf32>, vector<176x196xf32>, vector<528x196xf32> -> vector<528x196xf32>
    %c0_3 = arith.constant 0 : index
    %c0_4 = arith.constant 0 : index
    %3 = vector.load %arg3[%c0_3, %c0_4] : memref<528x196xf32, #tpu.memory_space<vmem>>, vector<528x196xf32>
    tpu.vector_store %arg3[%c0_3, %c0_4], %2 {strides = array<i32>} : memref<528x196xf32, #tpu.memory_space<vmem>>, vector<528x196xf32>,
    return
  }
  func.func @transform_0(%arg0: i32) -> (i32, i32) {
    %c0_i32 = arith.constant 0 : i32
    %c0_i32_0 = arith.constant 0 : i32
    return %arg0, %c0_i32 : i32, i32
  }
  func.func @transform_1(%arg0: i32) -> (i32, i32) {
    %c0_i32 = arith.constant 0 : i32
    %c0_i32_0 = arith.constant 0 : i32
    %c0_i32_1 = arith.constant 0 : i32
    return %c0_i32, %c0_i32_0 : i32, i32
  }
  func.func @transform_2(%arg0: i32) -> (i32, i32) {
    %c0_i32 = arith.constant 0 : i32
    %c0_i32_0 = arith.constant 0 : i32
    return %arg0, %c0_i32 : i32, i32
  }
}

</mosaic_0001>

<bundles_post_ra>
// kernel: tpu_custom_call.1
= control target key start
LH: loop header
LB: loop body
LE: loop exit
PB: predicated region body
PF: predicated region fallthrough
CT: control target
= control target key end

     0   :  { %s9926_s9 = smov 0   ;;  %s15078_s0 = inlined_call_operand.vmem [shape: f32[1056,176], index: 0, kind: input, shape index: {}]   ;;  %s15079_s1 = inlined_call_operand.vmem [shape: f32[176,196], index: 1, kind: input, shape index: {}]   ;;  %s15080_s2 = inlined_call_operand.vmem [shape: f32[1056,196], index: 2, kind: output, shape index: {}]  }
   0x1 LB: > { %s9882_s10 = sadd.s32 4294967295, %s9909_s9   ;;  %p9886_p0 = scmp.ge.s32.totalorder %s9909_s9, 1  ;;  %s9909_s9 = sphi %s9926_s9, %s12_s9  }
   0x2   : > { %p114_p1 = scmp.lt.s32.totalorder %s9909_s9, 3 }
   0x4   : > { %p115_p2 = pnand %p9886_p0, %p114_p1 }
   0x6   : > { %118 = sbr.rel (%p115_p2) target bundleno = 3346 (0xd12), region = 28 }
   0xb   : > { %v314_v0 = vld [vmem:[%s15079_s1 + $0xf0] sm:$0xff]  ;;  %v312_v1 = vld [vmem:[%s15079_s1 + $0xe0] sm:$0xff]  ;;  %s138_s17 = smul.u32 66, %s9882_s10  ;;  %vm328_vm0 = vcmask 392192   ;;  %vm9692_vm1 = vcmask 556032  }
   0xc   : > { %v310_v2 = vld [vmem:[%s15079_s1 + $0xd0] sm:$0xff]  ;;  %v9943_v3 = vand.u32 4294901760, %v314_v0  ;;  %v9945_v4 = vand.u32 4294901760, %v312_v1  ;;  %v308_v6 = vld [vmem:[%s15079_s1 + $0xc0] sm:$0xff] }
   0xd   : > { %v9947_v5 = vand.u32 4294901760, %v310_v2  ;;  %v306_v7 = vld [vmem:[%s15079_s1 + $0xb0] sm:$0xff]  ;;  %v304_v8 = vld [vmem:[%s15079_s1 + $0xa0] sm:$0xff]  ;;  %v9958_v9 = vand.u32 4294901760, %v308_v6  ;;  %p139_p3 = scmp.lt.s32.totalorder %s138_s17, 131 }
   0xe   : > { %v9960_v10 = vand.u32 4294901760, %v306_v7  ;;  %v9962_v11 = vand.u32 4294901760, %v304_v8  ;;  %v302_v12 = vld [vmem:[%s15079_s1 + $0x90] sm:$0xff]  ;;  %v300_v13 = vld [vmem:[%s15079_s1 + $0x80] sm:$0xff]  ;;  %528 = vmatpush.msra.mxu0 %v9943_v3  ;;  %v9972_v14 = vsub.f32 %v314_v0, %v9943_v3  ;;  %v9975_v15 = vsub.f32 %v312_v1, %v9945_v4  ;;  %1829 = vmatpush.msra.mxu3 %v9943_v3 }
   0xf   : > { %v9979_v16 = vsub.f32 %v310_v2, %v9947_v5  ;;  %v9981_v17 = vand.u32 4294901760, %v302_v12  ;;  %v298_v18 = vld [vmem:[%s15079_s1 + $0x70] sm:$0xff]  ;;  %v9987_v19 = vsub.f32 %v308_v6, %v9958_v9  ;;  %v9992_v21 = vand.u32 4294901760, %v300_v13  ;;  %s17685_s17 = smov (!%p139_p3, %s138_s17), 131  ;;  %v296_v29 = vld [vmem:[%s15079_s1 + $0x60] sm:$0xff] }
  0x10   : > { %v9990_v20 = vsub.f32 %v306_v7, %v9960_v10  ;;  %v9995_v22 = vsub.f32 %v304_v8, %v9962_v11  ;;  %530 = vmatpush.msra.mxu0 %v9945_v4  ;;  %1451 = vmatpush.msra.mxu2 %v9972_v14  ;;  %v1090_v23 = vand.u32 4294901760, %v9972_v14  ;;  %v1096_v24 = vand.u32 4294901760, %v9975_v15  ;;  %v294_v36 = vld [vmem:[%s15079_s1 + $0x50] sm:$0xff]  ;;  %s9893_s6 = sshll.u32 %s17685_s17, 4  ;;  %v292_v43 = vld [vmem:[%s15079_s1 + $0x40] sm:$0xff] }
  0x11   : > { %v1102_v25 = vand.u32 4294901760, %v9979_v16  ;;  %1831 = vmatpush.msra.mxu3 %v9945_v4  ;;  %v1108_v26 = vand.u32 4294901760, %v9987_v19  ;;  %v10006_v27 = vand.u32 4294901760, %v298_v18  ;;  %v10009_v28 = vsub.f32 %v302_v12, %v9981_v17  ;;  %s10061_s12 = scalar_lea.vmem %s15078_s0, %s9893_s6  ;;  %v290_v49 = vld [vmem:[%s15079_s1 + $0x30] sm:$0xff]  ;;  %v288_v55 = vld [vmem:[%s15079_s1 + $0x20] sm:$0xff]  ;;  %s13121_s21 = scalar_lea.vmem %s15080_s2, %s9893_s6 }
  0x12   : > { %532 = vmatpush.msra.mxu0 %v9947_v5  ;;  %1454 = vmatpush.msra.mxu2 %v9975_v15  ;;  %v1091_v30 = vsub.f32 %v9972_v14, %v1090_v23  ;;  %v1097_v31 = vsub.f32 %v9975_v15, %v1096_v24  ;;  %v1114_v33 = vand.u32 4294901760, %v9990_v20  ;;  %v1120_v34 = vand.u32 4294901760, %v9995_v22  ;;  %v152_v56 = vld [vmem:[%s10061_s12] sm:$0xff]  ;;  %v286_v60 = vld [vmem:[%s15079_s1 + $0x10] sm:$0xff] }
  0x13   : > { %v1103_v32 = vsub.f32 %v9979_v16, %v1102_v25  ;;  %1833 = vmatpush.msra.mxu3 %v9947_v5  ;;  %v10029_v35 = vsub.f32 %v300_v13, %v9992_v21  ;;  %v1109_v39 = vsub.f32 %v9987_v19, %v1108_v26  ;;  %v10040_v40 = vand.u32 4294901760, %v296_v29  ;;  %v326_v63 = vld [vmem:[%s15079_s1 + $0x150] sm:$0xff]  ;;  %v284_v13 = vld [vmem:[%s15079_s1] sm:$0xff] }
  0x14   : > { %534 = vmatpush.msra.mxu0 %v9958_v9  ;;  %v1092_v37 = vand.u32 4294901760, %v1091_v30  ;;  %1457 = vmatpush.msra.mxu2 %v9979_v16  ;;  %v1098_v38 = vand.u32 4294901760, %v1097_v31  ;;  %v1126_v41 = vand.u32 4294901760, %v10009_v28  ;;  %v10045_v42 = vsub.f32 %v298_v18, %v10006_v27  ;;  %v162_v16 = vld [vmem:[%s10061_s12 + $0x50] sm:$0xff] }
  0x15   : > { %1835 = vmatpush.msra.mxu3 %v9958_v9  ;;  %v1104_v44 = vand.u32 4294901760, %v1103_v32  ;;  %v1115_v45 = vsub.f32 %v9990_v20, %v1114_v33  ;;  %v10054_v46 = vand.u32 4294901760, %v294_v36  ;;  %v1121_v47 = vsub.f32 %v9995_v22, %v1120_v34  ;;  %v154_v32 = vld [vmem:[%s10061_s12 + $0x10] sm:$0xff] }
  0x16   : > { %536 = vmatpush.msra.mxu0 %v9960_v10  ;;  %1093 = vmatpush.msra.mxu1 %v1092_v37  ;;  %v1132_v48 = vand.u32 4294901760, %v10029_v35  ;;  %v1110_v50 = vand.u32 4294901760, %v1109_v39  ;;  %v10073_v51 = vand.u32 4294901760, %v292_v43  ;;  %v10076_v52 = vsub.f32 %v296_v29, %v10040_v40 }
  0x17   : > { %1460 = vmatpush.msra.mxu2 %v9987_v19  ;;  %1837 = vmatpush.msra.mxu3 %v9960_v10  ;;  %v1127_v53 = vsub.f32 %v10009_v28, %v1126_v41  ;;  %v1138_v54 = vand.u32 4294901760, %v10045_v42  ;;  %v1116_v57 = vand.u32 4294901760, %v1115_v45  ;;  %v10089_v58 = vand.u32 4294901760, %v290_v49 }
  0x18   : > { %538 = vmatpush.msra.mxu0 %v9962_v11  ;;  %1099 = vmatpush.msra.mxu1 %v1098_v38  ;;  %v10092_v59 = vsub.f32 %v294_v36, %v10054_v46  ;;  %v1122_v61 = vand.u32 4294901760, %v1121_v47  ;;  %v1133_v62 = vsub.f32 %v10029_v35, %v1132_v48  ;;  %v10106_v0 = vand.u32 4294901760, %v288_v55 }
  0x19   : > { %1463 = vmatpush.msra.mxu2 %v9990_v20  ;;  %1839 = vmatpush.msra.mxu3 %v9962_v11  ;;  %v1144_v1 = vand.u32 4294901760, %v10076_v52  ;;  %v10110_v2 = vsub.f32 %v292_v43, %v10073_v51  ;;  %v10112_v6 = vand.u32 4294901760, %v152_v56  ;;  %v1128_v7 = vand.u32 4294901760, %v1127_v53  ;;  %v164_v20 = vld [vmem:[%s10061_s12 + $0x60] sm:$0xff] }
  0x1a   : > { %540 = vmatpush.msra.mxu0 %v9981_v17  ;;  %1105 = vmatpush.msra.mxu1 %v1104_v44  ;;  %v1139_v8 = vsub.f32 %v10045_v42, %v1138_v54  ;;  %v10119_v12 = vand.u32 4294901760, %v286_v60  ;;  %v15083_v18 = vand.u32 4294901760, %v10092_v59  ;;  %v10127_v29 = vsub.f32 %v290_v49, %v10089_v58 }
  0x1b   : > { %1466 = vmatpush.msra.mxu2 %v9995_v22  ;;  %1841 = vmatpush.msra.mxu3 %v9981_v17  ;;  %15993 = vst [vmem:[#allocation2_spill] sm:$0xff] %v10112_v6  ;;  %v10130_v30 = vsub.f32 %v152_v56, %v10112_v6  ;;  %v10132_v31 = vand.u32 4294901760, %v326_v63  ;;  %v1134_v36 = vand.u32 4294901760, %v1133_v62  ;;  %v1145_v37 = vsub.f32 %v10076_v52, %v1144_v1 }
  0x1c   : > { %542 = vmatpush.msra.mxu0 %v9992_v21  ;;  %1111 = vmatpush.msra.mxu1 %v1110_v50  ;;  %v10141_v38 = vand.u32 4294901760, %v284_v13  ;;  %v15082_v39 = vand.u32 4294901760, %v10110_v2  ;;  %v10145_v43 = vsub.f32 %v288_v55, %v10106_v0  ;;  %v1140_v44 = vand.u32 4294901760, %v1139_v8 }
  0x1d   : > { %1469 = vmatpush.msra.mxu2 %v10009_v28  ;;  %1843 = vmatpush.msra.mxu3 %v9992_v21  ;;  %15994 = vst [vmem:[#allocation3_spill] sm:$0xff] %v10130_v30  ;;  %v10150_v45 = vand.u32 4294901760, %v10130_v30  ;;  %v10152_v47 = vand.u32 4294901760, %v154_v32  ;;  %v1151_v49 = vsub.f32 %v10092_v59, %v15083_v18  ;;  %v15081_v50 = vand.u32 4294901760, %v10127_v29 }
  0x1e   : > { %544 = vmatpush.msra.mxu0 %v10006_v27  ;;  %1117 = vmatpush.msra.mxu1 %v1116_v57  ;;  %v10160_v53 = vsub.f32 %v286_v60, %v10119_v12  ;;  %v10163_v55 = vsub.f32 %v326_v63, %v10132_v31  ;;  %v1146_v56 = vand.u32 4294901760, %v1145_v37  ;;  %v1157_v57 = vsub.f32 %v10110_v2, %v15082_v39  ;;  %v156_v37 = vld [vmem:[%s10061_s12 + $0x20] sm:$0xff] }
  0x1f   : > { %1472 = vmatpush.msra.mxu2 %v10029_v35  ;;  %1845 = vmatpush.msra.mxu3 %v10006_v27  ;;  %15995 = vst [vmem:[#allocation4_spill] sm:$0xff] %v10150_v45  ;;  %v10173_v60 = vsub.f32 %v284_v13, %v10141_v38  ;;  %v562_v62 = vsub.f32 %v10130_v30, %v10150_v45  ;;  %v10203_v18 = vand.u32 4294901760, %v156_v37  ;;  %v10288_v19 = vand.u32 4294901760, %v162_v16 }
  0x20   : > { %546 = vmatpush.msra.mxu0 %v10040_v40  ;;  %1123 = vmatpush.msra.mxu1 %v1122_v61  ;;  %15996 = vst [vmem:[#allocation5_spill] sm:$0xff] %v10152_v47  ;;  %v15084_v61 = vand.u32 4294901760, %v10145_v43  ;;  %v10180_v63 = vsub.f32 %v154_v32, %v10152_v47  ;;  %v1163_v8 = vsub.f32 %v10127_v29, %v15081_v50  ;;  %v15086_v13 = vand.u32 4294901760, %v10160_v53 }
  0x21   : > { %1475 = vmatpush.msra.mxu2 %v10045_v42  ;;  %1847 = vmatpush.msra.mxu3 %v10040_v40  ;;  %v1158_v32 = vand.u32 4294901760, %v1157_v57  ;;  %v10197_v50 = vand.u32 4294901760, %v562_v62  ;;  %16000 = vst [vmem:[#allocation9_spill] sm:$0xff] %v10203_v18  ;;  %v10316_v22 = vand.u32 4294901760, %v164_v20  ;;  %v16024_v42 = vand.u32 4294901760, %v10145_v43 }
  0x22   : > { %548 = vmatpush.msra.mxu0 %v10054_v46  ;;  %1129 = vmatpush.msra.mxu1 %v1128_v7  ;;  %15997 = vst [vmem:[#allocation6_spill] sm:$0xff] %v10180_v63  ;;  %v1152_v7 = vand.u32 4294901760, %v1151_v49  ;;  %v15087_v49 = vand.u32 4294901760, %v10173_v60  ;;  %v10201_v39 = vand.u32 4294901760, %v10180_v63  ;;  %v1175_v57 = vsub.f32 %v10160_v53, %v15086_v13 }
  0x23   : > { %1478 = vmatpush.msra.mxu2 %v10076_v52  ;;  %1849 = vmatpush.msra.mxu3 %v10054_v46  ;;  %15998 = vst [vmem:[#allocation7_spill] sm:$0xff] %v10197_v50  ;;  %v10329_v28 = vsub.f32 %v164_v20, %v10316_v22  ;;  %v168_v52 = vld [vmem:[%s10061_s12 + $0x80] sm:$0xff] }
  0x24   : > { %550 = vmatpush.msra.mxu0 %v10073_v51  ;;  %1135 = vmatpush.msra.mxu1 %v1134_v36  ;;  %v15085_v36 = vand.u32 4294901760, %v10163_v55  ;;  %15999 = vst [vmem:[#allocation8_spill] sm:$0xff] %v10201_v39  ;;  %v1176_v13 = vand.u32 4294901760, %v1175_v57 }
  0x25   : > { %1481 = vmatpush.msra.mxu2 %v10092_v59  ;;  %1851 = vmatpush.msra.mxu3 %v10073_v51  ;;  %16012 = vst [vmem:[#allocation21_spill] sm:$0xff] %v10288_v19 }
  0x26   : > { %552 = vmatpush.msra.mxu0 %v10089_v58  ;;  %1141 = vmatpush.msra.mxu1 %v1140_v44  ;;  %v1169_v44 = vsub.f32 %v10145_v43, %v15084_v61  ;;  %v3447_v62 = vsub.f32 %v10163_v55, %v15085_v36  ;;  %v10223_v36 = vsub.f32 %v156_v37, %v10203_v18 }
  0x27   : > { %1484 = vmatpush.msra.mxu2 %v10110_v2  ;;  %1853 = vmatpush.msra.mxu3 %v10089_v58  ;;  %16016 = vst [vmem:[#allocation25_spill] sm:$0xff] %v10316_v22 }
  0x28   : > { %554 = vmatpush.msra.mxu0 %v10106_v0  ;;  %1147 = vmatpush.msra.mxu1 %v1146_v56  ;;  %v1164_v56 = vand.u32 4294901760, %v1163_v8  ;;  %v1170_v61 = vand.u32 4294901760, %v1169_v44  ;;  %v570_v8 = vsub.f32 %v10180_v63, %v10201_v39  ;;  %16001 = vst [vmem:[#allocation10_spill] sm:$0xff] %v10223_v36  ;;  %v158_v44 = vld [vmem:[%s10061_s12 + $0x30] sm:$0xff] }
  0x29   : > { %1487 = vmatpush.msra.mxu2 %v10127_v29  ;;  %1855 = vmatpush.msra.mxu3 %v10106_v0  ;;  %v10238_v57 = vand.u32 4294901760, %v158_v44  ;;  %16019 = vst [vmem:[#allocation26_spill] sm:$0xff] %v10329_v28 }
  0x2a   : > { %556 = vmatpush.msra.mxu0 %v10119_v12  ;;  %1153 = vmatpush.msra.mxu1 %v1152_v7  ;;  %v1181_v7 = vsub.f32 %v10173_v60, %v15087_v49  ;;  %v10233_v37 = vand.u32 4294901760, %v570_v8 }
  0x2b   : > { %1490 = vmatpush.msra.mxu2 %v10145_v43  ;;  %1857 = vmatpush.msra.mxu3 %v10119_v12  ;;  %16004 = vst [vmem:[#allocation13_spill] sm:$0xff] %v10238_v57 }
  0x2c   : > { %558 = vmatpush.msra.mxu0 %v10141_v38  ;;  %1159 = vmatpush.msra.mxu1 %v1158_v32  ;;  %v3448_v32 = vand.u32 4294901760, %v3447_v62  ;;  %v1182_v49 = vand.u32 4294901760, %v1181_v7  ;;  %16002 = vst [vmem:[#allocation11_spill] sm:$0xff] %v10233_v37  ;;  %v324_v62 = vld [vmem:[%s15079_s1 + $0x140] sm:$0xff] }
  0x2d   : > { %564 = vmatmul.f32.vlgmr.msra.gmra.mxu0 %v10197_v50  ;;  %1493 = vmatpush.msra.mxu2 %v10160_v53 }
  0x2e   : > { %1165 = vmatpush.msra.mxu1 %v1164_v56  ;;  %1859 = vmatpush.msra.mxu3 %v10141_v38  ;;  %v10236_v56 = vand.u32 4294901760, %v10223_v36 }
  0x2f   : > { %1496 = vmatpush.msra.mxu2 %v10173_v60  ;;  %1863 = vmatmul.f32.vlgmr.msra.gmra.mxu3 %v10150_v45 }
  0x30   : > { %1171 = vmatpush.msra.mxu1 %v1170_v61  ;;  %1499 = vmatmul.f32.vlgmr.msra.gmra.mxu2 %v10130_v30  ;;  %16003 = vst [vmem:[#allocation12_spill] sm:$0xff] %v10236_v56  ;;  %v578_v14 = vsub.f32 %v10223_v36, %v10236_v56  ;;  %v160_v61 = vld [vmem:[%s10061_s12 + $0x40] sm:$0xff] }
  0x31   : > { %2894 = vmatpush.msrb.mxu2 %v10132_v31  ;;  %2260 = vmatpush.msrb.mxu0 %v1090_v23  ;;  %v10247_v23 = vsub.f32 %v158_v44, %v10238_v57  ;;  %v10410_v44 = vand.u32 4294901760, %v324_v62 }
  0x32   : > { %1177 = vmatpush.msra.mxu1 %v1176_v13  ;;  %3449 = vmatpush.msrb.mxu3 %v3448_v32  ;;  %v10256_v15 = vand.u32 4294901760, %v578_v14  ;;  %v10261_v13 = vand.u32 4294901760, %v160_v61 }
  0x33   : > { %2264 = vmatpush.msrb.mxu0 %v1096_v24  ;;  %16005 = vst [vmem:[#allocation14_spill] sm:$0xff] %v10247_v23  ;;  %v10259_v24 = vand.u32 4294901760, %v10247_v23  ;;  %2896 = vmatpush.msrb.mxu2 %v10410_v44  ;;  %v10414_v14 = vsub.f32 %v324_v62, %v10410_v44 }
  0x34   : > { %1183 = vmatpush.msra.mxu1 %v1182_v49  ;;  %16006 = vst [vmem:[#allocation15_spill] sm:$0xff] %v10256_v15  ;;  %v172_v49 = vld [vmem:[%s10061_s12 + $0xa0] sm:$0xff] }
  0x35   : > { %572 = vmatmul.f32.gmra.mxu0 %v10233_v37  ;;  %1185 = vmatmul.f32.vlgmr.msra.gmra.mxu1 %v10112_v6  ;;  %16007 = vst [vmem:[#allocation16_spill] sm:$0xff] %v10259_v24  ;;  %v10408_v32 = vand.u32 4294901760, %v172_v49 }
  0x36   : > { %2587 = vmatpush.msrb.mxu1 %v9943_v3  ;;  %2268 = vmatpush.msrb.mxu0 %v1102_v25  ;;  %16008 = vst [vmem:[#allocation17_spill] sm:$0xff] %v10261_v13  ;;  %v586_v3 = vsub.f32 %v10247_v23, %v10259_v24  ;;  %v16017_v25 = vand.u32 4294901760, %v10092_v59 }
  0x37   : > { %1869 = vmatmul.f32.gmra.mxu3 %v10201_v39  ;;  %16038 = vst [vmem:[#allocation41_spill] sm:$0xff] %v10408_v32 }
  0x38   : > { %1504 = vmatmul.f32.gmra.mxu2 %v10180_v63  ;;  %2589 = vmatpush.msrb.mxu1 %v9945_v4  ;;  %v10274_v4 = vsub.f32 %v160_v61, %v10261_v13 }
  0x39   : > { %2272 = vmatpush.msrb.mxu0 %v1108_v26  ;;  %v16018_v26 = vand.u32 4294901760, %v10110_v2 }
  0x3a   : > { %2591 = vmatpush.msrb.mxu1 %v9947_v5  ;;  %16009 = vst [vmem:[#allocation18_spill] sm:$0xff] %v10274_v4  ;;  %v10283_v5 = vand.u32 4294901760, %v586_v3  ;;  %v10422_v3 = vsub.f32 %v172_v49, %v10408_v32 }
  0x3b   : > { %2276 = vmatpush.msrb.mxu0 %v1114_v33  ;;  %v166_v33 = vld [vmem:[%s10061_s12 + $0x70] sm:$0xff] }
  0x3c   : > { %2593 = vmatpush.msrb.mxu1 %v9958_v9  ;;  %16010 = vst [vmem:[#allocation19_spill] sm:$0xff] %v10283_v5  ;;  %v10286_v9 = vand.u32 4294901760, %v10274_v4 }
  0x3d   : > { %580 = vmatmul.f32.gmra.mxu0 %v10256_v15  ;;  %1189 = vmatmul.f32.gmra.mxu1 %v10152_v47  ;;  %16039 = vst [vmem:[#allocation42_spill] sm:$0xff] %v10422_v3 }
  0x3e   : > { %2595 = vmatpush.msrb.mxu1 %v9960_v10  ;;  %2280 = vmatpush.msrb.mxu0 %v1120_v34  ;;  %16011 = vst [vmem:[#allocation20_spill] sm:$0xff] %v10286_v9  ;;  %v594_v10 = vsub.f32 %v10274_v4, %v10286_v9  ;;  %v16020_v34 = vand.u32 4294901760, %v10127_v29 }
  0x3f   : > { %1875 = vmatmul.f32.gmra.mxu3 %v10236_v56 }
  0x40   : > { %1509 = vmatmul.f32.gmra.mxu2 %v10223_v36  ;;  %2597 = vmatpush.msrb.mxu1 %v9962_v11  ;;  %v10301_v11 = vsub.f32 %v162_v16, %v10288_v19  ;;  %v15088_v16 = vand.u32 4294901760, %v10414_v14 }
  0x41   : > { %2284 = vmatpush.msrb.mxu0 %v1126_v41  ;;  %v10343_v41 = vand.u32 4294901760, %v166_v33 }
  0x42   : > { %2599 = vmatpush.msrb.mxu1 %v9981_v17  ;;  %16013 = vst [vmem:[#allocation22_spill] sm:$0xff] %v10301_v11  ;;  %v10311_v17 = vand.u32 4294901760, %v594_v10  ;;  %v174_v10 = vld [vmem:[%s10061_s12 + $0xb0] sm:$0xff]  ;;  %v3453_v20 = vsub.f32 %v10414_v14, %v15088_v16 }
  0x43   : > { %2288 = vmatpush.msrb.mxu0 %v1132_v48  ;;  %16023 = vst [vmem:[#allocation29_spill] sm:$0xff] %v10343_v41 }
  0x44   : > { %2601 = vmatpush.msrb.mxu1 %v9992_v21  ;;  %16014 = vst [vmem:[#allocation23_spill] sm:$0xff] %v10311_v17  ;;  %v10314_v21 = vand.u32 4294901760, %v10301_v11 }
  0x45   : > { %588 = vmatmul.f32.gmra.mxu0 %v10283_v5  ;;  %1193 = vmatmul.f32.gmra.mxu1 %v10203_v18 }
  0x46   : > { %2292 = vmatpush.msrb.mxu0 %v1138_v54  ;;  %2603 = vmatpush.msrb.mxu1 %v10006_v27  ;;  %16015 = vst [vmem:[#allocation24_spill] sm:$0xff] %v10314_v21  ;;  %v602_v27 = vsub.f32 %v10301_v11, %v10314_v21  ;;  %v16027_v54 = vand.u32 4294901760, %v10173_v60 }
  0x47   : > { %1881 = vmatmul.f32.gmra.mxu3 %v10259_v24 }
  0x48   : > { %1514 = vmatmul.f32.gmra.mxu2 %v10247_v23  ;;  %2296 = vmatpush.msrb.mxu0 %v1144_v1  ;;  %v10338_v35 = vand.u32 4294901760, %v602_v27  ;;  %v10437_v27 = vand.u32 4294901760, %v174_v10 }
  0x49   : > { %2605 = vmatpush.msrb.mxu1 %v10040_v40  ;;  %v10341_v40 = vand.u32 4294901760, %v10329_v28 }
  0x4a   : > { %2300 = vmatpush.msrb.mxu0 %v16017_v25  ;;  %16021 = vst [vmem:[#allocation27_spill] sm:$0xff] %v10338_v35 }
  0x4b   : > { %2607 = vmatpush.msrb.mxu1 %v10054_v46  ;;  %16022 = vst [vmem:[#allocation28_spill] sm:$0xff] %v10341_v40  ;;  %v16025_v46 = vand.u32 4294901760, %v10160_v53  ;;  %v610_v48 = vsub.f32 %v10329_v28, %v10341_v40 }
  0x4c   : > { %2304 = vmatpush.msrb.mxu0 %v16018_v26  ;;  %v10435_v26 = vand.u32 4294901760, %v10422_v3  ;;  %16042 = vst [vmem:[#allocation45_spill] sm:$0xff] %v10437_v27 }
  0x4d   : > { %596 = vmatmul.f32.gmra.mxu0 %v10311_v17  ;;  %1197 = vmatmul.f32.gmra.mxu1 %v10238_v57 }
  0x4e   : > { %2609 = vmatpush.msrb.mxu1 %v10073_v51  ;;  %2308 = vmatpush.msrb.mxu0 %v16020_v34  ;;  %v10356_v51 = vsub.f32 %v166_v33, %v10343_v41  ;;  %16041 = vst [vmem:[#allocation44_spill] sm:$0xff] %v10435_v26  ;;  %v3454_v33 = vand.u32 4294901760, %v3453_v20  ;;  %v642_v34 = vsub.f32 %v10422_v3, %v10435_v26 }
  0x4f   : > { %1887 = vmatmul.f32.gmra.mxu3 %v10286_v9 }
  0x50   : > { %1519 = vmatmul.f32.gmra.mxu2 %v10274_v4  ;;  %2611 = vmatpush.msrb.mxu1 %v10089_v58  ;;  %16026 = vst [vmem:[#allocation30_spill] sm:$0xff] %v10356_v51  ;;  %v10366_v58 = vand.u32 4294901760, %v610_v48  ;;  %v10369_v59 = vand.u32 4294901760, %v10356_v51  ;;  %v10449_v48 = vand.u32 4294901760, %v642_v34 }
  0x51   : > { %2312 = vmatpush.msrb.mxu0 %v16024_v42  ;;  %3455 = vmatpush.msrb.mxu3 %v3454_v33  ;;  %v10444_v42 = vsub.f32 %v174_v10, %v10437_v27  ;;  %v180_v33 = vld [vmem:[%s10061_s12 + $0xe0] sm:$0xff] }
  0x52   : > { %2613 = vmatpush.msrb.mxu1 %v10106_v0  ;;  %16028 = vst [vmem:[#allocation31_spill] sm:$0xff] %v10366_v58  ;;  %v10371_v0 = vand.u32 4294901760, %v168_v52  ;;  %v618_v1 = vsub.f32 %v10356_v51, %v10369_v59 }
  0x53   : > { %2316 = vmatpush.msrb.mxu0 %v16025_v46  ;;  %16029 = vst [vmem:[#allocation32_spill] sm:$0xff] %v10369_v59  ;;  %v176_v46 = vld [vmem:[%s10061_s12 + $0xc0] sm:$0xff] }
  0x54   : > { %2615 = vmatpush.msrb.mxu1 %v10119_v12  ;;  %16030 = vst [vmem:[#allocation33_spill] sm:$0xff] %v10371_v0  ;;  %v10378_v2 = vsub.f32 %v168_v52, %v10371_v0  ;;  %v170_v12 = vld [vmem:[%s10061_s12 + $0x90] sm:$0xff]  ;;  %v10383_v29 = vand.u32 4294901760, %v618_v1  ;;  %v10452_v52 = vand.u32 4294901760, %v10444_v42 }
  0x55   : > { %604 = vmatmul.f32.gmra.mxu0 %v10338_v35  ;;  %1201 = vmatmul.f32.gmra.mxu1 %v10261_v13  ;;  %v10388_v43 = vand.u32 4294901760, %v170_v12  ;;  %16043 = vst [vmem:[#allocation46_spill] sm:$0xff] %v10444_v42 }
  0x56   : > { %2320 = vmatpush.msrb.mxu0 %v16027_v54  ;;  %2617 = vmatpush.msrb.mxu1 %v10141_v38  ;;  %16031 = vst [vmem:[#allocation34_spill] sm:$0xff] %v10378_v2  ;;  %v10386_v38 = vand.u32 4294901760, %v10378_v2  ;;  %v10454_v54 = vand.u32 4294901760, %v176_v46  ;;  %v650_v1 = vsub.f32 %v10444_v42, %v10452_v52 }
  0x57   : > { %1893 = vmatmul.f32.gmra.mxu3 %v10314_v21  ;;  %16032 = vst [vmem:[#allocation35_spill] sm:$0xff] %v10383_v29  ;;  %v10395_v60 = vsub.f32 %v170_v12, %v10388_v43 }
  0x58   : > { %3757 = vmatpush.msra.mxu0 %v10163_v55  ;;  %1524 = vmatmul.f32.gmra.mxu2 %v10301_v11  ;;  %16033 = vst [vmem:[#allocation36_spill] sm:$0xff] %v10386_v38  ;;  %v626_v53 = vsub.f32 %v10378_v2, %v10386_v38  ;;  %v10461_v12 = vsub.f32 %v176_v46, %v10454_v54  ;;  %v10466_v49 = vand.u32 4294901760, %v650_v1  ;;  %v10488_v1 = vand.u32 4294901760, %v180_v33 }
  0x59   : > { %4115 = vmatpush.msra.mxu1 %v10132_v31  ;;  %16034 = vst [vmem:[#allocation37_spill] sm:$0xff] %v10388_v43  ;;  %v10406_v8 = vand.u32 4294901760, %v10395_v60 }
  0x5a   : > { %16035 = vst [vmem:[#allocation38_spill] sm:$0xff] %v10395_v60  ;;  %v10403_v7 = vand.u32 4294901760, %v626_v53  ;;  %3760 = vmatpush.msra.mxu0 %v10414_v14  ;;  %v178_v53 = vld [vmem:[%s10061_s12 + $0xd0] sm:$0xff]  ;;  %v10469_v62 = vand.u32 4294901760, %v10461_v12  ;;  %v10495_v16 = vsub.f32 %v180_v33, %v10488_v1 }
  0x5b   : > { %16037 = vst [vmem:[#allocation40_spill] sm:$0xff] %v10406_v8  ;;  %4117 = vmatpush.msra.mxu1 %v10410_v44  ;;  %v634_v61 = vsub.f32 %v10395_v60, %v10406_v8 }
  0x5c   : > { %16036 = vst [vmem:[#allocation39_spill] sm:$0xff] %v10403_v7  ;;  %v658_v10 = vsub.f32 %v10461_v12, %v10469_v62 }
  0x5d   : > { %612 = vmatmul.f32.gmra.mxu0 %v10366_v58  ;;  %1205 = vmatmul.f32.gmra.mxu1 %v10288_v19  ;;  %v10432_v25 = vand.u32 4294901760, %v634_v61  ;;  %16044 = vst [vmem:[#allocation47_spill] sm:$0xff] %v10449_v48  ;;  %v10471_v61 = vand.u32 4294901760, %v178_v53 }
  0x5e   : > { %16045 = vst [vmem:[#allocation48_spill] sm:$0xff] %v10452_v52  ;;  %v10483_v34 = vand.u32 4294901760, %v658_v10 }
  0x5f   : > { %1899 = vmatmul.f32.gmra.mxu3 %v10341_v40  ;;  %16040 = vst [vmem:[#allocation43_spill] sm:$0xff] %v10432_v25  ;;  %v10478_v20 = vsub.f32 %v178_v53, %v10471_v61 }
  0x60   : > { %1529 = vmatmul.f32.gmra.mxu2 %v10329_v28  ;;  %16046 = vst [vmem:[#allocation49_spill] sm:$0xff] %v10454_v54 }
  0x61   : > { %16047 = vst [vmem:[#allocation50_spill] sm:$0xff] %v10461_v12  ;;  %v10486_v46 = vand.u32 4294901760, %v10478_v20 }
  0x62   : > { %16048 = vst [vmem:[#allocation51_spill] sm:$0xff] %v10466_v49 }
  0x63   : > { %16049 = vst [vmem:[#allocation52_spill] sm:$0xff] %v10469_v62  ;;  %v666_v53 = vsub.f32 %v10478_v20, %v10486_v46 }
  0x64   : > { %16050 = vst [vmem:[#allocation53_spill] sm:$0xff] %v10471_v61 }
  0x65   : > { %620 = vmatmul.f32.gmra.mxu0 %v10383_v29  ;;  %1209 = vmatmul.f32.gmra.mxu1 %v10316_v22  ;;  %16051 = vst [vmem:[#allocation54_spill] sm:$0xff] %v10478_v20  ;;  %v10500_v10 = vand.u32 4294901760, %v666_v53 }
  0x66   : > { %16052 = vst [vmem:[#allocation55_spill] sm:$0xff] %v10483_v34 }
  0x67   : > { %1905 = vmatmul.f32.gmra.mxu3 %v10369_v59  ;;  %16053 = vst [vmem:[#allocation56_spill] sm:$0xff] %v10486_v46 }
  0x68   : > { %1534 = vmatmul.f32.gmra.mxu2 %v10356_v51  ;;  %16054 = vst [vmem:[#allocation57_spill] sm:$0xff] %v10488_v1 }
  0x69   : > { %16055 = vst [vmem:[#allocation58_spill] sm:$0xff] %v10495_v16 }
  0x6a   : > { %16056 = vst [vmem:[#allocation59_spill] sm:$0xff] %v10500_v10 }
  0x6d   : > { %628 = vmatmul.f32.gmra.mxu0 %v10403_v7  ;;  %1213 = vmatmul.f32.gmra.mxu1 %v10343_v41 }
  0x6f   : > { %1911 = vmatmul.f32.gmra.mxu3 %v10386_v38 }
  0x70   : > { %1539 = vmatmul.f32.gmra.mxu2 %v10378_v2 }
  0x75   : > { %636 = vmatmul.f32.gmra.mxu0 %v10432_v25  ;;  %1217 = vmatmul.f32.gmra.mxu1 %v10371_v0 }
  0x77   : > { %1917 = vmatmul.f32.gmra.mxu3 %v10406_v8 }
  0x78   : > { %1544 = vmatmul.f32.gmra.mxu2 %v10395_v60 }
  0x7d   : > { %644 = vmatmul.f32.gmra.mxu0 %v10449_v48  ;;  %1221 = vmatmul.f32.gmra.mxu1 %v10388_v43 }
  0x7f   : > { %1923 = vmatmul.f32.gmra.mxu3 %v10435_v26 }
  0x80   : > { %1549 = vmatmul.f32.gmra.mxu2 %v10422_v3 }
  0x85   : > { %652 = vmatmul.f32.gmra.mxu0 %v10466_v49  ;;  %1225 = vmatmul.f32.gmra.mxu1 %v10408_v32 }
  0x87   : > { %1929 = vmatmul.f32.gmra.mxu3 %v10452_v52  ;;  %v182_v52 = vld [vmem:[%s10061_s12 + $0xf0] sm:$0xff] }
  0x88   : > { %1554 = vmatmul.f32.gmra.mxu2 %v10444_v42  ;;  %v10503_v42 = vand.u32 4294901760, %v10495_v16 }
  0x8a   : > { %16057 = vst [vmem:[#allocation60_spill] sm:$0xff] %v10503_v42  ;;  %v674_v33 = vsub.f32 %v10495_v16, %v10503_v42 }
  0x8c   : > { %v10517_v53 = vand.u32 4294901760, %v674_v33 }
  0x8d   : > { %660 = vmatmul.f32.gmra.mxu0 %v10483_v34  ;;  %1229 = vmatmul.f32.gmra.mxu1 %v10437_v27  ;;  %v10505_v34 = vand.u32 4294901760, %v182_v52 }
  0x8e   : > { %16060 = vst [vmem:[#allocation63_spill] sm:$0xff] %v10517_v53 }
  0x8f   : > { %1935 = vmatmul.f32.gmra.mxu3 %v10469_v62  ;;  %16058 = vst [vmem:[#allocation61_spill] sm:$0xff] %v10505_v34  ;;  %v10512_v49 = vsub.f32 %v182_v52, %v10505_v34  ;;  %v184_v62 = vld [vmem:[%s10061_s12 + $0x100] sm:$0xff] }
  0x90   : > { %1559 = vmatmul.f32.gmra.mxu2 %v10461_v12 }
  0x91   : > { %16059 = vst [vmem:[#allocation62_spill] sm:$0xff] %v10512_v49  ;;  %v10520_v12 = vand.u32 4294901760, %v10512_v49 }
  0x93   : > { %16061 = vst [vmem:[#allocation64_spill] sm:$0xff] %v10520_v12  ;;  %v682_v52 = vsub.f32 %v10512_v49, %v10520_v12 }
  0x95   : > { %668 = vmatmul.f32.gmra.mxu0 %v10500_v10  ;;  %1233 = vmatmul.f32.gmra.mxu1 %v10454_v54  ;;  %v10522_v10 = vand.u32 4294901760, %v184_v62  ;;  %v10534_v33 = vand.u32 4294901760, %v682_v52 }
  0x97   : > { %1941 = vmatmul.f32.gmra.mxu3 %v10486_v46  ;;  %16062 = vst [vmem:[#allocation65_spill] sm:$0xff] %v10522_v10  ;;  %v10529_v3 = vsub.f32 %v184_v62, %v10522_v10  ;;  %v186_v46 = vld [vmem:[%s10061_s12 + $0x110] sm:$0xff] }
  0x98   : > { %1564 = vmatmul.f32.gmra.mxu2 %v10478_v20  ;;  %16064 = vst [vmem:[#allocation67_spill] sm:$0xff] %v10534_v33  ;;  %v10539_v26 = vand.u32 4294901760, %v186_v46 }
  0x99   : > { %16063 = vst [vmem:[#allocation66_spill] sm:$0xff] %v10529_v3  ;;  %v10537_v20 = vand.u32 4294901760, %v10529_v3 }
  0x9a   : > { %16066 = vst [vmem:[#allocation69_spill] sm:$0xff] %v10539_v26 }
  0x9b   : > { %16065 = vst [vmem:[#allocation68_spill] sm:$0xff] %v10537_v20  ;;  %v690_v62 = vsub.f32 %v10529_v3, %v10537_v20 }
  0x9d   : > { %676 = vmatmul.f32.gmra.mxu0 %v10517_v53  ;;  %1237 = vmatmul.f32.gmra.mxu1 %v10471_v61  ;;  %v10546_v53 = vsub.f32 %v186_v46, %v10539_v26  ;;  %v10551_v52 = vand.u32 4294901760, %v690_v62 }
  0x9f   : > { %1947 = vmatmul.f32.gmra.mxu3 %v10503_v42  ;;  %16067 = vst [vmem:[#allocation70_spill] sm:$0xff] %v10546_v53  ;;  %v188_v42 = vld [vmem:[%s10061_s12 + $0x120] sm:$0xff] }
  0xa0   : > { %1569 = vmatmul.f32.gmra.mxu2 %v10495_v16  ;;  %16068 = vst [vmem:[#allocation71_spill] sm:$0xff] %v10551_v52  ;;  %v10554_v16 = vand.u32 4294901760, %v10546_v53  ;;  %v10556_v48 = vand.u32 4294901760, %v188_v42 }
  0xa2   : > { %16069 = vst [vmem:[#allocation72_spill] sm:$0xff] %v10554_v16  ;;  %v698_v46 = vsub.f32 %v10546_v53, %v10554_v16  ;;  %v10563_v60 = vsub.f32 %v188_v42, %v10556_v48 }
  0xa3   : > { %16070 = vst [vmem:[#allocation73_spill] sm:$0xff] %v10556_v48 }
  0xa4   : > { %16071 = vst [vmem:[#allocation74_spill] sm:$0xff] %v10563_v60  ;;  %v10568_v62 = vand.u32 4294901760, %v698_v46 }
  0xa5   : > { %684 = vmatmul.f32.gmra.mxu0 %v10534_v33  ;;  %1241 = vmatmul.f32.gmra.mxu1 %v10488_v1 }
  0xa6   : > { %16072 = vst [vmem:[#allocation75_spill] sm:$0xff] %v10568_v62 }
  0xa7   : > { %1953 = vmatmul.f32.gmra.mxu3 %v10520_v12  ;;  %v190_v12 = vld [vmem:[%s10061_s12 + $0x130] sm:$0xff] }
  0xa8   : > { %1574 = vmatmul.f32.gmra.mxu2 %v10512_v49  ;;  %v10571_v49 = vand.u32 4294901760, %v10563_v60 }
  0xaa   : > { %v565_v33 = vpop.f32.mrf.mxu0  ;;  %16073 = vst [vmem:[#allocation76_spill] sm:$0xff] %v10571_v49 }
  0xad   : > { %692 = vmatmul.f32.gmra.mxu0 %v10551_v52  ;;  %1245 = vmatmul.f32.gmra.mxu1 %v10505_v34  ;;  %v10573_v52 = vand.u32 4294901760, %v190_v12 }
  0xaf   : > { %1959 = vmatmul.f32.gmra.mxu3 %v10537_v20  ;;  %16074 = vst [vmem:[#allocation77_spill] sm:$0xff] %v10573_v52  ;;  %v10580_v46 = vsub.f32 %v190_v12, %v10573_v52  ;;  %v192_v20 = vld [vmem:[%s10061_s12 + $0x140] sm:$0xff] }
  0xb0   : > { %1579 = vmatmul.f32.gmra.mxu2 %v10529_v3  ;;  %v706_v3 = vsub.f32 %v10563_v60, %v10571_v49 }
  0xb1   : > { %16075 = vst [vmem:[#allocation78_spill] sm:$0xff] %v10580_v46 }
  0xb2   : > { %v573_v8 = vpop.f32.mrf.mxu0  ;;  %v1186_v25 = vpop.f32.mrf.mxu1 }
  0xb3   : > { %v1187_v2 = vadd.f32 %v1186_v25, %v565_v33  ;;  %v1500_v38 = vpop.f32.mrf.mxu2  ;;  %v1864_v7 = vpop.f32.mrf.mxu3  ;;  %v10587_v25 = vand.u32 4294901760, %v706_v3 }
  0xb5   : > { %v1501_v42 = vadd.f32 %v1500_v38, %v1187_v2  ;;  %700 = vmatmul.f32.gmra.mxu0 %v10568_v62  ;;  %1249 = vmatmul.f32.gmra.mxu1 %v10522_v10  ;;  %16076 = vst [vmem:[#allocation79_spill] sm:$0xff] %v10587_v25  ;;  %v10590_v2 = vand.u32 4294901760, %v10580_v46  ;;  %v10592_v38 = vand.u32 4294901760, %v192_v20 }
  0xb7   : > { %v10583_v51 = vadd.f32 %v1864_v7, %v1501_v42  ;;  %1965 = vmatmul.f32.gmra.mxu3 %v10554_v16  ;;  %16077 = vst [vmem:[#allocation80_spill] sm:$0xff] %v10590_v2  ;;  %v714_v7 = vsub.f32 %v10580_v46, %v10590_v2  ;;  %v10599_v3 = vsub.f32 %v192_v20, %v10592_v38  ;;  %v194_v42 = vld [vmem:[%s10061_s12 + $0x150] sm:$0xff] }
  0xb8   : > { %1584 = vmatmul.f32.gmra.mxu2 %v10546_v53  ;;  %16078 = vst [vmem:[#allocation81_spill] sm:$0xff] %v10592_v38 }
  0xb9   : > { %16079 = vst [vmem:[#allocation82_spill] sm:$0xff] %v10599_v3 }
  0xba   : > { %v581_v33 = vpop.f32.mrf.mxu0  ;;  %v1190_v62 = vpop.f32.mrf.mxu1 }
  0xbb   : > { %v1191_v59 = vadd.f32 %v1190_v62, %v573_v8  ;;  %v1505_v12 = vpop.f32.mrf.mxu2  ;;  %v1870_v29 = vpop.f32.mrf.mxu3  ;;  %v10609_v8 = vand.u32 4294901760, %v714_v7  ;;  %v10612_v62 = vand.u32 4294901760, %v10599_v3 }
  0xbd   : > { %v1506_v28 = vadd.f32 %v1505_v12, %v1191_v59  ;;  %708 = vmatmul.f32.gmra.mxu0 %v10587_v25  ;;  %1253 = vmatmul.f32.gmra.mxu1 %v10539_v26  ;;  %v322_v59 = vld [vmem:[%s15079_s1 + $0x130] sm:$0xff]  ;;  %16080 = vst [vmem:[#allocation83_spill] sm:$0xff] %v10609_v8  ;;  %v10614_v12 = vand.u32 4294901760, %v194_v42  ;;  %v722_v40 = vsub.f32 %v10599_v3, %v10612_v62 }
  0xbe   : > { %16081 = vst [vmem:[#allocation84_spill] sm:$0xff] %v10612_v62  ;;  %v10616_v20 = vand.u32 4294901760, %v322_v59 }
  0xbf   : > { %v10602_v53 = vadd.f32 %v1870_v29, %v1506_v28  ;;  %1971 = vmatmul.f32.gmra.mxu3 %v10571_v49  ;;  %16082 = vst [vmem:[#allocation85_spill] sm:$0xff] %v10614_v12  ;;  %v10628_v58 = vsub.f32 %v194_v42, %v10614_v12 }
  0xc0   : > { %1589 = vmatmul.f32.gmra.mxu2 %v10563_v60  ;;  %v10620_v60 = vsub.f32 %v322_v59, %v10616_v20  ;;  %4119 = vmatpush.msra.mxu1 %v10616_v20 }
  0xc1   : > { %2898 = vmatpush.msrb.mxu2 %v10616_v20  ;;  %16083 = vst [vmem:[#allocation86_spill] sm:$0xff] %v10628_v58  ;;  %v10643_v42 = vand.u32 4294901760, %v10628_v58 }
  0xc2   : > { %v589_v28 = vpop.f32.mrf.mxu0  ;;  %v1194_v29 = vpop.f32.mrf.mxu1  ;;  %3763 = vmatpush.msra.mxu0 %v10620_v60 }
  0xc3   : > { %v1195_v25 = vadd.f32 %v1194_v29, %v581_v33  ;;  %v1510_v49 = vpop.f32.mrf.mxu2  ;;  %v1876_v16 = vpop.f32.mrf.mxu3  ;;  %v15134_v33 = vand.u32 4294901760, %v10620_v60  ;;  %v196_v29 = vld [vmem:[%s10061_s12 + $0x160] sm:$0xff]  ;;  %16085 = vst [vmem:[#allocation88_spill] sm:$0xff] %v10643_v42 }
  0xc5   : > { %v1511_v7 = vadd.f32 %v1510_v49, %v1195_v25  ;;  %716 = vmatmul.f32.gmra.mxu0 %v10609_v8  ;;  %1257 = vmatmul.f32.gmra.mxu1 %v10556_v48  ;;  %v3459_v49 = vsub.f32 %v10620_v60, %v15134_v33  ;;  %v10640_v25 = vand.u32 4294901760, %v722_v40  ;;  %v10645_v8 = vand.u32 4294901760, %v196_v29 }
  0xc6   : > { %v730_v40 = vsub.f32 %v10628_v58, %v10643_v42 }
  0xc7   : > { %v10633_v59 = vadd.f32 %v1876_v16, %v1511_v7  ;;  %1977 = vmatmul.f32.gmra.mxu3 %v10590_v2  ;;  %16084 = vst [vmem:[#allocation87_spill] sm:$0xff] %v10640_v25  ;;  %v3460_v11 = vand.u32 4294901760, %v3459_v49  ;;  %v10652_v33 = vsub.f32 %v196_v29, %v10645_v8 }
  0xc8   : > { %1594 = vmatmul.f32.gmra.mxu2 %v10580_v46  ;;  %16086 = vst [vmem:[#allocation89_spill] sm:$0xff] %v10645_v8  ;;  %v198_v46 = vld [vmem:[%s10061_s12 + $0x170] sm:$0xff] }
  0xc9   : > { %3461 = vmatpush.msrb.mxu3 %v3460_v11  ;;  %16087 = vst [vmem:[#allocation90_spill] sm:$0xff] %v10652_v33  ;;  %v10659_v11 = vand.u32 4294901760, %v730_v40  ;;  %v200_v40 = vld [vmem:[%s10061_s12 + $0x180] sm:$0xff] }
  0xca   : > { %v597_v21 = vpop.f32.mrf.mxu0  ;;  %v1198_v16 = vpop.f32.mrf.mxu1 }
  0xcb   : > { %v1199_v7 = vadd.f32 %v1198_v16, %v589_v28  ;;  %v1515_v35 = vpop.f32.mrf.mxu2  ;;  %v1882_v2 = vpop.f32.mrf.mxu3  ;;  %16088 = vst [vmem:[#allocation91_spill] sm:$0xff] %v10659_v11  ;;  %v10664_v28 = vand.u32 4294901760, %v198_v46 }
  0xcd   : > { %v1516_v4 = vadd.f32 %v1515_v35, %v1199_v7  ;;  %724 = vmatmul.f32.gmra.mxu0 %v10640_v25  ;;  %1261 = vmatmul.f32.gmra.mxu1 %v10573_v52  ;;  %v10662_v35 = vand.u32 4294901760, %v10652_v33  ;;  %16090 = vst [vmem:[#allocation93_spill] sm:$0xff] %v10664_v28 }
  0xcf   : > { %v10655_v9 = vadd.f32 %v1882_v2, %v1516_v4  ;;  %1983 = vmatmul.f32.gmra.mxu3 %v10612_v62  ;;  %16089 = vst [vmem:[#allocation92_spill] sm:$0xff] %v10662_v35  ;;  %v738_v4 = vsub.f32 %v10652_v33, %v10662_v35  ;;  %v10671_v2 = vsub.f32 %v198_v46, %v10664_v28 }
  0xd0   : > { %1599 = vmatmul.f32.gmra.mxu2 %v10599_v3 }
  0xd1   : > { %16091 = vst [vmem:[#allocation94_spill] sm:$0xff] %v10671_v2 }
  0xd2   : > { %v605_v49 = vpop.f32.mrf.mxu0  ;;  %v1202_v16 = vpop.f32.mrf.mxu1 }
  0xd3   : > { %v1203_v7 = vadd.f32 %v1202_v16, %v597_v21  ;;  %v1520_v29 = vpop.f32.mrf.mxu2  ;;  %v1888_v25 = vpop.f32.mrf.mxu3  ;;  %v10678_v21 = vand.u32 4294901760, %v738_v4  ;;  %v10681_v16 = vand.u32 4294901760, %v10671_v2  ;;  %v202_v4 = vld [vmem:[%s10061_s12 + $0x190] sm:$0xff] }
  0xd5   : > { %v1521_v17 = vadd.f32 %v1520_v29, %v1203_v7  ;;  %732 = vmatmul.f32.gmra.mxu0 %v10659_v11  ;;  %1265 = vmatmul.f32.gmra.mxu1 %v10592_v38  ;;  %16092 = vst [vmem:[#allocation95_spill] sm:$0xff] %v10678_v21  ;;  %v10683_v7 = vand.u32 4294901760, %v200_v40 }
  0xd6   : > { %16093 = vst [vmem:[#allocation96_spill] sm:$0xff] %v10681_v16 }
  0xd7   : > { %v10674_v3 = vadd.f32 %v1888_v25, %v1521_v17  ;;  %1989 = vmatmul.f32.gmra.mxu3 %v10643_v42  ;;  %16094 = vst [vmem:[#allocation97_spill] sm:$0xff] %v10683_v7  ;;  %v746_v17 = vsub.f32 %v10671_v2, %v10681_v16  ;;  %v10690_v25 = vsub.f32 %v200_v40, %v10683_v7 }
  0xd8   : > { %1604 = vmatmul.f32.gmra.mxu2 %v10628_v58 }
  0xd9   : > { %16095 = vst [vmem:[#allocation98_spill] sm:$0xff] %v10690_v25 }
  0xda   : > { %v613_v29 = vpop.f32.mrf.mxu0  ;;  %v1206_v11 = vpop.f32.mrf.mxu1 }
  0xdb   : > { %v1207_v62 = vadd.f32 %v1206_v11, %v605_v49  ;;  %v1525_v46 = vpop.f32.mrf.mxu2  ;;  %v1894_v23 = vpop.f32.mrf.mxu3  ;;  %v10697_v11 = vand.u32 4294901760, %v746_v17  ;;  %v10702_v49 = vand.u32 4294901760, %v202_v4  ;;  %v204_v17 = vld [vmem:[%s10061_s12 + $0x1a0] sm:$0xff] }
  0xdd   : > { %v1526_v24 = vadd.f32 %v1525_v46, %v1207_v62  ;;  %740 = vmatmul.f32.gmra.mxu0 %v10678_v21  ;;  %1269 = vmatmul.f32.gmra.mxu1 %v10614_v12  ;;  %16096 = vst [vmem:[#allocation99_spill] sm:$0xff] %v10697_v11  ;;  %v10700_v62 = vand.u32 4294901760, %v10690_v25 }
  0xde   : > { %16098 = vst [vmem:[#allocation101_spill] sm:$0xff] %v10702_v49 }
  0xdf   : > { %v10693_v58 = vadd.f32 %v1894_v23, %v1526_v24  ;;  %1995 = vmatmul.f32.gmra.mxu3 %v10662_v35  ;;  %16097 = vst [vmem:[#allocation100_spill] sm:$0xff] %v10700_v62  ;;  %v754_v23 = vsub.f32 %v10690_v25, %v10700_v62  ;;  %v10709_v24 = vsub.f32 %v202_v4, %v10702_v49 }
  0xe0   : > { %1609 = vmatmul.f32.gmra.mxu2 %v10652_v33 }
  0xe1   : > { %16099 = vst [vmem:[#allocation102_spill] sm:$0xff] %v10709_v24 }
  0xe2   : > { %v621_v46 = vpop.f32.mrf.mxu0  ;;  %v1210_v21 = vpop.f32.mrf.mxu1 }
  0xe3   : > { %v1211_v42 = vadd.f32 %v1210_v21, %v613_v29  ;;  %v1530_v40 = vpop.f32.mrf.mxu2  ;;  %v1900_v5 = vpop.f32.mrf.mxu3  ;;  %v10716_v21 = vand.u32 4294901760, %v754_v23  ;;  %v10721_v29 = vand.u32 4294901760, %v204_v17  ;;  %v206_v23 = vld [vmem:[%s10061_s12 + $0x1b0] sm:$0xff] }
  0xe5   : > { %v1531_v36 = vadd.f32 %v1530_v40, %v1211_v42  ;;  %748 = vmatmul.f32.gmra.mxu0 %v10697_v11  ;;  %1273 = vmatmul.f32.gmra.mxu1 %v10645_v8  ;;  %16100 = vst [vmem:[#allocation103_spill] sm:$0xff] %v10716_v21  ;;  %v10719_v42 = vand.u32 4294901760, %v10709_v24 }
  0xe6   : > { %16102 = vst [vmem:[#allocation105_spill] sm:$0xff] %v10721_v29 }
  0xe7   : > { %v10712_v33 = vadd.f32 %v1900_v5, %v1531_v36  ;;  %2001 = vmatmul.f32.gmra.mxu3 %v10681_v16  ;;  %16101 = vst [vmem:[#allocation104_spill] sm:$0xff] %v10719_v42  ;;  %v762_v36 = vsub.f32 %v10709_v24, %v10719_v42  ;;  %v10728_v5 = vsub.f32 %v204_v17, %v10721_v29 }
  0xe8   : > { %1614 = vmatmul.f32.gmra.mxu2 %v10671_v2 }
  0xe9   : > { %16103 = vst [vmem:[#allocation106_spill] sm:$0xff] %v10728_v5 }
  0xea   : > { %v629_v40 = vpop.f32.mrf.mxu0  ;;  %v1214_v11 = vpop.f32.mrf.mxu1 }
  0xeb   : > { %v1215_v35 = vadd.f32 %v1214_v11, %v621_v46  ;;  %v1535_v4 = vpop.f32.mrf.mxu2  ;;  %v1906_v56 = vpop.f32.mrf.mxu3  ;;  %v10735_v11 = vand.u32 4294901760, %v762_v36  ;;  %v10740_v46 = vand.u32 4294901760, %v206_v23  ;;  %v208_v36 = vld [vmem:[%s10061_s12 + $0x1c0] sm:$0xff] }
  0xed   : > { %v1536_v15 = vadd.f32 %v1535_v4, %v1215_v35  ;;  %756 = vmatmul.f32.gmra.mxu0 %v10716_v21  ;;  %1277 = vmatmul.f32.gmra.mxu1 %v10664_v28  ;;  %16105 = vst [vmem:[#allocation108_spill] sm:$0xff] %v10735_v11  ;;  %v10738_v35 = vand.u32 4294901760, %v10728_v5 }
  0xee   : > { %16107 = vst [vmem:[#allocation110_spill] sm:$0xff] %v10740_v46 }
  0xef   : > { %v10731_v2 = vadd.f32 %v1906_v56, %v1536_v15  ;;  %2007 = vmatmul.f32.gmra.mxu3 %v10700_v62  ;;  %16106 = vst [vmem:[#allocation109_spill] sm:$0xff] %v10738_v35  ;;  %v770_v56 = vsub.f32 %v10728_v5, %v10738_v35  ;;  %v10747_v15 = vsub.f32 %v206_v23, %v10740_v46 }
  0xf0   : > { %1619 = vmatmul.f32.gmra.mxu2 %v10690_v25 }
  0xf1   : > { %16104 = vst [vmem:[#allocation107_spill] sm:$0xff] %v10731_v2 }
  0xf2   : > { %v637_v4 = vpop.f32.mrf.mxu0  ;;  %v1218_v21 = vpop.f32.mrf.mxu1  ;;  %16108 = vst [vmem:[#allocation111_spill] sm:$0xff] %v10747_v15 }
  0xf3   : > { %v1219_v16 = vadd.f32 %v1218_v21, %v629_v40  ;;  %v1540_v17 = vpop.f32.mrf.mxu2  ;;  %v1912_v63 = vpop.f32.mrf.mxu3  ;;  %v10754_v21 = vand.u32 4294901760, %v770_v56  ;;  %v10759_v40 = vand.u32 4294901760, %v208_v36  ;;  %v210_v56 = vld [vmem:[%s10061_s12 + $0x1d0] sm:$0xff] }
  0xf5   : > { %v1541_v39 = vadd.f32 %v1540_v17, %v1219_v16  ;;  %764 = vmatmul.f32.gmra.mxu0 %v10735_v11  ;;  %1281 = vmatmul.f32.gmra.mxu1 %v10683_v7  ;;  %16110 = vst [vmem:[#allocation113_spill] sm:$0xff] %v10754_v21  ;;  %v10757_v16 = vand.u32 4294901760, %v10747_v15 }
  0xf6   : > { %16112 = vst [vmem:[#allocation115_spill] sm:$0xff] %v10759_v40 }
  0xf7   : > { %v10750_v25 = vadd.f32 %v1912_v63, %v1541_v39  ;;  %2013 = vmatmul.f32.gmra.mxu3 %v10719_v42  ;;  %16111 = vst [vmem:[#allocation114_spill] sm:$0xff] %v10757_v16  ;;  %v778_v39 = vsub.f32 %v10747_v15, %v10757_v16  ;;  %v10766_v63 = vsub.f32 %v208_v36, %v10759_v40 }
  0xf8   : > { %1624 = vmatmul.f32.gmra.mxu2 %v10709_v24 }
  0xf9   : > { %16109 = vst [vmem:[#allocation112_spill] sm:$0xff] %v10750_v25 }
  0xfa   : > { %v645_v17 = vpop.f32.mrf.mxu0  ;;  %v1222_v11 = vpop.f32.mrf.mxu1  ;;  %16113 = vst [vmem:[#allocation116_spill] sm:$0xff] %v10766_v63 }
  0xfb   : > { %v1223_v62 = vadd.f32 %v1222_v11, %v637_v4  ;;  %v1545_v23 = vpop.f32.mrf.mxu2  ;;  %v1918_v37 = vpop.f32.mrf.mxu3  ;;  %v10773_v11 = vand.u32 4294901760, %v778_v39  ;;  %v10778_v4 = vand.u32 4294901760, %v210_v56  ;;  %v212_v39 = vld [vmem:[%s10061_s12 + $0x1e0] sm:$0xff] }
  0xfd   : > { %v1546_v30 = vadd.f32 %v1545_v23, %v1223_v62  ;;  %772 = vmatmul.f32.gmra.mxu0 %v10754_v21  ;;  %1285 = vmatmul.f32.gmra.mxu1 %v10702_v49  ;;  %16115 = vst [vmem:[#allocation118_spill] sm:$0xff] %v10773_v11  ;;  %v10776_v62 = vand.u32 4294901760, %v10766_v63 }
  0xfe   : > { %16117 = vst [vmem:[#allocation120_spill] sm:$0xff] %v10778_v4 }
  0xff   : > { %v10769_v24 = vadd.f32 %v1918_v37, %v1546_v30  ;;  %2019 = vmatmul.f32.gmra.mxu3 %v10738_v35  ;;  %16116 = vst [vmem:[#allocation119_spill] sm:$0xff] %v10776_v62  ;;  %v786_v30 = vsub.f32 %v10766_v63, %v10776_v62  ;;  %v10785_v37 = vsub.f32 %v210_v56, %v10778_v4 }
 0x100   : > { %1629 = vmatmul.f32.gmra.mxu2 %v10728_v5 }
 0x101   : > { %16114 = vst [vmem:[#allocation117_spill] sm:$0xff] %v10769_v24 }
 0x102   : > { %v653_v23 = vpop.f32.mrf.mxu0  ;;  %v1226_v21 = vpop.f32.mrf.mxu1  ;;  %16118 = vst [vmem:[#allocation121_spill] sm:$0xff] %v10785_v37 }
 0x103   : > { %v1227_v42 = vadd.f32 %v1226_v21, %v645_v17  ;;  %v1550_v36 = vpop.f32.mrf.mxu2  ;;  %v1924_v45 = vpop.f32.mrf.mxu3  ;;  %v10792_v21 = vand.u32 4294901760, %v786_v30  ;;  %v10797_v17 = vand.u32 4294901760, %v212_v39  ;;  %v214_v30 = vld [vmem:[%s10061_s12 + $0x1f0] sm:$0xff] }
 0x105   : > { %v1551_v50 = vadd.f32 %v1550_v36, %v1227_v42  ;;  %780 = vmatmul.f32.gmra.mxu0 %v10773_v11  ;;  %1289 = vmatmul.f32.gmra.mxu1 %v10721_v29  ;;  %16120 = vst [vmem:[#allocation123_spill] sm:$0xff] %v10792_v21  ;;  %v10795_v42 = vand.u32 4294901760, %v10785_v37 }
 0x106   : > { %16122 = vst [vmem:[#allocation125_spill] sm:$0xff] %v10797_v17 }
 0x107   : > { %v10788_v5 = vadd.f32 %v1924_v45, %v1551_v50  ;;  %2025 = vmatmul.f32.gmra.mxu3 %v10757_v16  ;;  %16121 = vst [vmem:[#allocation124_spill] sm:$0xff] %v10795_v42  ;;  %v794_v45 = vsub.f32 %v10785_v37, %v10795_v42  ;;  %v10804_v50 = vsub.f32 %v212_v39, %v10797_v17 }
 0x108   : > { %1634 = vmatmul.f32.gmra.mxu2 %v10747_v15 }
 0x109   : > { %16119 = vst [vmem:[#allocation122_spill] sm:$0xff] %v10788_v5 }
 0x10a   : > { %v661_v36 = vpop.f32.mrf.mxu0  ;;  %v1230_v11 = vpop.f32.mrf.mxu1  ;;  %16123 = vst [vmem:[#allocation126_spill] sm:$0xff] %v10804_v50 }
 0x10b   : > { %v1231_v35 = vadd.f32 %v1230_v11, %v653_v23  ;;  %v1555_v56 = vpop.f32.mrf.mxu2  ;;  %v1930_v29 = vpop.f32.mrf.mxu3  ;;  %v10811_v11 = vand.u32 4294901760, %v794_v45  ;;  %v10816_v23 = vand.u32 4294901760, %v214_v30  ;;  %v216_v45 = vld [vmem:[%s10061_s12 + $0x200] sm:$0xff] }
 0x10d   : > { %v1556_v24 = vadd.f32 %v1555_v56, %v1231_v35  ;;  %788 = vmatmul.f32.gmra.mxu0 %v10792_v21  ;;  %1293 = vmatmul.f32.gmra.mxu1 %v10740_v46  ;;  %16125 = vst [vmem:[#allocation128_spill] sm:$0xff] %v10811_v11  ;;  %v10814_v35 = vand.u32 4294901760, %v10804_v50 }
 0x10e   : > { %16127 = vst [vmem:[#allocation130_spill] sm:$0xff] %v10816_v23 }
 0x10f   : > { %v10807_v15 = vadd.f32 %v1930_v29, %v1556_v24  ;;  %2031 = vmatmul.f32.gmra.mxu3 %v10776_v62  ;;  %16126 = vst [vmem:[#allocation129_spill] sm:$0xff] %v10814_v35  ;;  %v802_v24 = vsub.f32 %v10804_v50, %v10814_v35  ;;  %v10823_v29 = vsub.f32 %v214_v30, %v10816_v23 }
 0x110   : > { %1639 = vmatmul.f32.gmra.mxu2 %v10766_v63 }
 0x111   : > { %16124 = vst [vmem:[#allocation127_spill] sm:$0xff] %v10807_v15 }
 0x112   : > { %v669_v56 = vpop.f32.mrf.mxu0  ;;  %v1234_v21 = vpop.f32.mrf.mxu1  ;;  %16128 = vst [vmem:[#allocation131_spill] sm:$0xff] %v10823_v29 }
 0x113   : > { %v1235_v16 = vadd.f32 %v1234_v21, %v661_v36  ;;  %v1560_v39 = vpop.f32.mrf.mxu2  ;;  %v1936_v46 = vpop.f32.mrf.mxu3  ;;  %v10833_v21 = vand.u32 4294901760, %v802_v24  ;;  %v10836_v36 = vand.u32 4294901760, %v10823_v29 }
 0x115   : > { %v1561_v5 = vadd.f32 %v1560_v39, %v1235_v16  ;;  %796 = vmatmul.f32.gmra.mxu0 %v10811_v11  ;;  %1297 = vmatmul.f32.gmra.mxu1 %v10759_v40  ;;  %v320_v16 = vld [vmem:[%s15079_s1 + $0x120] sm:$0xff]  ;;  %16130 = vst [vmem:[#allocation133_spill] sm:$0xff] %v10833_v21  ;;  %v10838_v39 = vand.u32 4294901760, %v216_v45 }
 0x116   : > { %16131 = vst [vmem:[#allocation134_spill] sm:$0xff] %v10836_v36  ;;  %v10840_v30 = vand.u32 4294901760, %v320_v16 }
 0x117   : > { %v10826_v63 = vadd.f32 %v1936_v46, %v1561_v5  ;;  %2037 = vmatmul.f32.gmra.mxu3 %v10795_v42  ;;  %16132 = vst [vmem:[#allocation135_spill] sm:$0xff] %v10838_v39  ;;  %v10852_v40 = vsub.f32 %v216_v45, %v10838_v39 }
 0x118   : > { %1644 = vmatmul.f32.gmra.mxu2 %v10785_v37  ;;  %v10844_v37 = vsub.f32 %v320_v16, %v10840_v30  ;;  %4121 = vmatpush.msra.mxu1 %v10840_v30 }
 0x119   : > { %16129 = vst [vmem:[#allocation132_spill] sm:$0xff] %v10826_v63  ;;  %2900 = vmatpush.msrb.mxu2 %v10840_v30  ;;  %v810_v63 = vsub.f32 %v10823_v29, %v10836_v36  ;;  %v10867_v45 = vand.u32 4294901760, %v10852_v40 }
 0x11a   : > { %v677_v5 = vpop.f32.mrf.mxu0  ;;  %v1238_v46 = vpop.f32.mrf.mxu1  ;;  %16133 = vst [vmem:[#allocation136_spill] sm:$0xff] %v10852_v40  ;;  %3766 = vmatpush.msra.mxu0 %v10844_v37 }
 0x11b   : > { %v1239_v11 = vadd.f32 %v1238_v46, %v669_v56  ;;  %v1565_v42 = vpop.f32.mrf.mxu2  ;;  %v1942_v62 = vpop.f32.mrf.mxu3  ;;  %v15192_v56 = vand.u32 4294901760, %v10844_v37  ;;  %v218_v46 = vld [vmem:[%s10061_s12 + $0x210] sm:$0xff]  ;;  %16136 = vst [vmem:[#allocation139_spill] sm:$0xff] %v10867_v45 }
 0x11d   : > { %v1566_v24 = vadd.f32 %v1565_v42, %v1239_v11  ;;  %804 = vmatmul.f32.gmra.mxu0 %v10833_v21  ;;  %1301 = vmatmul.f32.gmra.mxu1 %v10778_v4  ;;  %v3465_v42 = vsub.f32 %v10844_v37, %v15192_v56  ;;  %v10864_v11 = vand.u32 4294901760, %v810_v63  ;;  %v10869_v21 = vand.u32 4294901760, %v218_v46 }
 0x11e   : > { %v818_v63 = vsub.f32 %v10852_v40, %v10867_v45 }
 0x11f   : > { %v10857_v16 = vadd.f32 %v1942_v62, %v1566_v24  ;;  %2043 = vmatmul.f32.gmra.mxu3 %v10814_v35  ;;  %16135 = vst [vmem:[#allocation138_spill] sm:$0xff] %v10864_v11  ;;  %v3466_v4 = vand.u32 4294901760, %v3465_v42  ;;  %v10876_v56 = vsub.f32 %v218_v46, %v10869_v21 }
 0x120   : > { %1649 = vmatmul.f32.gmra.mxu2 %v10804_v50  ;;  %16137 = vst [vmem:[#allocation140_spill] sm:$0xff] %v10869_v21  ;;  %v220_v50 = vld [vmem:[%s10061_s12 + $0x220] sm:$0xff] }
 0x121   : > { %16134 = vst [vmem:[#allocation137_spill] sm:$0xff] %v10857_v16  ;;  %3467 = vmatpush.msrb.mxu3 %v3466_v4  ;;  %v10883_v4 = vand.u32 4294901760, %v818_v63  ;;  %v222_v63 = vld [vmem:[%s10061_s12 + $0x230] sm:$0xff] }
 0x122   : > { %v685_v15 = vpop.f32.mrf.mxu0  ;;  %v1242_v62 = vpop.f32.mrf.mxu1  ;;  %16138 = vst [vmem:[#allocation141_spill] sm:$0xff] %v10876_v56 }
 0x123   : > { %v1243_v24 = vadd.f32 %v1242_v62, %v677_v5  ;;  %v1570_v16 = vpop.f32.mrf.mxu2  ;;  %v1948_v35 = vpop.f32.mrf.mxu3  ;;  %16140 = vst [vmem:[#allocation143_spill] sm:$0xff] %v10883_v4  ;;  %v10886_v5 = vand.u32 4294901760, %v10876_v56 }
 0x125   : > { %v1571_v49 = vadd.f32 %v1570_v16, %v1243_v24  ;;  %812 = vmatmul.f32.gmra.mxu0 %v10864_v11  ;;  %1305 = vmatmul.f32.gmra.mxu1 %v10797_v17  ;;  %16141 = vst [vmem:[#allocation144_spill] sm:$0xff] %v10886_v5  ;;  %v10888_v16 = vand.u32 4294901760, %v220_v50 }
 0x127   : > { %v10879_v25 = vadd.f32 %v1948_v35, %v1571_v49  ;;  %2049 = vmatmul.f32.gmra.mxu3 %v10836_v36  ;;  %16142 = vst [vmem:[#allocation145_spill] sm:$0xff] %v10888_v16  ;;  %v826_v49 = vsub.f32 %v10876_v56, %v10886_v5  ;;  %v10895_v35 = vsub.f32 %v220_v50, %v10888_v16 }
 0x128   : > { %1654 = vmatmul.f32.gmra.mxu2 %v10823_v29 }
 0x129   : > { %16139 = vst [vmem:[#allocation142_spill] sm:$0xff] %v10879_v25 }
 0x12a   : > { %v693_v42 = vpop.f32.mrf.mxu0  ;;  %v1246_v62 = vpop.f32.mrf.mxu1  ;;  %16143 = vst [vmem:[#allocation146_spill] sm:$0xff] %v10895_v35 }
 0x12b   : > { %v1247_v24 = vadd.f32 %v1246_v62, %v685_v15  ;;  %v1575_v46 = vpop.f32.mrf.mxu2  ;;  %v1954_v11 = vpop.f32.mrf.mxu3  ;;  %v10902_v15 = vand.u32 4294901760, %v826_v49  ;;  %v10905_v62 = vand.u32 4294901760, %v10895_v35  ;;  %v224_v49 = vld [vmem:[%s10061_s12 + $0x240] sm:$0xff] }
 0x12d   : > { %v1576_v17 = vadd.f32 %v1575_v46, %v1247_v24  ;;  %820 = vmatmul.f32.gmra.mxu0 %v10883_v4  ;;  %1309 = vmatmul.f32.gmra.mxu1 %v10816_v23  ;;  %16145 = vst [vmem:[#allocation148_spill] sm:$0xff] %v10902_v15  ;;  %v10907_v24 = vand.u32 4294901760, %v222_v63 }
 0x12e   : > { %16146 = vst [vmem:[#allocation149_spill] sm:$0xff] %v10905_v62 }
 0x12f   : > { %v10898_v29 = vadd.f32 %v1954_v11, %v1576_v17  ;;  %2055 = vmatmul.f32.gmra.mxu3 %v10867_v45  ;;  %16147 = vst [vmem:[#allocation150_spill] sm:$0xff] %v10907_v24  ;;  %v834_v17 = vsub.f32 %v10895_v35, %v10905_v62  ;;  %v10914_v11 = vsub.f32 %v222_v63, %v10907_v24 }
 0x130   : > { %1659 = vmatmul.f32.gmra.mxu2 %v10852_v40 }
 0x131   : > { %16144 = vst [vmem:[#allocation147_spill] sm:$0xff] %v10898_v29 }
 0x132   : > { %v701_v46 = vpop.f32.mrf.mxu0  ;;  %v1250_v4 = vpop.f32.mrf.mxu1  ;;  %16148 = vst [vmem:[#allocation151_spill] sm:$0xff] %v10914_v11 }
 0x133   : > { %v1251_v36 = vadd.f32 %v1250_v4, %v693_v42  ;;  %v1580_v50 = vpop.f32.mrf.mxu2  ;;  %v1960_v23 = vpop.f32.mrf.mxu3  ;;  %v10921_v4 = vand.u32 4294901760, %v834_v17  ;;  %v10926_v42 = vand.u32 4294901760, %v224_v49  ;;  %v226_v17 = vld [vmem:[%s10061_s12 + $0x250] sm:$0xff] }
 0x135   : > { %v1581_v25 = vadd.f32 %v1580_v50, %v1251_v36  ;;  %828 = vmatmul.f32.gmra.mxu0 %v10902_v15  ;;  %1313 = vmatmul.f32.gmra.mxu1 %v10838_v39  ;;  %16150 = vst [vmem:[#allocation153_spill] sm:$0xff] %v10921_v4  ;;  %v10924_v36 = vand.u32 4294901760, %v10914_v11 }
 0x136   : > { %16152 = vst [vmem:[#allocation155_spill] sm:$0xff] %v10926_v42 }
 0x137   : > { %v10917_v40 = vadd.f32 %v1960_v23, %v1581_v25  ;;  %2061 = vmatmul.f32.gmra.mxu3 %v10886_v5  ;;  %16151 = vst [vmem:[#allocation154_spill] sm:$0xff] %v10924_v36  ;;  %v842_v25 = vsub.f32 %v10914_v11, %v10924_v36  ;;  %v10933_v23 = vsub.f32 %v224_v49, %v10926_v42 }
 0x138   : > { %1664 = vmatmul.f32.gmra.mxu2 %v10876_v56 }
 0x139   : > { %16149 = vst [vmem:[#allocation152_spill] sm:$0xff] %v10917_v40 }
 0x13a   : > { %v709_v50 = vpop.f32.mrf.mxu0  ;;  %v1254_v15 = vpop.f32.mrf.mxu1  ;;  %16153 = vst [vmem:[#allocation156_spill] sm:$0xff] %v10933_v23 }
 0x13b   : > { %v1255_v45 = vadd.f32 %v1254_v15, %v701_v46  ;;  %v1585_v63 = vpop.f32.mrf.mxu2  ;;  %v1966_v39 = vpop.f32.mrf.mxu3  ;;  %v10940_v15 = vand.u32 4294901760, %v842_v25  ;;  %v10945_v46 = vand.u32 4294901760, %v226_v17  ;;  %v228_v25 = vld [vmem:[%s10061_s12 + $0x260] sm:$0xff] }
 0x13d   : > { %v1586_v29 = vadd.f32 %v1585_v63, %v1255_v45  ;;  %836 = vmatmul.f32.gmra.mxu0 %v10921_v4  ;;  %1317 = vmatmul.f32.gmra.mxu1 %v10869_v21  ;;  %16155 = vst [vmem:[#allocation158_spill] sm:$0xff] %v10940_v15  ;;  %v10943_v45 = vand.u32 4294901760, %v10933_v23 }
 0x13e   : > { %16157 = vst [vmem:[#allocation160_spill] sm:$0xff] %v10945_v46 }
 0x13f   : > { %v10936_v56 = vadd.f32 %v1966_v39, %v1586_v29  ;;  %2067 = vmatmul.f32.gmra.mxu3 %v10905_v62  ;;  %16156 = vst [vmem:[#allocation159_spill] sm:$0xff] %v10943_v45  ;;  %v850_v29 = vsub.f32 %v10933_v23, %v10943_v45  ;;  %v10952_v39 = vsub.f32 %v226_v17, %v10945_v46 }
 0x140   : > { %1669 = vmatmul.f32.gmra.mxu2 %v10895_v35 }
 0x141   : > { %16154 = vst [vmem:[#allocation157_spill] sm:$0xff] %v10936_v56 }
 0x142   : > { %v717_v63 = vpop.f32.mrf.mxu0  ;;  %v1258_v4 = vpop.f32.mrf.mxu1  ;;  %16158 = vst [vmem:[#allocation161_spill] sm:$0xff] %v10952_v39 }
 0x143   : > { %v1259_v5 = vadd.f32 %v1258_v4, %v709_v50  ;;  %v1590_v49 = vpop.f32.mrf.mxu2  ;;  %v1972_v21 = vpop.f32.mrf.mxu3  ;;  %v10959_v4 = vand.u32 4294901760, %v850_v29  ;;  %v10964_v50 = vand.u32 4294901760, %v228_v25  ;;  %v230_v29 = vld [vmem:[%s10061_s12 + $0x270] sm:$0xff] }
 0x145   : > { %v1591_v40 = vadd.f32 %v1590_v49, %v1259_v5  ;;  %844 = vmatmul.f32.gmra.mxu0 %v10940_v15  ;;  %1321 = vmatmul.f32.gmra.mxu1 %v10888_v16  ;;  %16160 = vst [vmem:[#allocation163_spill] sm:$0xff] %v10959_v4  ;;  %v10962_v5 = vand.u32 4294901760, %v10952_v39 }
 0x146   : > { %16162 = vst [vmem:[#allocation165_spill] sm:$0xff] %v10964_v50 }
 0x147   : > { %v10955_v35 = vadd.f32 %v1972_v21, %v1591_v40  ;;  %2073 = vmatmul.f32.gmra.mxu3 %v10924_v36  ;;  %16161 = vst [vmem:[#allocation164_spill] sm:$0xff] %v10962_v5  ;;  %v858_v40 = vsub.f32 %v10952_v39, %v10962_v5  ;;  %v10971_v21 = vsub.f32 %v228_v25, %v10964_v50 }
 0x148   : > { %1674 = vmatmul.f32.gmra.mxu2 %v10914_v11 }
 0x149   : > { %16159 = vst [vmem:[#allocation162_spill] sm:$0xff] %v10955_v35 }
 0x14a   : > { %v725_v49 = vpop.f32.mrf.mxu0  ;;  %v1262_v15 = vpop.f32.mrf.mxu1  ;;  %16163 = vst [vmem:[#allocation166_spill] sm:$0xff] %v10971_v21 }
 0x14b   : > { %v1263_v62 = vadd.f32 %v1262_v15, %v717_v63  ;;  %v1595_v17 = vpop.f32.mrf.mxu2  ;;  %v1978_v16 = vpop.f32.mrf.mxu3  ;;  %v10978_v15 = vand.u32 4294901760, %v858_v40  ;;  %v10983_v63 = vand.u32 4294901760, %v230_v29  ;;  %v232_v40 = vld [vmem:[%s10061_s12 + $0x280] sm:$0xff] }
 0x14d   : > { %v1596_v56 = vadd.f32 %v1595_v17, %v1263_v62  ;;  %852 = vmatmul.f32.gmra.mxu0 %v10959_v4  ;;  %1325 = vmatmul.f32.gmra.mxu1 %v10907_v24  ;;  %16165 = vst [vmem:[#allocation168_spill] sm:$0xff] %v10978_v15  ;;  %v10981_v62 = vand.u32 4294901760, %v10971_v21 }
 0x14e   : > { %16167 = vst [vmem:[#allocation170_spill] sm:$0xff] %v10983_v63 }
 0x14f   : > { %v10974_v11 = vadd.f32 %v1978_v16, %v1596_v56  ;;  %2079 = vmatmul.f32.gmra.mxu3 %v10943_v45  ;;  %16166 = vst [vmem:[#allocation169_spill] sm:$0xff] %v10981_v62  ;;  %v866_v56 = vsub.f32 %v10971_v21, %v10981_v62  ;;  %v10990_v16 = vsub.f32 %v230_v29, %v10983_v63 }
 0x150   : > { %1679 = vmatmul.f32.gmra.mxu2 %v10933_v23 }
 0x151   : > { %16164 = vst [vmem:[#allocation167_spill] sm:$0xff] %v10974_v11 }
 0x152   : > { %v733_v17 = vpop.f32.mrf.mxu0  ;;  %v1266_v4 = vpop.f32.mrf.mxu1  ;;  %16168 = vst [vmem:[#allocation171_spill] sm:$0xff] %v10990_v16 }
 0x153   : > { %v1267_v36 = vadd.f32 %v1266_v4, %v725_v49  ;;  %v1600_v25 = vpop.f32.mrf.mxu2  ;;  %v1984_v24 = vpop.f32.mrf.mxu3  ;;  %v10997_v4 = vand.u32 4294901760, %v866_v56  ;;  %v11002_v49 = vand.u32 4294901760, %v232_v40  ;;  %v234_v56 = vld [vmem:[%s10061_s12 + $0x290] sm:$0xff] }
 0x155   : > { %v1601_v35 = vadd.f32 %v1600_v25, %v1267_v36  ;;  %860 = vmatmul.f32.gmra.mxu0 %v10978_v15  ;;  %1329 = vmatmul.f32.gmra.mxu1 %v10926_v42  ;;  %16170 = vst [vmem:[#allocation173_spill] sm:$0xff] %v10997_v4  ;;  %v11000_v36 = vand.u32 4294901760, %v10990_v16 }
 0x156   : > { %16172 = vst [vmem:[#allocation175_spill] sm:$0xff] %v11002_v49 }
 0x157   : > { %v10993_v23 = vadd.f32 %v1984_v24, %v1601_v35  ;;  %2085 = vmatmul.f32.gmra.mxu3 %v10962_v5  ;;  %16171 = vst [vmem:[#allocation174_spill] sm:$0xff] %v11000_v36  ;;  %v874_v35 = vsub.f32 %v10990_v16, %v11000_v36  ;;  %v11009_v24 = vsub.f32 %v232_v40, %v11002_v49 }
 0x158   : > { %1684 = vmatmul.f32.gmra.mxu2 %v10952_v39 }
 0x159   : > { %16169 = vst [vmem:[#allocation172_spill] sm:$0xff] %v10993_v23 }
 0x15a   : > { %v741_v25 = vpop.f32.mrf.mxu0  ;;  %v1270_v15 = vpop.f32.mrf.mxu1  ;;  %16173 = vst [vmem:[#allocation176_spill] sm:$0xff] %v11009_v24 }
 0x15b   : > { %v1271_v45 = vadd.f32 %v1270_v15, %v733_v17  ;;  %v1605_v29 = vpop.f32.mrf.mxu2  ;;  %v1990_v42 = vpop.f32.mrf.mxu3  ;;  %v11016_v15 = vand.u32 4294901760, %v874_v35  ;;  %v11021_v17 = vand.u32 4294901760, %v234_v56  ;;  %v236_v35 = vld [vmem:[%s10061_s12 + $0x2a0] sm:$0xff] }
 0x15d   : > { %v1606_v11 = vadd.f32 %v1605_v29, %v1271_v45  ;;  %868 = vmatmul.f32.gmra.mxu0 %v10997_v4  ;;  %1333 = vmatmul.f32.gmra.mxu1 %v10945_v46  ;;  %16175 = vst [vmem:[#allocation178_spill] sm:$0xff] %v11016_v15  ;;  %v11019_v45 = vand.u32 4294901760, %v11009_v24 }
 0x15e   : > { %16177 = vst [vmem:[#allocation180_spill] sm:$0xff] %v11021_v17 }
 0x15f   : > { %v11012_v39 = vadd.f32 %v1990_v42, %v1606_v11  ;;  %2091 = vmatmul.f32.gmra.mxu3 %v10981_v62  ;;  %16176 = vst [vmem:[#allocation179_spill] sm:$0xff] %v11019_v45  ;;  %v882_v11 = vsub.f32 %v11009_v24, %v11019_v45  ;;  %v11028_v42 = vsub.f32 %v234_v56, %v11021_v17 }
 0x160   : > { %1689 = vmatmul.f32.gmra.mxu2 %v10971_v21 }
 0x161   : > { %16174 = vst [vmem:[#allocation177_spill] sm:$0xff] %v11012_v39 }
 0x162   : > { %v749_v29 = vpop.f32.mrf.mxu0  ;;  %v1274_v4 = vpop.f32.mrf.mxu1  ;;  %16178 = vst [vmem:[#allocation181_spill] sm:$0xff] %v11028_v42 }
 0x163   : > { %v1275_v5 = vadd.f32 %v1274_v4, %v741_v25  ;;  %v1610_v40 = vpop.f32.mrf.mxu2  ;;  %v1996_v46 = vpop.f32.mrf.mxu3  ;;  %v11035_v4 = vand.u32 4294901760, %v882_v11  ;;  %v11040_v25 = vand.u32 4294901760, %v236_v35  ;;  %v238_v11 = vld [vmem:[%s10061_s12 + $0x2b0] sm:$0xff] }
 0x165   : > { %v1611_v23 = vadd.f32 %v1610_v40, %v1275_v5  ;;  %876 = vmatmul.f32.gmra.mxu0 %v11016_v15  ;;  %1337 = vmatmul.f32.gmra.mxu1 %v10964_v50  ;;  %16180 = vst [vmem:[#allocation183_spill] sm:$0xff] %v11035_v4  ;;  %v11038_v5 = vand.u32 4294901760, %v11028_v42 }
 0x166   : > { %16182 = vst [vmem:[#allocation185_spill] sm:$0xff] %v11040_v25 }
 0x167   : > { %v11031_v21 = vadd.f32 %v1996_v46, %v1611_v23  ;;  %2097 = vmatmul.f32.gmra.mxu3 %v11000_v36  ;;  %16181 = vst [vmem:[#allocation184_spill] sm:$0xff] %v11038_v5  ;;  %v890_v23 = vsub.f32 %v11028_v42, %v11038_v5  ;;  %v11047_v46 = vsub.f32 %v236_v35, %v11040_v25 }
 0x168   : > { %1694 = vmatmul.f32.gmra.mxu2 %v10990_v16 }
 0x169   : > { %16179 = vst [vmem:[#allocation182_spill] sm:$0xff] %v11031_v21 }
 0x16a   : > { %v757_v40 = vpop.f32.mrf.mxu0  ;;  %v1278_v15 = vpop.f32.mrf.mxu1  ;;  %16183 = vst [vmem:[#allocation186_spill] sm:$0xff] %v11047_v46 }
 0x16b   : > { %v1279_v62 = vadd.f32 %v1278_v15, %v749_v29  ;;  %v1615_v56 = vpop.f32.mrf.mxu2  ;;  %v2002_v50 = vpop.f32.mrf.mxu3  ;;  %v11057_v15 = vand.u32 4294901760, %v890_v23  ;;  %v11060_v29 = vand.u32 4294901760, %v11047_v46 }
 0x16d   : > { %v1616_v39 = vadd.f32 %v1615_v56, %v1279_v62  ;;  %884 = vmatmul.f32.gmra.mxu0 %v11035_v4  ;;  %1341 = vmatmul.f32.gmra.mxu1 %v10983_v63  ;;  %v318_v62 = vld [vmem:[%s15079_s1 + $0x110] sm:$0xff]  ;;  %16185 = vst [vmem:[#allocation188_spill] sm:$0xff] %v11057_v15  ;;  %v11062_v56 = vand.u32 4294901760, %v238_v11 }
 0x16e   : > { %16186 = vst [vmem:[#allocation189_spill] sm:$0xff] %v11060_v29  ;;  %v11064_v35 = vand.u32 4294901760, %v318_v62 }
 0x16f   : > { %v11050_v16 = vadd.f32 %v2002_v50, %v1616_v39  ;;  %2103 = vmatmul.f32.gmra.mxu3 %v11019_v45  ;;  %16187 = vst [vmem:[#allocation190_spill] sm:$0xff] %v11062_v56  ;;  %v11076_v63 = vsub.f32 %v238_v11, %v11062_v56 }
 0x170   : > { %1699 = vmatmul.f32.gmra.mxu2 %v11009_v24  ;;  %v11068_v24 = vsub.f32 %v318_v62, %v11064_v35  ;;  %4123 = vmatpush.msra.mxu1 %v11064_v35 }
 0x171   : > { %16184 = vst [vmem:[#allocation187_spill] sm:$0xff] %v11050_v16  ;;  %2902 = vmatpush.msrb.mxu2 %v11064_v35  ;;  %v898_v16 = vsub.f32 %v11047_v46, %v11060_v29  ;;  %v11091_v11 = vand.u32 4294901760, %v11076_v63 }
 0x172   : > { %v765_v39 = vpop.f32.mrf.mxu0  ;;  %v1282_v50 = vpop.f32.mrf.mxu1  ;;  %16188 = vst [vmem:[#allocation191_spill] sm:$0xff] %v11076_v63  ;;  %3769 = vmatpush.msra.mxu0 %v11068_v24 }
 0x173   : > { %v1283_v4 = vadd.f32 %v1282_v50, %v757_v40  ;;  %v1620_v45 = vpop.f32.mrf.mxu2  ;;  %v2008_v36 = vpop.f32.mrf.mxu3  ;;  %v15250_v40 = vand.u32 4294901760, %v11068_v24  ;;  %v240_v50 = vld [vmem:[%s10061_s12 + $0x2c0] sm:$0xff]  ;;  %16191 = vst [vmem:[#allocation194_spill] sm:$0xff] %v11091_v11 }
 0x175   : > { %v1621_v23 = vadd.f32 %v1620_v45, %v1283_v4  ;;  %892 = vmatmul.f32.gmra.mxu0 %v11057_v15  ;;  %1345 = vmatmul.f32.gmra.mxu1 %v11002_v49  ;;  %v3471_v45 = vsub.f32 %v11068_v24, %v15250_v40  ;;  %v11088_v4 = vand.u32 4294901760, %v898_v16  ;;  %v11093_v15 = vand.u32 4294901760, %v240_v50 }
 0x176   : > { %v906_v16 = vsub.f32 %v11076_v63, %v11091_v11 }
 0x177   : > { %v11081_v62 = vadd.f32 %v2008_v36, %v1621_v23  ;;  %2109 = vmatmul.f32.gmra.mxu3 %v11038_v5  ;;  %16190 = vst [vmem:[#allocation193_spill] sm:$0xff] %v11088_v4  ;;  %v3472_v49 = vand.u32 4294901760, %v3471_v45  ;;  %v11100_v40 = vsub.f32 %v240_v50, %v11093_v15 }
 0x178   : > { %1704 = vmatmul.f32.gmra.mxu2 %v11028_v42  ;;  %16192 = vst [vmem:[#allocation195_spill] sm:$0xff] %v11093_v15  ;;  %v242_v42 = vld [vmem:[%s10061_s12 + $0x2d0] sm:$0xff] }
 0x179   : > { %16189 = vst [vmem:[#allocation192_spill] sm:$0xff] %v11081_v62  ;;  %3473 = vmatpush.msrb.mxu3 %v3472_v49  ;;  %v11107_v49 = vand.u32 4294901760, %v906_v16  ;;  %v244_v16 = vld [vmem:[%s10061_s12 + $0x2e0] sm:$0xff] }
 0x17a   : > { %v773_v21 = vpop.f32.mrf.mxu0  ;;  %v1286_v36 = vpop.f32.mrf.mxu1  ;;  %16193 = vst [vmem:[#allocation196_spill] sm:$0xff] %v11100_v40 }
 0x17b   : > { %v1287_v23 = vadd.f32 %v1286_v36, %v765_v39  ;;  %v1625_v62 = vpop.f32.mrf.mxu2  ;;  %v2014_v5 = vpop.f32.mrf.mxu3  ;;  %16195 = vst [vmem:[#allocation198_spill] sm:$0xff] %v11107_v49  ;;  %v11110_v39 = vand.u32 4294901760, %v11100_v40 }
 0x17d   : > { %v1626_v7 = vadd.f32 %v1625_v62, %v1287_v23  ;;  %900 = vmatmul.f32.gmra.mxu0 %v11088_v4  ;;  %1349 = vmatmul.f32.gmra.mxu1 %v11021_v17  ;;  %16196 = vst [vmem:[#allocation199_spill] sm:$0xff] %v11110_v39  ;;  %v11112_v62 = vand.u32 4294901760, %v242_v42 }
 0x17f   : > { %v11103_v2 = vadd.f32 %v2014_v5, %v1626_v7  ;;  %2115 = vmatmul.f32.gmra.mxu3 %v11060_v29  ;;  %16197 = vst [vmem:[#allocation200_spill] sm:$0xff] %v11112_v62  ;;  %v914_v7 = vsub.f32 %v11100_v40, %v11110_v39  ;;  %v11119_v5 = vsub.f32 %v242_v42, %v11112_v62 }
 0x180   : > { %1709 = vmatmul.f32.gmra.mxu2 %v11047_v46 }
 0x181   : > { %16194 = vst [vmem:[#allocation197_spill] sm:$0xff] %v11103_v2 }
 0x182   : > { %v781_v45 = vpop.f32.mrf.mxu0  ;;  %v1290_v36 = vpop.f32.mrf.mxu1  ;;  %16198 = vst [vmem:[#allocation201_spill] sm:$0xff] %v11119_v5 }
 0x183   : > { %v1291_v23 = vadd.f32 %v1290_v36, %v773_v21  ;;  %v1630_v50 = vpop.f32.mrf.mxu2  ;;  %v2020_v4 = vpop.f32.mrf.mxu3  ;;  %v11126_v21 = vand.u32 4294901760, %v914_v7  ;;  %v11129_v36 = vand.u32 4294901760, %v11119_v5  ;;  %v246_v7 = vld [vmem:[%s10061_s12 + $0x2f0] sm:$0xff] }
 0x185   : > { %v1631_v17 = vadd.f32 %v1630_v50, %v1291_v23  ;;  %908 = vmatmul.f32.gmra.mxu0 %v11107_v49  ;;  %1353 = vmatmul.f32.gmra.mxu1 %v11040_v25  ;;  %16200 = vst [vmem:[#allocation203_spill] sm:$0xff] %v11126_v21  ;;  %v11131_v23 = vand.u32 4294901760, %v244_v16 }
 0x186   : > { %16201 = vst [vmem:[#allocation204_spill] sm:$0xff] %v11129_v36 }
 0x187   : > { %v11122_v46 = vadd.f32 %v2020_v4, %v1631_v17  ;;  %2121 = vmatmul.f32.gmra.mxu3 %v11091_v11  ;;  %16202 = vst [vmem:[#allocation205_spill] sm:$0xff] %v11131_v23  ;;  %v922_v17 = vsub.f32 %v11119_v5, %v11129_v36  ;;  %v11138_v4 = vsub.f32 %v244_v16, %v11131_v23 }
 0x188   : > { %1714 = vmatmul.f32.gmra.mxu2 %v11076_v63 }
 0x189   : > { %16199 = vst [vmem:[#allocation202_spill] sm:$0xff] %v11122_v46 }
 0x18a   : > { %v789_v50 = vpop.f32.mrf.mxu0  ;;  %v1294_v49 = vpop.f32.mrf.mxu1  ;;  %16203 = vst [vmem:[#allocation206_spill] sm:$0xff] %v11138_v4 }
 0x18b   : > { %v1295_v29 = vadd.f32 %v1294_v49, %v781_v45  ;;  %v1635_v42 = vpop.f32.mrf.mxu2  ;;  %v2026_v25 = vpop.f32.mrf.mxu3  ;;  %v11145_v49 = vand.u32 4294901760, %v922_v17  ;;  %v11150_v45 = vand.u32 4294901760, %v246_v7  ;;  %v248_v17 = vld [vmem:[%s10061_s12 + $0x300] sm:$0xff] }
 0x18d   : > { %v1636_v2 = vadd.f32 %v1635_v42, %v1295_v29  ;;  %916 = vmatmul.f32.gmra.mxu0 %v11126_v21  ;;  %1357 = vmatmul.f32.gmra.mxu1 %v11062_v56  ;;  %16205 = vst [vmem:[#allocation208_spill] sm:$0xff] %v11145_v49  ;;  %v11148_v29 = vand.u32 4294901760, %v11138_v4 }
 0x18e   : > { %16207 = vst [vmem:[#allocation210_spill] sm:$0xff] %v11150_v45 }
 0x18f   : > { %v11141_v63 = vadd.f32 %v2026_v25, %v1636_v2  ;;  %2127 = vmatmul.f32.gmra.mxu3 %v11110_v39  ;;  %16206 = vst [vmem:[#allocation209_spill] sm:$0xff] %v11148_v29  ;;  %v930_v2 = vsub.f32 %v11138_v4, %v11148_v29  ;;  %v11157_v25 = vsub.f32 %v246_v7, %v11150_v45 }
 0x190   : > { %1719 = vmatmul.f32.gmra.mxu2 %v11100_v40 }
 0x191   : > { %16204 = vst [vmem:[#allocation207_spill] sm:$0xff] %v11141_v63 }
 0x192   : > { %v797_v42 = vpop.f32.mrf.mxu0  ;;  %v1298_v21 = vpop.f32.mrf.mxu1  ;;  %16208 = vst [vmem:[#allocation211_spill] sm:$0xff] %v11157_v25 }
 0x193   : > { %v1299_v11 = vadd.f32 %v1298_v21, %v789_v50  ;;  %v1640_v16 = vpop.f32.mrf.mxu2  ;;  %v2032_v56 = vpop.f32.mrf.mxu3  ;;  %v11164_v21 = vand.u32 4294901760, %v930_v2  ;;  %v11169_v50 = vand.u32 4294901760, %v248_v17  ;;  %v250_v2 = vld [vmem:[%s10061_s12 + $0x310] sm:$0xff] }
 0x195   : > { %v1641_v46 = vadd.f32 %v1640_v16, %v1299_v11  ;;  %924 = vmatmul.f32.gmra.mxu0 %v11145_v49  ;;  %1361 = vmatmul.f32.gmra.mxu1 %v11093_v15  ;;  %16210 = vst [vmem:[#allocation213_spill] sm:$0xff] %v11164_v21  ;;  %v11167_v11 = vand.u32 4294901760, %v11157_v25 }
 0x196   : > { %16212 = vst [vmem:[#allocation215_spill] sm:$0xff] %v11169_v50 }
 0x197   : > { %v11160_v40 = vadd.f32 %v2032_v56, %v1641_v46  ;;  %2133 = vmatmul.f32.gmra.mxu3 %v11129_v36  ;;  %16211 = vst [vmem:[#allocation214_spill] sm:$0xff] %v11167_v11  ;;  %v938_v46 = vsub.f32 %v11157_v25, %v11167_v11  ;;  %v11176_v56 = vsub.f32 %v248_v17, %v11169_v50 }
 0x198   : > { %1724 = vmatmul.f32.gmra.mxu2 %v11119_v5 }
 0x199   : > { %16209 = vst [vmem:[#allocation212_spill] sm:$0xff] %v11160_v40 }
 0x19a   : > { %v805_v16 = vpop.f32.mrf.mxu0  ;;  %v1302_v49 = vpop.f32.mrf.mxu1  ;;  %16213 = vst [vmem:[#allocation216_spill] sm:$0xff] %v11176_v56 }
 0x19b   : > { %v1303_v39 = vadd.f32 %v1302_v49, %v797_v42  ;;  %v1645_v7 = vpop.f32.mrf.mxu2  ;;  %v2038_v15 = vpop.f32.mrf.mxu3  ;;  %v11183_v49 = vand.u32 4294901760, %v938_v46  ;;  %v11188_v42 = vand.u32 4294901760, %v250_v2  ;;  %v252_v46 = vld [vmem:[%s10061_s12 + $0x320] sm:$0xff] }
 0x19d   : > { %v1646_v63 = vadd.f32 %v1645_v7, %v1303_v39  ;;  %932 = vmatmul.f32.gmra.mxu0 %v11164_v21  ;;  %1365 = vmatmul.f32.gmra.mxu1 %v11112_v62  ;;  %16215 = vst [vmem:[#allocation218_spill] sm:$0xff] %v11183_v49  ;;  %v11186_v39 = vand.u32 4294901760, %v11176_v56 }
 0x19e   : > { %16217 = vst [vmem:[#allocation220_spill] sm:$0xff] %v11188_v42 }
 0x19f   : > { %v11179_v5 = vadd.f32 %v2038_v15, %v1646_v63  ;;  %2139 = vmatmul.f32.gmra.mxu3 %v11148_v29  ;;  %16216 = vst [vmem:[#allocation219_spill] sm:$0xff] %v11186_v39  ;;  %v946_v63 = vsub.f32 %v11176_v56, %v11186_v39  ;;  %v11195_v15 = vsub.f32 %v250_v2, %v11188_v42 }
 0x1a0   : > { %1729 = vmatmul.f32.gmra.mxu2 %v11138_v4 }
 0x1a1   : > { %16214 = vst [vmem:[#allocation217_spill] sm:$0xff] %v11179_v5 }
 0x1a2   : > { %v813_v7 = vpop.f32.mrf.mxu0  ;;  %v1306_v21 = vpop.f32.mrf.mxu1  ;;  %16218 = vst [vmem:[#allocation221_spill] sm:$0xff] %v11195_v15 }
 0x1a3   : > { %v1307_v36 = vadd.f32 %v1306_v21, %v805_v16  ;;  %v1650_v17 = vpop.f32.mrf.mxu2  ;;  %v2044_v62 = vpop.f32.mrf.mxu3  ;;  %v11202_v21 = vand.u32 4294901760, %v946_v63  ;;  %v11207_v16 = vand.u32 4294901760, %v252_v46  ;;  %v254_v63 = vld [vmem:[%s10061_s12 + $0x330] sm:$0xff] }
 0x1a5   : > { %v1651_v40 = vadd.f32 %v1650_v17, %v1307_v36  ;;  %940 = vmatmul.f32.gmra.mxu0 %v11183_v49  ;;  %1369 = vmatmul.f32.gmra.mxu1 %v11131_v23  ;;  %16220 = vst [vmem:[#allocation223_spill] sm:$0xff] %v11202_v21  ;;  %v11205_v36 = vand.u32 4294901760, %v11195_v15 }
 0x1a6   : > { %16222 = vst [vmem:[#allocation225_spill] sm:$0xff] %v11207_v16 }
 0x1a7   : > { %v11198_v4 = vadd.f32 %v2044_v62, %v1651_v40  ;;  %2145 = vmatmul.f32.gmra.mxu3 %v11167_v11  ;;  %16221 = vst [vmem:[#allocation224_spill] sm:$0xff] %v11205_v36  ;;  %v954_v40 = vsub.f32 %v11195_v15, %v11205_v36  ;;  %v11214_v62 = vsub.f32 %v252_v46, %v11207_v16 }
 0x1a8   : > { %1734 = vmatmul.f32.gmra.mxu2 %v11157_v25 }
 0x1a9   : > { %16219 = vst [vmem:[#allocation222_spill] sm:$0xff] %v11198_v4 }
 0x1aa   : > { %v821_v17 = vpop.f32.mrf.mxu0  ;;  %v1310_v49 = vpop.f32.mrf.mxu1  ;;  %16223 = vst [vmem:[#allocation226_spill] sm:$0xff] %v11214_v62 }
 0x1ab   : > { %v1311_v29 = vadd.f32 %v1310_v49, %v813_v7  ;;  %v1655_v2 = vpop.f32.mrf.mxu2  ;;  %v2050_v23 = vpop.f32.mrf.mxu3  ;;  %v11221_v49 = vand.u32 4294901760, %v954_v40  ;;  %v11226_v7 = vand.u32 4294901760, %v254_v63  ;;  %v256_v40 = vld [vmem:[%s10061_s12 + $0x340] sm:$0xff] }
 0x1ad   : > { %v1656_v5 = vadd.f32 %v1655_v2, %v1311_v29  ;;  %948 = vmatmul.f32.gmra.mxu0 %v11202_v21  ;;  %1373 = vmatmul.f32.gmra.mxu1 %v11150_v45  ;;  %16225 = vst [vmem:[#allocation228_spill] sm:$0xff] %v11221_v49  ;;  %v11224_v29 = vand.u32 4294901760, %v11214_v62 }
 0x1ae   : > { %16227 = vst [vmem:[#allocation230_spill] sm:$0xff] %v11226_v7 }
 0x1af   : > { %v11217_v25 = vadd.f32 %v2050_v23, %v1656_v5  ;;  %2151 = vmatmul.f32.gmra.mxu3 %v11186_v39  ;;  %16226 = vst [vmem:[#allocation229_spill] sm:$0xff] %v11224_v29  ;;  %v962_v5 = vsub.f32 %v11214_v62, %v11224_v29  ;;  %v11233_v23 = vsub.f32 %v254_v63, %v11226_v7 }
 0x1b0   : > { %1739 = vmatmul.f32.gmra.mxu2 %v11176_v56 }
 0x1b1   : > { %16224 = vst [vmem:[#allocation227_spill] sm:$0xff] %v11217_v25 }
 0x1b2   : > { %v829_v2 = vpop.f32.mrf.mxu0  ;;  %v1314_v21 = vpop.f32.mrf.mxu1  ;;  %16228 = vst [vmem:[#allocation231_spill] sm:$0xff] %v11233_v23 }
 0x1b3   : > { %v1315_v11 = vadd.f32 %v1314_v21, %v821_v17  ;;  %v1660_v46 = vpop.f32.mrf.mxu2  ;;  %v2056_v45 = vpop.f32.mrf.mxu3  ;;  %v11240_v21 = vand.u32 4294901760, %v962_v5  ;;  %v11245_v17 = vand.u32 4294901760, %v256_v40  ;;  %v258_v5 = vld [vmem:[%s10061_s12 + $0x350] sm:$0xff] }
 0x1b5   : > { %v1661_v4 = vadd.f32 %v1660_v46, %v1315_v11  ;;  %956 = vmatmul.f32.gmra.mxu0 %v11221_v49  ;;  %1377 = vmatmul.f32.gmra.mxu1 %v11169_v50  ;;  %16230 = vst [vmem:[#allocation233_spill] sm:$0xff] %v11240_v21  ;;  %v11243_v11 = vand.u32 4294901760, %v11233_v23 }
 0x1b6   : > { %16232 = vst [vmem:[#allocation235_spill] sm:$0xff] %v11245_v17 }
 0x1b7   : > { %v11236_v56 = vadd.f32 %v2056_v45, %v1661_v4  ;;  %2157 = vmatmul.f32.gmra.mxu3 %v11205_v36  ;;  %16231 = vst [vmem:[#allocation234_spill] sm:$0xff] %v11243_v11  ;;  %v970_v4 = vsub.f32 %v11233_v23, %v11243_v11  ;;  %v11252_v45 = vsub.f32 %v256_v40, %v11245_v17 }
 0x1b8   : > { %1744 = vmatmul.f32.gmra.mxu2 %v11195_v15 }
 0x1b9   : > { %16229 = vst [vmem:[#allocation232_spill] sm:$0xff] %v11236_v56 }
 0x1ba   : > { %v837_v46 = vpop.f32.mrf.mxu0  ;;  %v1318_v49 = vpop.f32.mrf.mxu1  ;;  %16233 = vst [vmem:[#allocation236_spill] sm:$0xff] %v11252_v45 }
 0x1bb   : > { %v1319_v39 = vadd.f32 %v1318_v49, %v829_v2  ;;  %v1665_v63 = vpop.f32.mrf.mxu2  ;;  %v2062_v50 = vpop.f32.mrf.mxu3  ;;  %v11259_v49 = vand.u32 4294901760, %v970_v4  ;;  %v11264_v2 = vand.u32 4294901760, %v258_v5  ;;  %v260_v4 = vld [vmem:[%s10061_s12 + $0x360] sm:$0xff] }
 0x1bd   : > { %v1666_v25 = vadd.f32 %v1665_v63, %v1319_v39  ;;  %964 = vmatmul.f32.gmra.mxu0 %v11240_v21  ;;  %1381 = vmatmul.f32.gmra.mxu1 %v11188_v42  ;;  %16235 = vst [vmem:[#allocation238_spill] sm:$0xff] %v11259_v49  ;;  %v11262_v39 = vand.u32 4294901760, %v11252_v45 }
 0x1be   : > { %16237 = vst [vmem:[#allocation240_spill] sm:$0xff] %v11264_v2 }
 0x1bf   : > { %v11255_v15 = vadd.f32 %v2062_v50, %v1666_v25  ;;  %2163 = vmatmul.f32.gmra.mxu3 %v11224_v29  ;;  %16236 = vst [vmem:[#allocation239_spill] sm:$0xff] %v11262_v39  ;;  %v978_v25 = vsub.f32 %v11252_v45, %v11262_v39  ;;  %v11271_v50 = vsub.f32 %v258_v5, %v11264_v2 }
 0x1c0   : > { %1749 = vmatmul.f32.gmra.mxu2 %v11214_v62 }
 0x1c1   : > { %16234 = vst [vmem:[#allocation237_spill] sm:$0xff] %v11255_v15  ;;  %v262_v15 = vld [vmem:[%s10061_s12 + $0x370] sm:$0xff] }
 0x1c2   : > { %v845_v63 = vpop.f32.mrf.mxu0  ;;  %v1322_v21 = vpop.f32.mrf.mxu1  ;;  %16238 = vst [vmem:[#allocation241_spill] sm:$0xff] %v11271_v50 }
 0x1c3   : > { %v1323_v36 = vadd.f32 %v1322_v21, %v837_v46  ;;  %v1670_v40 = vpop.f32.mrf.mxu2  ;;  %v2068_v42 = vpop.f32.mrf.mxu3  ;;  %v11281_v21 = vand.u32 4294901760, %v978_v25  ;;  %v11284_v46 = vand.u32 4294901760, %v11271_v50  ;;  %v16243_v25 = vand.u32 4294901760, %v10163_v55 }
 0x1c5   : > { %v1671_v56 = vadd.f32 %v1670_v40, %v1323_v36  ;;  %972 = vmatmul.f32.gmra.mxu0 %v11259_v49  ;;  %1385 = vmatmul.f32.gmra.mxu1 %v11207_v16  ;;  %v316_v36 = vld [vmem:[%s15079_s1 + $0x100] sm:$0xff]  ;;  %16240 = vst [vmem:[#allocation243_spill] sm:$0xff] %v11281_v21  ;;  %v11286_v40 = vand.u32 4294901760, %v260_v4  ;;  %v986_v16 = vsub.f32 %v11271_v50, %v11284_v46 }
 0x1c6   : > { %16241 = vst [vmem:[#allocation244_spill] sm:$0xff] %v11284_v46  ;;  %v11288_v5 = vand.u32 4294901760, %v316_v36 }
 0x1c7   : > { %v11274_v62 = vadd.f32 %v2068_v42, %v1671_v56  ;;  %2169 = vmatmul.f32.gmra.mxu3 %v11243_v11  ;;  %16242 = vst [vmem:[#allocation245_spill] sm:$0xff] %v11286_v40 }
 0x1c8   : > { %1754 = vmatmul.f32.gmra.mxu2 %v11233_v23  ;;  %v3475_v23 = vsub.f32 %v316_v36, %v11288_v5  ;;  %4125 = vmatpush.msra.mxu1 %v11288_v5  ;;  %v16245_v36 = vand.u32 4294901760, %v10414_v14  ;;  %v16249_v14 = vand.u32 4294901760, %v10620_v60 }
 0x1c9   : > { %16239 = vst [vmem:[#allocation242_spill] sm:$0xff] %v11274_v62  ;;  %2904 = vmatpush.msrb.mxu2 %v11288_v5 }
 0x1ca   : > { %v853_v56 = vpop.f32.mrf.mxu0  ;;  %v1326_v42 = vpop.f32.mrf.mxu1  ;;  %3772 = vmatpush.msra.mxu0 %v3475_v23 }
 0x1cb   : > { %v1327_v49 = vadd.f32 %v1326_v42, %v845_v63  ;;  %v1675_v11 = vpop.f32.mrf.mxu2  ;;  %v2074_v29 = vpop.f32.mrf.mxu3  ;;  %4536 = vmatpush.msra.mxu2 %v16243_v25  ;;  %v11300_v63 = vsub.f32 %v260_v4, %v11286_v40  ;;  %v3476_v42 = vand.u32 4294901760, %v3475_v23  ;;  %v11314_v4 = vand.u32 4294901760, %v262_v15 }
 0x1cd   : > { %v1676_v62 = vadd.f32 %v1675_v11, %v1327_v49  ;;  %980 = vmatmul.f32.gmra.mxu0 %v11281_v21  ;;  %1389 = vmatmul.f32.gmra.mxu1 %v11226_v7  ;;  %16244 = vst [vmem:[#allocation246_spill] sm:$0xff] %v11300_v63  ;;  %v3477_v55 = vsub.f32 %v3475_v23, %v3476_v42  ;;  %v11309_v11 = vand.u32 4294901760, %v986_v16  ;;  %v11312_v49 = vand.u32 4294901760, %v11300_v63 }
 0x1ce   : > { %4540 = vmatpush.msra.mxu2 %v16245_v36  ;;  %16248 = vst [vmem:[#allocation249_spill] sm:$0xff] %v11314_v4  ;;  %v16250_v23 = vand.u32 4294901760, %v10844_v37 }
 0x1cf   : > { %v11305_v28 = vadd.f32 %v2074_v29, %v1676_v62  ;;  %2175 = vmatmul.f32.gmra.mxu3 %v11262_v39  ;;  %16246 = vst [vmem:[#allocation247_spill] sm:$0xff] %v11309_v11  ;;  %v3478_v25 = vand.u32 4294901760, %v3477_v55  ;;  %v994_v60 = vsub.f32 %v11300_v63, %v11312_v49  ;;  %v11326_v55 = vsub.f32 %v262_v15, %v11314_v4 }
 0x1d0   : > { %1759 = vmatmul.f32.gmra.mxu2 %v11252_v45  ;;  %16247 = vst [vmem:[#allocation248_spill] sm:$0xff] %v11312_v49 }
 0x1d1   : > { %4544 = vmatpush.msra.mxu2 %v16249_v14  ;;  %3479 = vmatpush.msrb.mxu3 %v3478_v25  ;;  %16251 = vst [vmem:[#allocation250_spill] sm:$0xff] %v11326_v55  ;;  %v16252_v25 = vand.u32 4294901760, %v11068_v24  ;;  %v11340_v15 = vand.u32 4294901760, %v11326_v55 }
 0x1d2   : > { %v861_v36 = vpop.f32.mrf.mxu0  ;;  %v1330_v62 = vpop.f32.mrf.mxu1 }
 0x1d3   : > { %v1331_v29 = vadd.f32 %v1330_v62, %v853_v56  ;;  %v1680_v21 = vpop.f32.mrf.mxu2  ;;  %v2080_v39 = vpop.f32.mrf.mxu3  ;;  %4548 = vmatpush.msra.mxu2 %v16250_v23  ;;  %4833 = vmatpush.msra.mxu3 %v10132_v31  ;;  %v264_v56 = vld [vmem:[%s10061_s12 + $0x380] sm:$0xff]  ;;  %v11337_v31 = vand.u32 4294901760, %v994_v60  ;;  %16254 = vst [vmem:[#allocation252_spill] sm:$0xff] %v11340_v15 }
 0x1d5   : > { %v1681_v16 = vadd.f32 %v1680_v21, %v1331_v29  ;;  %988 = vmatmul.f32.gmra.mxu0 %v11309_v11  ;;  %1393 = vmatmul.f32.gmra.mxu1 %v11245_v17  ;;  %16253 = vst [vmem:[#allocation251_spill] sm:$0xff] %v11337_v31  ;;  %v11342_v21 = vand.u32 4294901760, %v264_v56 }
 0x1d6   : > { %4835 = vmatpush.msra.mxu3 %v10410_v44  ;;  %4552 = vmatpush.msra.mxu2 %v16252_v25 }
 0x1d7   : > { %v11332_v37 = vadd.f32 %v2080_v39, %v1681_v16  ;;  %2181 = vmatmul.f32.gmra.mxu3 %v11284_v46  ;;  %16255 = vst [vmem:[#allocation253_spill] sm:$0xff] %v11342_v21  ;;  %v11351_v23 = vsub.f32 %v264_v56, %v11342_v21 }
 0x1d8   : > { %1764 = vmatmul.f32.gmra.mxu2 %v11271_v50  ;;  %4837 = vmatpush.msra.mxu3 %v10616_v20  ;;  %v1002_v20 = vsub.f32 %v11326_v55, %v11340_v15 }
 0x1d9   : > { %4556 = vmatpush.msra.mxu2 %v3476_v42  ;;  %16256 = vst [vmem:[#allocation254_spill] sm:$0xff] %v11351_v23  ;;  %v266_v42 = vld [vmem:[%s10061_s12 + $0x390] sm:$0xff] }
 0x1da   : > { %v869_v44 = vpop.f32.mrf.mxu0  ;;  %v1334_v24 = vpop.f32.mrf.mxu1  ;;  %4839 = vmatpush.msra.mxu3 %v10840_v30  ;;  %v11364_v16 = vand.u32 4294901760, %v266_v42 }
 0x1db   : > { %v1335_v39 = vadd.f32 %v1334_v24, %v861_v36  ;;  %v1685_v14 = vpop.f32.mrf.mxu2  ;;  %v2086_v62 = vpop.f32.mrf.mxu3  ;;  %v11362_v36 = vand.u32 4294901760, %v11351_v23 }
 0x1dc   : > { %4841 = vmatpush.msra.mxu3 %v11064_v35  ;;  %v11359_v35 = vand.u32 4294901760, %v1002_v20  ;;  %16259 = vst [vmem:[#allocation257_spill] sm:$0xff] %v11364_v16 }
 0x1dd   : > { %v1686_v29 = vadd.f32 %v1685_v14, %v1335_v39  ;;  %996 = vmatmul.f32.gmra.mxu0 %v11337_v31  ;;  %1397 = vmatmul.f32.gmra.mxu1 %v11264_v2  ;;  %16258 = vst [vmem:[#allocation256_spill] sm:$0xff] %v11362_v36  ;;  %v1010_v14 = vsub.f32 %v11351_v23, %v11362_v36 }
 0x1de   : > { %4843 = vmatpush.msra.mxu3 %v11288_v5  ;;  %16257 = vst [vmem:[#allocation255_spill] sm:$0xff] %v11359_v35 }
 0x1df   : > { %v11355_v30 = vadd.f32 %v2086_v62, %v1686_v29  ;;  %2187 = vmatmul.f32.gmra.mxu3 %v11312_v49  ;;  %v11371_v62 = vsub.f32 %v266_v42, %v11364_v16  ;;  %v268_v29 = vld [vmem:[%s10061_s12 + $0x3a0] sm:$0xff] }
 0x1e0   : > { %1769 = vmatmul.f32.gmra.mxu2 %v11300_v63 }
 0x1e1   : > { %16260 = vst [vmem:[#allocation258_spill] sm:$0xff] %v11371_v62 }
 0x1e2   : > { %v877_v60 = vpop.f32.mrf.mxu0  ;;  %v1338_v56 = vpop.f32.mrf.mxu1 }
 0x1e3   : > { %v1339_v25 = vadd.f32 %v1338_v56, %v869_v44  ;;  %v1690_v24 = vpop.f32.mrf.mxu2  ;;  %v2092_v39 = vpop.f32.mrf.mxu3  ;;  %v11378_v44 = vand.u32 4294901760, %v1010_v14  ;;  %v11381_v56 = vand.u32 4294901760, %v11371_v62  ;;  %v270_v14 = vld [vmem:[%s10061_s12 + $0x3b0] sm:$0xff] }
 0x1e5   : > { %v1691_v5 = vadd.f32 %v1690_v24, %v1339_v25  ;;  %1004 = vmatmul.f32.gmra.mxu0 %v11359_v35  ;;  %1401 = vmatmul.f32.gmra.mxu1 %v11286_v40  ;;  %16261 = vst [vmem:[#allocation259_spill] sm:$0xff] %v11378_v44  ;;  %v11383_v25 = vand.u32 4294901760, %v268_v29 }
 0x1e6   : > { %16262 = vst [vmem:[#allocation260_spill] sm:$0xff] %v11381_v56 }
 0x1e7   : > { %v11374_v20 = vadd.f32 %v2092_v39, %v1691_v5  ;;  %2193 = vmatmul.f32.gmra.mxu3 %v11340_v15  ;;  %16263 = vst [vmem:[#allocation261_spill] sm:$0xff] %v11383_v25  ;;  %v1018_v39 = vsub.f32 %v11371_v62, %v11381_v56  ;;  %v11390_v5 = vsub.f32 %v268_v29, %v11383_v25 }
 0x1e8   : > { %1774 = vmatmul.f32.gmra.mxu2 %v11326_v55 }
 0x1e9   : > { %16264 = vst [vmem:[#allocation262_spill] sm:$0xff] %v11390_v5 }
 0x1ea   : > { %v885_v24 = vpop.f32.mrf.mxu0  ;;  %v1342_v35 = vpop.f32.mrf.mxu1 }
 0x1eb   : > { %v1343_v63 = vadd.f32 %v1342_v35, %v877_v60  ;;  %v1695_v42 = vpop.f32.mrf.mxu2  ;;  %v2098_v49 = vpop.f32.mrf.mxu3  ;;  %v11397_v35 = vand.u32 4294901760, %v1018_v39  ;;  %v11402_v60 = vand.u32 4294901760, %v270_v14  ;;  %v272_v39 = vld [vmem:[%s10061_s12 + $0x3c0] sm:$0xff] }
 0x1ed   : > { %v1696_v31 = vadd.f32 %v1695_v42, %v1343_v63  ;;  %1012 = vmatmul.f32.gmra.mxu0 %v11378_v44  ;;  %1405 = vmatmul.f32.gmra.mxu1 %v11314_v4  ;;  %16265 = vst [vmem:[#allocation263_spill] sm:$0xff] %v11397_v35  ;;  %v11400_v63 = vand.u32 4294901760, %v11390_v5 }
 0x1ee   : > { %16267 = vst [vmem:[#allocation265_spill] sm:$0xff] %v11402_v60 }
 0x1ef   : > { %v11393_v55 = vadd.f32 %v2098_v49, %v1696_v31  ;;  %2199 = vmatmul.f32.gmra.mxu3 %v11362_v36  ;;  %16266 = vst [vmem:[#allocation264_spill] sm:$0xff] %v11400_v63  ;;  %v1026_v49 = vsub.f32 %v11390_v5, %v11400_v63  ;;  %v11409_v31 = vsub.f32 %v270_v14, %v11402_v60 }
 0x1f0   : > { %1779 = vmatmul.f32.gmra.mxu2 %v11351_v23 }
 0x1f1   : > { %16268 = vst [vmem:[#allocation266_spill] sm:$0xff] %v11409_v31 }
 0x1f2   : > { %v893_v42 = vpop.f32.mrf.mxu0  ;;  %v1346_v44 = vpop.f32.mrf.mxu1 }
 0x1f3   : > { %v1347_v15 = vadd.f32 %v1346_v44, %v885_v24  ;;  %v1700_v29 = vpop.f32.mrf.mxu2  ;;  %v2104_v50 = vpop.f32.mrf.mxu3  ;;  %v11416_v44 = vand.u32 4294901760, %v1026_v49  ;;  %v11421_v24 = vand.u32 4294901760, %v272_v39  ;;  %v274_v49 = vld [vmem:[%s10061_s12 + $0x3d0] sm:$0xff] }
 0x1f5   : > { %v1701_v46 = vadd.f32 %v1700_v29, %v1347_v15  ;;  %1020 = vmatmul.f32.gmra.mxu0 %v11397_v35  ;;  %1409 = vmatmul.f32.gmra.mxu1 %v11342_v21  ;;  %16270 = vst [vmem:[#allocation268_spill] sm:$0xff] %v11416_v44  ;;  %v11419_v15 = vand.u32 4294901760, %v11409_v31 }
 0x1f6   : > { %16272 = vst [vmem:[#allocation270_spill] sm:$0xff] %v11421_v24 }
 0x1f7   : > { %v11412_v23 = vadd.f32 %v2104_v50, %v1701_v46  ;;  %2205 = vmatmul.f32.gmra.mxu3 %v11381_v56  ;;  %16271 = vst [vmem:[#allocation269_spill] sm:$0xff] %v11419_v15  ;;  %v1034_v50 = vsub.f32 %v11409_v31, %v11419_v15  ;;  %v11428_v46 = vsub.f32 %v272_v39, %v11421_v24 }
 0x1f8   : > { %1784 = vmatmul.f32.gmra.mxu2 %v11371_v62 }
 0x1f9   : > { %16269 = vst [vmem:[#allocation267_spill] sm:$0xff] %v11412_v23 }
 0x1fa   : > { %v901_v29 = vpop.f32.mrf.mxu0  ;;  %v1350_v35 = vpop.f32.mrf.mxu1  ;;  %16273 = vst [vmem:[#allocation271_spill] sm:$0xff] %v11428_v46 }
 0x1fb   : > { %v1351_v36 = vadd.f32 %v1350_v35, %v893_v42  ;;  %v1705_v14 = vpop.f32.mrf.mxu2  ;;  %v2110_v11 = vpop.f32.mrf.mxu3  ;;  %v11435_v35 = vand.u32 4294901760, %v1034_v50  ;;  %v11440_v42 = vand.u32 4294901760, %v274_v49  ;;  %v276_v50 = vld [vmem:[%s10061_s12 + $0x3e0] sm:$0xff] }
 0x1fd   : > { %v1706_v45 = vadd.f32 %v1705_v14, %v1351_v36  ;;  %1028 = vmatmul.f32.gmra.mxu0 %v11416_v44  ;;  %1413 = vmatmul.f32.gmra.mxu1 %v11364_v16  ;;  %16275 = vst [vmem:[#allocation273_spill] sm:$0xff] %v11435_v35  ;;  %v11438_v36 = vand.u32 4294901760, %v11428_v46 }
 0x1fe   : > { %16277 = vst [vmem:[#allocation275_spill] sm:$0xff] %v11440_v42 }
 0x1ff   : > { %v11431_v62 = vadd.f32 %v2110_v11, %v1706_v45  ;;  %2211 = vmatmul.f32.gmra.mxu3 %v11400_v63  ;;  %16276 = vst [vmem:[#allocation274_spill] sm:$0xff] %v11438_v36  ;;  %v1042_v45 = vsub.f32 %v11428_v46, %v11438_v36  ;;  %v11447_v11 = vsub.f32 %v274_v49, %v11440_v42 }
 0x200   : > { %1789 = vmatmul.f32.gmra.mxu2 %v11390_v5 }
 0x201   : > { %16274 = vst [vmem:[#allocation272_spill] sm:$0xff] %v11431_v62 }
 0x202   : > { %v909_v14 = vpop.f32.mrf.mxu0  ;;  %v1354_v44 = vpop.f32.mrf.mxu1  ;;  %16278 = vst [vmem:[#allocation276_spill] sm:$0xff] %v11447_v11 }
 0x203   : > { %v1355_v56 = vadd.f32 %v1354_v44, %v901_v29  ;;  %v1710_v39 = vpop.f32.mrf.mxu2  ;;  %v2116_v16 = vpop.f32.mrf.mxu3  ;;  %v11454_v44 = vand.u32 4294901760, %v1042_v45  ;;  %v11459_v29 = vand.u32 4294901760, %v276_v50  ;;  %v278_v45 = vld [vmem:[%s10061_s12 + $0x3f0] sm:$0xff] }
 0x205   : > { %v1711_v23 = vadd.f32 %v1710_v39, %v1355_v56  ;;  %1036 = vmatmul.f32.gmra.mxu0 %v11435_v35  ;;  %1417 = vmatmul.f32.gmra.mxu1 %v11383_v25  ;;  %16280 = vst [vmem:[#allocation278_spill] sm:$0xff] %v11454_v44  ;;  %v11457_v56 = vand.u32 4294901760, %v11447_v11 }
 0x206   : > { %16282 = vst [vmem:[#allocation280_spill] sm:$0xff] %v11459_v29 }
 0x207   : > { %v11450_v5 = vadd.f32 %v2116_v16, %v1711_v23  ;;  %2217 = vmatmul.f32.gmra.mxu3 %v11419_v15  ;;  %16281 = vst [vmem:[#allocation279_spill] sm:$0xff] %v11457_v56  ;;  %v1050_v23 = vsub.f32 %v11447_v11, %v11457_v56  ;;  %v11466_v16 = vsub.f32 %v276_v50, %v11459_v29 }
 0x208   : > { %1794 = vmatmul.f32.gmra.mxu2 %v11409_v31 }
 0x209   : > { %16279 = vst [vmem:[#allocation277_spill] sm:$0xff] %v11450_v5 }
 0x20a   : > { %v917_v39 = vpop.f32.mrf.mxu0  ;;  %v1358_v35 = vpop.f32.mrf.mxu1  ;;  %16283 = vst [vmem:[#allocation281_spill] sm:$0xff] %v11466_v16 }
 0x20b   : > { %v1359_v63 = vadd.f32 %v1358_v35, %v909_v14  ;;  %v1715_v49 = vpop.f32.mrf.mxu2  ;;  %v2122_v25 = vpop.f32.mrf.mxu3  ;;  %v11473_v35 = vand.u32 4294901760, %v1050_v23  ;;  %v11478_v14 = vand.u32 4294901760, %v278_v45  ;;  %v280_v23 = vld [vmem:[%s10061_s12 + $0x400] sm:$0xff] }
 0x20d   : > { %v1716_v62 = vadd.f32 %v1715_v49, %v1359_v63  ;;  %1044 = vmatmul.f32.gmra.mxu0 %v11454_v44  ;;  %1421 = vmatmul.f32.gmra.mxu1 %v11402_v60  ;;  %16285 = vst [vmem:[#allocation283_spill] sm:$0xff] %v11473_v35  ;;  %v11476_v63 = vand.u32 4294901760, %v11466_v16 }
 0x20e   : > { %16287 = vst [vmem:[#allocation285_spill] sm:$0xff] %v11478_v14 }
 0x20f   : > { %v11469_v31 = vadd.f32 %v2122_v25, %v1716_v62  ;;  %2223 = vmatmul.f32.gmra.mxu3 %v11438_v36  ;;  %16286 = vst [vmem:[#allocation284_spill] sm:$0xff] %v11476_v63  ;;  %v1058_v62 = vsub.f32 %v11466_v16, %v11476_v63  ;;  %v11485_v25 = vsub.f32 %v278_v45, %v11478_v14 }
 0x210   : > { %1799 = vmatmul.f32.gmra.mxu2 %v11428_v46 }
 0x211   : > { %16284 = vst [vmem:[#allocation282_spill] sm:$0xff] %v11469_v31 }
 0x212   : > { %v925_v49 = vpop.f32.mrf.mxu0  ;;  %v1362_v44 = vpop.f32.mrf.mxu1  ;;  %16288 = vst [vmem:[#allocation286_spill] sm:$0xff] %v11485_v25 }
 0x213   : > { %v1363_v15 = vadd.f32 %v1362_v44, %v917_v39  ;;  %v1720_v50 = vpop.f32.mrf.mxu2  ;;  %v2128_v60 = vpop.f32.mrf.mxu3  ;;  %v11492_v44 = vand.u32 4294901760, %v1058_v62  ;;  %v11497_v39 = vand.u32 4294901760, %v280_v23  ;;  %v282_v62 = vld [vmem:[%s10061_s12 + $0x410] sm:$0xff] }
 0x215   : > { %v1721_v5 = vadd.f32 %v1720_v50, %v1363_v15  ;;  %1052 = vmatmul.f32.gmra.mxu0 %v11473_v35  ;;  %1425 = vmatmul.f32.gmra.mxu1 %v11421_v24  ;;  %16290 = vst [vmem:[#allocation288_spill] sm:$0xff] %v11492_v44  ;;  %v11495_v15 = vand.u32 4294901760, %v11485_v25 }
 0x216   : > { %16292 = vst [vmem:[#allocation290_spill] sm:$0xff] %v11497_v39 }
 0x217   : > { %v11488_v46 = vadd.f32 %v2128_v60, %v1721_v5  ;;  %2229 = vmatmul.f32.gmra.mxu3 %v11457_v56  ;;  %16291 = vst [vmem:[#allocation289_spill] sm:$0xff] %v11495_v15  ;;  %v1066_v5 = vsub.f32 %v11485_v25, %v11495_v15  ;;  %v11504_v60 = vsub.f32 %v280_v23, %v11497_v39 }
 0x218   : > { %1804 = vmatmul.f32.gmra.mxu2 %v11447_v11 }
 0x219   : > { %16289 = vst [vmem:[#allocation287_spill] sm:$0xff] %v11488_v46 }
 0x21a   : > { %v933_v50 = vpop.f32.mrf.mxu0  ;;  %v1366_v35 = vpop.f32.mrf.mxu1  ;;  %16293 = vst [vmem:[#allocation291_spill] sm:$0xff] %v11504_v60 }
 0x21b   : > { %v1367_v36 = vadd.f32 %v1366_v35, %v925_v49  ;;  %v1725_v45 = vpop.f32.mrf.mxu2  ;;  %v2134_v24 = vpop.f32.mrf.mxu3  ;;  %v11511_v35 = vand.u32 4294901760, %v1066_v5  ;;  %v11516_v49 = vand.u32 4294901760, %v282_v62  ;;  %v153_v5 = vld [vmem:[%s10061_s12 + $0x8] sm:$0xff] }
 0x21d   : > { %v1726_v31 = vadd.f32 %v1725_v45, %v1367_v36  ;;  %1060 = vmatmul.f32.gmra.mxu0 %v11492_v44  ;;  %1429 = vmatmul.f32.gmra.mxu1 %v11440_v42  ;;  %16295 = vst [vmem:[#allocation293_spill] sm:$0xff] %v11511_v35  ;;  %v11514_v36 = vand.u32 4294901760, %v11504_v60 }
 0x21e   : > { %16297 = vst [vmem:[#allocation295_spill] sm:$0xff] %v11516_v49 }
 0x21f   : > { %v11507_v11 = vadd.f32 %v2134_v24, %v1726_v31  ;;  %2235 = vmatmul.f32.gmra.mxu3 %v11476_v63  ;;  %16296 = vst [vmem:[#allocation294_spill] sm:$0xff] %v11514_v36  ;;  %v1074_v31 = vsub.f32 %v11504_v60, %v11514_v36  ;;  %v11523_v24 = vsub.f32 %v282_v62, %v11516_v49 }
 0x220   : > { %1809 = vmatmul.f32.gmra.mxu2 %v11466_v16 }
 0x221   : > { %16294 = vst [vmem:[#allocation292_spill] sm:$0xff] %v11507_v11 }
 0x222   : > { %v941_v45 = vpop.f32.mrf.mxu0  ;;  %v1370_v44 = vpop.f32.mrf.mxu1  ;;  %16298 = vst [vmem:[#allocation296_spill] sm:$0xff] %v11523_v24 }
 0x223   : > { %v1371_v56 = vadd.f32 %v1370_v44, %v933_v50  ;;  %v1730_v23 = vpop.f32.mrf.mxu2  ;;  %v2140_v42 = vpop.f32.mrf.mxu3  ;;  %v11533_v44 = vand.u32 4294901760, %v11523_v24  ;;  %v330_v50 = vsel %vm328_vm0, %v153_v5, 0 }
 0x224   : > { %v11536_v11 = vand.u32 4294901760, %v330_v50 }
 0x225   : > { %v1731_v46 = vadd.f32 %v1730_v23, %v1371_v56  ;;  %1068 = vmatmul.f32.gmra.mxu0 %v11511_v35  ;;  %1433 = vmatmul.f32.gmra.mxu1 %v11459_v29  ;;  %v11530_v56 = vand.u32 4294901760, %v1074_v31  ;;  %16300 = vst [vmem:[#allocation298_spill] sm:$0xff] %v11533_v44  ;;  %v155_v31 = vld [vmem:[%s10061_s12 + $0x18] sm:$0xff] }
 0x226   : > { %16301 = vst [vmem:[#allocation299_spill] sm:$0xff] %v11536_v11 }
 0x227   : > { %v11526_v16 = vadd.f32 %v2140_v42, %v1731_v46  ;;  %2241 = vmatmul.f32.gmra.mxu3 %v11495_v15  ;;  %16299 = vst [vmem:[#allocation297_spill] sm:$0xff] %v11530_v56  ;;  %v1082_v42 = vsub.f32 %v11523_v24, %v11533_v44 }
 0x228   : > { %1814 = vmatmul.f32.gmra.mxu2 %v11485_v25 }
 0x22a   : > { %v949_v23 = vpop.f32.mrf.mxu0  ;;  %v1374_v35 = vpop.f32.mrf.mxu1 }
 0x22b   : > { %v1375_v62 = vadd.f32 %v1374_v35, %v941_v45  ;;  %v1735_v63 = vpop.f32.mrf.mxu2  ;;  %v2146_v29 = vpop.f32.mrf.mxu3  ;;  %v11548_v35 = vsub.f32 %v330_v50, %v11536_v11  ;;  %v11550_v45 = vand.u32 4294901760, %v1082_v42  ;;  %v157_v50 = vld [vmem:[%s10061_s12 + $0x28] sm:$0xff] }
 0x22d   : > { %v1736_v46 = vadd.f32 %v1735_v63, %v1375_v62  ;;  %1076 = vmatmul.f32.gmra.mxu0 %v11530_v56  ;;  %1437 = vmatmul.f32.gmra.mxu1 %v11478_v14  ;;  %16302 = vst [vmem:[#allocation300_spill] sm:$0xff] %v11548_v35  ;;  %v333_v63 = vsel %vm328_vm0, %v155_v31, 0 }
 0x22e   : > { %16303 = vst [vmem:[#allocation301_spill] sm:$0xff] %v11550_v45 }
 0x22f   : > { %v11543_v25 = vadd.f32 %v2146_v29, %v1736_v46  ;;  %2247 = vmatmul.f32.gmra.mxu3 %v11514_v36  ;;  %v11554_v29 = vand.u32 4294901760, %v11548_v35  ;;  %v11556_v46 = vand.u32 4294901760, %v333_v63 }
 0x230   : > { %1819 = vmatmul.f32.gmra.mxu2 %v11504_v60 }
 0x231   : > { %16304 = vst [vmem:[#allocation302_spill] sm:$0xff] %v11554_v29  ;;  %v11568_v31 = vsub.f32 %v333_v63, %v11556_v46  ;;  %v159_v63 = vld [vmem:[%s10061_s12 + $0x38] sm:$0xff] }
 0x232   : > { %v957_v5 = vpop.f32.mrf.mxu0  ;;  %v1378_v62 = vpop.f32.mrf.mxu1  ;;  %16305 = vst [vmem:[#allocation303_spill] sm:$0xff] %v11556_v46 }
 0x233   : > { %v1379_v56 = vadd.f32 %v1378_v62, %v949_v23  ;;  %v1740_v15 = vpop.f32.mrf.mxu2  ;;  %v2152_v14 = vpop.f32.mrf.mxu3  ;;  %v2908_v23 = vsub.f32 %v11548_v35, %v11554_v29  ;;  %16306 = vst [vmem:[#allocation304_spill] sm:$0xff] %v11568_v31 }
 0x235   : > { %v1741_v36 = vadd.f32 %v1740_v15, %v1379_v56  ;;  %1084 = vmatmul.f32.gmra.mxu0 %v11550_v45  ;;  %1441 = vmatmul.f32.gmra.mxu1 %v11497_v39  ;;  %v336_v15 = vsel %vm328_vm0, %v157_v50, 0 }
 0x237   : > { %v11561_v42 = vadd.f32 %v2152_v14, %v1741_v36  ;;  %2253 = vmatmul.f32.gmra.mxu3 %v11533_v44  ;;  %v11571_v14 = vand.u32 4294901760, %v2908_v23  ;;  %v11574_v36 = vand.u32 4294901760, %v11568_v31  ;;  %v11576_v44 = vand.u32 4294901760, %v336_v15 }
 0x238   : > { %1824 = vmatmul.f32.gmra.mxu2 %v11523_v24 }
 0x239   : > { %16307 = vst [vmem:[#allocation305_spill] sm:$0xff] %v11571_v14  ;;  %v11588_v50 = vsub.f32 %v336_v15, %v11576_v44  ;;  %v161_v15 = vld [vmem:[%s10061_s12 + $0x48] sm:$0xff] }
 0x23a   : > { %v965_v56 = vpop.f32.mrf.mxu0  ;;  %v1382_v62 = vpop.f32.mrf.mxu1  ;;  %16308 = vst [vmem:[#allocation306_spill] sm:$0xff] %v11574_v36 }
 0x23b   : > { %v1383_v45 = vadd.f32 %v1382_v62, %v957_v5  ;;  %v1745_v60 = vpop.f32.mrf.mxu2  ;;  %v2158_v39 = vpop.f32.mrf.mxu3  ;;  %16309 = vst [vmem:[#allocation307_spill] sm:$0xff] %v11576_v44  ;;  %v2916_v5 = vsub.f32 %v11568_v31, %v11574_v36 }
 0x23c   : > { %16310 = vst [vmem:[#allocation308_spill] sm:$0xff] %v11588_v50 }
 0x23d   : > { %v1746_v24 = vadd.f32 %v1745_v60, %v1383_v45  ;;  %1445 = vmatmul.f32.gmra.mxu1 %v11516_v49  ;;  %2322 = vmatmul.f32.vlgmr.msrb.gmra.mxu0 %v10112_v6  ;;  %v339_v60 = vsel %vm328_vm0, %v159_v63, 0 }
 0x23f   : > { %v11581_v29 = vadd.f32 %v2158_v39, %v1746_v24  ;;  %3481 = vmatmul.f32.vlgmr.msrb.gmra.mxu3 %v11536_v11  ;;  %v11591_v39 = vand.u32 4294901760, %v2916_v5  ;;  %v11594_v24 = vand.u32 4294901760, %v11588_v50  ;;  %v11596_v11 = vand.u32 4294901760, %v339_v60 }
 0x240   : > { %2910 = vmatmul.f32.vlgmr.msrb.gmra.mxu2 %v11571_v14 }
 0x241   : > { %16311 = vst [vmem:[#allocation309_spill] sm:$0xff] %v11591_v39  ;;  %v11608_v63 = vsub.f32 %v339_v60, %v11596_v11  ;;  %v163_v60 = vld [vmem:[%s10061_s12 + $0x58] sm:$0xff] }
 0x242   : > { %v973_v45 = vpop.f32.mrf.mxu0  ;;  %v1386_v23 = vpop.f32.mrf.mxu1  ;;  %16312 = vst [vmem:[#allocation310_spill] sm:$0xff] %v11594_v24 }
 0x243   : > { %v1387_v62 = vadd.f32 %v1386_v23, %v965_v56  ;;  %v1750_v35 = vpop.f32.mrf.mxu2  ;;  %v2164_v49 = vpop.f32.mrf.mxu3  ;;  %16313 = vst [vmem:[#allocation311_spill] sm:$0xff] %v11596_v11  ;;  %v2924_v56 = vsub.f32 %v11588_v50, %v11594_v24 }
 0x244   : > { %16314 = vst [vmem:[#allocation312_spill] sm:$0xff] %v11608_v63 }
 0x245   : > { %v1751_v14 = vadd.f32 %v1750_v35, %v1387_v62  ;;  %2326 = vmatmul.f32.gmra.mxu0 %v10152_v47  ;;  %2619 = vmatmul.f32.vlgmr.msrb.gmra.mxu1 %v10112_v6  ;;  %v342_v35 = vsel %vm328_vm0, %v161_v15, 0 }
 0x247   : > { %v11601_v36 = vadd.f32 %v2164_v49, %v1751_v14  ;;  %3485 = vmatmul.f32.gmra.mxu3 %v11556_v46  ;;  %v11611_v49 = vand.u32 4294901760, %v2924_v56  ;;  %v11614_v14 = vand.u32 4294901760, %v11608_v63  ;;  %v11616_v46 = vand.u32 4294901760, %v342_v35 }
 0x248   : > { %2918 = vmatmul.f32.gmra.mxu2 %v11591_v39 }
 0x249   : > { %16315 = vst [vmem:[#allocation313_spill] sm:$0xff] %v11611_v49  ;;  %v11628_v15 = vsub.f32 %v342_v35, %v11616_v46  ;;  %v165_v35 = vld [vmem:[%s10061_s12 + $0x68] sm:$0xff] }
 0x24a   : > { %v981_v5 = vpop.f32.mrf.mxu0  ;;  %v1390_v23 = vpop.f32.mrf.mxu1  ;;  %16316 = vst [vmem:[#allocation314_spill] sm:$0xff] %v11614_v14 }
 0x24b   : > { %v1391_v62 = vadd.f32 %v1390_v23, %v973_v45  ;;  %v1755_v6 = vpop.f32.mrf.mxu2  ;;  %v2170_v31 = vpop.f32.mrf.mxu3  ;;  %16317 = vst [vmem:[#allocation315_spill] sm:$0xff] %v11616_v46  ;;  %v2932_v45 = vsub.f32 %v11608_v63, %v11614_v14 }
 0x24c   : > { %16318 = vst [vmem:[#allocation316_spill] sm:$0xff] %v11628_v15 }
 0x24d   : > { %v1756_v39 = vadd.f32 %v1755_v6, %v1391_v62  ;;  %2330 = vmatmul.f32.gmra.mxu0 %v10203_v18  ;;  %2623 = vmatmul.f32.gmra.mxu1 %v10152_v47  ;;  %v345_v6 = vsel %vm328_vm0, %v163_v60, 0 }
 0x24f   : > { %v11621_v24 = vadd.f32 %v2170_v31, %v1756_v39  ;;  %3489 = vmatmul.f32.gmra.mxu3 %v11576_v44  ;;  %v11631_v31 = vand.u32 4294901760, %v2932_v45  ;;  %v11634_v39 = vand.u32 4294901760, %v11628_v15  ;;  %v11636_v44 = vand.u32 4294901760, %v345_v6 }
 0x250   : > { %2926 = vmatmul.f32.gmra.mxu2 %v11611_v49 }
 0x251   : > { %16319 = vst [vmem:[#allocation317_spill] sm:$0xff] %v11631_v31  ;;  %v11648_v60 = vsub.f32 %v345_v6, %v11636_v44  ;;  %v167_v6 = vld [vmem:[%s10061_s12 + $0x78] sm:$0xff] }
 0x252   : > { %v989_v56 = vpop.f32.mrf.mxu0  ;;  %v1394_v23 = vpop.f32.mrf.mxu1  ;;  %16320 = vst [vmem:[#allocation318_spill] sm:$0xff] %v11634_v39 }
 0x253   : > { %v1395_v62 = vadd.f32 %v1394_v23, %v981_v5  ;;  %v1760_v47 = vpop.f32.mrf.mxu2  ;;  %v2176_v50 = vpop.f32.mrf.mxu3  ;;  %16321 = vst [vmem:[#allocation319_spill] sm:$0xff] %v11636_v44  ;;  %v2940_v5 = vsub.f32 %v11628_v15, %v11634_v39 }
 0x254   : > { %16322 = vst [vmem:[#allocation320_spill] sm:$0xff] %v11648_v60 }
 0x255   : > { %v1761_v49 = vadd.f32 %v1760_v47, %v1395_v62  ;;  %2334 = vmatmul.f32.gmra.mxu0 %v10238_v57  ;;  %2627 = vmatmul.f32.gmra.mxu1 %v10203_v18  ;;  %v348_v47 = vsel %vm328_vm0, %v165_v35, 0 }
 0x257   : > { %v11641_v14 = vadd.f32 %v2176_v50, %v1761_v49  ;;  %3493 = vmatmul.f32.gmra.mxu3 %v11596_v11  ;;  %v11651_v50 = vand.u32 4294901760, %v2940_v5  ;;  %v11654_v49 = vand.u32 4294901760, %v11648_v60  ;;  %v11656_v11 = vand.u32 4294901760, %v348_v47 }
 0x258   : > { %2934 = vmatmul.f32.gmra.mxu2 %v11631_v31 }
 0x259   : > { %16323 = vst [vmem:[#allocation321_spill] sm:$0xff] %v11651_v50  ;;  %v11668_v35 = vsub.f32 %v348_v47, %v11656_v11  ;;  %v169_v47 = vld [vmem:[%s10061_s12 + $0x88] sm:$0xff] }
 0x25a   : > { %v997_v45 = vpop.f32.mrf.mxu0  ;;  %v1398_v23 = vpop.f32.mrf.mxu1  ;;  %16324 = vst [vmem:[#allocation322_spill] sm:$0xff] %v11654_v49 }
 0x25b   : > { %v1399_v62 = vadd.f32 %v1398_v23, %v989_v56  ;;  %v1765_v18 = vpop.f32.mrf.mxu2  ;;  %v2182_v63 = vpop.f32.mrf.mxu3  ;;  %16325 = vst [vmem:[#allocation323_spill] sm:$0xff] %v11656_v11  ;;  %v2948_v56 = vsub.f32 %v11648_v60, %v11654_v49 }
 0x25c   : > { %16326 = vst [vmem:[#allocation324_spill] sm:$0xff] %v11668_v35 }
 0x25d   : > { %v1766_v31 = vadd.f32 %v1765_v18, %v1399_v62  ;;  %2338 = vmatmul.f32.gmra.mxu0 %v10261_v13  ;;  %2631 = vmatmul.f32.gmra.mxu1 %v10238_v57  ;;  %v351_v18 = vsel %vm328_vm0, %v167_v6, 0 }
 0x25f   : > { %v11661_v39 = vadd.f32 %v2182_v63, %v1766_v31  ;;  %3497 = vmatmul.f32.gmra.mxu3 %v11616_v46  ;;  %v11671_v63 = vand.u32 4294901760, %v2948_v56  ;;  %v11674_v31 = vand.u32 4294901760, %v11668_v35  ;;  %v11676_v46 = vand.u32 4294901760, %v351_v18 }
 0x260   : > { %2942 = vmatmul.f32.gmra.mxu2 %v11651_v50 }
 0x261   : > { %16327 = vst [vmem:[#allocation325_spill] sm:$0xff] %v11671_v63  ;;  %v11688_v6 = vsub.f32 %v351_v18, %v11676_v46  ;;  %v171_v18 = vld [vmem:[%s10061_s12 + $0x98] sm:$0xff] }
 0x262   : > { %v1005_v5 = vpop.f32.mrf.mxu0  ;;  %v1402_v23 = vpop.f32.mrf.mxu1  ;;  %16328 = vst [vmem:[#allocation326_spill] sm:$0xff] %v11674_v31 }
 0x263   : > { %v1403_v62 = vadd.f32 %v1402_v23, %v997_v45  ;;  %v1770_v57 = vpop.f32.mrf.mxu2  ;;  %v2188_v15 = vpop.f32.mrf.mxu3  ;;  %16329 = vst [vmem:[#allocation327_spill] sm:$0xff] %v11676_v46  ;;  %v2956_v45 = vsub.f32 %v11668_v35, %v11674_v31 }
 0x264   : > { %16330 = vst [vmem:[#allocation328_spill] sm:$0xff] %v11688_v6 }
 0x265   : > { %v1771_v50 = vadd.f32 %v1770_v57, %v1403_v62  ;;  %2342 = vmatmul.f32.gmra.mxu0 %v10288_v19  ;;  %2635 = vmatmul.f32.gmra.mxu1 %v10261_v13  ;;  %v354_v57 = vsel %vm328_vm0, %v169_v47, 0 }
 0x267   : > { %v11681_v49 = vadd.f32 %v2188_v15, %v1771_v50  ;;  %3501 = vmatmul.f32.gmra.mxu3 %v11636_v44  ;;  %v11691_v15 = vand.u32 4294901760, %v2956_v45  ;;  %v11694_v50 = vand.u32 4294901760, %v11688_v6  ;;  %v11696_v44 = vand.u32 4294901760, %v354_v57 }
 0x268   : > { %2950 = vmatmul.f32.gmra.mxu2 %v11671_v63 }
 0x269   : > { %16331 = vst [vmem:[#allocation329_spill] sm:$0xff] %v11691_v15  ;;  %v11708_v47 = vsub.f32 %v354_v57, %v11696_v44  ;;  %v173_v57 = vld [vmem:[%s10061_s12 + $0xa8] sm:$0xff] }
 0x26a   : > { %v1013_v56 = vpop.f32.mrf.mxu0  ;;  %v1406_v23 = vpop.f32.mrf.mxu1  ;;  %16332 = vst [vmem:[#allocation330_spill] sm:$0xff] %v11694_v50 }
 0x26b   : > { %v1407_v62 = vadd.f32 %v1406_v23, %v1005_v5  ;;  %v1775_v13 = vpop.f32.mrf.mxu2  ;;  %v2194_v60 = vpop.f32.mrf.mxu3  ;;  %16333 = vst [vmem:[#allocation331_spill] sm:$0xff] %v11696_v44  ;;  %v2964_v5 = vsub.f32 %v11688_v6, %v11694_v50 }
 0x26c   : > { %16334 = vst [vmem:[#allocation332_spill] sm:$0xff] %v11708_v47 }
 0x26d   : > { %v1776_v63 = vadd.f32 %v1775_v13, %v1407_v62  ;;  %2346 = vmatmul.f32.gmra.mxu0 %v10316_v22  ;;  %2639 = vmatmul.f32.gmra.mxu1 %v10288_v19  ;;  %v357_v13 = vsel %vm328_vm0, %v171_v18, 0 }
 0x26f   : > { %v11701_v31 = vadd.f32 %v2194_v60, %v1776_v63  ;;  %3505 = vmatmul.f32.gmra.mxu3 %v11656_v11  ;;  %v11711_v60 = vand.u32 4294901760, %v2964_v5  ;;  %v11714_v63 = vand.u32 4294901760, %v11708_v47  ;;  %v11716_v11 = vand.u32 4294901760, %v357_v13 }
 0x270   : > { %2958 = vmatmul.f32.gmra.mxu2 %v11691_v15 }
 0x271   : > { %16335 = vst [vmem:[#allocation333_spill] sm:$0xff] %v11711_v60  ;;  %v11728_v18 = vsub.f32 %v357_v13, %v11716_v11  ;;  %v175_v13 = vld [vmem:[%s10061_s12 + $0xb8] sm:$0xff] }
 0x272   : > { %v1021_v45 = vpop.f32.mrf.mxu0  ;;  %v1410_v23 = vpop.f32.mrf.mxu1  ;;  %16336 = vst [vmem:[#allocation334_spill] sm:$0xff] %v11714_v63 }
 0x273   : > { %v1411_v62 = vadd.f32 %v1410_v23, %v1013_v56  ;;  %v1780_v19 = vpop.f32.mrf.mxu2  ;;  %v2200_v35 = vpop.f32.mrf.mxu3  ;;  %16337 = vst [vmem:[#allocation335_spill] sm:$0xff] %v11716_v11  ;;  %v2972_v56 = vsub.f32 %v11708_v47, %v11714_v63 }
 0x274   : > { %16338 = vst [vmem:[#allocation336_spill] sm:$0xff] %v11728_v18 }
 0x275   : > { %v1781_v15 = vadd.f32 %v1780_v19, %v1411_v62  ;;  %2350 = vmatmul.f32.gmra.mxu0 %v10343_v41  ;;  %2643 = vmatmul.f32.gmra.mxu1 %v10316_v22  ;;  %v360_v19 = vsel %vm328_vm0, %v173_v57, 0 }
 0x277   : > { %v11721_v50 = vadd.f32 %v2200_v35, %v1781_v15  ;;  %3509 = vmatmul.f32.gmra.mxu3 %v11676_v46  ;;  %v11731_v35 = vand.u32 4294901760, %v2972_v56  ;;  %v11734_v15 = vand.u32 4294901760, %v11728_v18  ;;  %v11736_v46 = vand.u32 4294901760, %v360_v19 }
 0x278   : > { %2966 = vmatmul.f32.gmra.mxu2 %v11711_v60 }
 0x279   : > { %16339 = vst [vmem:[#allocation337_spill] sm:$0xff] %v11731_v35  ;;  %v11748_v57 = vsub.f32 %v360_v19, %v11736_v46  ;;  %v177_v19 = vld [vmem:[%s10061_s12 + $0xc8] sm:$0xff] }
 0x27a   : > { %v1029_v5 = vpop.f32.mrf.mxu0  ;;  %v1414_v23 = vpop.f32.mrf.mxu1  ;;  %16340 = vst [vmem:[#allocation338_spill] sm:$0xff] %v11734_v15 }
 0x27b   : > { %v1415_v62 = vadd.f32 %v1414_v23, %v1021_v45  ;;  %v1785_v22 = vpop.f32.mrf.mxu2  ;;  %v2206_v6 = vpop.f32.mrf.mxu3  ;;  %16341 = vst [vmem:[#allocation339_spill] sm:$0xff] %v11736_v46  ;;  %v2980_v45 = vsub.f32 %v11728_v18, %v11734_v15 }
 0x27c   : > { %16342 = vst [vmem:[#allocation340_spill] sm:$0xff] %v11748_v57 }
 0x27d   : > { %v1786_v60 = vadd.f32 %v1785_v22, %v1415_v62  ;;  %2354 = vmatmul.f32.gmra.mxu0 %v10371_v0  ;;  %2647 = vmatmul.f32.gmra.mxu1 %v10343_v41  ;;  %v363_v22 = vsel %vm328_vm0, %v175_v13, 0 }
 0x27f   : > { %v11741_v63 = vadd.f32 %v2206_v6, %v1786_v60  ;;  %3513 = vmatmul.f32.gmra.mxu3 %v11696_v44  ;;  %v11751_v6 = vand.u32 4294901760, %v2980_v45  ;;  %v11754_v60 = vand.u32 4294901760, %v11748_v57  ;;  %v11756_v44 = vand.u32 4294901760, %v363_v22 }
 0x280   : > { %2974 = vmatmul.f32.gmra.mxu2 %v11731_v35 }
 0x281   : > { %16343 = vst [vmem:[#allocation341_spill] sm:$0xff] %v11751_v6  ;;  %v11768_v13 = vsub.f32 %v363_v22, %v11756_v44  ;;  %v179_v22 = vld [vmem:[%s10061_s12 + $0xd8] sm:$0xff] }
 0x282   : > { %v1037_v56 = vpop.f32.mrf.mxu0  ;;  %v1418_v23 = vpop.f32.mrf.mxu1  ;;  %16344 = vst [vmem:[#allocation342_spill] sm:$0xff] %v11754_v60 }
 0x283   : > { %v1419_v62 = vadd.f32 %v1418_v23, %v1029_v5  ;;  %v1790_v41 = vpop.f32.mrf.mxu2  ;;  %v2212_v47 = vpop.f32.mrf.mxu3  ;;  %16345 = vst [vmem:[#allocation343_spill] sm:$0xff] %v11756_v44  ;;  %v2988_v5 = vsub.f32 %v11748_v57, %v11754_v60 }
 0x284   : > { %16346 = vst [vmem:[#allocation344_spill] sm:$0xff] %v11768_v13 }
 0x285   : > { %v1791_v35 = vadd.f32 %v1790_v41, %v1419_v62  ;;  %2358 = vmatmul.f32.gmra.mxu0 %v10388_v43  ;;  %2651 = vmatmul.f32.gmra.mxu1 %v10371_v0  ;;  %v366_v41 = vsel %vm328_vm0, %v177_v19, 0 }
 0x287   : > { %v11761_v15 = vadd.f32 %v2212_v47, %v1791_v35  ;;  %3517 = vmatmul.f32.gmra.mxu3 %v11716_v11  ;;  %v11771_v47 = vand.u32 4294901760, %v2988_v5  ;;  %v11774_v35 = vand.u32 4294901760, %v11768_v13  ;;  %v11776_v11 = vand.u32 4294901760, %v366_v41 }
 0x288   : > { %2982 = vmatmul.f32.gmra.mxu2 %v11751_v6 }
 0x289   : > { %16347 = vst [vmem:[#allocation345_spill] sm:$0xff] %v11771_v47  ;;  %v11788_v19 = vsub.f32 %v366_v41, %v11776_v11  ;;  %v181_v41 = vld [vmem:[%s10061_s12 + $0xe8] sm:$0xff] }
 0x28a   : > { %v1045_v45 = vpop.f32.mrf.mxu0  ;;  %v1422_v23 = vpop.f32.mrf.mxu1  ;;  %16348 = vst [vmem:[#allocation346_spill] sm:$0xff] %v11774_v35 }
 0x28b   : > { %v1423_v62 = vadd.f32 %v1422_v23, %v1037_v56  ;;  %v1795_v0 = vpop.f32.mrf.mxu2  ;;  %v2218_v18 = vpop.f32.mrf.mxu3  ;;  %16349 = vst [vmem:[#allocation347_spill] sm:$0xff] %v11776_v11  ;;  %v2996_v56 = vsub.f32 %v11768_v13, %v11774_v35 }
 0x28c   : > { %16350 = vst [vmem:[#allocation348_spill] sm:$0xff] %v11788_v19 }
 0x28d   : > { %v1796_v6 = vadd.f32 %v1795_v0, %v1423_v62  ;;  %2362 = vmatmul.f32.gmra.mxu0 %v10408_v32  ;;  %2655 = vmatmul.f32.gmra.mxu1 %v10388_v43  ;;  %v369_v0 = vsel %vm328_vm0, %v179_v22, 0 }
 0x28f   : > { %v11781_v60 = vadd.f32 %v2218_v18, %v1796_v6  ;;  %3521 = vmatmul.f32.gmra.mxu3 %v11736_v46  ;;  %v11791_v18 = vand.u32 4294901760, %v2996_v56  ;;  %v11794_v6 = vand.u32 4294901760, %v11788_v19  ;;  %v11796_v46 = vand.u32 4294901760, %v369_v0 }
 0x290   : > { %2990 = vmatmul.f32.gmra.mxu2 %v11771_v47 }
 0x291   : > { %16351 = vst [vmem:[#allocation349_spill] sm:$0xff] %v11791_v18  ;;  %v11808_v22 = vsub.f32 %v369_v0, %v11796_v46  ;;  %v183_v0 = vld [vmem:[%s10061_s12 + $0xf8] sm:$0xff] }
 0x292   : > { %v1053_v5 = vpop.f32.mrf.mxu0  ;;  %v1426_v23 = vpop.f32.mrf.mxu1  ;;  %16352 = vst [vmem:[#allocation350_spill] sm:$0xff] %v11794_v6 }
 0x293   : > { %v1427_v62 = vadd.f32 %v1426_v23, %v1045_v45  ;;  %v1800_v43 = vpop.f32.mrf.mxu2  ;;  %v2224_v57 = vpop.f32.mrf.mxu3  ;;  %16353 = vst [vmem:[#allocation351_spill] sm:$0xff] %v11796_v46  ;;  %v3004_v45 = vsub.f32 %v11788_v19, %v11794_v6 }
 0x294   : > { %16354 = vst [vmem:[#allocation352_spill] sm:$0xff] %v11808_v22 }
 0x295   : > { %v1801_v47 = vadd.f32 %v1800_v43, %v1427_v62  ;;  %2366 = vmatmul.f32.gmra.mxu0 %v10437_v27  ;;  %2659 = vmatmul.f32.gmra.mxu1 %v10408_v32  ;;  %v372_v43 = vsel %vm328_vm0, %v181_v41, 0 }
 0x297   : > { %v11801_v35 = vadd.f32 %v2224_v57, %v1801_v47  ;;  %3525 = vmatmul.f32.gmra.mxu3 %v11756_v44  ;;  %v11811_v57 = vand.u32 4294901760, %v3004_v45  ;;  %v11814_v47 = vand.u32 4294901760, %v11808_v22  ;;  %v11816_v44 = vand.u32 4294901760, %v372_v43 }
 0x298   : > { %2998 = vmatmul.f32.gmra.mxu2 %v11791_v18 }
 0x299   : > { %16355 = vst [vmem:[#allocation353_spill] sm:$0xff] %v11811_v57  ;;  %v11828_v41 = vsub.f32 %v372_v43, %v11816_v44  ;;  %v185_v43 = vld [vmem:[%s10061_s12 + $0x108] sm:$0xff] }
 0x29a   : > { %v1061_v56 = vpop.f32.mrf.mxu0  ;;  %v1430_v23 = vpop.f32.mrf.mxu1  ;;  %16356 = vst [vmem:[#allocation354_spill] sm:$0xff] %v11814_v47 }
 0x29b   : > { %v1431_v62 = vadd.f32 %v1430_v23, %v1053_v5  ;;  %v1805_v32 = vpop.f32.mrf.mxu2  ;;  %v2230_v13 = vpop.f32.mrf.mxu3  ;;  %16357 = vst [vmem:[#allocation355_spill] sm:$0xff] %v11816_v44  ;;  %v3012_v5 = vsub.f32 %v11808_v22, %v11814_v47 }
 0x29c   : > { %16358 = vst [vmem:[#allocation356_spill] sm:$0xff] %v11828_v41 }
 0x29d   : > { %v1806_v18 = vadd.f32 %v1805_v32, %v1431_v62  ;;  %2370 = vmatmul.f32.gmra.mxu0 %v10454_v54  ;;  %2663 = vmatmul.f32.gmra.mxu1 %v10437_v27  ;;  %v375_v32 = vsel %vm328_vm0, %v183_v0, 0 }
 0x29f   : > { %v11821_v6 = vadd.f32 %v2230_v13, %v1806_v18  ;;  %3529 = vmatmul.f32.gmra.mxu3 %v11776_v11  ;;  %v11831_v13 = vand.u32 4294901760, %v3012_v5  ;;  %v11834_v18 = vand.u32 4294901760, %v11828_v41  ;;  %v11836_v11 = vand.u32 4294901760, %v375_v32 }
 0x2a0   : > { %3006 = vmatmul.f32.gmra.mxu2 %v11811_v57 }
 0x2a1   : > { %16359 = vst [vmem:[#allocation357_spill] sm:$0xff] %v11831_v13  ;;  %v11848_v0 = vsub.f32 %v375_v32, %v11836_v11  ;;  %v187_v32 = vld [vmem:[%s10061_s12 + $0x118] sm:$0xff] }
 0x2a2   : > { %v1069_v45 = vpop.f32.mrf.mxu0  ;;  %v1434_v23 = vpop.f32.mrf.mxu1  ;;  %16360 = vst [vmem:[#allocation358_spill] sm:$0xff] %v11834_v18 }
 0x2a3   : > { %v1435_v62 = vadd.f32 %v1434_v23, %v1061_v56  ;;  %v1810_v27 = vpop.f32.mrf.mxu2  ;;  %v2236_v19 = vpop.f32.mrf.mxu3  ;;  %16361 = vst [vmem:[#allocation359_spill] sm:$0xff] %v11836_v11  ;;  %v3020_v56 = vsub.f32 %v11828_v41, %v11834_v18 }
 0x2a4   : > { %16362 = vst [vmem:[#allocation360_spill] sm:$0xff] %v11848_v0 }
 0x2a5   : > { %v1811_v57 = vadd.f32 %v1810_v27, %v1435_v62  ;;  %2374 = vmatmul.f32.gmra.mxu0 %v10471_v61  ;;  %2667 = vmatmul.f32.gmra.mxu1 %v10454_v54  ;;  %v378_v27 = vsel %vm328_vm0, %v185_v43, 0 }
 0x2a7   : > { %v11841_v47 = vadd.f32 %v2236_v19, %v1811_v57  ;;  %3533 = vmatmul.f32.gmra.mxu3 %v11796_v46  ;;  %v11851_v19 = vand.u32 4294901760, %v3020_v56  ;;  %v11854_v57 = vand.u32 4294901760, %v11848_v0  ;;  %v11856_v46 = vand.u32 4294901760, %v378_v27 }
 0x2a8   : > { %3014 = vmatmul.f32.gmra.mxu2 %v11831_v13 }
 0x2a9   : > { %16363 = vst [vmem:[#allocation361_spill] sm:$0xff] %v11851_v19  ;;  %v11868_v43 = vsub.f32 %v378_v27, %v11856_v46  ;;  %v189_v27 = vld [vmem:[%s10061_s12 + $0x128] sm:$0xff] }
 0x2aa   : > { %v1077_v5 = vpop.f32.mrf.mxu0  ;;  %v1438_v23 = vpop.f32.mrf.mxu1  ;;  %16364 = vst [vmem:[#allocation362_spill] sm:$0xff] %v11854_v57 }
 0x2ab   : > { %v1439_v62 = vadd.f32 %v1438_v23, %v1069_v45  ;;  %v1815_v54 = vpop.f32.mrf.mxu2  ;;  %v2242_v22 = vpop.f32.mrf.mxu3  ;;  %16365 = vst [vmem:[#allocation363_spill] sm:$0xff] %v11856_v46  ;;  %v3028_v45 = vsub.f32 %v11848_v0, %v11854_v57 }
 0x2ac   : > { %16366 = vst [vmem:[#allocation364_spill] sm:$0xff] %v11868_v43 }
 0x2ad   : > { %v1816_v13 = vadd.f32 %v1815_v54, %v1439_v62  ;;  %2378 = vmatmul.f32.gmra.mxu0 %v10488_v1  ;;  %2671 = vmatmul.f32.gmra.mxu1 %v10471_v61  ;;  %v381_v54 = vsel %vm328_vm0, %v187_v32, 0 }
 0x2af   : > { %v11861_v18 = vadd.f32 %v2242_v22, %v1816_v13  ;;  %3537 = vmatmul.f32.gmra.mxu3 %v11816_v44  ;;  %v11871_v22 = vand.u32 4294901760, %v3028_v45  ;;  %v11874_v13 = vand.u32 4294901760, %v11868_v43  ;;  %v11876_v44 = vand.u32 4294901760, %v381_v54 }
 0x2b0   : > { %3022 = vmatmul.f32.gmra.mxu2 %v11851_v19 }
 0x2b1   : > { %16367 = vst [vmem:[#allocation365_spill] sm:$0xff] %v11871_v22  ;;  %v11888_v32 = vsub.f32 %v381_v54, %v11876_v44  ;;  %v191_v54 = vld [vmem:[%s10061_s12 + $0x138] sm:$0xff] }
 0x2b2   : > { %v1085_v56 = vpop.f32.mrf.mxu0  ;;  %v1442_v23 = vpop.f32.mrf.mxu1  ;;  %16368 = vst [vmem:[#allocation366_spill] sm:$0xff] %v11874_v13 }
 0x2b3   : > { %v1443_v62 = vadd.f32 %v1442_v23, %v1077_v5  ;;  %v1820_v61 = vpop.f32.mrf.mxu2  ;;  %v2248_v41 = vpop.f32.mrf.mxu3  ;;  %16369 = vst [vmem:[#allocation367_spill] sm:$0xff] %v11876_v44  ;;  %v3036_v5 = vsub.f32 %v11868_v43, %v11874_v13 }
 0x2b4   : > { %16370 = vst [vmem:[#allocation368_spill] sm:$0xff] %v11888_v32 }
 0x2b5   : > { %v1821_v19 = vadd.f32 %v1820_v61, %v1443_v62  ;;  %2382 = vmatmul.f32.gmra.mxu0 %v10505_v34  ;;  %2675 = vmatmul.f32.gmra.mxu1 %v10488_v1  ;;  %v384_v61 = vsel %vm328_vm0, %v189_v27, 0 }
 0x2b7   : > { %v11881_v57 = vadd.f32 %v2248_v41, %v1821_v19  ;;  %3541 = vmatmul.f32.gmra.mxu3 %v11836_v11  ;;  %v11891_v41 = vand.u32 4294901760, %v3036_v5  ;;  %v11894_v19 = vand.u32 4294901760, %v11888_v32  ;;  %v11896_v11 = vand.u32 4294901760, %v384_v61 }
 0x2b8   : > { %3030 = vmatmul.f32.gmra.mxu2 %v11871_v22  ;;  %v387_v5 = vsel %vm328_vm0, %v191_v54, 0 }
 0x2b9   : > { %16371 = vst [vmem:[#allocation369_spill] sm:$0xff] %v11891_v41  ;;  %v11908_v27 = vsub.f32 %v384_v61, %v11896_v11 }
 0x2ba   : > { %v1446_v45 = vpop.f32.mrf.mxu1  ;;  %v2323_v23 = vpop.f32.mrf.mxu0  ;;  %16372 = vst [vmem:[#allocation370_spill] sm:$0xff] %v11894_v19 }
 0x2bb   : > { %v1447_v62 = vadd.f32 %v1446_v45, %v1085_v56  ;;  %v1825_v1 = vpop.f32.mrf.mxu2  ;;  %v2254_v0 = vpop.f32.mrf.mxu3  ;;  %16373 = vst [vmem:[#allocation371_spill] sm:$0xff] %v11896_v11  ;;  %v3044_v56 = vsub.f32 %v11888_v32, %v11894_v19 }
 0x2bc   : > { %16374 = vst [vmem:[#allocation372_spill] sm:$0xff] %v11908_v27 }
 0x2bd   : > { %v1826_v22 = vadd.f32 %v1825_v1, %v1447_v62  ;;  %2386 = vmatmul.f32.gmra.mxu0 %v10522_v10  ;;  %2679 = vmatmul.f32.gmra.mxu1 %v10505_v34  ;;  %v2324_v1 = vadd.f32 %v2323_v23, %v10583_v51  ;;  %v11912_v43 = vand.u32 4294901760, %v3044_v56  ;;  %v193_v51 = vld [vmem:[%s10061_s12 + $0x148] sm:$0xff] }
 0x2be   : > { %v390_v56 = vsel %vm328_vm0, %v193_v51, 0 }
 0x2bf   : > { %v11901_v13 = vadd.f32 %v2254_v0, %v1826_v22  ;;  %3545 = vmatmul.f32.gmra.mxu3 %v11856_v46  ;;  %16375 = vst [vmem:[#allocation373_spill] sm:$0xff] %v11912_v43  ;;  %v11917_v46 = vand.u32 4294901760, %v387_v5 }
 0x2c0   : > { %3038 = vmatmul.f32.gmra.mxu2 %v11891_v41  ;;  %v11915_v41 = vand.u32 4294901760, %v11908_v27 }
 0x2c1   : > { %16377 = vst [vmem:[#allocation375_spill] sm:$0xff] %v11917_v46  ;;  %v11929_v54 = vsub.f32 %v387_v5, %v11917_v46 }
 0x2c2   : > { %v2327_v45 = vpop.f32.mrf.mxu0  ;;  %v2620_v62 = vpop.f32.mrf.mxu1  ;;  %16376 = vst [vmem:[#allocation374_spill] sm:$0xff] %v11915_v41  ;;  %v3052_v23 = vsub.f32 %v11908_v27, %v11915_v41 }
 0x2c3   : > { %v2621_v34 = vadd.f32 %v2620_v62, %v2324_v1  ;;  %v2911_v0 = vpop.f32.mrf.mxu2  ;;  %v3482_v22 = vpop.f32.mrf.mxu3  ;;  %16378 = vst [vmem:[#allocation376_spill] sm:$0xff] %v11929_v54 }
 0x2c5   : > { %v2912_v19 = vadd.f32 %v2911_v0, %v2621_v34  ;;  %2390 = vmatmul.f32.gmra.mxu0 %v10539_v26  ;;  %2683 = vmatmul.f32.gmra.mxu1 %v10522_v10  ;;  %v2328_v34 = vadd.f32 %v2327_v45, %v10602_v53  ;;  %v11933_v10 = vand.u32 4294901760, %v3052_v23  ;;  %v195_v53 = vld [vmem:[%s10061_s12 + $0x158] sm:$0xff] }
 0x2c7   : > { %v11922_v61 = vadd.f32 %v3482_v22, %v2912_v19  ;;  %3549 = vmatmul.f32.gmra.mxu3 %v11876_v44  ;;  %16379 = vst [vmem:[#allocation377_spill] sm:$0xff] %v11933_v10  ;;  %v11938_v44 = vand.u32 4294901760, %v390_v56 }
 0x2c8   : > { %3046 = vmatmul.f32.gmra.mxu2 %v11912_v43  ;;  %v11936_v43 = vand.u32 4294901760, %v11929_v54 }
 0x2c9   : > { %16381 = vst [vmem:[#allocation379_spill] sm:$0xff] %v11938_v44  ;;  %v11950_v51 = vsub.f32 %v390_v56, %v11938_v44 }
 0x2ca   : > { %v2331_v1 = vpop.f32.mrf.mxu0  ;;  %v2624_v62 = vpop.f32.mrf.mxu1  ;;  %16380 = vst [vmem:[#allocation378_spill] sm:$0xff] %v11936_v43  ;;  %v3060_v45 = vsub.f32 %v11929_v54, %v11936_v43 }
 0x2cb   : > { %v2625_v0 = vadd.f32 %v2624_v62, %v2328_v34  ;;  %v2919_v19 = vpop.f32.mrf.mxu2  ;;  %v3486_v22 = vpop.f32.mrf.mxu3  ;;  %16382 = vst [vmem:[#allocation380_spill] sm:$0xff] %v11950_v51  ;;  %v2332_v23 = vadd.f32 %v2331_v1, %v10633_v59  ;;  %v393_v34 = vsel %vm328_vm0, %v195_v53, 0  ;;  %v197_v59 = vld [vmem:[%s10061_s12 + $0x168] sm:$0xff] }
 0x2cd   : > { %v2920_v41 = vadd.f32 %v2919_v19, %v2625_v0  ;;  %2394 = vmatmul.f32.gmra.mxu0 %v10556_v48  ;;  %2687 = vmatmul.f32.gmra.mxu1 %v10539_v26  ;;  %v11954_v26 = vand.u32 4294901760, %v3060_v45 }
 0x2cf   : > { %v11943_v5 = vadd.f32 %v3486_v22, %v2920_v41  ;;  %3553 = vmatmul.f32.gmra.mxu3 %v11896_v11  ;;  %16383 = vst [vmem:[#allocation381_spill] sm:$0xff] %v11954_v26  ;;  %v11959_v11 = vand.u32 4294901760, %v393_v34 }
 0x2d0   : > { %3054 = vmatmul.f32.gmra.mxu2 %v11933_v10  ;;  %v11957_v10 = vand.u32 4294901760, %v11950_v51 }
 0x2d1   : > { %16385 = vst [vmem:[#allocation383_spill] sm:$0xff] %v11959_v11  ;;  %v11971_v53 = vsub.f32 %v393_v34, %v11959_v11 }
 0x2d2   : > { %v2335_v62 = vpop.f32.mrf.mxu0  ;;  %v2628_v0 = vpop.f32.mrf.mxu1  ;;  %16384 = vst [vmem:[#allocation382_spill] sm:$0xff] %v11957_v10  ;;  %v3068_v1 = vsub.f32 %v11950_v51, %v11957_v10 }
 0x2d3   : > { %v2629_v19 = vadd.f32 %v2628_v0, %v2332_v23  ;;  %v2927_v41 = vpop.f32.mrf.mxu2  ;;  %v3490_v22 = vpop.f32.mrf.mxu3  ;;  %16386 = vst [vmem:[#allocation384_spill] sm:$0xff] %v11971_v53  ;;  %v2336_v45 = vadd.f32 %v2335_v62, %v10655_v9  ;;  %v396_v23 = vsel %vm328_vm0, %v197_v59, 0  ;;  %v199_v9 = vld [vmem:[%s10061_s12 + $0x178] sm:$0xff] }
 0x2d5   : > { %v2928_v43 = vadd.f32 %v2927_v41, %v2629_v19  ;;  %2398 = vmatmul.f32.gmra.mxu0 %v10573_v52  ;;  %2691 = vmatmul.f32.gmra.mxu1 %v10556_v48  ;;  %v11975_v48 = vand.u32 4294901760, %v3068_v1 }
 0x2d7   : > { %v11964_v56 = vadd.f32 %v3490_v22, %v2928_v43  ;;  %3557 = vmatmul.f32.gmra.mxu3 %v11917_v46  ;;  %16387 = vst [vmem:[#allocation385_spill] sm:$0xff] %v11975_v48  ;;  %v11980_v46 = vand.u32 4294901760, %v396_v23 }
 0x2d8   : > { %3062 = vmatmul.f32.gmra.mxu2 %v11954_v26  ;;  %v11978_v26 = vand.u32 4294901760, %v11971_v53 }
 0x2d9   : > { %16389 = vst [vmem:[#allocation387_spill] sm:$0xff] %v11980_v46  ;;  %v11992_v59 = vsub.f32 %v396_v23, %v11980_v46 }
 0x2da   : > { %v2339_v0 = vpop.f32.mrf.mxu0  ;;  %v2632_v19 = vpop.f32.mrf.mxu1  ;;  %16388 = vst [vmem:[#allocation386_spill] sm:$0xff] %v11978_v26  ;;  %v3076_v62 = vsub.f32 %v11971_v53, %v11978_v26 }
 0x2db   : > { %v2633_v41 = vadd.f32 %v2632_v19, %v2336_v45  ;;  %v2935_v43 = vpop.f32.mrf.mxu2  ;;  %v3494_v22 = vpop.f32.mrf.mxu3  ;;  %16390 = vst [vmem:[#allocation388_spill] sm:$0xff] %v11992_v59  ;;  %v2340_v1 = vadd.f32 %v2339_v0, %v10674_v3  ;;  %v399_v45 = vsel %vm328_vm0, %v199_v9, 0  ;;  %v201_v3 = vld [vmem:[%s10061_s12 + $0x188] sm:$0xff] }
 0x2dd   : > { %v2936_v10 = vadd.f32 %v2935_v43, %v2633_v41  ;;  %2402 = vmatmul.f32.gmra.mxu0 %v10592_v38  ;;  %2695 = vmatmul.f32.gmra.mxu1 %v10573_v52  ;;  %v11996_v52 = vand.u32 4294901760, %v3076_v62 }
 0x2df   : > { %v11985_v34 = vadd.f32 %v3494_v22, %v2936_v10  ;;  %3561 = vmatmul.f32.gmra.mxu3 %v11938_v44  ;;  %16391 = vst [vmem:[#allocation389_spill] sm:$0xff] %v11996_v52  ;;  %v12001_v44 = vand.u32 4294901760, %v399_v45 }
 0x2e0   : > { %3070 = vmatmul.f32.gmra.mxu2 %v11975_v48  ;;  %v11999_v48 = vand.u32 4294901760, %v11992_v59 }
 0x2e1   : > { %16393 = vst [vmem:[#allocation391_spill] sm:$0xff] %v12001_v44  ;;  %v12013_v9 = vsub.f32 %v399_v45, %v12001_v44 }
 0x2e2   : > { %v2343_v19 = vpop.f32.mrf.mxu0  ;;  %v2636_v41 = vpop.f32.mrf.mxu1  ;;  %16392 = vst [vmem:[#allocation390_spill] sm:$0xff] %v11999_v48  ;;  %v3084_v0 = vsub.f32 %v11992_v59, %v11999_v48 }
 0x2e3   : > { %v2637_v43 = vadd.f32 %v2636_v41, %v2340_v1  ;;  %v2943_v10 = vpop.f32.mrf.mxu2  ;;  %v3498_v22 = vpop.f32.mrf.mxu3  ;;  %16394 = vst [vmem:[#allocation392_spill] sm:$0xff] %v12013_v9  ;;  %v2344_v62 = vadd.f32 %v2343_v19, %v10693_v58  ;;  %v402_v1 = vsel %vm328_vm0, %v201_v3, 0  ;;  %v203_v58 = vld [vmem:[%s10061_s12 + $0x198] sm:$0xff] }
 0x2e5   : > { %v2944_v26 = vadd.f32 %v2943_v10, %v2637_v43  ;;  %2406 = vmatmul.f32.gmra.mxu0 %v10614_v12  ;;  %2699 = vmatmul.f32.gmra.mxu1 %v10592_v38  ;;  %v12017_v38 = vand.u32 4294901760, %v3084_v0 }
 0x2e7   : > { %v12006_v23 = vadd.f32 %v3498_v22, %v2944_v26  ;;  %3565 = vmatmul.f32.gmra.mxu3 %v11959_v11  ;;  %16395 = vst [vmem:[#allocation393_spill] sm:$0xff] %v12017_v38  ;;  %v12022_v11 = vand.u32 4294901760, %v402_v1 }
 0x2e8   : > { %3078 = vmatmul.f32.gmra.mxu2 %v11996_v52  ;;  %v12020_v52 = vand.u32 4294901760, %v12013_v9 }
 0x2e9   : > { %16397 = vst [vmem:[#allocation395_spill] sm:$0xff] %v12022_v11  ;;  %v12034_v3 = vsub.f32 %v402_v1, %v12022_v11 }
 0x2ea   : > { %v2347_v41 = vpop.f32.mrf.mxu0  ;;  %v2640_v43 = vpop.f32.mrf.mxu1  ;;  %16396 = vst [vmem:[#allocation394_spill] sm:$0xff] %v12020_v52  ;;  %v3092_v19 = vsub.f32 %v12013_v9, %v12020_v52  ;;  %v16402_v9 = vld [vmem:[#allocation93_spill] sm:$0xff] }
 0x2eb   : > { %v2641_v10 = vadd.f32 %v2640_v43, %v2344_v62  ;;  %v2951_v26 = vpop.f32.mrf.mxu2  ;;  %v3502_v22 = vpop.f32.mrf.mxu3  ;;  %16398 = vst [vmem:[#allocation396_spill] sm:$0xff] %v12034_v3  ;;  %v2348_v0 = vadd.f32 %v2347_v41, %v10712_v33  ;;  %v405_v62 = vsel %vm328_vm0, %v203_v58, 0  ;;  %v205_v33 = vld [vmem:[%s10061_s12 + $0x1a8] sm:$0xff] }
 0x2ed   : > { %v2952_v48 = vadd.f32 %v2951_v26, %v2641_v10  ;;  %2410 = vmatmul.f32.gmra.mxu0 %v10645_v8  ;;  %2703 = vmatmul.f32.gmra.mxu1 %v10614_v12  ;;  %v12038_v12 = vand.u32 4294901760, %v3092_v19  ;;  %v16405_v19 = vld [vmem:[#allocation107_spill] sm:$0xff] }
 0x2ef   : > { %v12027_v45 = vadd.f32 %v3502_v22, %v2952_v48  ;;  %3569 = vmatmul.f32.gmra.mxu3 %v11980_v46  ;;  %16399 = vst [vmem:[#allocation397_spill] sm:$0xff] %v12038_v12  ;;  %v12043_v46 = vand.u32 4294901760, %v405_v62 }
 0x2f0   : > { %3086 = vmatmul.f32.gmra.mxu2 %v12017_v38  ;;  %v12041_v38 = vand.u32 4294901760, %v12034_v3 }
 0x2f1   : > { %16401 = vst [vmem:[#allocation399_spill] sm:$0xff] %v12043_v46  ;;  %v12055_v58 = vsub.f32 %v405_v62, %v12043_v46  ;;  %v207_v62 = vld [vmem:[%s10061_s12 + $0x1b8] sm:$0xff] }
 0x2f2   : > { %v2351_v43 = vpop.f32.mrf.mxu0  ;;  %v2644_v10 = vpop.f32.mrf.mxu1  ;;  %16400 = vst [vmem:[#allocation398_spill] sm:$0xff] %v12041_v38  ;;  %v3100_v41 = vsub.f32 %v12034_v3, %v12041_v38  ;;  %v16409_v3 = vld [vmem:[#allocation97_spill] sm:$0xff] }
 0x2f3   : > { %v2645_v26 = vadd.f32 %v2644_v10, %v2348_v0  ;;  %v2959_v48 = vpop.f32.mrf.mxu2  ;;  %v3506_v22 = vpop.f32.mrf.mxu3  ;;  %16404 = vst [vmem:[#allocation401_spill] sm:$0xff] %v12055_v58  ;;  %v2352_v0 = vadd.f32 %v2351_v43, %v16405_v19  ;;  %v408_v10 = vsel %vm328_vm0, %v205_v33, 0  ;;  %v16412_v19 = vld [vmem:[#allocation112_spill] sm:$0xff] }
 0x2f5   : > { %v2960_v52 = vadd.f32 %v2959_v48, %v2645_v26  ;;  %2414 = vmatmul.f32.gmra.mxu0 %v16402_v9  ;;  %2707 = vmatmul.f32.gmra.mxu1 %v10645_v8 }
 0x2f7   : > { %v12048_v1 = vadd.f32 %v3506_v22, %v2960_v52  ;;  %3573 = vmatmul.f32.gmra.mxu3 %v12001_v44  ;;  %v12064_v44 = vand.u32 4294901760, %v408_v10 }
 0x2f8   : > { %3094 = vmatmul.f32.gmra.mxu2 %v12038_v12  ;;  %v12062_v12 = vand.u32 4294901760, %v12055_v58 }
 0x2f9   : > { %16403 = vst [vmem:[#allocation400_spill] sm:$0xff] %v12048_v1  ;;  %v12059_v1 = vand.u32 4294901760, %v3100_v41  ;;  %v12076_v41 = vsub.f32 %v408_v10, %v12064_v44  ;;  %v209_v10 = vld [vmem:[%s10061_s12 + $0x1c8] sm:$0xff] }
 0x2fa   : > { %v2355_v26 = vpop.f32.mrf.mxu0  ;;  %v2648_v48 = vpop.f32.mrf.mxu1  ;;  %16407 = vst [vmem:[#allocation402_spill] sm:$0xff] %v12062_v12  ;;  %v3108_v33 = vsub.f32 %v12055_v58, %v12062_v12  ;;  %v16416_v58 = vld [vmem:[#allocation101_spill] sm:$0xff] }
 0x2fb   : > { %v2649_v8 = vadd.f32 %v2648_v48, %v2352_v0  ;;  %v2967_v52 = vpop.f32.mrf.mxu2  ;;  %v3510_v22 = vpop.f32.mrf.mxu3  ;;  %16406 = vst [vmem:[#allocation107_spill] sm:$0xff] %v12059_v1  ;;  %v411_v0 = vsel %vm328_vm0, %v207_v62, 0 }
 0x2fc   : > { %16408 = vst [vmem:[#allocation403_spill] sm:$0xff] %v12064_v44 }
 0x2fd   : > { %v2968_v38 = vadd.f32 %v2967_v52, %v2649_v8  ;;  %2418 = vmatmul.f32.gmra.mxu0 %v16409_v3  ;;  %2711 = vmatmul.f32.gmra.mxu1 %v16402_v9  ;;  %16411 = vst [vmem:[#allocation405_spill] sm:$0xff] %v12076_v41  ;;  %v2356_v8 = vadd.f32 %v2355_v26, %v16412_v19  ;;  %v16419_v19 = vld [vmem:[#allocation117_spill] sm:$0xff] }
 0x2ff   : > { %v12069_v43 = vadd.f32 %v3510_v22, %v2968_v38  ;;  %3577 = vmatmul.f32.gmra.mxu3 %v12022_v11  ;;  %v12085_v11 = vand.u32 4294901760, %v411_v0 }
 0x300   : > { %3102 = vmatmul.f32.gmra.mxu2 %v12059_v1  ;;  %v12083_v1 = vand.u32 4294901760, %v12076_v41 }
 0x301   : > { %16410 = vst [vmem:[#allocation404_spill] sm:$0xff] %v12069_v43  ;;  %v12080_v43 = vand.u32 4294901760, %v3108_v33  ;;  %v12097_v33 = vsub.f32 %v411_v0, %v12085_v11  ;;  %v211_v0 = vld [vmem:[%s10061_s12 + $0x1d8] sm:$0xff] }
 0x302   : > { %v2359_v48 = vpop.f32.mrf.mxu0  ;;  %v2652_v52 = vpop.f32.mrf.mxu1  ;;  %16414 = vst [vmem:[#allocation406_spill] sm:$0xff] %v12083_v1  ;;  %v3116_v62 = vsub.f32 %v12076_v41, %v12083_v1  ;;  %v16423_v41 = vld [vmem:[#allocation105_spill] sm:$0xff] }
 0x303   : > { %v2653_v9 = vadd.f32 %v2652_v52, %v2356_v8  ;;  %v2975_v38 = vpop.f32.mrf.mxu2  ;;  %v3514_v22 = vpop.f32.mrf.mxu3  ;;  %16413 = vst [vmem:[#allocation112_spill] sm:$0xff] %v12080_v43  ;;  %v414_v8 = vsel %vm328_vm0, %v209_v10, 0 }
 0x304   : > { %16415 = vst [vmem:[#allocation407_spill] sm:$0xff] %v12085_v11 }
 0x305   : > { %v2976_v12 = vadd.f32 %v2975_v38, %v2653_v9  ;;  %2422 = vmatmul.f32.gmra.mxu0 %v16416_v58  ;;  %2715 = vmatmul.f32.gmra.mxu1 %v16409_v3  ;;  %16418 = vst [vmem:[#allocation409_spill] sm:$0xff] %v12097_v33  ;;  %v2360_v9 = vadd.f32 %v2359_v48, %v16419_v19  ;;  %v16426_v19 = vld [vmem:[#allocation122_spill] sm:$0xff] }
 0x307   : > { %v12090_v26 = vadd.f32 %v3514_v22, %v2976_v12  ;;  %3581 = vmatmul.f32.gmra.mxu3 %v12043_v46  ;;  %v12106_v46 = vand.u32 4294901760, %v414_v8 }
 0x308   : > { %3110 = vmatmul.f32.gmra.mxu2 %v12080_v43  ;;  %v12104_v43 = vand.u32 4294901760, %v12097_v33 }
 0x309   : > { %16417 = vst [vmem:[#allocation408_spill] sm:$0xff] %v12090_v26  ;;  %v12101_v26 = vand.u32 4294901760, %v3116_v62  ;;  %v12118_v62 = vsub.f32 %v414_v8, %v12106_v46  ;;  %v213_v8 = vld [vmem:[%s10061_s12 + $0x1e8] sm:$0xff] }
 0x30a   : > { %v2363_v52 = vpop.f32.mrf.mxu0  ;;  %v2656_v38 = vpop.f32.mrf.mxu1  ;;  %16421 = vst [vmem:[#allocation410_spill] sm:$0xff] %v12104_v43  ;;  %v3124_v10 = vsub.f32 %v12097_v33, %v12104_v43  ;;  %v16430_v33 = vld [vmem:[#allocation110_spill] sm:$0xff] }
 0x30b   : > { %v2657_v3 = vadd.f32 %v2656_v38, %v2360_v9  ;;  %v2983_v12 = vpop.f32.mrf.mxu2  ;;  %v3518_v22 = vpop.f32.mrf.mxu3  ;;  %16420 = vst [vmem:[#allocation117_spill] sm:$0xff] %v12101_v26  ;;  %v417_v9 = vsel %vm328_vm0, %v211_v0, 0 }
 0x30c   : > { %16422 = vst [vmem:[#allocation411_spill] sm:$0xff] %v12106_v46 }
 0x30d   : > { %v2984_v1 = vadd.f32 %v2983_v12, %v2657_v3  ;;  %2426 = vmatmul.f32.gmra.mxu0 %v16423_v41  ;;  %2719 = vmatmul.f32.gmra.mxu1 %v16416_v58  ;;  %16425 = vst [vmem:[#allocation413_spill] sm:$0xff] %v12118_v62  ;;  %v2364_v3 = vadd.f32 %v2363_v52, %v16426_v19  ;;  %v16433_v19 = vld [vmem:[#allocation127_spill] sm:$0xff] }
 0x30f   : > { %v12111_v48 = vadd.f32 %v3518_v22, %v2984_v1  ;;  %3585 = vmatmul.f32.gmra.mxu3 %v12064_v44  ;;  %v12127_v44 = vand.u32 4294901760, %v417_v9 }
 0x310   : > { %3118 = vmatmul.f32.gmra.mxu2 %v12101_v26  ;;  %v12125_v26 = vand.u32 4294901760, %v12118_v62 }
 0x311   : > { %16424 = vst [vmem:[#allocation412_spill] sm:$0xff] %v12111_v48  ;;  %v12122_v48 = vand.u32 4294901760, %v3124_v10  ;;  %v12139_v10 = vsub.f32 %v417_v9, %v12127_v44  ;;  %v215_v9 = vld [vmem:[%s10061_s12 + $0x1f8] sm:$0xff] }
 0x312   : > { %v2367_v38 = vpop.f32.mrf.mxu0  ;;  %v2660_v12 = vpop.f32.mrf.mxu1  ;;  %16428 = vst [vmem:[#allocation414_spill] sm:$0xff] %v12125_v26  ;;  %v3132_v0 = vsub.f32 %v12118_v62, %v12125_v26  ;;  %v16437_v62 = vld [vmem:[#allocation115_spill] sm:$0xff] }
 0x313   : > { %v2661_v58 = vadd.f32 %v2660_v12, %v2364_v3  ;;  %v2991_v1 = vpop.f32.mrf.mxu2  ;;  %v3522_v22 = vpop.f32.mrf.mxu3  ;;  %16427 = vst [vmem:[#allocation122_spill] sm:$0xff] %v12122_v48  ;;  %v420_v3 = vsel %vm328_vm0, %v213_v8, 0 }
 0x314   : > { %16429 = vst [vmem:[#allocation415_spill] sm:$0xff] %v12127_v44 }
 0x315   : > { %v2992_v43 = vadd.f32 %v2991_v1, %v2661_v58  ;;  %2430 = vmatmul.f32.gmra.mxu0 %v16430_v33  ;;  %2723 = vmatmul.f32.gmra.mxu1 %v16423_v41  ;;  %16432 = vst [vmem:[#allocation417_spill] sm:$0xff] %v12139_v10  ;;  %v2368_v58 = vadd.f32 %v2367_v38, %v16433_v19  ;;  %v16440_v19 = vld [vmem:[#allocation132_spill] sm:$0xff] }
 0x317   : > { %v12132_v52 = vadd.f32 %v3522_v22, %v2992_v43  ;;  %3589 = vmatmul.f32.gmra.mxu3 %v12085_v11  ;;  %v12148_v11 = vand.u32 4294901760, %v420_v3 }
 0x318   : > { %3126 = vmatmul.f32.gmra.mxu2 %v12122_v48  ;;  %v12146_v48 = vand.u32 4294901760, %v12139_v10 }
 0x319   : > { %16431 = vst [vmem:[#allocation416_spill] sm:$0xff] %v12132_v52  ;;  %v12143_v52 = vand.u32 4294901760, %v3132_v0  ;;  %v12160_v0 = vsub.f32 %v420_v3, %v12148_v11  ;;  %v217_v3 = vld [vmem:[%s10061_s12 + $0x208] sm:$0xff] }
 0x31a   : > { %v2371_v12 = vpop.f32.mrf.mxu0  ;;  %v2664_v1 = vpop.f32.mrf.mxu1  ;;  %16435 = vst [vmem:[#allocation418_spill] sm:$0xff] %v12146_v48  ;;  %v3140_v8 = vsub.f32 %v12139_v10, %v12146_v48  ;;  %v16444_v10 = vld [vmem:[#allocation120_spill] sm:$0xff] }
 0x31b   : > { %v2665_v41 = vadd.f32 %v2664_v1, %v2368_v58  ;;  %v2999_v43 = vpop.f32.mrf.mxu2  ;;  %v3526_v22 = vpop.f32.mrf.mxu3  ;;  %16434 = vst [vmem:[#allocation127_spill] sm:$0xff] %v12143_v52  ;;  %v423_v58 = vsel %vm328_vm0, %v215_v9, 0 }
 0x31c   : > { %16436 = vst [vmem:[#allocation419_spill] sm:$0xff] %v12148_v11 }
 0x31d   : > { %v3000_v26 = vadd.f32 %v2999_v43, %v2665_v41  ;;  %2434 = vmatmul.f32.gmra.mxu0 %v16437_v62  ;;  %2727 = vmatmul.f32.gmra.mxu1 %v16430_v33  ;;  %16439 = vst [vmem:[#allocation421_spill] sm:$0xff] %v12160_v0  ;;  %v2372_v41 = vadd.f32 %v2371_v12, %v16440_v19  ;;  %v16447_v19 = vld [vmem:[#allocation137_spill] sm:$0xff] }
 0x31f   : > { %v12153_v38 = vadd.f32 %v3526_v22, %v3000_v26  ;;  %3593 = vmatmul.f32.gmra.mxu3 %v12106_v46  ;;  %v12169_v46 = vand.u32 4294901760, %v423_v58 }
 0x320   : > { %3134 = vmatmul.f32.gmra.mxu2 %v12143_v52  ;;  %v12167_v52 = vand.u32 4294901760, %v12160_v0 }
 0x321   : > { %16438 = vst [vmem:[#allocation420_spill] sm:$0xff] %v12153_v38  ;;  %v12164_v38 = vand.u32 4294901760, %v3140_v8  ;;  %v12181_v8 = vsub.f32 %v423_v58, %v12169_v46  ;;  %v219_v58 = vld [vmem:[%s10061_s12 + $0x218] sm:$0xff] }
 0x322   : > { %v2375_v1 = vpop.f32.mrf.mxu0  ;;  %v2668_v43 = vpop.f32.mrf.mxu1  ;;  %16442 = vst [vmem:[#allocation422_spill] sm:$0xff] %v12167_v52  ;;  %v3148_v9 = vsub.f32 %v12160_v0, %v12167_v52  ;;  %v16451_v0 = vld [vmem:[#allocation125_spill] sm:$0xff] }
 0x323   : > { %v2669_v33 = vadd.f32 %v2668_v43, %v2372_v41  ;;  %v3007_v26 = vpop.f32.mrf.mxu2  ;;  %v3530_v22 = vpop.f32.mrf.mxu3  ;;  %16441 = vst [vmem:[#allocation132_spill] sm:$0xff] %v12164_v38  ;;  %v426_v41 = vsel %vm328_vm0, %v217_v3, 0 }
 0x324   : > { %16443 = vst [vmem:[#allocation423_spill] sm:$0xff] %v12169_v46 }
 0x325   : > { %v3008_v48 = vadd.f32 %v3007_v26, %v2669_v33  ;;  %2438 = vmatmul.f32.gmra.mxu0 %v16444_v10  ;;  %2731 = vmatmul.f32.gmra.mxu1 %v16437_v62  ;;  %16446 = vst [vmem:[#allocation425_spill] sm:$0xff] %v12181_v8  ;;  %v2376_v33 = vadd.f32 %v2375_v1, %v16447_v19  ;;  %v16454_v19 = vld [vmem:[#allocation142_spill] sm:$0xff] }
 0x327   : > { %v12174_v12 = vadd.f32 %v3530_v22, %v3008_v48  ;;  %3597 = vmatmul.f32.gmra.mxu3 %v12127_v44  ;;  %v12190_v44 = vand.u32 4294901760, %v426_v41 }
 0x328   : > { %3142 = vmatmul.f32.gmra.mxu2 %v12164_v38  ;;  %v12188_v38 = vand.u32 4294901760, %v12181_v8 }
 0x329   : > { %16445 = vst [vmem:[#allocation424_spill] sm:$0xff] %v12174_v12  ;;  %v12185_v12 = vand.u32 4294901760, %v3148_v9  ;;  %v12202_v9 = vsub.f32 %v426_v41, %v12190_v44  ;;  %v221_v41 = vld [vmem:[%s10061_s12 + $0x228] sm:$0xff] }
 0x32a   : > { %v2379_v43 = vpop.f32.mrf.mxu0  ;;  %v2672_v26 = vpop.f32.mrf.mxu1  ;;  %16449 = vst [vmem:[#allocation426_spill] sm:$0xff] %v12188_v38  ;;  %v3156_v3 = vsub.f32 %v12181_v8, %v12188_v38  ;;  %v16458_v8 = vld [vmem:[#allocation130_spill] sm:$0xff] }
 0x32b   : > { %v2673_v62 = vadd.f32 %v2672_v26, %v2376_v33  ;;  %v3015_v48 = vpop.f32.mrf.mxu2  ;;  %v3534_v22 = vpop.f32.mrf.mxu3  ;;  %16448 = vst [vmem:[#allocation137_spill] sm:$0xff] %v12185_v12  ;;  %v429_v33 = vsel %vm328_vm0, %v219_v58, 0 }
 0x32c   : > { %16450 = vst [vmem:[#allocation427_spill] sm:$0xff] %v12190_v44 }
 0x32d   : > { %v3016_v52 = vadd.f32 %v3015_v48, %v2673_v62  ;;  %2442 = vmatmul.f32.gmra.mxu0 %v16451_v0  ;;  %2735 = vmatmul.f32.gmra.mxu1 %v16444_v10  ;;  %16453 = vst [vmem:[#allocation429_spill] sm:$0xff] %v12202_v9  ;;  %v2380_v62 = vadd.f32 %v2379_v43, %v16454_v19  ;;  %v16461_v19 = vld [vmem:[#allocation147_spill] sm:$0xff] }
 0x32f   : > { %v12195_v1 = vadd.f32 %v3534_v22, %v3016_v52  ;;  %3601 = vmatmul.f32.gmra.mxu3 %v12148_v11  ;;  %v12211_v11 = vand.u32 4294901760, %v429_v33 }
 0x330   : > { %3150 = vmatmul.f32.gmra.mxu2 %v12185_v12  ;;  %v12209_v12 = vand.u32 4294901760, %v12202_v9 }
 0x331   : > { %16452 = vst [vmem:[#allocation428_spill] sm:$0xff] %v12195_v1  ;;  %v12206_v1 = vand.u32 4294901760, %v3156_v3  ;;  %v12223_v3 = vsub.f32 %v429_v33, %v12211_v11  ;;  %v223_v33 = vld [vmem:[%s10061_s12 + $0x238] sm:$0xff] }
 0x332   : > { %v2383_v26 = vpop.f32.mrf.mxu0  ;;  %v2676_v48 = vpop.f32.mrf.mxu1  ;;  %16456 = vst [vmem:[#allocation430_spill] sm:$0xff] %v12209_v12  ;;  %v3164_v58 = vsub.f32 %v12202_v9, %v12209_v12  ;;  %v16465_v9 = vld [vmem:[#allocation135_spill] sm:$0xff] }
 0x333   : > { %v2677_v10 = vadd.f32 %v2676_v48, %v2380_v62  ;;  %v3023_v52 = vpop.f32.mrf.mxu2  ;;  %v3538_v22 = vpop.f32.mrf.mxu3  ;;  %16455 = vst [vmem:[#allocation142_spill] sm:$0xff] %v12206_v1  ;;  %v432_v62 = vsel %vm328_vm0, %v221_v41, 0 }
 0x334   : > { %16457 = vst [vmem:[#allocation431_spill] sm:$0xff] %v12211_v11 }
 0x335   : > { %v3024_v38 = vadd.f32 %v3023_v52, %v2677_v10  ;;  %2446 = vmatmul.f32.gmra.mxu0 %v16458_v8  ;;  %2739 = vmatmul.f32.gmra.mxu1 %v16451_v0  ;;  %16460 = vst [vmem:[#allocation433_spill] sm:$0xff] %v12223_v3  ;;  %v2384_v10 = vadd.f32 %v2383_v26, %v16461_v19  ;;  %v16468_v19 = vld [vmem:[#allocation152_spill] sm:$0xff] }
 0x337   : > { %v12216_v43 = vadd.f32 %v3538_v22, %v3024_v38  ;;  %3605 = vmatmul.f32.gmra.mxu3 %v12169_v46  ;;  %v12232_v46 = vand.u32 4294901760, %v432_v62 }
 0x338   : > { %3158 = vmatmul.f32.gmra.mxu2 %v12206_v1  ;;  %v12230_v1 = vand.u32 4294901760, %v12223_v3 }
 0x339   : > { %16459 = vst [vmem:[#allocation432_spill] sm:$0xff] %v12216_v43  ;;  %v12227_v43 = vand.u32 4294901760, %v3164_v58  ;;  %v12244_v58 = vsub.f32 %v432_v62, %v12232_v46  ;;  %v225_v62 = vld [vmem:[%s10061_s12 + $0x248] sm:$0xff] }
 0x33a   : > { %v2387_v48 = vpop.f32.mrf.mxu0  ;;  %v2680_v52 = vpop.f32.mrf.mxu1  ;;  %16463 = vst [vmem:[#allocation434_spill] sm:$0xff] %v12230_v1  ;;  %v3172_v41 = vsub.f32 %v12223_v3, %v12230_v1  ;;  %v16472_v3 = vld [vmem:[#allocation140_spill] sm:$0xff] }
 0x33b   : > { %v2681_v0 = vadd.f32 %v2680_v52, %v2384_v10  ;;  %v3031_v38 = vpop.f32.mrf.mxu2  ;;  %v3542_v22 = vpop.f32.mrf.mxu3  ;;  %16462 = vst [vmem:[#allocation147_spill] sm:$0xff] %v12227_v43  ;;  %v435_v10 = vsel %vm328_vm0, %v223_v33, 0 }
 0x33c   : > { %16464 = vst [vmem:[#allocation435_spill] sm:$0xff] %v12232_v46 }
 0x33d   : > { %v3032_v12 = vadd.f32 %v3031_v38, %v2681_v0  ;;  %2450 = vmatmul.f32.gmra.mxu0 %v16465_v9  ;;  %2743 = vmatmul.f32.gmra.mxu1 %v16458_v8  ;;  %16467 = vst [vmem:[#allocation437_spill] sm:$0xff] %v12244_v58  ;;  %v2388_v0 = vadd.f32 %v2387_v48, %v16468_v19  ;;  %v16475_v19 = vld [vmem:[#allocation157_spill] sm:$0xff] }
 0x33f   : > { %v12237_v26 = vadd.f32 %v3542_v22, %v3032_v12  ;;  %3609 = vmatmul.f32.gmra.mxu3 %v12190_v44  ;;  %v12253_v44 = vand.u32 4294901760, %v435_v10 }
 0x340   : > { %3166 = vmatmul.f32.gmra.mxu2 %v12227_v43  ;;  %v12251_v43 = vand.u32 4294901760, %v12244_v58 }
 0x341   : > { %16466 = vst [vmem:[#allocation436_spill] sm:$0xff] %v12237_v26  ;;  %v12248_v26 = vand.u32 4294901760, %v3172_v41  ;;  %v12265_v41 = vsub.f32 %v435_v10, %v12253_v44  ;;  %v227_v10 = vld [vmem:[%s10061_s12 + $0x258] sm:$0xff] }
 0x342   : > { %v2391_v52 = vpop.f32.mrf.mxu0  ;;  %v2684_v38 = vpop.f32.mrf.mxu1  ;;  %16470 = vst [vmem:[#allocation438_spill] sm:$0xff] %v12251_v43  ;;  %v3180_v33 = vsub.f32 %v12244_v58, %v12251_v43  ;;  %v16479_v58 = vld [vmem:[#allocation145_spill] sm:$0xff] }
 0x343   : > { %v2685_v8 = vadd.f32 %v2684_v38, %v2388_v0  ;;  %v3039_v12 = vpop.f32.mrf.mxu2  ;;  %v3546_v22 = vpop.f32.mrf.mxu3  ;;  %16469 = vst [vmem:[#allocation152_spill] sm:$0xff] %v12248_v26  ;;  %v438_v0 = vsel %vm328_vm0, %v225_v62, 0 }
 0x344   : > { %16471 = vst [vmem:[#allocation439_spill] sm:$0xff] %v12253_v44 }
 0x345   : > { %v3040_v1 = vadd.f32 %v3039_v12, %v2685_v8  ;;  %2454 = vmatmul.f32.gmra.mxu0 %v16472_v3  ;;  %2747 = vmatmul.f32.gmra.mxu1 %v16465_v9  ;;  %16474 = vst [vmem:[#allocation441_spill] sm:$0xff] %v12265_v41  ;;  %v2392_v8 = vadd.f32 %v2391_v52, %v16475_v19  ;;  %v16482_v19 = vld [vmem:[#allocation162_spill] sm:$0xff] }
 0x347   : > { %v12258_v48 = vadd.f32 %v3546_v22, %v3040_v1  ;;  %3613 = vmatmul.f32.gmra.mxu3 %v12211_v11  ;;  %v12274_v11 = vand.u32 4294901760, %v438_v0 }
 0x348   : > { %3174 = vmatmul.f32.gmra.mxu2 %v12248_v26  ;;  %v12272_v26 = vand.u32 4294901760, %v12265_v41 }
 0x349   : > { %16473 = vst [vmem:[#allocation440_spill] sm:$0xff] %v12258_v48  ;;  %v12269_v48 = vand.u32 4294901760, %v3180_v33  ;;  %v12286_v33 = vsub.f32 %v438_v0, %v12274_v11  ;;  %v229_v0 = vld [vmem:[%s10061_s12 + $0x268] sm:$0xff] }
 0x34a   : > { %v2395_v38 = vpop.f32.mrf.mxu0  ;;  %v2688_v12 = vpop.f32.mrf.mxu1  ;;  %16477 = vst [vmem:[#allocation442_spill] sm:$0xff] %v12272_v26  ;;  %v3188_v62 = vsub.f32 %v12265_v41, %v12272_v26  ;;  %v16486_v41 = vld [vmem:[#allocation150_spill] sm:$0xff] }
 0x34b   : > { %v2689_v9 = vadd.f32 %v2688_v12, %v2392_v8  ;;  %v3047_v1 = vpop.f32.mrf.mxu2  ;;  %v3550_v22 = vpop.f32.mrf.mxu3  ;;  %16476 = vst [vmem:[#allocation157_spill] sm:$0xff] %v12269_v48  ;;  %v441_v8 = vsel %vm328_vm0, %v227_v10, 0 }
 0x34c   : > { %16478 = vst [vmem:[#allocation443_spill] sm:$0xff] %v12274_v11 }
 0x34d   : > { %v3048_v43 = vadd.f32 %v3047_v1, %v2689_v9  ;;  %2458 = vmatmul.f32.gmra.mxu0 %v16479_v58  ;;  %2751 = vmatmul.f32.gmra.mxu1 %v16472_v3  ;;  %16481 = vst [vmem:[#allocation445_spill] sm:$0xff] %v12286_v33  ;;  %v2396_v9 = vadd.f32 %v2395_v38, %v16482_v19  ;;  %v16489_v19 = vld [vmem:[#allocation167_spill] sm:$0xff] }
 0x34f   : > { %v12279_v52 = vadd.f32 %v3550_v22, %v3048_v43  ;;  %3617 = vmatmul.f32.gmra.mxu3 %v12232_v46  ;;  %v12295_v46 = vand.u32 4294901760, %v441_v8 }
 0x350   : > { %3182 = vmatmul.f32.gmra.mxu2 %v12269_v48  ;;  %v12293_v48 = vand.u32 4294901760, %v12286_v33 }
 0x351   : > { %16480 = vst [vmem:[#allocation444_spill] sm:$0xff] %v12279_v52  ;;  %v12290_v52 = vand.u32 4294901760, %v3188_v62  ;;  %v12307_v62 = vsub.f32 %v441_v8, %v12295_v46  ;;  %v231_v8 = vld [vmem:[%s10061_s12 + $0x278] sm:$0xff] }
 0x352   : > { %v2399_v12 = vpop.f32.mrf.mxu0  ;;  %v2692_v1 = vpop.f32.mrf.mxu1  ;;  %16484 = vst [vmem:[#allocation446_spill] sm:$0xff] %v12293_v48  ;;  %v3196_v10 = vsub.f32 %v12286_v33, %v12293_v48  ;;  %v16493_v33 = vld [vmem:[#allocation155_spill] sm:$0xff] }
 0x353   : > { %v2693_v3 = vadd.f32 %v2692_v1, %v2396_v9  ;;  %v3055_v43 = vpop.f32.mrf.mxu2  ;;  %v3554_v22 = vpop.f32.mrf.mxu3  ;;  %16483 = vst [vmem:[#allocation162_spill] sm:$0xff] %v12290_v52  ;;  %v444_v9 = vsel %vm328_vm0, %v229_v0, 0 }
 0x354   : > { %16485 = vst [vmem:[#allocation447_spill] sm:$0xff] %v12295_v46 }
 0x355   : > { %v3056_v26 = vadd.f32 %v3055_v43, %v2693_v3  ;;  %2462 = vmatmul.f32.gmra.mxu0 %v16486_v41  ;;  %2755 = vmatmul.f32.gmra.mxu1 %v16479_v58  ;;  %16488 = vst [vmem:[#allocation449_spill] sm:$0xff] %v12307_v62  ;;  %v2400_v3 = vadd.f32 %v2399_v12, %v16489_v19  ;;  %v16496_v19 = vld [vmem:[#allocation172_spill] sm:$0xff] }
 0x357   : > { %v12300_v38 = vadd.f32 %v3554_v22, %v3056_v26  ;;  %3621 = vmatmul.f32.gmra.mxu3 %v12253_v44  ;;  %v12316_v44 = vand.u32 4294901760, %v444_v9 }
 0x358   : > { %3190 = vmatmul.f32.gmra.mxu2 %v12290_v52  ;;  %v12314_v52 = vand.u32 4294901760, %v12307_v62 }
 0x359   : > { %16487 = vst [vmem:[#allocation448_spill] sm:$0xff] %v12300_v38  ;;  %v12311_v38 = vand.u32 4294901760, %v3196_v10  ;;  %v12328_v10 = vsub.f32 %v444_v9, %v12316_v44  ;;  %v233_v9 = vld [vmem:[%s10061_s12 + $0x288] sm:$0xff] }
 0x35a   : > { %v2403_v1 = vpop.f32.mrf.mxu0  ;;  %v2696_v43 = vpop.f32.mrf.mxu1  ;;  %16491 = vst [vmem:[#allocation450_spill] sm:$0xff] %v12314_v52  ;;  %v3204_v0 = vsub.f32 %v12307_v62, %v12314_v52  ;;  %v16500_v62 = vld [vmem:[#allocation160_spill] sm:$0xff] }
 0x35b   : > { %v2697_v58 = vadd.f32 %v2696_v43, %v2400_v3  ;;  %v3063_v26 = vpop.f32.mrf.mxu2  ;;  %v3558_v22 = vpop.f32.mrf.mxu3  ;;  %16490 = vst [vmem:[#allocation167_spill] sm:$0xff] %v12311_v38  ;;  %v447_v3 = vsel %vm328_vm0, %v231_v8, 0 }
 0x35c   : > { %16492 = vst [vmem:[#allocation451_spill] sm:$0xff] %v12316_v44 }
 0x35d   : > { %v3064_v48 = vadd.f32 %v3063_v26, %v2697_v58  ;;  %2466 = vmatmul.f32.gmra.mxu0 %v16493_v33  ;;  %2759 = vmatmul.f32.gmra.mxu1 %v16486_v41  ;;  %16495 = vst [vmem:[#allocation453_spill] sm:$0xff] %v12328_v10  ;;  %v2404_v58 = vadd.f32 %v2403_v1, %v16496_v19  ;;  %v16503_v19 = vld [vmem:[#allocation177_spill] sm:$0xff] }
 0x35f   : > { %v12321_v12 = vadd.f32 %v3558_v22, %v3064_v48  ;;  %3625 = vmatmul.f32.gmra.mxu3 %v12274_v11  ;;  %v12337_v11 = vand.u32 4294901760, %v447_v3 }
 0x360   : > { %3198 = vmatmul.f32.gmra.mxu2 %v12311_v38  ;;  %v12335_v38 = vand.u32 4294901760, %v12328_v10 }
 0x361   : > { %16494 = vst [vmem:[#allocation452_spill] sm:$0xff] %v12321_v12  ;;  %v12332_v12 = vand.u32 4294901760, %v3204_v0  ;;  %v12349_v0 = vsub.f32 %v447_v3, %v12337_v11  ;;  %v235_v3 = vld [vmem:[%s10061_s12 + $0x298] sm:$0xff] }
 0x362   : > { %v2407_v43 = vpop.f32.mrf.mxu0  ;;  %v2700_v26 = vpop.f32.mrf.mxu1  ;;  %16498 = vst [vmem:[#allocation454_spill] sm:$0xff] %v12335_v38  ;;  %v3212_v8 = vsub.f32 %v12328_v10, %v12335_v38  ;;  %v16507_v10 = vld [vmem:[#allocation165_spill] sm:$0xff] }
 0x363   : > { %v2701_v41 = vadd.f32 %v2700_v26, %v2404_v58  ;;  %v3071_v48 = vpop.f32.mrf.mxu2  ;;  %v3562_v22 = vpop.f32.mrf.mxu3  ;;  %16497 = vst [vmem:[#allocation172_spill] sm:$0xff] %v12332_v12  ;;  %v450_v58 = vsel %vm328_vm0, %v233_v9, 0 }
 0x364   : > { %16499 = vst [vmem:[#allocation455_spill] sm:$0xff] %v12337_v11 }
 0x365   : > { %v3072_v52 = vadd.f32 %v3071_v48, %v2701_v41  ;;  %2470 = vmatmul.f32.gmra.mxu0 %v16500_v62  ;;  %2763 = vmatmul.f32.gmra.mxu1 %v16493_v33  ;;  %16502 = vst [vmem:[#allocation457_spill] sm:$0xff] %v12349_v0  ;;  %v2408_v41 = vadd.f32 %v2407_v43, %v16503_v19  ;;  %v16510_v19 = vld [vmem:[#allocation182_spill] sm:$0xff] }
 0x367   : > { %v12342_v1 = vadd.f32 %v3562_v22, %v3072_v52  ;;  %3629 = vmatmul.f32.gmra.mxu3 %v12295_v46  ;;  %v12358_v46 = vand.u32 4294901760, %v450_v58 }
 0x368   : > { %3206 = vmatmul.f32.gmra.mxu2 %v12332_v12  ;;  %v12356_v12 = vand.u32 4294901760, %v12349_v0 }
 0x369   : > { %16501 = vst [vmem:[#allocation456_spill] sm:$0xff] %v12342_v1  ;;  %v12353_v1 = vand.u32 4294901760, %v3212_v8  ;;  %v12370_v8 = vsub.f32 %v450_v58, %v12358_v46  ;;  %v237_v58 = vld [vmem:[%s10061_s12 + $0x2a8] sm:$0xff] }
 0x36a   : > { %v2411_v26 = vpop.f32.mrf.mxu0  ;;  %v2704_v48 = vpop.f32.mrf.mxu1  ;;  %16505 = vst [vmem:[#allocation458_spill] sm:$0xff] %v12356_v12  ;;  %v3220_v9 = vsub.f32 %v12349_v0, %v12356_v12  ;;  %v16514_v0 = vld [vmem:[#allocation170_spill] sm:$0xff] }
 0x36b   : > { %v2705_v33 = vadd.f32 %v2704_v48, %v2408_v41  ;;  %v3079_v52 = vpop.f32.mrf.mxu2  ;;  %v3566_v22 = vpop.f32.mrf.mxu3  ;;  %16504 = vst [vmem:[#allocation177_spill] sm:$0xff] %v12353_v1  ;;  %v453_v41 = vsel %vm328_vm0, %v235_v3, 0 }
 0x36c   : > { %16506 = vst [vmem:[#allocation459_spill] sm:$0xff] %v12358_v46 }
 0x36d   : > { %v3080_v38 = vadd.f32 %v3079_v52, %v2705_v33  ;;  %2474 = vmatmul.f32.gmra.mxu0 %v16507_v10  ;;  %2767 = vmatmul.f32.gmra.mxu1 %v16500_v62  ;;  %16509 = vst [vmem:[#allocation461_spill] sm:$0xff] %v12370_v8  ;;  %v2412_v33 = vadd.f32 %v2411_v26, %v16510_v19  ;;  %v16517_v19 = vld [vmem:[#allocation187_spill] sm:$0xff] }
 0x36f   : > { %v12363_v43 = vadd.f32 %v3566_v22, %v3080_v38  ;;  %3633 = vmatmul.f32.gmra.mxu3 %v12316_v44  ;;  %v12379_v44 = vand.u32 4294901760, %v453_v41 }
 0x370   : > { %3214 = vmatmul.f32.gmra.mxu2 %v12353_v1  ;;  %v12377_v1 = vand.u32 4294901760, %v12370_v8 }
 0x371   : > { %16508 = vst [vmem:[#allocation460_spill] sm:$0xff] %v12363_v43  ;;  %v12374_v43 = vand.u32 4294901760, %v3220_v9  ;;  %v12391_v9 = vsub.f32 %v453_v41, %v12379_v44  ;;  %v239_v41 = vld [vmem:[%s10061_s12 + $0x2b8] sm:$0xff] }
 0x372   : > { %v2415_v48 = vpop.f32.mrf.mxu0  ;;  %v2708_v52 = vpop.f32.mrf.mxu1  ;;  %16512 = vst [vmem:[#allocation462_spill] sm:$0xff] %v12377_v1  ;;  %v3228_v3 = vsub.f32 %v12370_v8, %v12377_v1  ;;  %v16521_v8 = vld [vmem:[#allocation175_spill] sm:$0xff] }
 0x373   : > { %v2709_v62 = vadd.f32 %v2708_v52, %v2412_v33  ;;  %v3087_v38 = vpop.f32.mrf.mxu2  ;;  %v3570_v22 = vpop.f32.mrf.mxu3  ;;  %16511 = vst [vmem:[#allocation182_spill] sm:$0xff] %v12374_v43  ;;  %v456_v33 = vsel %vm328_vm0, %v237_v58, 0 }
 0x374   : > { %16513 = vst [vmem:[#allocation463_spill] sm:$0xff] %v12379_v44 }
 0x375   : > { %v3088_v12 = vadd.f32 %v3087_v38, %v2709_v62  ;;  %2478 = vmatmul.f32.gmra.mxu0 %v16514_v0  ;;  %2771 = vmatmul.f32.gmra.mxu1 %v16507_v10  ;;  %16516 = vst [vmem:[#allocation465_spill] sm:$0xff] %v12391_v9  ;;  %v2416_v62 = vadd.f32 %v2415_v48, %v16517_v19  ;;  %v16524_v19 = vld [vmem:[#allocation192_spill] sm:$0xff] }
 0x377   : > { %v12384_v26 = vadd.f32 %v3570_v22, %v3088_v12  ;;  %3637 = vmatmul.f32.gmra.mxu3 %v12337_v11  ;;  %v12400_v11 = vand.u32 4294901760, %v456_v33 }
 0x378   : > { %3222 = vmatmul.f32.gmra.mxu2 %v12374_v43  ;;  %v12398_v43 = vand.u32 4294901760, %v12391_v9 }
 0x379   : > { %16515 = vst [vmem:[#allocation464_spill] sm:$0xff] %v12384_v26  ;;  %v12395_v26 = vand.u32 4294901760, %v3228_v3  ;;  %v12412_v3 = vsub.f32 %v456_v33, %v12400_v11  ;;  %v241_v33 = vld [vmem:[%s10061_s12 + $0x2c8] sm:$0xff] }
 0x37a   : > { %v2419_v52 = vpop.f32.mrf.mxu0  ;;  %v2712_v38 = vpop.f32.mrf.mxu1  ;;  %16519 = vst [vmem:[#allocation466_spill] sm:$0xff] %v12398_v43  ;;  %v3236_v58 = vsub.f32 %v12391_v9, %v12398_v43  ;;  %v16528_v9 = vld [vmem:[#allocation180_spill] sm:$0xff] }
 0x37b   : > { %v2713_v10 = vadd.f32 %v2712_v38, %v2416_v62  ;;  %v3095_v12 = vpop.f32.mrf.mxu2  ;;  %v3574_v22 = vpop.f32.mrf.mxu3  ;;  %16518 = vst [vmem:[#allocation187_spill] sm:$0xff] %v12395_v26  ;;  %v459_v62 = vsel %vm328_vm0, %v239_v41, 0 }
 0x37c   : > { %16520 = vst [vmem:[#allocation467_spill] sm:$0xff] %v12400_v11 }
 0x37d   : > { %v3096_v1 = vadd.f32 %v3095_v12, %v2713_v10  ;;  %2482 = vmatmul.f32.gmra.mxu0 %v16521_v8  ;;  %2775 = vmatmul.f32.gmra.mxu1 %v16514_v0  ;;  %16523 = vst [vmem:[#allocation469_spill] sm:$0xff] %v12412_v3  ;;  %v2420_v10 = vadd.f32 %v2419_v52, %v16524_v19  ;;  %v16531_v19 = vld [vmem:[#allocation197_spill] sm:$0xff] }
 0x37f   : > { %v12405_v48 = vadd.f32 %v3574_v22, %v3096_v1  ;;  %3641 = vmatmul.f32.gmra.mxu3 %v12358_v46  ;;  %v12421_v46 = vand.u32 4294901760, %v459_v62 }
 0x380   : > { %3230 = vmatmul.f32.gmra.mxu2 %v12395_v26  ;;  %v12419_v26 = vand.u32 4294901760, %v12412_v3 }
 0x381   : > { %16522 = vst [vmem:[#allocation468_spill] sm:$0xff] %v12405_v48  ;;  %v12416_v48 = vand.u32 4294901760, %v3236_v58  ;;  %v12433_v58 = vsub.f32 %v459_v62, %v12421_v46  ;;  %v243_v62 = vld [vmem:[%s10061_s12 + $0x2d8] sm:$0xff] }
 0x382   : > { %v2423_v38 = vpop.f32.mrf.mxu0  ;;  %v2716_v12 = vpop.f32.mrf.mxu1  ;;  %16526 = vst [vmem:[#allocation470_spill] sm:$0xff] %v12419_v26  ;;  %v3244_v41 = vsub.f32 %v12412_v3, %v12419_v26  ;;  %v16535_v3 = vld [vmem:[#allocation185_spill] sm:$0xff] }
 0x383   : > { %v2717_v0 = vadd.f32 %v2716_v12, %v2420_v10  ;;  %v3103_v1 = vpop.f32.mrf.mxu2  ;;  %v3578_v22 = vpop.f32.mrf.mxu3  ;;  %16525 = vst [vmem:[#allocation192_spill] sm:$0xff] %v12416_v48  ;;  %v462_v10 = vsel %vm328_vm0, %v241_v33, 0 }
 0x384   : > { %16527 = vst [vmem:[#allocation471_spill] sm:$0xff] %v12421_v46 }
 0x385   : > { %v3104_v43 = vadd.f32 %v3103_v1, %v2717_v0  ;;  %2486 = vmatmul.f32.gmra.mxu0 %v16528_v9  ;;  %2779 = vmatmul.f32.gmra.mxu1 %v16521_v8  ;;  %16530 = vst [vmem:[#allocation473_spill] sm:$0xff] %v12433_v58  ;;  %v2424_v0 = vadd.f32 %v2423_v38, %v16531_v19  ;;  %v16538_v19 = vld [vmem:[#allocation202_spill] sm:$0xff] }
 0x387   : > { %v12426_v52 = vadd.f32 %v3578_v22, %v3104_v43  ;;  %3645 = vmatmul.f32.gmra.mxu3 %v12379_v44  ;;  %v12442_v44 = vand.u32 4294901760, %v462_v10 }
 0x388   : > { %3238 = vmatmul.f32.gmra.mxu2 %v12416_v48  ;;  %v12440_v48 = vand.u32 4294901760, %v12433_v58 }
 0x389   : > { %16529 = vst [vmem:[#allocation472_spill] sm:$0xff] %v12426_v52  ;;  %v12437_v52 = vand.u32 4294901760, %v3244_v41  ;;  %v12454_v41 = vsub.f32 %v462_v10, %v12442_v44  ;;  %v245_v10 = vld [vmem:[%s10061_s12 + $0x2e8] sm:$0xff] }
 0x38a   : > { %v2427_v12 = vpop.f32.mrf.mxu0  ;;  %v2720_v1 = vpop.f32.mrf.mxu1  ;;  %16533 = vst [vmem:[#allocation474_spill] sm:$0xff] %v12440_v48  ;;  %v3252_v33 = vsub.f32 %v12433_v58, %v12440_v48  ;;  %v16542_v58 = vld [vmem:[#allocation190_spill] sm:$0xff] }
 0x38b   : > { %v2721_v8 = vadd.f32 %v2720_v1, %v2424_v0  ;;  %v3111_v43 = vpop.f32.mrf.mxu2  ;;  %v3582_v22 = vpop.f32.mrf.mxu3  ;;  %16532 = vst [vmem:[#allocation197_spill] sm:$0xff] %v12437_v52  ;;  %v465_v0 = vsel %vm328_vm0, %v243_v62, 0 }
 0x38c   : > { %16534 = vst [vmem:[#allocation475_spill] sm:$0xff] %v12442_v44 }
 0x38d   : > { %v3112_v26 = vadd.f32 %v3111_v43, %v2721_v8  ;;  %2490 = vmatmul.f32.gmra.mxu0 %v16535_v3  ;;  %2783 = vmatmul.f32.gmra.mxu1 %v16528_v9  ;;  %16537 = vst [vmem:[#allocation477_spill] sm:$0xff] %v12454_v41  ;;  %v2428_v8 = vadd.f32 %v2427_v12, %v16538_v19  ;;  %v16545_v19 = vld [vmem:[#allocation207_spill] sm:$0xff] }
 0x38f   : > { %v12447_v38 = vadd.f32 %v3582_v22, %v3112_v26  ;;  %3649 = vmatmul.f32.gmra.mxu3 %v12400_v11  ;;  %v12463_v11 = vand.u32 4294901760, %v465_v0 }
 0x390   : > { %3246 = vmatmul.f32.gmra.mxu2 %v12437_v52  ;;  %v12461_v52 = vand.u32 4294901760, %v12454_v41 }
 0x391   : > { %16536 = vst [vmem:[#allocation476_spill] sm:$0xff] %v12447_v38  ;;  %v12458_v38 = vand.u32 4294901760, %v3252_v33  ;;  %v12475_v33 = vsub.f32 %v465_v0, %v12463_v11  ;;  %v247_v0 = vld [vmem:[%s10061_s12 + $0x2f8] sm:$0xff] }
 0x392   : > { %v2431_v1 = vpop.f32.mrf.mxu0  ;;  %v2724_v43 = vpop.f32.mrf.mxu1  ;;  %16540 = vst [vmem:[#allocation478_spill] sm:$0xff] %v12461_v52  ;;  %v3260_v62 = vsub.f32 %v12454_v41, %v12461_v52  ;;  %v16549_v41 = vld [vmem:[#allocation195_spill] sm:$0xff] }
 0x393   : > { %v2725_v9 = vadd.f32 %v2724_v43, %v2428_v8  ;;  %v3119_v26 = vpop.f32.mrf.mxu2  ;;  %v3586_v22 = vpop.f32.mrf.mxu3  ;;  %16539 = vst [vmem:[#allocation202_spill] sm:$0xff] %v12458_v38  ;;  %v468_v8 = vsel %vm328_vm0, %v245_v10, 0 }
 0x394   : > { %16541 = vst [vmem:[#allocation479_spill] sm:$0xff] %v12463_v11 }
 0x395   : > { %v3120_v48 = vadd.f32 %v3119_v26, %v2725_v9  ;;  %2494 = vmatmul.f32.gmra.mxu0 %v16542_v58  ;;  %2787 = vmatmul.f32.gmra.mxu1 %v16535_v3  ;;  %16544 = vst [vmem:[#allocation481_spill] sm:$0xff] %v12475_v33  ;;  %v2432_v9 = vadd.f32 %v2431_v1, %v16545_v19  ;;  %v16552_v19 = vld [vmem:[#allocation212_spill] sm:$0xff] }
 0x397   : > { %v12468_v12 = vadd.f32 %v3586_v22, %v3120_v48  ;;  %3653 = vmatmul.f32.gmra.mxu3 %v12421_v46  ;;  %v12484_v46 = vand.u32 4294901760, %v468_v8 }
 0x398   : > { %3254 = vmatmul.f32.gmra.mxu2 %v12458_v38  ;;  %v12482_v38 = vand.u32 4294901760, %v12475_v33 }
 0x399   : > { %16543 = vst [vmem:[#allocation480_spill] sm:$0xff] %v12468_v12  ;;  %v12479_v12 = vand.u32 4294901760, %v3260_v62  ;;  %v12496_v62 = vsub.f32 %v468_v8, %v12484_v46  ;;  %v249_v8 = vld [vmem:[%s10061_s12 + $0x308] sm:$0xff] }
 0x39a   : > { %v2435_v43 = vpop.f32.mrf.mxu0  ;;  %v2728_v26 = vpop.f32.mrf.mxu1  ;;  %16547 = vst [vmem:[#allocation482_spill] sm:$0xff] %v12482_v38  ;;  %v3268_v10 = vsub.f32 %v12475_v33, %v12482_v38  ;;  %v16556_v33 = vld [vmem:[#allocation200_spill] sm:$0xff] }
 0x39b   : > { %v2729_v3 = vadd.f32 %v2728_v26, %v2432_v9  ;;  %v3127_v48 = vpop.f32.mrf.mxu2  ;;  %v3590_v22 = vpop.f32.mrf.mxu3  ;;  %16546 = vst [vmem:[#allocation207_spill] sm:$0xff] %v12479_v12  ;;  %v471_v9 = vsel %vm328_vm0, %v247_v0, 0 }
 0x39c   : > { %16548 = vst [vmem:[#allocation483_spill] sm:$0xff] %v12484_v46 }
 0x39d   : > { %v3128_v52 = vadd.f32 %v3127_v48, %v2729_v3  ;;  %2498 = vmatmul.f32.gmra.mxu0 %v16549_v41  ;;  %2791 = vmatmul.f32.gmra.mxu1 %v16542_v58  ;;  %16551 = vst [vmem:[#allocation485_spill] sm:$0xff] %v12496_v62  ;;  %v2436_v3 = vadd.f32 %v2435_v43, %v16552_v19  ;;  %v16559_v19 = vld [vmem:[#allocation217_spill] sm:$0xff] }
 0x39f   : > { %v12489_v1 = vadd.f32 %v3590_v22, %v3128_v52  ;;  %3657 = vmatmul.f32.gmra.mxu3 %v12442_v44  ;;  %v12505_v44 = vand.u32 4294901760, %v471_v9 }
 0x3a0   : > { %3262 = vmatmul.f32.gmra.mxu2 %v12479_v12  ;;  %v12503_v12 = vand.u32 4294901760, %v12496_v62 }
 0x3a1   : > { %16550 = vst [vmem:[#allocation484_spill] sm:$0xff] %v12489_v1  ;;  %v12500_v1 = vand.u32 4294901760, %v3268_v10  ;;  %v12517_v10 = vsub.f32 %v471_v9, %v12505_v44  ;;  %v251_v9 = vld [vmem:[%s10061_s12 + $0x318] sm:$0xff] }
 0x3a2   : > { %v2439_v26 = vpop.f32.mrf.mxu0  ;;  %v2732_v48 = vpop.f32.mrf.mxu1  ;;  %16554 = vst [vmem:[#allocation486_spill] sm:$0xff] %v12503_v12  ;;  %v3276_v0 = vsub.f32 %v12496_v62, %v12503_v12  ;;  %v16563_v62 = vld [vmem:[#allocation205_spill] sm:$0xff] }
 0x3a3   : > { %v2733_v58 = vadd.f32 %v2732_v48, %v2436_v3  ;;  %v3135_v52 = vpop.f32.mrf.mxu2  ;;  %v3594_v22 = vpop.f32.mrf.mxu3  ;;  %16553 = vst [vmem:[#allocation212_spill] sm:$0xff] %v12500_v1  ;;  %v474_v3 = vsel %vm328_vm0, %v249_v8, 0 }
 0x3a4   : > { %16555 = vst [vmem:[#allocation487_spill] sm:$0xff] %v12505_v44 }
 0x3a5   : > { %v3136_v38 = vadd.f32 %v3135_v52, %v2733_v58  ;;  %2502 = vmatmul.f32.gmra.mxu0 %v16556_v33  ;;  %2795 = vmatmul.f32.gmra.mxu1 %v16549_v41  ;;  %16558 = vst [vmem:[#allocation489_spill] sm:$0xff] %v12517_v10  ;;  %v2440_v58 = vadd.f32 %v2439_v26, %v16559_v19  ;;  %v16566_v19 = vld [vmem:[#allocation222_spill] sm:$0xff] }
 0x3a7   : > { %v12510_v43 = vadd.f32 %v3594_v22, %v3136_v38  ;;  %3661 = vmatmul.f32.gmra.mxu3 %v12463_v11  ;;  %v12526_v11 = vand.u32 4294901760, %v474_v3 }
 0x3a8   : > { %3270 = vmatmul.f32.gmra.mxu2 %v12500_v1  ;;  %v12524_v1 = vand.u32 4294901760, %v12517_v10 }
 0x3a9   : > { %16557 = vst [vmem:[#allocation488_spill] sm:$0xff] %v12510_v43  ;;  %v12521_v43 = vand.u32 4294901760, %v3276_v0  ;;  %v12538_v0 = vsub.f32 %v474_v3, %v12526_v11  ;;  %v253_v3 = vld [vmem:[%s10061_s12 + $0x328] sm:$0xff] }
 0x3aa   : > { %v2443_v48 = vpop.f32.mrf.mxu0  ;;  %v2736_v52 = vpop.f32.mrf.mxu1  ;;  %16561 = vst [vmem:[#allocation490_spill] sm:$0xff] %v12524_v1  ;;  %v3284_v8 = vsub.f32 %v12517_v10, %v12524_v1  ;;  %v16570_v10 = vld [vmem:[#allocation210_spill] sm:$0xff] }
 0x3ab   : > { %v2737_v41 = vadd.f32 %v2736_v52, %v2440_v58  ;;  %v3143_v38 = vpop.f32.mrf.mxu2  ;;  %v3598_v22 = vpop.f32.mrf.mxu3  ;;  %16560 = vst [vmem:[#allocation217_spill] sm:$0xff] %v12521_v43  ;;  %v477_v58 = vsel %vm328_vm0, %v251_v9, 0 }
 0x3ac   : > { %16562 = vst [vmem:[#allocation491_spill] sm:$0xff] %v12526_v11 }
 0x3ad   : > { %v3144_v12 = vadd.f32 %v3143_v38, %v2737_v41  ;;  %2506 = vmatmul.f32.gmra.mxu0 %v16563_v62  ;;  %2799 = vmatmul.f32.gmra.mxu1 %v16556_v33  ;;  %16565 = vst [vmem:[#allocation493_spill] sm:$0xff] %v12538_v0  ;;  %v2444_v41 = vadd.f32 %v2443_v48, %v16566_v19  ;;  %v16573_v19 = vld [vmem:[#allocation227_spill] sm:$0xff] }
 0x3af   : > { %v12531_v26 = vadd.f32 %v3598_v22, %v3144_v12  ;;  %3665 = vmatmul.f32.gmra.mxu3 %v12484_v46  ;;  %v12547_v46 = vand.u32 4294901760, %v477_v58 }
 0x3b0   : > { %3278 = vmatmul.f32.gmra.mxu2 %v12521_v43  ;;  %v12545_v43 = vand.u32 4294901760, %v12538_v0 }
 0x3b1   : > { %16564 = vst [vmem:[#allocation492_spill] sm:$0xff] %v12531_v26  ;;  %v12542_v26 = vand.u32 4294901760, %v3284_v8  ;;  %v12559_v8 = vsub.f32 %v477_v58, %v12547_v46  ;;  %v255_v58 = vld [vmem:[%s10061_s12 + $0x338] sm:$0xff] }
 0x3b2   : > { %v2447_v52 = vpop.f32.mrf.mxu0  ;;  %v2740_v38 = vpop.f32.mrf.mxu1  ;;  %16568 = vst [vmem:[#allocation494_spill] sm:$0xff] %v12545_v43  ;;  %v3292_v9 = vsub.f32 %v12538_v0, %v12545_v43  ;;  %v16577_v0 = vld [vmem:[#allocation215_spill] sm:$0xff] }
 0x3b3   : > { %v2741_v33 = vadd.f32 %v2740_v38, %v2444_v41  ;;  %v3151_v12 = vpop.f32.mrf.mxu2  ;;  %v3602_v22 = vpop.f32.mrf.mxu3  ;;  %16567 = vst [vmem:[#allocation222_spill] sm:$0xff] %v12542_v26  ;;  %v480_v41 = vsel %vm328_vm0, %v253_v3, 0 }
 0x3b4   : > { %16569 = vst [vmem:[#allocation495_spill] sm:$0xff] %v12547_v46 }
 0x3b5   : > { %v3152_v1 = vadd.f32 %v3151_v12, %v2741_v33  ;;  %2510 = vmatmul.f32.gmra.mxu0 %v16570_v10  ;;  %2803 = vmatmul.f32.gmra.mxu1 %v16563_v62  ;;  %16572 = vst [vmem:[#allocation497_spill] sm:$0xff] %v12559_v8  ;;  %v2448_v33 = vadd.f32 %v2447_v52, %v16573_v19  ;;  %v16580_v19 = vld [vmem:[#allocation232_spill] sm:$0xff] }
 0x3b7   : > { %v12552_v48 = vadd.f32 %v3602_v22, %v3152_v1  ;;  %3669 = vmatmul.f32.gmra.mxu3 %v12505_v44  ;;  %v12568_v44 = vand.u32 4294901760, %v480_v41 }
 0x3b8   : > { %3286 = vmatmul.f32.gmra.mxu2 %v12542_v26  ;;  %v12566_v26 = vand.u32 4294901760, %v12559_v8 }
 0x3b9   : > { %16571 = vst [vmem:[#allocation496_spill] sm:$0xff] %v12552_v48  ;;  %v12563_v48 = vand.u32 4294901760, %v3292_v9  ;;  %v12580_v9 = vsub.f32 %v480_v41, %v12568_v44  ;;  %v257_v41 = vld [vmem:[%s10061_s12 + $0x348] sm:$0xff] }
 0x3ba   : > { %v2451_v38 = vpop.f32.mrf.mxu0  ;;  %v2744_v12 = vpop.f32.mrf.mxu1  ;;  %16575 = vst [vmem:[#allocation498_spill] sm:$0xff] %v12566_v26  ;;  %v3300_v3 = vsub.f32 %v12559_v8, %v12566_v26  ;;  %v16584_v8 = vld [vmem:[#allocation220_spill] sm:$0xff] }
 0x3bb   : > { %v2745_v62 = vadd.f32 %v2744_v12, %v2448_v33  ;;  %v3159_v1 = vpop.f32.mrf.mxu2  ;;  %v3606_v22 = vpop.f32.mrf.mxu3  ;;  %16574 = vst [vmem:[#allocation227_spill] sm:$0xff] %v12563_v48  ;;  %v483_v33 = vsel %vm328_vm0, %v255_v58, 0 }
 0x3bc   : > { %16576 = vst [vmem:[#allocation499_spill] sm:$0xff] %v12568_v44 }
 0x3bd   : > { %v3160_v43 = vadd.f32 %v3159_v1, %v2745_v62  ;;  %2514 = vmatmul.f32.gmra.mxu0 %v16577_v0  ;;  %2807 = vmatmul.f32.gmra.mxu1 %v16570_v10  ;;  %16579 = vst [vmem:[#allocation501_spill] sm:$0xff] %v12580_v9  ;;  %v2452_v62 = vadd.f32 %v2451_v38, %v16580_v19  ;;  %v16587_v19 = vld [vmem:[#allocation237_spill] sm:$0xff] }
 0x3bf   : > { %v12573_v52 = vadd.f32 %v3606_v22, %v3160_v43  ;;  %3673 = vmatmul.f32.gmra.mxu3 %v12526_v11  ;;  %v12589_v11 = vand.u32 4294901760, %v483_v33 }
 0x3c0   : > { %3294 = vmatmul.f32.gmra.mxu2 %v12563_v48  ;;  %v12587_v48 = vand.u32 4294901760, %v12580_v9 }
 0x3c1   : > { %16578 = vst [vmem:[#allocation500_spill] sm:$0xff] %v12573_v52  ;;  %v12584_v52 = vand.u32 4294901760, %v3300_v3  ;;  %v12601_v3 = vsub.f32 %v483_v33, %v12589_v11  ;;  %v259_v33 = vld [vmem:[%s10061_s12 + $0x358] sm:$0xff] }
 0x3c2   : > { %v2455_v12 = vpop.f32.mrf.mxu0  ;;  %v2748_v1 = vpop.f32.mrf.mxu1  ;;  %16582 = vst [vmem:[#allocation502_spill] sm:$0xff] %v12587_v48  ;;  %v3308_v58 = vsub.f32 %v12580_v9, %v12587_v48  ;;  %v16591_v9 = vld [vmem:[#allocation225_spill] sm:$0xff] }
 0x3c3   : > { %v2749_v10 = vadd.f32 %v2748_v1, %v2452_v62  ;;  %v3167_v43 = vpop.f32.mrf.mxu2  ;;  %v3610_v22 = vpop.f32.mrf.mxu3  ;;  %16581 = vst [vmem:[#allocation232_spill] sm:$0xff] %v12584_v52  ;;  %v486_v62 = vsel %vm328_vm0, %v257_v41, 0 }
 0x3c4   : > { %16583 = vst [vmem:[#allocation503_spill] sm:$0xff] %v12589_v11 }
 0x3c5   : > { %v3168_v26 = vadd.f32 %v3167_v43, %v2749_v10  ;;  %2518 = vmatmul.f32.gmra.mxu0 %v16584_v8  ;;  %2811 = vmatmul.f32.gmra.mxu1 %v16577_v0  ;;  %16586 = vst [vmem:[#allocation505_spill] sm:$0xff] %v12601_v3  ;;  %v2456_v10 = vadd.f32 %v2455_v12, %v16587_v19  ;;  %v16594_v19 = vld [vmem:[#allocation242_spill] sm:$0xff] }
 0x3c7   : > { %v12594_v38 = vadd.f32 %v3610_v22, %v3168_v26  ;;  %3677 = vmatmul.f32.gmra.mxu3 %v12547_v46  ;;  %v12610_v46 = vand.u32 4294901760, %v486_v62 }
 0x3c8   : > { %3302 = vmatmul.f32.gmra.mxu2 %v12584_v52  ;;  %v12608_v52 = vand.u32 4294901760, %v12601_v3 }
 0x3c9   : > { %16585 = vst [vmem:[#allocation504_spill] sm:$0xff] %v12594_v38  ;;  %v12605_v38 = vand.u32 4294901760, %v3308_v58  ;;  %v12622_v58 = vsub.f32 %v486_v62, %v12610_v46  ;;  %v261_v62 = vld [vmem:[%s10061_s12 + $0x368] sm:$0xff] }
 0x3ca   : > { %v2459_v1 = vpop.f32.mrf.mxu0  ;;  %v2752_v43 = vpop.f32.mrf.mxu1  ;;  %16589 = vst [vmem:[#allocation506_spill] sm:$0xff] %v12608_v52  ;;  %v3316_v41 = vsub.f32 %v12601_v3, %v12608_v52 }
 0x3cb   : > { %v2753_v0 = vadd.f32 %v2752_v43, %v2456_v10  ;;  %v3175_v26 = vpop.f32.mrf.mxu2  ;;  %v3614_v22 = vpop.f32.mrf.mxu3  ;;  %16588 = vst [vmem:[#allocation237_spill] sm:$0xff] %v12605_v38  ;;  %v489_v10 = vsel %vm328_vm0, %v259_v33, 0 }
 0x3cc   : > { %16590 = vst [vmem:[#allocation507_spill] sm:$0xff] %v12610_v46 }
 0x3cd   : > { %v3176_v48 = vadd.f32 %v3175_v26, %v2753_v0  ;;  %2522 = vmatmul.f32.gmra.mxu0 %v16591_v9  ;;  %2815 = vmatmul.f32.gmra.mxu1 %v16584_v8  ;;  %16593 = vst [vmem:[#allocation509_spill] sm:$0xff] %v12622_v58  ;;  %v2460_v0 = vadd.f32 %v2459_v1, %v16594_v19  ;;  %v492_v19 = vsel %vm328_vm0, %v261_v62, 0 }
 0x3cf   : > { %v12615_v12 = vadd.f32 %v3614_v22, %v3176_v48  ;;  %3681 = vmatmul.f32.gmra.mxu3 %v12568_v44  ;;  %v12631_v44 = vand.u32 4294901760, %v489_v10 }
 0x3d0   : > { %3310 = vmatmul.f32.gmra.mxu2 %v12605_v38  ;;  %v12629_v38 = vand.u32 4294901760, %v12622_v58 }
 0x3d1   : > { %16592 = vst [vmem:[#allocation508_spill] sm:$0xff] %v12615_v12  ;;  %v12626_v12 = vand.u32 4294901760, %v3316_v41  ;;  %v12643_v41 = vsub.f32 %v489_v10, %v12631_v44 }
 0x3d2   : > { %v2463_v43 = vpop.f32.mrf.mxu0  ;;  %v2756_v26 = vpop.f32.mrf.mxu1  ;;  %16596 = vst [vmem:[#allocation510_spill] sm:$0xff] %v12629_v38  ;;  %v3324_v33 = vsub.f32 %v12622_v58, %v12629_v38 }
 0x3d3   : > { %v2757_v8 = vadd.f32 %v2756_v26, %v2460_v0  ;;  %v3183_v48 = vpop.f32.mrf.mxu2  ;;  %v3618_v22 = vpop.f32.mrf.mxu3  ;;  %16595 = vst [vmem:[#allocation242_spill] sm:$0xff] %v12626_v12 }
 0x3d4   : > { %16597 = vst [vmem:[#allocation511_spill] sm:$0xff] %v12631_v44 }
 0x3d5   : > { %v3184_v52 = vadd.f32 %v3183_v48, %v2757_v8  ;;  %2526 = vmatmul.f32.gmra.mxu0 %v11226_v7  ;;  %2819 = vmatmul.f32.gmra.mxu1 %v16591_v9  ;;  %16598 = vst [vmem:[#allocation512_spill] sm:$0xff] %v12643_v41  ;;  %v2464_v8 = vadd.f32 %v2463_v43, %v11305_v28  ;;  %v12647_v9 = vand.u32 4294901760, %v3324_v33  ;;  %v263_v28 = vld [vmem:[%s10061_s12 + $0x378] sm:$0xff] }
 0x3d7   : > { %v12636_v1 = vadd.f32 %v3618_v22, %v3184_v52  ;;  %3685 = vmatmul.f32.gmra.mxu3 %v12589_v11  ;;  %16599 = vst [vmem:[#allocation513_spill] sm:$0xff] %v12647_v9  ;;  %v12652_v11 = vand.u32 4294901760, %v492_v19 }
 0x3d8   : > { %3318 = vmatmul.f32.gmra.mxu2 %v12626_v12  ;;  %v12650_v12 = vand.u32 4294901760, %v12643_v41 }
 0x3d9   : > { %16601 = vst [vmem:[#allocation515_spill] sm:$0xff] %v12652_v11  ;;  %v12664_v62 = vsub.f32 %v492_v19, %v12652_v11 }
 0x3da   : > { %v2467_v0 = vpop.f32.mrf.mxu0  ;;  %v2760_v26 = vpop.f32.mrf.mxu1  ;;  %16600 = vst [vmem:[#allocation514_spill] sm:$0xff] %v12650_v12  ;;  %v3332_v43 = vsub.f32 %v12643_v41, %v12650_v12 }
 0x3db   : > { %v2761_v48 = vadd.f32 %v2760_v26, %v2464_v8  ;;  %v3191_v52 = vpop.f32.mrf.mxu2  ;;  %v3622_v22 = vpop.f32.mrf.mxu3  ;;  %16602 = vst [vmem:[#allocation516_spill] sm:$0xff] %v12664_v62  ;;  %v2468_v33 = vadd.f32 %v2467_v0, %v11332_v37  ;;  %v495_v8 = vsel %vm328_vm0, %v263_v28, 0  ;;  %v265_v37 = vld [vmem:[%s10061_s12 + $0x388] sm:$0xff] }
 0x3dd   : > { %v3192_v38 = vadd.f32 %v3191_v52, %v2761_v48  ;;  %2530 = vmatmul.f32.gmra.mxu0 %v11245_v17  ;;  %2823 = vmatmul.f32.gmra.mxu1 %v11226_v7  ;;  %v12668_v7 = vand.u32 4294901760, %v3332_v43 }
 0x3df   : > { %v12657_v10 = vadd.f32 %v3622_v22, %v3192_v38  ;;  %3689 = vmatmul.f32.gmra.mxu3 %v12610_v46  ;;  %16603 = vst [vmem:[#allocation517_spill] sm:$0xff] %v12668_v7  ;;  %v12673_v46 = vand.u32 4294901760, %v495_v8 }
 0x3e0   : > { %3326 = vmatmul.f32.gmra.mxu2 %v12647_v9  ;;  %v12671_v9 = vand.u32 4294901760, %v12664_v62 }
 0x3e1   : > { %16605 = vst [vmem:[#allocation519_spill] sm:$0xff] %v12673_v46  ;;  %v12685_v28 = vsub.f32 %v495_v8, %v12673_v46 }
 0x3e2   : > { %v2471_v26 = vpop.f32.mrf.mxu0  ;;  %v2764_v48 = vpop.f32.mrf.mxu1  ;;  %16604 = vst [vmem:[#allocation518_spill] sm:$0xff] %v12671_v9  ;;  %v3340_v0 = vsub.f32 %v12664_v62, %v12671_v9 }
 0x3e3   : > { %v2765_v52 = vadd.f32 %v2764_v48, %v2468_v33  ;;  %v3199_v38 = vpop.f32.mrf.mxu2  ;;  %v3626_v22 = vpop.f32.mrf.mxu3  ;;  %16606 = vst [vmem:[#allocation520_spill] sm:$0xff] %v12685_v28  ;;  %v2472_v43 = vadd.f32 %v2471_v26, %v11355_v30  ;;  %v498_v33 = vsel %vm328_vm0, %v265_v37, 0  ;;  %v267_v30 = vld [vmem:[%s10061_s12 + $0x398] sm:$0xff] }
 0x3e5   : > { %v3200_v12 = vadd.f32 %v3199_v38, %v2765_v52  ;;  %2534 = vmatmul.f32.gmra.mxu0 %v11264_v2  ;;  %2827 = vmatmul.f32.gmra.mxu1 %v11245_v17  ;;  %v12689_v17 = vand.u32 4294901760, %v3340_v0 }
 0x3e7   : > { %v12678_v19 = vadd.f32 %v3626_v22, %v3200_v12  ;;  %3693 = vmatmul.f32.gmra.mxu3 %v12631_v44  ;;  %16607 = vst [vmem:[#allocation521_spill] sm:$0xff] %v12689_v17  ;;  %v12694_v44 = vand.u32 4294901760, %v498_v33 }
 0x3e8   : > { %3334 = vmatmul.f32.gmra.mxu2 %v12668_v7  ;;  %v12692_v7 = vand.u32 4294901760, %v12685_v28 }
 0x3e9   : > { %16609 = vst [vmem:[#allocation523_spill] sm:$0xff] %v12694_v44  ;;  %v12706_v37 = vsub.f32 %v498_v33, %v12694_v44 }
 0x3ea   : > { %v2475_v48 = vpop.f32.mrf.mxu0  ;;  %v2768_v52 = vpop.f32.mrf.mxu1  ;;  %16608 = vst [vmem:[#allocation522_spill] sm:$0xff] %v12692_v7  ;;  %v3348_v26 = vsub.f32 %v12685_v28, %v12692_v7 }
 0x3eb   : > { %v2769_v38 = vadd.f32 %v2768_v52, %v2472_v43  ;;  %v3207_v12 = vpop.f32.mrf.mxu2  ;;  %v3630_v22 = vpop.f32.mrf.mxu3  ;;  %16610 = vst [vmem:[#allocation524_spill] sm:$0xff] %v12706_v37  ;;  %v2476_v0 = vadd.f32 %v2475_v48, %v11374_v20  ;;  %v501_v43 = vsel %vm328_vm0, %v267_v30, 0  ;;  %v269_v20 = vld [vmem:[%s10061_s12 + $0x3a8] sm:$0xff] }
 0x3ed   : > { %v3208_v9 = vadd.f32 %v3207_v12, %v2769_v38  ;;  %2538 = vmatmul.f32.gmra.mxu0 %v11286_v40  ;;  %2831 = vmatmul.f32.gmra.mxu1 %v11264_v2  ;;  %v12710_v2 = vand.u32 4294901760, %v3348_v26 }
 0x3ef   : > { %v12699_v8 = vadd.f32 %v3630_v22, %v3208_v9  ;;  %3697 = vmatmul.f32.gmra.mxu3 %v12652_v11  ;;  %16611 = vst [vmem:[#allocation525_spill] sm:$0xff] %v12710_v2  ;;  %v12715_v11 = vand.u32 4294901760, %v501_v43 }
 0x3f0   : > { %3342 = vmatmul.f32.gmra.mxu2 %v12689_v17  ;;  %v12713_v17 = vand.u32 4294901760, %v12706_v37 }
 0x3f1   : > { %16613 = vst [vmem:[#allocation527_spill] sm:$0xff] %v12715_v11  ;;  %v12727_v30 = vsub.f32 %v501_v43, %v12715_v11 }
 0x3f2   : > { %v2479_v52 = vpop.f32.mrf.mxu0  ;;  %v2772_v38 = vpop.f32.mrf.mxu1  ;;  %16612 = vst [vmem:[#allocation526_spill] sm:$0xff] %v12713_v17  ;;  %v3356_v48 = vsub.f32 %v12706_v37, %v12713_v17 }
 0x3f3   : > { %v2773_v12 = vadd.f32 %v2772_v38, %v2476_v0  ;;  %v3215_v9 = vpop.f32.mrf.mxu2  ;;  %v3634_v22 = vpop.f32.mrf.mxu3  ;;  %16614 = vst [vmem:[#allocation528_spill] sm:$0xff] %v12727_v30  ;;  %v2480_v26 = vadd.f32 %v2479_v52, %v11393_v55  ;;  %v504_v0 = vsel %vm328_vm0, %v269_v20, 0  ;;  %v271_v55 = vld [vmem:[%s10061_s12 + $0x3b8] sm:$0xff] }
 0x3f5   : > { %v3216_v7 = vadd.f32 %v3215_v9, %v2773_v12  ;;  %2542 = vmatmul.f32.gmra.mxu0 %v11314_v4  ;;  %2835 = vmatmul.f32.gmra.mxu1 %v11286_v40  ;;  %v12731_v40 = vand.u32 4294901760, %v3356_v48  ;;  %v16619_v48 = vld [vmem:[#allocation267_spill] sm:$0xff] }
 0x3f7   : > { %v12720_v33 = vadd.f32 %v3634_v22, %v3216_v7  ;;  %3701 = vmatmul.f32.gmra.mxu3 %v12673_v46  ;;  %16615 = vst [vmem:[#allocation529_spill] sm:$0xff] %v12731_v40  ;;  %v12736_v46 = vand.u32 4294901760, %v504_v0 }
 0x3f8   : > { %3350 = vmatmul.f32.gmra.mxu2 %v12710_v2  ;;  %v12734_v2 = vand.u32 4294901760, %v12727_v30 }
 0x3f9   : > { %16617 = vst [vmem:[#allocation531_spill] sm:$0xff] %v12736_v46  ;;  %v12748_v20 = vsub.f32 %v504_v0, %v12736_v46  ;;  %v273_v0 = vld [vmem:[%s10061_s12 + $0x3c8] sm:$0xff] }
 0x3fa   : > { %v2483_v38 = vpop.f32.mrf.mxu0  ;;  %v2776_v12 = vpop.f32.mrf.mxu1  ;;  %16616 = vst [vmem:[#allocation530_spill] sm:$0xff] %v12734_v2  ;;  %v3364_v52 = vsub.f32 %v12727_v30, %v12734_v2  ;;  %v16623_v30 = vld [vmem:[#allocation257_spill] sm:$0xff] }
 0x3fb   : > { %v2777_v9 = vadd.f32 %v2776_v12, %v2480_v26  ;;  %v3223_v7 = vpop.f32.mrf.mxu2  ;;  %v3638_v22 = vpop.f32.mrf.mxu3  ;;  %16618 = vst [vmem:[#allocation532_spill] sm:$0xff] %v12748_v20  ;;  %v2484_v26 = vadd.f32 %v2483_v38, %v16619_v48  ;;  %v507_v12 = vsel %vm328_vm0, %v271_v55, 0  ;;  %v16626_v48 = vld [vmem:[#allocation272_spill] sm:$0xff] }
 0x3fc   : > { %v12752_v37 = vand.u32 4294901760, %v3364_v52 }
 0x3fd   : > { %v3224_v17 = vadd.f32 %v3223_v7, %v2777_v9  ;;  %2546 = vmatmul.f32.gmra.mxu0 %v11342_v21  ;;  %2839 = vmatmul.f32.gmra.mxu1 %v11314_v4 }
 0x3fe   : > { %16620 = vst [vmem:[#allocation267_spill] sm:$0xff] %v12752_v37 }
 0x3ff   : > { %v12741_v43 = vadd.f32 %v3638_v22, %v3224_v17  ;;  %3705 = vmatmul.f32.gmra.mxu3 %v12694_v44  ;;  %v12757_v44 = vand.u32 4294901760, %v507_v12 }
 0x400   : > { %3358 = vmatmul.f32.gmra.mxu2 %v12731_v40  ;;  %v12755_v40 = vand.u32 4294901760, %v12748_v20 }
 0x401   : > { %16622 = vst [vmem:[#allocation534_spill] sm:$0xff] %v12757_v44  ;;  %v12769_v52 = vsub.f32 %v507_v12, %v12757_v44  ;;  %v275_v12 = vld [vmem:[%s10061_s12 + $0x3d8] sm:$0xff] }
 0x402   : > { %v2487_v9 = vpop.f32.mrf.mxu0  ;;  %v2780_v7 = vpop.f32.mrf.mxu1  ;;  %16621 = vst [vmem:[#allocation533_spill] sm:$0xff] %v12755_v40  ;;  %v3372_v55 = vsub.f32 %v12748_v20, %v12755_v40  ;;  %v16630_v20 = vld [vmem:[#allocation261_spill] sm:$0xff] }
 0x403   : > { %v2781_v4 = vadd.f32 %v2780_v7, %v2484_v26  ;;  %v3231_v17 = vpop.f32.mrf.mxu2  ;;  %v3642_v22 = vpop.f32.mrf.mxu3  ;;  %16625 = vst [vmem:[#allocation536_spill] sm:$0xff] %v12769_v52  ;;  %v510_v26 = vsel %vm328_vm0, %v273_v0, 0 }
 0x405   : > { %v3232_v2 = vadd.f32 %v3231_v17, %v2781_v4  ;;  %2550 = vmatmul.f32.gmra.mxu0 %v16623_v30  ;;  %2843 = vmatmul.f32.gmra.mxu1 %v11342_v21  ;;  %v2488_v4 = vadd.f32 %v2487_v9, %v16626_v48  ;;  %v16633_v48 = vld [vmem:[#allocation277_spill] sm:$0xff] }
 0x407   : > { %v12762_v38 = vadd.f32 %v3642_v22, %v3232_v2  ;;  %3709 = vmatmul.f32.gmra.mxu3 %v12715_v11  ;;  %v12778_v11 = vand.u32 4294901760, %v510_v26 }
 0x408   : > { %3366 = vmatmul.f32.gmra.mxu2 %v12752_v37  ;;  %v12776_v37 = vand.u32 4294901760, %v12769_v52 }
 0x409   : > { %16624 = vst [vmem:[#allocation535_spill] sm:$0xff] %v12762_v38  ;;  %v12773_v38 = vand.u32 4294901760, %v3372_v55  ;;  %v12790_v55 = vsub.f32 %v510_v26, %v12778_v11  ;;  %v277_v26 = vld [vmem:[%s10061_s12 + $0x3e8] sm:$0xff] }
 0x40a   : > { %v2491_v7 = vpop.f32.mrf.mxu0  ;;  %v2784_v17 = vpop.f32.mrf.mxu1  ;;  %16628 = vst [vmem:[#allocation537_spill] sm:$0xff] %v12776_v37  ;;  %v3380_v0 = vsub.f32 %v12769_v52, %v12776_v37  ;;  %v16637_v52 = vld [vmem:[#allocation265_spill] sm:$0xff] }
 0x40b   : > { %v2785_v21 = vadd.f32 %v2784_v17, %v2488_v4  ;;  %v3239_v2 = vpop.f32.mrf.mxu2  ;;  %v3646_v22 = vpop.f32.mrf.mxu3  ;;  %16627 = vst [vmem:[#allocation272_spill] sm:$0xff] %v12773_v38  ;;  %v513_v4 = vsel %vm328_vm0, %v275_v12, 0 }
 0x40c   : > { %16629 = vst [vmem:[#allocation538_spill] sm:$0xff] %v12778_v11 }
 0x40d   : > { %v3240_v40 = vadd.f32 %v3239_v2, %v2785_v21  ;;  %2554 = vmatmul.f32.gmra.mxu0 %v16630_v20  ;;  %2847 = vmatmul.f32.gmra.mxu1 %v16623_v30  ;;  %16632 = vst [vmem:[#allocation540_spill] sm:$0xff] %v12790_v55  ;;  %v2492_v21 = vadd.f32 %v2491_v7, %v16633_v48  ;;  %v16640_v48 = vld [vmem:[#allocation282_spill] sm:$0xff] }
 0x40f   : > { %v12783_v9 = vadd.f32 %v3646_v22, %v3240_v40  ;;  %3713 = vmatmul.f32.gmra.mxu3 %v12736_v46  ;;  %v12799_v46 = vand.u32 4294901760, %v513_v4 }
 0x410   : > { %3374 = vmatmul.f32.gmra.mxu2 %v12773_v38  ;;  %v12797_v38 = vand.u32 4294901760, %v12790_v55 }
 0x411   : > { %16631 = vst [vmem:[#allocation539_spill] sm:$0xff] %v12783_v9  ;;  %v12794_v9 = vand.u32 4294901760, %v3380_v0  ;;  %v12811_v0 = vsub.f32 %v513_v4, %v12799_v46  ;;  %v279_v4 = vld [vmem:[%s10061_s12 + $0x3f8] sm:$0xff] }
 0x412   : > { %v2495_v17 = vpop.f32.mrf.mxu0  ;;  %v2788_v2 = vpop.f32.mrf.mxu1  ;;  %16635 = vst [vmem:[#allocation541_spill] sm:$0xff] %v12797_v38  ;;  %v3388_v12 = vsub.f32 %v12790_v55, %v12797_v38  ;;  %v16644_v55 = vld [vmem:[#allocation270_spill] sm:$0xff] }
 0x413   : > { %v2789_v30 = vadd.f32 %v2788_v2, %v2492_v21  ;;  %v3247_v40 = vpop.f32.mrf.mxu2  ;;  %v3650_v22 = vpop.f32.mrf.mxu3  ;;  %16634 = vst [vmem:[#allocation277_spill] sm:$0xff] %v12794_v9  ;;  %v516_v21 = vsel %vm328_vm0, %v277_v26, 0 }
 0x414   : > { %16636 = vst [vmem:[#allocation542_spill] sm:$0xff] %v12799_v46 }
 0x415   : > { %v3248_v37 = vadd.f32 %v3247_v40, %v2789_v30  ;;  %2558 = vmatmul.f32.gmra.mxu0 %v16637_v52  ;;  %2851 = vmatmul.f32.gmra.mxu1 %v16630_v20  ;;  %16639 = vst [vmem:[#allocation544_spill] sm:$0xff] %v12811_v0  ;;  %v2496_v30 = vadd.f32 %v2495_v17, %v16640_v48  ;;  %v16647_v48 = vld [vmem:[#allocation287_spill] sm:$0xff] }
 0x417   : > { %v12804_v7 = vadd.f32 %v3650_v22, %v3248_v37  ;;  %3717 = vmatmul.f32.gmra.mxu3 %v12757_v44  ;;  %v12820_v44 = vand.u32 4294901760, %v516_v21 }
 0x418   : > { %3382 = vmatmul.f32.gmra.mxu2 %v12794_v9  ;;  %v12818_v9 = vand.u32 4294901760, %v12811_v0 }
 0x419   : > { %16638 = vst [vmem:[#allocation543_spill] sm:$0xff] %v12804_v7  ;;  %v12815_v7 = vand.u32 4294901760, %v3388_v12  ;;  %v12832_v12 = vsub.f32 %v516_v21, %v12820_v44  ;;  %v281_v21 = vld [vmem:[%s10061_s12 + $0x408] sm:$0xff] }
 0x41a   : > { %v2499_v2 = vpop.f32.mrf.mxu0  ;;  %v2792_v40 = vpop.f32.mrf.mxu1  ;;  %16642 = vst [vmem:[#allocation545_spill] sm:$0xff] %v12818_v9  ;;  %v3396_v26 = vsub.f32 %v12811_v0, %v12818_v9  ;;  %v16651_v0 = vld [vmem:[#allocation275_spill] sm:$0xff] }
 0x41b   : > { %v2793_v20 = vadd.f32 %v2792_v40, %v2496_v30  ;;  %v3255_v37 = vpop.f32.mrf.mxu2  ;;  %v3654_v22 = vpop.f32.mrf.mxu3  ;;  %16641 = vst [vmem:[#allocation282_spill] sm:$0xff] %v12815_v7  ;;  %v519_v30 = vsel %vm328_vm0, %v279_v4, 0 }
 0x41c   : > { %16643 = vst [vmem:[#allocation546_spill] sm:$0xff] %v12820_v44 }
 0x41d   : > { %v3256_v38 = vadd.f32 %v3255_v37, %v2793_v20  ;;  %2562 = vmatmul.f32.gmra.mxu0 %v16644_v55  ;;  %2855 = vmatmul.f32.gmra.mxu1 %v16637_v52  ;;  %16646 = vst [vmem:[#allocation548_spill] sm:$0xff] %v12832_v12  ;;  %v2500_v20 = vadd.f32 %v2499_v2, %v16647_v48  ;;  %v16654_v48 = vld [vmem:[#allocation292_spill] sm:$0xff] }
 0x41f   : > { %v12825_v17 = vadd.f32 %v3654_v22, %v3256_v38  ;;  %3721 = vmatmul.f32.gmra.mxu3 %v12778_v11  ;;  %v12841_v11 = vand.u32 4294901760, %v519_v30 }
 0x420   : > { %3390 = vmatmul.f32.gmra.mxu2 %v12815_v7  ;;  %v12839_v7 = vand.u32 4294901760, %v12832_v12 }
 0x421   : > { %16645 = vst [vmem:[#allocation547_spill] sm:$0xff] %v12825_v17  ;;  %v12836_v17 = vand.u32 4294901760, %v3396_v26  ;;  %v12853_v26 = vsub.f32 %v519_v30, %v12841_v11  ;;  %v283_v30 = vld [vmem:[%s10061_s12 + $0x418] sm:$0xff] }
 0x422   : > { %v2503_v40 = vpop.f32.mrf.mxu0  ;;  %v2796_v37 = vpop.f32.mrf.mxu1  ;;  %16649 = vst [vmem:[#allocation549_spill] sm:$0xff] %v12839_v7  ;;  %v3404_v4 = vsub.f32 %v12832_v12, %v12839_v7  ;;  %v16658_v12 = vld [vmem:[#allocation280_spill] sm:$0xff] }
 0x423   : > { %v2797_v52 = vadd.f32 %v2796_v37, %v2500_v20  ;;  %v3263_v38 = vpop.f32.mrf.mxu2  ;;  %v3658_v22 = vpop.f32.mrf.mxu3  ;;  %16648 = vst [vmem:[#allocation287_spill] sm:$0xff] %v12836_v17  ;;  %v522_v20 = vsel %vm328_vm0, %v281_v21, 0 }
 0x424   : > { %16650 = vst [vmem:[#allocation550_spill] sm:$0xff] %v12841_v11 }
 0x425   : > { %v3264_v9 = vadd.f32 %v3263_v38, %v2797_v52  ;;  %2566 = vmatmul.f32.gmra.mxu0 %v16651_v0  ;;  %2859 = vmatmul.f32.gmra.mxu1 %v16644_v55  ;;  %16653 = vst [vmem:[#allocation552_spill] sm:$0xff] %v12853_v26  ;;  %v2504_v52 = vadd.f32 %v2503_v40, %v16654_v48 }
 0x427   : > { %v12846_v2 = vadd.f32 %v3658_v22, %v3264_v9  ;;  %3725 = vmatmul.f32.gmra.mxu3 %v12799_v46  ;;  %v12862_v46 = vand.u32 4294901760, %v522_v20 }
 0x428   : > { %3398 = vmatmul.f32.gmra.mxu2 %v12836_v17  ;;  %v12860_v17 = vand.u32 4294901760, %v12853_v26 }
 0x429   : > { %16652 = vst [vmem:[#allocation551_spill] sm:$0xff] %v12846_v2  ;;  %v12857_v2 = vand.u32 4294901760, %v3404_v4  ;;  %v12874_v4 = vsub.f32 %v522_v20, %v12862_v46 }
 0x42a   : > { %v2507_v37 = vpop.f32.mrf.mxu0  ;;  %v2800_v38 = vpop.f32.mrf.mxu1  ;;  %16656 = vst [vmem:[#allocation553_spill] sm:$0xff] %v12860_v17  ;;  %v3412_v21 = vsub.f32 %v12853_v26, %v12860_v17  ;;  %v16665_v26 = vld [vmem:[#allocation285_spill] sm:$0xff] }
 0x42b   : > { %v2801_v55 = vadd.f32 %v2800_v38, %v2504_v52  ;;  %v3271_v9 = vpop.f32.mrf.mxu2  ;;  %v3662_v22 = vpop.f32.mrf.mxu3  ;;  %16655 = vst [vmem:[#allocation292_spill] sm:$0xff] %v12857_v2  ;;  %v2508_v48 = vadd.f32 %v2507_v37, %v11526_v16  ;;  %v525_v52 = vsel %vm328_vm0, %v283_v30, 0  ;;  %v12891_v16 = vand.u32 4294901760, %v12874_v4 }
 0x42c   : > { %16657 = vst [vmem:[#allocation554_spill] sm:$0xff] %v12862_v46  ;;  %v12888_v20 = vand.u32 4294901760, %v3412_v21  ;;  %v12893_v37 = vand.u32 4294901760, %v525_v52 }
 0x42d   : > { %v3272_v7 = vadd.f32 %v3271_v9, %v2801_v55  ;;  %2570 = vmatmul.f32.gmra.mxu0 %v16658_v12  ;;  %2863 = vmatmul.f32.gmra.mxu1 %v16651_v0  ;;  %16660 = vst [vmem:[#allocation556_spill] sm:$0xff] %v12874_v4  ;;  %v315_v55 = vld [vmem:[%s15079_s1 + $0xf8] sm:$0xff] }
 0x42e   : > { %16662 = vst [vmem:[#allocation558_spill] sm:$0xff] %v12888_v20 }
 0x42f   : > { %v12867_v40 = vadd.f32 %v3662_v22, %v3272_v7  ;;  %3729 = vmatmul.f32.gmra.mxu3 %v12820_v44  ;;  %v12881_v7 = vand.u32 4294901760, %v315_v55  ;;  %16663 = vst [vmem:[#allocation559_spill] sm:$0xff] %v12891_v16 }
 0x430   : > { %3406 = vmatmul.f32.gmra.mxu2 %v12857_v2  ;;  %16664 = vst [vmem:[#allocation560_spill] sm:$0xff] %v12893_v37 }
 0x431   : > { %16659 = vst [vmem:[#allocation555_spill] sm:$0xff] %v12867_v40  ;;  %v12884_v17 = vsub.f32 %v315_v55, %v12881_v7  ;;  %5110 = vmatpush.msrb.mxu0 %v12881_v7  ;;  %6411 = vmatpush.msrb.mxu3 %v12881_v7 }
 0x432   : > { %16661 = vst [vmem:[#allocation557_spill] sm:$0xff] %v12881_v7  ;;  %v2511_v38 = vpop.f32.mrf.mxu0  ;;  %v2804_v9 = vpop.f32.mrf.mxu1  ;;  %v16670_v7 = vld [vmem:[#allocation290_spill] sm:$0xff] }
 0x433   : > { %v2805_v22 = vadd.f32 %v2804_v9, %v2508_v48  ;;  %v3279_v2 = vpop.f32.mrf.mxu2  ;;  %v3666_v0 = vpop.f32.mrf.mxu3  ;;  %v15881_v48 = vand.u32 4294901760, %v12884_v17  ;;  %6033 = vmatpush.msrb.mxu2 %v12884_v17  ;;  %v12909_v9 = vsub.f32 %v525_v52, %v12893_v37 }
 0x435   : > { %v3280_v30 = vadd.f32 %v3279_v2, %v2805_v22  ;;  %2574 = vmatmul.f32.gmra.mxu0 %v16665_v26  ;;  %2867 = vmatmul.f32.gmra.mxu1 %v16658_v12  ;;  %v5673_v21 = vsub.f32 %v12884_v17, %v15881_v48  ;;  %v3420_v2 = vsub.f32 %v12874_v4, %v12891_v16  ;;  %v12915_v48 = vand.u32 4294901760, %v12909_v9 }
 0x436   : > { %16667 = vst [vmem:[#allocation562_spill] sm:$0xff] %v12909_v9  ;;  %v2512_v22 = vadd.f32 %v2511_v38, %v11543_v25 }
 0x437   : > { %v12899_v55 = vadd.f32 %v3666_v0, %v3280_v30  ;;  %3733 = vmatmul.f32.gmra.mxu3 %v12841_v11  ;;  %v5674_v12 = vand.u32 4294901760, %v5673_v21  ;;  %v12912_v40 = vand.u32 4294901760, %v3420_v2  ;;  %16669 = vst [vmem:[#allocation564_spill] sm:$0xff] %v12915_v48  ;;  %v3428_v25 = vsub.f32 %v12909_v9, %v12915_v48 }
 0x438   : > { %3414 = vmatmul.f32.gmra.mxu2 %v12888_v20 }
 0x439   : > { %16666 = vst [vmem:[#allocation561_spill] sm:$0xff] %v12899_v55  ;;  %5675 = vmatpush.msrb.mxu1 %v5674_v12 }
 0x43a   : > { %v2515_v44 = vpop.f32.mrf.mxu0  ;;  %v2808_v0 = vpop.f32.mrf.mxu1  ;;  %16668 = vst [vmem:[#allocation563_spill] sm:$0xff] %v12912_v40 }
 0x43b   : > { %v2809_v30 = vadd.f32 %v2808_v0, %v2512_v22  ;;  %v3287_v55 = vpop.f32.mrf.mxu2  ;;  %v3670_v11 = vpop.f32.mrf.mxu3  ;;  %v2516_v12 = vadd.f32 %v2515_v44, %v11561_v42  ;;  %v12926_v0 = vand.u32 4294901760, %v3428_v25 }
 0x43d   : > { %v3288_v20 = vadd.f32 %v3287_v55, %v2809_v30  ;;  %2578 = vmatmul.f32.gmra.mxu0 %v16670_v7  ;;  %2871 = vmatmul.f32.gmra.mxu1 %v16665_v26  ;;  %16671 = vst [vmem:[#allocation565_spill] sm:$0xff] %v12926_v0  ;;  %v16672_v26 = vld [vmem:[#allocation295_spill] sm:$0xff] }
 0x43f   : > { %v12919_v52 = vadd.f32 %v3670_v11, %v3288_v20  ;;  %3737 = vmatmul.f32.gmra.mxu3 %v12862_v46 }
 0x440   : > { %3422 = vmatmul.f32.gmra.mxu2 %v12912_v40 }
 0x442   : > { %v2519_v38 = vpop.f32.mrf.mxu0  ;;  %v2812_v21 = vpop.f32.mrf.mxu1 }
 0x443   : > { %v2813_v2 = vadd.f32 %v2812_v21, %v2516_v12  ;;  %v3295_v22 = vpop.f32.mrf.mxu2  ;;  %v3674_v55 = vpop.f32.mrf.mxu3  ;;  %v2520_v44 = vadd.f32 %v2519_v38, %v11581_v29 }
 0x445   : > { %v3296_v30 = vadd.f32 %v3295_v22, %v2813_v2  ;;  %2582 = vmatmul.f32.gmra.mxu0 %v16672_v26  ;;  %2875 = vmatmul.f32.gmra.mxu1 %v16670_v7  ;;  %v16673_v2 = vld [vmem:[#allocation300_spill] sm:$0xff] }
 0x447   : > { %v12930_v11 = vadd.f32 %v3674_v55, %v3296_v30  ;;  %3741 = vmatmul.f32.gmra.mxu3 %v12893_v37  ;;  %v16675_v55 = vld [vmem:[#allocation299_spill] sm:$0xff] }
 0x448   : > { %3430 = vmatmul.f32.gmra.mxu2 %v12926_v0 }
 0x44a   : > { %v2523_v42 = vpop.f32.mrf.mxu0  ;;  %v2816_v20 = vpop.f32.mrf.mxu1 }
 0x44b   : > { %v2817_v12 = vadd.f32 %v2816_v20, %v2520_v44  ;;  %v3303_v21 = vpop.f32.mrf.mxu2  ;;  %v3678_v40 = vpop.f32.mrf.mxu3  ;;  %v2524_v30 = vadd.f32 %v2523_v42, %v11601_v36  ;;  %v313_v20 = vld [vmem:[%s15079_s1 + $0xe8] sm:$0xff] }
 0x44c   : > { %v16679_v42 = vld [vmem:[#allocation303_spill] sm:$0xff] }
 0x44d   : > { %v3304_v25 = vadd.f32 %v3303_v21, %v2817_v12  ;;  %2879 = vmatmul.f32.gmra.mxu1 %v16672_v26  ;;  %3775 = vmatmul.f32.vlgmr.msra.gmra.mxu0 %v16673_v2  ;;  %v12945_v12 = vand.u32 4294901760, %v313_v20  ;;  %v16680_v26 = vld [vmem:[#allocation308_spill] sm:$0xff] }
 0x44f   : > { %v12937_v22 = vadd.f32 %v3678_v40, %v3304_v25  ;;  %4845 = vmatmul.f32.vlgmr.msra.gmra.mxu3 %v16675_v55  ;;  %v16676_v40 = vld [vmem:[#allocation304_spill] sm:$0xff]  ;;  %v16677_v25 = vld [vmem:[#allocation302_spill] sm:$0xff]  ;;  %v12950_v2 = vsub.f32 %v313_v20, %v12945_v12  ;;  %5112 = vmatpush.msrb.mxu0 %v12945_v12 }
 0x450   : > { %4558 = vmatmul.f32.vlgmr.msra.gmra.mxu2 %v16675_v55  ;;  %6413 = vmatpush.msrb.mxu3 %v12945_v12 }
 0x451   : > { %16674 = vst [vmem:[#allocation566_spill] sm:$0xff] %v12937_v22  ;;  %6036 = vmatpush.msrb.mxu2 %v12950_v2 }
 0x452   : > { %v2527_v0 = vpop.f32.mrf.mxu0  ;;  %v2820_v29 = vpop.f32.mrf.mxu1 }
 0x453   : > { %v2821_v38 = vadd.f32 %v2820_v29, %v2524_v30  ;;  %v3311_v7 = vpop.f32.mrf.mxu2  ;;  %v3682_v44 = vpop.f32.mrf.mxu3  ;;  %v15893_v30 = vand.u32 4294901760, %v12950_v2 }
 0x455   : > { %v3312_v21 = vadd.f32 %v3311_v7, %v2821_v38  ;;  %3780 = vmatmul.f32.gmra.mxu0 %v16676_v40  ;;  %4129 = vmatmul.f32.vlgmr.msra.gmra.mxu1 %v16677_v25  ;;  %v2528_v7 = vadd.f32 %v2527_v0, %v11621_v24  ;;  %v5679_v20 = vsub.f32 %v12950_v2, %v15893_v30  ;;  %v16682_v24 = vld [vmem:[#allocation307_spill] sm:$0xff] }
 0x457   : > { %v12954_v36 = vadd.f32 %v3682_v44, %v3312_v21  ;;  %4849 = vmatmul.f32.gmra.mxu3 %v16679_v42  ;;  %v5680_v21 = vand.u32 4294901760, %v5679_v20 }
 0x458   : > { %4562 = vmatmul.f32.gmra.mxu2 %v16679_v42  ;;  %v16681_v42 = vld [vmem:[#allocation306_spill] sm:$0xff] }
 0x459   : > { %16678 = vst [vmem:[#allocation567_spill] sm:$0xff] %v12954_v36  ;;  %5681 = vmatpush.msrb.mxu1 %v5680_v21 }
 0x45a   : > { %v2531_v29 = vpop.f32.mrf.mxu0  ;;  %v2824_v38 = vpop.f32.mrf.mxu1 }
 0x45b   : > { %v2825_v25 = vadd.f32 %v2824_v38, %v2528_v7  ;;  %v3319_v40 = vpop.f32.mrf.mxu2  ;;  %v3686_v44 = vpop.f32.mrf.mxu3  ;;  %v2532_v0 = vadd.f32 %v2531_v29, %v11641_v14 }
 0x45d   : > { %v3320_v55 = vadd.f32 %v3319_v40, %v2825_v25  ;;  %3785 = vmatmul.f32.gmra.mxu0 %v16680_v26  ;;  %4135 = vmatmul.f32.gmra.mxu1 %v16681_v42  ;;  %v16683_v40 = vld [vmem:[#allocation312_spill] sm:$0xff]  ;;  %v16684_v25 = vld [vmem:[#allocation310_spill] sm:$0xff] }
 0x45f   : > { %v12966_v36 = vadd.f32 %v3686_v44, %v3320_v55  ;;  %4853 = vmatmul.f32.gmra.mxu3 %v16682_v24  ;;  %v16685_v55 = vld [vmem:[#allocation311_spill] sm:$0xff] }
 0x460   : > { %4566 = vmatmul.f32.gmra.mxu2 %v16682_v24  ;;  %v16686_v24 = vld [vmem:[#allocation316_spill] sm:$0xff] }
 0x462   : > { %v2535_v48 = vpop.f32.mrf.mxu0  ;;  %v2828_v30 = vpop.f32.mrf.mxu1 }
 0x463   : > { %v2829_v7 = vadd.f32 %v2828_v30, %v2532_v0  ;;  %v3327_v38 = vpop.f32.mrf.mxu2  ;;  %v3690_v22 = vpop.f32.mrf.mxu3  ;;  %v2536_v44 = vadd.f32 %v2535_v48, %v11661_v39 }
 0x465   : > { %v3328_v20 = vadd.f32 %v3327_v38, %v2829_v7  ;;  %3790 = vmatmul.f32.gmra.mxu0 %v16683_v40  ;;  %4141 = vmatmul.f32.gmra.mxu1 %v16684_v25  ;;  %v16687_v7 = vld [vmem:[#allocation314_spill] sm:$0xff] }
 0x467   : > { %v12973_v42 = vadd.f32 %v3690_v22, %v3328_v20  ;;  %4857 = vmatmul.f32.gmra.mxu3 %v16685_v55  ;;  %v16689_v22 = vld [vmem:[#allocation315_spill] sm:$0xff] }
 0x468   : > { %4570 = vmatmul.f32.gmra.mxu2 %v16685_v55 }
 0x46a   : > { %v2539_v21 = vpop.f32.mrf.mxu0  ;;  %v2832_v14 = vpop.f32.mrf.mxu1 }
 0x46b   : > { %v2833_v29 = vadd.f32 %v2832_v14, %v2536_v44  ;;  %v3335_v26 = vpop.f32.mrf.mxu2  ;;  %v3694_v30 = vpop.f32.mrf.mxu3  ;;  %v2540_v20 = vadd.f32 %v2539_v21, %v11681_v49  ;;  %v16693_v21 = vld [vmem:[#allocation319_spill] sm:$0xff] }
 0x46d   : > { %v3336_v0 = vadd.f32 %v3335_v26, %v2833_v29  ;;  %3795 = vmatmul.f32.gmra.mxu0 %v16686_v24  ;;  %4147 = vmatmul.f32.gmra.mxu1 %v16687_v7  ;;  %v311_v26 = vld [vmem:[%s15079_s1 + $0xd8] sm:$0xff] }
 0x46e   : > { %v12988_v14 = vand.u32 4294901760, %v311_v26 }
 0x46f   : > { %v12980_v38 = vadd.f32 %v3694_v30, %v3336_v0  ;;  %4861 = vmatmul.f32.gmra.mxu3 %v16689_v22  ;;  %v16690_v30 = vld [vmem:[#allocation320_spill] sm:$0xff]  ;;  %v16691_v0 = vld [vmem:[#allocation318_spill] sm:$0xff] }
 0x470   : > { %4574 = vmatmul.f32.gmra.mxu2 %v16689_v22  ;;  %v12993_v7 = vsub.f32 %v311_v26, %v12988_v14  ;;  %5114 = vmatpush.msrb.mxu0 %v12988_v14  ;;  %v16694_v22 = vld [vmem:[#allocation324_spill] sm:$0xff] }
 0x471   : > { %16688 = vst [vmem:[#allocation568_spill] sm:$0xff] %v12980_v38  ;;  %6415 = vmatpush.msrb.mxu3 %v12988_v14 }
 0x472   : > { %v2543_v25 = vpop.f32.mrf.mxu0  ;;  %v2836_v39 = vpop.f32.mrf.mxu1  ;;  %6039 = vmatpush.msrb.mxu2 %v12993_v7 }
 0x473   : > { %v2837_v48 = vadd.f32 %v2836_v39, %v2540_v20  ;;  %v3343_v40 = vpop.f32.mrf.mxu2  ;;  %v3698_v44 = vpop.f32.mrf.mxu3  ;;  %v15898_v20 = vand.u32 4294901760, %v12993_v7 }
 0x475   : > { %v3344_v29 = vadd.f32 %v3343_v40, %v2837_v48  ;;  %3800 = vmatmul.f32.gmra.mxu0 %v16690_v30  ;;  %4153 = vmatmul.f32.gmra.mxu1 %v16691_v0  ;;  %v2544_v40 = vadd.f32 %v2543_v25, %v11701_v31  ;;  %v5685_v26 = vsub.f32 %v12993_v7, %v15898_v20  ;;  %v16696_v31 = vld [vmem:[#allocation323_spill] sm:$0xff] }
 0x477   : > { %v12997_v49 = vadd.f32 %v3698_v44, %v3344_v29  ;;  %4865 = vmatmul.f32.gmra.mxu3 %v16693_v21  ;;  %v5686_v29 = vand.u32 4294901760, %v5685_v26 }
 0x478   : > { %4578 = vmatmul.f32.gmra.mxu2 %v16693_v21  ;;  %v16695_v21 = vld [vmem:[#allocation322_spill] sm:$0xff] }
 0x479   : > { %16692 = vst [vmem:[#allocation569_spill] sm:$0xff] %v12997_v49  ;;  %5687 = vmatpush.msrb.mxu1 %v5686_v29 }
 0x47a   : > { %v2547_v39 = vpop.f32.mrf.mxu0  ;;  %v2840_v48 = vpop.f32.mrf.mxu1 }
 0x47b   : > { %v2841_v0 = vadd.f32 %v2840_v48, %v2544_v40  ;;  %v3351_v30 = vpop.f32.mrf.mxu2  ;;  %v3702_v44 = vpop.f32.mrf.mxu3  ;;  %v2548_v25 = vadd.f32 %v2547_v39, %v11721_v50 }
 0x47d   : > { %v3352_v24 = vadd.f32 %v3351_v30, %v2841_v0  ;;  %3805 = vmatmul.f32.gmra.mxu0 %v16694_v22  ;;  %4159 = vmatmul.f32.gmra.mxu1 %v16695_v21  ;;  %v16697_v30 = vld [vmem:[#allocation328_spill] sm:$0xff]  ;;  %v16698_v0 = vld [vmem:[#allocation326_spill] sm:$0xff] }
 0x47f   : > { %v13009_v55 = vadd.f32 %v3702_v44, %v3352_v24  ;;  %4869 = vmatmul.f32.gmra.mxu3 %v16696_v31  ;;  %v16699_v24 = vld [vmem:[#allocation327_spill] sm:$0xff] }
 0x480   : > { %4582 = vmatmul.f32.gmra.mxu2 %v16696_v31  ;;  %v16700_v31 = vld [vmem:[#allocation332_spill] sm:$0xff] }
 0x482   : > { %v2551_v49 = vpop.f32.mrf.mxu0  ;;  %v2844_v20 = vpop.f32.mrf.mxu1 }
 0x483   : > { %v2845_v40 = vadd.f32 %v2844_v20, %v2548_v25  ;;  %v3359_v48 = vpop.f32.mrf.mxu2  ;;  %v3706_v38 = vpop.f32.mrf.mxu3  ;;  %v2552_v44 = vadd.f32 %v2551_v49, %v11741_v63 }
 0x485   : > { %v3360_v26 = vadd.f32 %v3359_v48, %v2845_v40  ;;  %3810 = vmatmul.f32.gmra.mxu0 %v16697_v30  ;;  %4165 = vmatmul.f32.gmra.mxu1 %v16698_v0  ;;  %v16701_v40 = vld [vmem:[#allocation330_spill] sm:$0xff] }
 0x487   : > { %v13016_v21 = vadd.f32 %v3706_v38, %v3360_v26  ;;  %4873 = vmatmul.f32.gmra.mxu3 %v16699_v24  ;;  %v16703_v38 = vld [vmem:[#allocation331_spill] sm:$0xff] }
 0x488   : > { %4586 = vmatmul.f32.gmra.mxu2 %v16699_v24  ;;  %v16704_v24 = vld [vmem:[#allocation336_spill] sm:$0xff] }
 0x48a   : > { %v2555_v29 = vpop.f32.mrf.mxu0  ;;  %v2848_v50 = vpop.f32.mrf.mxu1 }
 0x48b   : > { %v2849_v39 = vadd.f32 %v2848_v50, %v2552_v44  ;;  %v3367_v22 = vpop.f32.mrf.mxu2  ;;  %v3710_v20 = vpop.f32.mrf.mxu3  ;;  %v2556_v26 = vadd.f32 %v2555_v29, %v11761_v15 }
 0x48d   : > { %v3368_v25 = vadd.f32 %v3367_v22, %v2849_v39  ;;  %3815 = vmatmul.f32.gmra.mxu0 %v16700_v31  ;;  %4171 = vmatmul.f32.gmra.mxu1 %v16701_v40  ;;  %v16705_v22 = vld [vmem:[#allocation334_spill] sm:$0xff]  ;;  %v309_v39 = vld [vmem:[%s15079_s1 + $0xc8] sm:$0xff] }
 0x48e   : > { %v16707_v40 = vld [vmem:[#allocation335_spill] sm:$0xff]  ;;  %v16709_v31 = vld [vmem:[#allocation338_spill] sm:$0xff] }
 0x48f   : > { %v13023_v48 = vadd.f32 %v3710_v20, %v3368_v25  ;;  %4877 = vmatmul.f32.gmra.mxu3 %v16703_v38  ;;  %v13033_v20 = vand.u32 4294901760, %v309_v39 }
 0x490   : > { %4590 = vmatmul.f32.gmra.mxu2 %v16703_v38 }
 0x491   : > { %16702 = vst [vmem:[#allocation570_spill] sm:$0xff] %v13023_v48  ;;  %v13040_v15 = vsub.f32 %v309_v39, %v13033_v20  ;;  %5116 = vmatpush.msrb.mxu0 %v13033_v20  ;;  %6417 = vmatpush.msrb.mxu3 %v13033_v20 }
 0x492   : > { %v2559_v0 = vpop.f32.mrf.mxu0  ;;  %v2852_v63 = vpop.f32.mrf.mxu1 }
 0x493   : > { %v2853_v49 = vadd.f32 %v2852_v63, %v2556_v26  ;;  %v3375_v30 = vpop.f32.mrf.mxu2  ;;  %v3714_v44 = vpop.f32.mrf.mxu3  ;;  %6042 = vmatpush.msrb.mxu2 %v13040_v15  ;;  %v15903_v63 = vand.u32 4294901760, %v13040_v15 }
 0x495   : > { %v3376_v50 = vadd.f32 %v3375_v30, %v2853_v49  ;;  %3820 = vmatmul.f32.gmra.mxu0 %v16704_v24  ;;  %4177 = vmatmul.f32.gmra.mxu1 %v16705_v22  ;;  %v2560_v30 = vadd.f32 %v2559_v0, %v11781_v60  ;;  %v5691_v39 = vsub.f32 %v13040_v15, %v15903_v63  ;;  %v16708_v24 = vld [vmem:[#allocation340_spill] sm:$0xff] }
 0x497   : > { %v13035_v25 = vadd.f32 %v3714_v44, %v3376_v50  ;;  %4881 = vmatmul.f32.gmra.mxu3 %v16707_v40  ;;  %v5692_v60 = vand.u32 4294901760, %v5691_v39 }
 0x498   : > { %4594 = vmatmul.f32.gmra.mxu2 %v16707_v40  ;;  %v16711_v40 = vld [vmem:[#allocation339_spill] sm:$0xff] }
 0x499   : > { %16706 = vst [vmem:[#allocation571_spill] sm:$0xff] %v13035_v25  ;;  %5693 = vmatpush.msrb.mxu1 %v5692_v60 }
 0x49a   : > { %v2563_v29 = vpop.f32.mrf.mxu0  ;;  %v2856_v26 = vpop.f32.mrf.mxu1 }
 0x49b   : > { %v2857_v49 = vadd.f32 %v2856_v26, %v2560_v30  ;;  %v3383_v44 = vpop.f32.mrf.mxu2  ;;  %v3718_v50 = vpop.f32.mrf.mxu3  ;;  %v2564_v30 = vadd.f32 %v2563_v29, %v11801_v35 }
 0x49d   : > { %v3384_v22 = vadd.f32 %v3383_v44, %v2857_v49  ;;  %3825 = vmatmul.f32.gmra.mxu0 %v16708_v24  ;;  %4183 = vmatmul.f32.gmra.mxu1 %v16709_v31  ;;  %v16712_v44 = vld [vmem:[#allocation344_spill] sm:$0xff]  ;;  %v16713_v24 = vld [vmem:[#allocation342_spill] sm:$0xff] }
 0x49f   : > { %v13052_v0 = vadd.f32 %v3718_v50, %v3384_v22  ;;  %4885 = vmatmul.f32.gmra.mxu3 %v16711_v40  ;;  %v16715_v22 = vld [vmem:[#allocation343_spill] sm:$0xff] }
 0x4a0   : > { %4598 = vmatmul.f32.gmra.mxu2 %v16711_v40  ;;  %v16716_v40 = vld [vmem:[#allocation348_spill] sm:$0xff] }
 0x4a1   : > { %16710 = vst [vmem:[#allocation572_spill] sm:$0xff] %v13052_v0 }
 0x4a2   : > { %v2567_v26 = vpop.f32.mrf.mxu0  ;;  %v2860_v38 = vpop.f32.mrf.mxu1 }
 0x4a3   : > { %v2861_v25 = vadd.f32 %v2860_v38, %v2564_v30  ;;  %v3391_v48 = vpop.f32.mrf.mxu2  ;;  %v3722_v63 = vpop.f32.mrf.mxu3  ;;  %v2568_v50 = vadd.f32 %v2567_v26, %v11821_v6 }
 0x4a5   : > { %v3392_v49 = vadd.f32 %v3391_v48, %v2861_v25  ;;  %3830 = vmatmul.f32.gmra.mxu0 %v16712_v44  ;;  %4189 = vmatmul.f32.gmra.mxu1 %v16713_v24  ;;  %v16717_v48 = vld [vmem:[#allocation346_spill] sm:$0xff] }
 0x4a7   : > { %v13059_v39 = vadd.f32 %v3722_v63, %v3392_v49  ;;  %4889 = vmatmul.f32.gmra.mxu3 %v16715_v22  ;;  %v16719_v63 = vld [vmem:[#allocation347_spill] sm:$0xff] }
 0x4a8   : > { %4602 = vmatmul.f32.gmra.mxu2 %v16715_v22  ;;  %v16720_v22 = vld [vmem:[#allocation352_spill] sm:$0xff] }
 0x4a9   : > { %16714 = vst [vmem:[#allocation573_spill] sm:$0xff] %v13059_v39 }
 0x4aa   : > { %v2571_v60 = vpop.f32.mrf.mxu0  ;;  %v2864_v35 = vpop.f32.mrf.mxu1 }
 0x4ab   : > { %v2865_v29 = vadd.f32 %v2864_v35, %v2568_v50  ;;  %v3399_v31 = vpop.f32.mrf.mxu2  ;;  %v3726_v38 = vpop.f32.mrf.mxu3  ;;  %v2572_v49 = vadd.f32 %v2571_v60, %v11841_v47 }
 0x4ad   : > { %v3400_v30 = vadd.f32 %v3399_v31, %v2865_v29  ;;  %3835 = vmatmul.f32.gmra.mxu0 %v16716_v40  ;;  %4195 = vmatmul.f32.gmra.mxu1 %v16717_v48  ;;  %v16721_v31 = vld [vmem:[#allocation350_spill] sm:$0xff]  ;;  %v307_v29 = vld [vmem:[%s15079_s1 + $0xb8] sm:$0xff]  ;;  %v16723_v48 = vld [vmem:[#allocation351_spill] sm:$0xff] }
 0x4ae   : > { %v16725_v40 = vld [vmem:[#allocation354_spill] sm:$0xff] }
 0x4af   : > { %v13066_v25 = vadd.f32 %v3726_v38, %v3400_v30  ;;  %4893 = vmatmul.f32.gmra.mxu3 %v16719_v63  ;;  %v13076_v38 = vand.u32 4294901760, %v307_v29 }
 0x4b0   : > { %4606 = vmatmul.f32.gmra.mxu2 %v16719_v63 }
 0x4b1   : > { %16718 = vst [vmem:[#allocation574_spill] sm:$0xff] %v13066_v25  ;;  %v13083_v47 = vsub.f32 %v307_v29, %v13076_v38  ;;  %5118 = vmatpush.msrb.mxu0 %v13076_v38  ;;  %6419 = vmatpush.msrb.mxu3 %v13076_v38 }
 0x4b2   : > { %v2575_v24 = vpop.f32.mrf.mxu0  ;;  %v2868_v6 = vpop.f32.mrf.mxu1 }
 0x4b3   : > { %v2869_v26 = vadd.f32 %v2868_v6, %v2572_v49  ;;  %v3407_v44 = vpop.f32.mrf.mxu2  ;;  %v3730_v50 = vpop.f32.mrf.mxu3  ;;  %6045 = vmatpush.msrb.mxu2 %v13083_v47  ;;  %v15908_v6 = vand.u32 4294901760, %v13083_v47 }
 0x4b5   : > { %v3408_v35 = vadd.f32 %v3407_v44, %v2869_v26  ;;  %3840 = vmatmul.f32.gmra.mxu0 %v16720_v22  ;;  %4201 = vmatmul.f32.gmra.mxu1 %v16721_v31  ;;  %v2576_v44 = vadd.f32 %v2575_v24, %v11861_v18  ;;  %v5697_v29 = vsub.f32 %v13083_v47, %v15908_v6  ;;  %v16724_v22 = vld [vmem:[#allocation356_spill] sm:$0xff] }
 0x4b7   : > { %v13078_v30 = vadd.f32 %v3730_v50, %v3408_v35  ;;  %4897 = vmatmul.f32.gmra.mxu3 %v16723_v48  ;;  %v5698_v18 = vand.u32 4294901760, %v5697_v29 }
 0x4b8   : > { %4610 = vmatmul.f32.gmra.mxu2 %v16723_v48  ;;  %v16727_v48 = vld [vmem:[#allocation355_spill] sm:$0xff] }
 0x4b9   : > { %16722 = vst [vmem:[#allocation575_spill] sm:$0xff] %v13078_v30  ;;  %5699 = vmatpush.msrb.mxu1 %v5698_v18 }
 0x4ba   : > { %v2579_v60 = vpop.f32.mrf.mxu0  ;;  %v2872_v49 = vpop.f32.mrf.mxu1 }
 0x4bb   : > { %v2873_v26 = vadd.f32 %v2872_v49, %v2576_v44  ;;  %v3415_v50 = vpop.f32.mrf.mxu2  ;;  %v3734_v35 = vpop.f32.mrf.mxu3  ;;  %v2580_v44 = vadd.f32 %v2579_v60, %v11881_v57 }
 0x4bd   : > { %v3416_v31 = vadd.f32 %v3415_v50, %v2873_v26  ;;  %3845 = vmatmul.f32.gmra.mxu0 %v16724_v22  ;;  %4207 = vmatmul.f32.gmra.mxu1 %v16725_v40  ;;  %v16728_v50 = vld [vmem:[#allocation360_spill] sm:$0xff]  ;;  %v16729_v22 = vld [vmem:[#allocation358_spill] sm:$0xff] }
 0x4bf   : > { %v13095_v24 = vadd.f32 %v3734_v35, %v3416_v31  ;;  %4901 = vmatmul.f32.gmra.mxu3 %v16727_v48  ;;  %v16731_v31 = vld [vmem:[#allocation359_spill] sm:$0xff] }
 0x4c0   : > { %4614 = vmatmul.f32.gmra.mxu2 %v16727_v48 }
 0x4c1   : > { %16726 = vst [vmem:[#allocation576_spill] sm:$0xff] %v13095_v24 }
 0x4c2   : > { %v2583_v49 = vpop.f32.mrf.mxu0  ;;  %v2876_v63 = vpop.f32.mrf.mxu1 }
 0x4c3   : > { %v2877_v30 = vadd.f32 %v2876_v63, %v2580_v44  ;;  %v3423_v25 = vpop.f32.mrf.mxu2  ;;  %v3738_v6 = vpop.f32.mrf.mxu3  ;;  %v2584_v35 = vadd.f32 %v2583_v49, %v11901_v13 }
 0x4c5   : > { %v3424_v26 = vadd.f32 %v3423_v25, %v2877_v30  ;;  %3850 = vmatmul.f32.gmra.mxu0 %v16728_v50  ;;  %4213 = vmatmul.f32.gmra.mxu1 %v16729_v22  ;;  %v16732_v25 = vld [vmem:[#allocation364_spill] sm:$0xff]  ;;  %v16733_v30 = vld [vmem:[#allocation362_spill] sm:$0xff] }
 0x4c7   : > { %v13102_v29 = vadd.f32 %v3738_v6, %v3424_v26  ;;  %4905 = vmatmul.f32.gmra.mxu3 %v16731_v31  ;;  %v16735_v6 = vld [vmem:[#allocation363_spill] sm:$0xff] }
 0x4c8   : > { %4618 = vmatmul.f32.gmra.mxu2 %v16731_v31 }
 0x4c9   : > { %16730 = vst [vmem:[#allocation577_spill] sm:$0xff] %v13102_v29 }
 0x4ca   : > { %v2880_v18 = vpop.f32.mrf.mxu1  ;;  %v3776_v57 = vpop.f32.mrf.mxu0 }
 0x4cb   : > { %v2881_v60 = vadd.f32 %v2880_v18, %v2584_v35  ;;  %v3431_v40 = vpop.f32.mrf.mxu2  ;;  %v3742_v63 = vpop.f32.mrf.mxu3  ;;  %v3777_v26 = vadd.f32 %v3776_v57, %v11922_v61 }
 0x4cd   : > { %v3432_v44 = vadd.f32 %v3431_v40, %v2881_v60  ;;  %3855 = vmatmul.f32.gmra.mxu0 %v16732_v25  ;;  %4219 = vmatmul.f32.gmra.mxu1 %v16733_v30  ;;  %v16736_v40 = vld [vmem:[#allocation366_spill] sm:$0xff] }
 0x4cf   : > { %v13109_v22 = vadd.f32 %v3742_v63, %v3432_v44  ;;  %4909 = vmatmul.f32.gmra.mxu3 %v16735_v6  ;;  %v16737_v63 = vld [vmem:[#allocation367_spill] sm:$0xff] }
 0x4d0   : > { %4622 = vmatmul.f32.gmra.mxu2 %v16735_v6 }
 0x4d1   : > { %16734 = vst [vmem:[#allocation578_spill] sm:$0xff] %v13109_v22 }
 0x4d2   : > { %v3781_v13 = vpop.f32.mrf.mxu0  ;;  %v4130_v49 = vpop.f32.mrf.mxu1 }
 0x4d3   : > { %v4131_v50 = vadd.f32 %v4130_v49, %v3777_v26  ;;  %v4559_v35 = vpop.f32.mrf.mxu2  ;;  %v4846_v18 = vpop.f32.mrf.mxu3  ;;  %v3782_v61 = vadd.f32 %v3781_v13, %v11943_v5  ;;  %v16738_v13 = vld [vmem:[#allocation370_spill] sm:$0xff] }
 0x4d5   : > { %v4560_v31 = vadd.f32 %v4559_v35, %v4131_v50  ;;  %3860 = vmatmul.f32.gmra.mxu0 %v11888_v32  ;;  %4225 = vmatmul.f32.gmra.mxu1 %v16736_v40  ;;  %v305_v50 = vld [vmem:[%s15079_s1 + $0xa8] sm:$0xff] }
 0x4d6   : > { %v13130_v26 = vand.u32 4294901760, %v305_v50 }
 0x4d7   : > { %v4847_v60 = vadd.f32 %v4846_v18, %v4560_v31  ;;  %4913 = vmatmul.f32.gmra.mxu3 %v16737_v63 }
 0x4d8   : > { %4626 = vmatmul.f32.gmra.mxu2 %v16737_v63  ;;  %v13133_v31 = vsub.f32 %v305_v50, %v13130_v26  ;;  %5120 = vmatpush.msrb.mxu0 %v13130_v26 }
 0x4d9   : > { %9691 = vst [vmem:[%s13121_s21] sm:$0xff] %v4847_v60  ;;  %6421 = vmatpush.msrb.mxu3 %v13130_v26 }
 0x4da   : > { %v3786_v57 = vpop.f32.mrf.mxu0  ;;  %v4136_v44 = vpop.f32.mrf.mxu1  ;;  %6048 = vmatpush.msrb.mxu2 %v13133_v31  ;;  %v15913_v18 = vand.u32 4294901760, %v13133_v31 }
 0x4db   : > { %v4137_v49 = vadd.f32 %v4136_v44, %v3782_v61  ;;  %v4563_v35 = vpop.f32.mrf.mxu2  ;;  %v4850_v40 = vpop.f32.mrf.mxu3  ;;  %v16739_v61 = vld [vmem:[#allocation371_spill] sm:$0xff]  ;;  %v3787_v44 = vadd.f32 %v3786_v57, %v11964_v56 }
 0x4dc   : > { %v5703_v50 = vsub.f32 %v13133_v31, %v15913_v18 }
 0x4dd   : > { %v4564_v5 = vadd.f32 %v4563_v35, %v4137_v49  ;;  %3865 = vmatmul.f32.gmra.mxu0 %v11908_v27  ;;  %4231 = vmatmul.f32.gmra.mxu1 %v16738_v13 }
 0x4de   : > { %v5704_v13 = vand.u32 4294901760, %v5703_v50 }
 0x4df   : > { %v4851_v60 = vadd.f32 %v4850_v40, %v4564_v5  ;;  %4917 = vmatmul.f32.gmra.mxu3 %v16739_v61  ;;  %v16740_v5 = vld [vmem:[#allocation374_spill] sm:$0xff] }
 0x4e0   : > { %4630 = vmatmul.f32.gmra.mxu2 %v16739_v61  ;;  %5705 = vmatpush.msrb.mxu1 %v5704_v13  ;;  %v16741_v61 = vld [vmem:[#allocation375_spill] sm:$0xff] }
 0x4e1   : > { %9694 = vst [vmem:[%s13121_s21 + $0x10] sm:$0xff] %v4851_v60 }
 0x4e2   : > { %v3791_v49 = vpop.f32.mrf.mxu0  ;;  %v4142_v35 = vpop.f32.mrf.mxu1 }
 0x4e3   : > { %v4143_v27 = vadd.f32 %v4142_v35, %v3787_v44  ;;  %v4567_v32 = vpop.f32.mrf.mxu2  ;;  %v4854_v30 = vpop.f32.mrf.mxu3  ;;  %v3792_v56 = vadd.f32 %v3791_v49, %v11985_v34 }
 0x4e5   : > { %v4568_v40 = vadd.f32 %v4567_v32, %v4143_v27  ;;  %3870 = vmatmul.f32.gmra.mxu0 %v11929_v54  ;;  %4237 = vmatmul.f32.gmra.mxu1 %v16740_v5  ;;  %v16742_v32 = vld [vmem:[#allocation378_spill] sm:$0xff]  ;;  %v16751_v54 = vld [vmem:[#allocation391_spill] sm:$0xff] }
 0x4e7   : > { %v4855_v25 = vadd.f32 %v4854_v30, %v4568_v40  ;;  %4921 = vmatmul.f32.gmra.mxu3 %v16741_v61  ;;  %v16743_v30 = vld [vmem:[#allocation379_spill] sm:$0xff] }
 0x4e8   : > { %4634 = vmatmul.f32.gmra.mxu2 %v16741_v61  ;;  %v16783_v61 = vld [vmem:[#allocation423_spill] sm:$0xff] }
 0x4e9   : > { %9696 = vst [vmem:[%s13121_s21 + $0x20] sm:$0xff] %v4855_v25 }
 0x4ea   : > { %v3796_v57 = vpop.f32.mrf.mxu0  ;;  %v4148_v60 = vpop.f32.mrf.mxu1 }
 0x4eb   : > { %v4149_v50 = vadd.f32 %v4148_v60, %v3792_v56  ;;  %v4571_v44 = vpop.f32.mrf.mxu2  ;;  %v4858_v35 = vpop.f32.mrf.mxu3  ;;  %v3797_v40 = vadd.f32 %v3796_v57, %v12006_v23  ;;  %v303_v23 = vld [vmem:[%s15079_s1 + $0x98] sm:$0xff] }
 0x4ed   : > { %v4572_v13 = vadd.f32 %v4571_v44, %v4149_v50  ;;  %3875 = vmatmul.f32.gmra.mxu0 %v11950_v51  ;;  %4243 = vmatmul.f32.gmra.mxu1 %v16742_v32  ;;  %v16744_v50 = vld [vmem:[#allocation382_spill] sm:$0xff] }
 0x4ee   : > { %v16750_v51 = vld [vmem:[#allocation390_spill] sm:$0xff] }
 0x4ef   : > { %v4859_v27 = vadd.f32 %v4858_v35, %v4572_v13  ;;  %4925 = vmatmul.f32.gmra.mxu3 %v16743_v30  ;;  %v16745_v35 = vld [vmem:[#allocation383_spill] sm:$0xff] }
 0x4f0   : > { %4638 = vmatmul.f32.gmra.mxu2 %v16743_v30  ;;  %v16782_v30 = vld [vmem:[#allocation422_spill] sm:$0xff] }
 0x4f1   : > { %9698 = vst [vmem:[%s13121_s21 + $0x30] sm:$0xff] %v4859_v27 }
 0x4f2   : > { %v3801_v34 = vpop.f32.mrf.mxu0  ;;  %v4154_v25 = vpop.f32.mrf.mxu1 }
 0x4f3   : > { %v4155_v49 = vadd.f32 %v4154_v25, %v3797_v40  ;;  %v4575_v56 = vpop.f32.mrf.mxu2  ;;  %v4862_v60 = vpop.f32.mrf.mxu3  ;;  %v3802_v13 = vadd.f32 %v3801_v34, %v12027_v45  ;;  %v13169_v40 = vand.u32 4294901760, %v303_v23  ;;  %v16746_v34 = vld [vmem:[#allocation386_spill] sm:$0xff] }
 0x4f5   : > { %v4576_v18 = vadd.f32 %v4575_v56, %v4155_v49  ;;  %3880 = vmatmul.f32.gmra.mxu0 %v11971_v53  ;;  %4249 = vmatmul.f32.gmra.mxu1 %v16744_v50 }
 0x4f6   : > { %5122 = vmatpush.msrb.mxu0 %v13169_v40  ;;  %6423 = vmatpush.msrb.mxu3 %v13169_v40 }
 0x4f7   : > { %v4863_v44 = vadd.f32 %v4862_v60, %v4576_v18  ;;  %4929 = vmatmul.f32.gmra.mxu3 %v16745_v35  ;;  %v13172_v18 = vsub.f32 %v303_v23, %v13169_v40 }
 0x4f8   : > { %4642 = vmatmul.f32.gmra.mxu2 %v16745_v35  ;;  %v16767_v35 = vld [vmem:[#allocation407_spill] sm:$0xff] }
 0x4f9   : > { %9700 = vst [vmem:[%s13121_s21 + $0x40] sm:$0xff] %v4863_v44  ;;  %6051 = vmatpush.msrb.mxu2 %v13172_v18  ;;  %v15918_v60 = vand.u32 4294901760, %v13172_v18 }
 0x4fa   : > { %v3806_v57 = vpop.f32.mrf.mxu0  ;;  %v4160_v27 = vpop.f32.mrf.mxu1 }
 0x4fb   : > { %v4161_v25 = vadd.f32 %v4160_v27, %v3802_v13  ;;  %v4579_v49 = vpop.f32.mrf.mxu2  ;;  %v4866_v56 = vpop.f32.mrf.mxu3  ;;  %v16747_v13 = vld [vmem:[#allocation387_spill] sm:$0xff]  ;;  %v5709_v23 = vsub.f32 %v13172_v18, %v15918_v60  ;;  %v16748_v27 = vld [vmem:[#allocation400_spill] sm:$0xff] }
 0x4fc   : > { %v3807_v50 = vadd.f32 %v3806_v57, %v16748_v27  ;;  %v16752_v57 = vld [vmem:[#allocation404_spill] sm:$0xff] }
 0x4fd   : > { %v4580_v45 = vadd.f32 %v4579_v49, %v4161_v25  ;;  %3885 = vmatmul.f32.gmra.mxu0 %v11992_v59  ;;  %4255 = vmatmul.f32.gmra.mxu1 %v16746_v34  ;;  %v5710_v34 = vand.u32 4294901760, %v5709_v23 }
 0x4ff   : > { %v4867_v44 = vadd.f32 %v4866_v56, %v4580_v45  ;;  %4933 = vmatmul.f32.gmra.mxu3 %v16747_v13  ;;  %5711 = vmatpush.msrb.mxu1 %v5710_v34  ;;  %v16749_v45 = vld [vmem:[#allocation392_spill] sm:$0xff] }
 0x500   : > { %4646 = vmatmul.f32.gmra.mxu2 %v16747_v13  ;;  %v16766_v13 = vld [vmem:[#allocation406_spill] sm:$0xff] }
 0x501   : > { %9702 = vst [vmem:[%s13121_s21 + $0x50] sm:$0xff] %v4867_v44 }
 0x502   : > { %v3811_v25 = vpop.f32.mrf.mxu0  ;;  %v4166_v49 = vpop.f32.mrf.mxu1 }
 0x503   : > { %v4167_v59 = vadd.f32 %v4166_v49, %v3807_v50  ;;  %v4583_v53 = vpop.f32.mrf.mxu2  ;;  %v4870_v32 = vpop.f32.mrf.mxu3  ;;  %v3812_v44 = vadd.f32 %v3811_v25, %v16752_v57 }
 0x505   : > { %v4584_v56 = vadd.f32 %v4583_v53, %v4167_v59  ;;  %3890 = vmatmul.f32.gmra.mxu0 %v16749_v45  ;;  %4261 = vmatmul.f32.gmra.mxu1 %v16750_v51  ;;  %v16753_v53 = vld [vmem:[#allocation396_spill] sm:$0xff]  ;;  %v16754_v59 = vld [vmem:[#allocation394_spill] sm:$0xff] }
 0x507   : > { %v4871_v5 = vadd.f32 %v4870_v32, %v4584_v56  ;;  %4937 = vmatmul.f32.gmra.mxu3 %v16751_v54  ;;  %v16755_v32 = vld [vmem:[#allocation395_spill] sm:$0xff]  ;;  %v16756_v56 = vld [vmem:[#allocation408_spill] sm:$0xff] }
 0x508   : > { %4650 = vmatmul.f32.gmra.mxu2 %v16751_v54 }
 0x509   : > { %9704 = vst [vmem:[%s13121_s21 + $0x60] sm:$0xff] %v4871_v5 }
 0x50a   : > { %v3816_v27 = vpop.f32.mrf.mxu0  ;;  %v4172_v23 = vpop.f32.mrf.mxu1 }
 0x50b   : > { %v4173_v50 = vadd.f32 %v4172_v23, %v3812_v44  ;;  %v4587_v49 = vpop.f32.mrf.mxu2  ;;  %v4874_v60 = vpop.f32.mrf.mxu3  ;;  %v3817_v45 = vadd.f32 %v3816_v27, %v16756_v56 }
 0x50d   : > { %v4588_v34 = vadd.f32 %v4587_v49, %v4173_v50  ;;  %3895 = vmatmul.f32.gmra.mxu0 %v16753_v53  ;;  %4267 = vmatmul.f32.gmra.mxu1 %v16754_v59  ;;  %v16757_v50 = vld [vmem:[#allocation401_spill] sm:$0xff]  ;;  %v16758_v49 = vld [vmem:[#allocation398_spill] sm:$0xff] }
 0x50f   : > { %v4875_v51 = vadd.f32 %v4874_v60, %v4588_v34  ;;  %4941 = vmatmul.f32.gmra.mxu3 %v16755_v32  ;;  %v16759_v60 = vld [vmem:[#allocation399_spill] sm:$0xff]  ;;  %v16760_v34 = vld [vmem:[#allocation412_spill] sm:$0xff] }
 0x510   : > { %4654 = vmatmul.f32.gmra.mxu2 %v16755_v32 }
 0x511   : > { %9706 = vst [vmem:[%s13121_s21 + $0x70] sm:$0xff] %v4875_v51  ;;  %v301_v51 = vld [vmem:[%s15079_s1 + $0x88] sm:$0xff] }
 0x512   : > { %v3821_v5 = vpop.f32.mrf.mxu0  ;;  %v4178_v25 = vpop.f32.mrf.mxu1  ;;  %v13208_v56 = vand.u32 4294901760, %v301_v51 }
 0x513   : > { %v4179_v57 = vadd.f32 %v4178_v25, %v3817_v45  ;;  %v4591_v44 = vpop.f32.mrf.mxu2  ;;  %v4878_v23 = vpop.f32.mrf.mxu3  ;;  %v3822_v53 = vadd.f32 %v3821_v5, %v16760_v34  ;;  %v16761_v5 = vld [vmem:[#allocation405_spill] sm:$0xff] }
 0x514   : > { %5124 = vmatpush.msrb.mxu0 %v13208_v56  ;;  %6425 = vmatpush.msrb.mxu3 %v13208_v56 }
 0x515   : > { %v4592_v54 = vadd.f32 %v4591_v44, %v4179_v57  ;;  %3900 = vmatmul.f32.gmra.mxu0 %v16757_v50  ;;  %4273 = vmatmul.f32.gmra.mxu1 %v16758_v49  ;;  %v16764_v49 = vld [vmem:[#allocation416_spill] sm:$0xff] }
 0x517   : > { %v4879_v59 = vadd.f32 %v4878_v23, %v4592_v54  ;;  %4945 = vmatmul.f32.gmra.mxu3 %v16759_v60  ;;  %v13211_v54 = vsub.f32 %v301_v51, %v13208_v56  ;;  %v16762_v23 = vld [vmem:[#allocation402_spill] sm:$0xff] }
 0x518   : > { %4658 = vmatmul.f32.gmra.mxu2 %v16759_v60 }
 0x519   : > { %9708 = vst [vmem:[%s13121_s21 + $0x80] sm:$0xff] %v4879_v59  ;;  %6054 = vmatpush.msrb.mxu2 %v13211_v54  ;;  %v15925_v34 = vand.u32 4294901760, %v13211_v54 }
 0x51a   : > { %v3826_v45 = vpop.f32.mrf.mxu0  ;;  %v4184_v27 = vpop.f32.mrf.mxu1 }
 0x51b   : > { %v4185_v25 = vadd.f32 %v4184_v27, %v3822_v53  ;;  %v4595_v57 = vpop.f32.mrf.mxu2  ;;  %v4882_v44 = vpop.f32.mrf.mxu3  ;;  %v16763_v27 = vld [vmem:[#allocation403_spill] sm:$0xff]  ;;  %v5715_v51 = vsub.f32 %v13211_v54, %v15925_v34  ;;  %v3827_v50 = vadd.f32 %v3826_v45, %v16764_v49  ;;  %v16768_v49 = vld [vmem:[#allocation420_spill] sm:$0xff] }
 0x51d   : > { %v4596_v59 = vadd.f32 %v4595_v57, %v4185_v25  ;;  %3905 = vmatmul.f32.gmra.mxu0 %v16761_v5  ;;  %4279 = vmatmul.f32.gmra.mxu1 %v16762_v23  ;;  %v5716_v23 = vand.u32 4294901760, %v5715_v51 }
 0x51f   : > { %v4883_v53 = vadd.f32 %v4882_v44, %v4596_v59  ;;  %4949 = vmatmul.f32.gmra.mxu3 %v16763_v27  ;;  %5717 = vmatpush.msrb.mxu1 %v5716_v23  ;;  %v16765_v59 = vld [vmem:[#allocation409_spill] sm:$0xff] }
 0x520   : > { %4662 = vmatmul.f32.gmra.mxu2 %v16763_v27 }
 0x521   : > { %9710 = vst [vmem:[%s13121_s21 + $0x90] sm:$0xff] %v4883_v53 }
 0x522   : > { %v3831_v25 = vpop.f32.mrf.mxu0  ;;  %v4190_v57 = vpop.f32.mrf.mxu1 }
 0x523   : > { %v4191_v5 = vadd.f32 %v4190_v57, %v3827_v50  ;;  %v4599_v60 = vpop.f32.mrf.mxu2  ;;  %v4886_v32 = vpop.f32.mrf.mxu3  ;;  %v3832_v45 = vadd.f32 %v3831_v25, %v16768_v49 }
 0x525   : > { %v4600_v44 = vadd.f32 %v4599_v60, %v4191_v5  ;;  %3910 = vmatmul.f32.gmra.mxu0 %v16765_v59  ;;  %4285 = vmatmul.f32.gmra.mxu1 %v16766_v13  ;;  %v16769_v60 = vld [vmem:[#allocation413_spill] sm:$0xff]  ;;  %v16770_v5 = vld [vmem:[#allocation410_spill] sm:$0xff] }
 0x527   : > { %v4887_v27 = vadd.f32 %v4886_v32, %v4600_v44  ;;  %4953 = vmatmul.f32.gmra.mxu3 %v16767_v35  ;;  %v16771_v32 = vld [vmem:[#allocation411_spill] sm:$0xff]  ;;  %v16772_v44 = vld [vmem:[#allocation424_spill] sm:$0xff] }
 0x528   : > { %4666 = vmatmul.f32.gmra.mxu2 %v16767_v35 }
 0x529   : > { %9712 = vst [vmem:[%s13121_s21 + $0xa0] sm:$0xff] %v4887_v27 }
 0x52a   : > { %v3836_v53 = vpop.f32.mrf.mxu0  ;;  %v4196_v51 = vpop.f32.mrf.mxu1 }
 0x52b   : > { %v4197_v50 = vadd.f32 %v4196_v51, %v3832_v45  ;;  %v4603_v57 = vpop.f32.mrf.mxu2  ;;  %v4890_v34 = vpop.f32.mrf.mxu3  ;;  %v3837_v59 = vadd.f32 %v3836_v53, %v16772_v44 }
 0x52d   : > { %v4604_v23 = vadd.f32 %v4603_v57, %v4197_v50  ;;  %3915 = vmatmul.f32.gmra.mxu0 %v16769_v60  ;;  %4291 = vmatmul.f32.gmra.mxu1 %v16770_v5  ;;  %v16773_v50 = vld [vmem:[#allocation417_spill] sm:$0xff]  ;;  %v16774_v57 = vld [vmem:[#allocation414_spill] sm:$0xff] }
 0x52f   : > { %v4891_v13 = vadd.f32 %v4890_v34, %v4604_v23  ;;  %4957 = vmatmul.f32.gmra.mxu3 %v16771_v32  ;;  %v16775_v34 = vld [vmem:[#allocation415_spill] sm:$0xff]  ;;  %v16776_v23 = vld [vmem:[#allocation428_spill] sm:$0xff] }
 0x530   : > { %4670 = vmatmul.f32.gmra.mxu2 %v16771_v32 }
 0x531   : > { %9714 = vst [vmem:[%s13121_s21 + $0xb0] sm:$0xff] %v4891_v13  ;;  %v299_v13 = vld [vmem:[%s15079_s1 + $0x78] sm:$0xff] }
 0x532   : > { %v3841_v27 = vpop.f32.mrf.mxu0  ;;  %v4202_v25 = vpop.f32.mrf.mxu1  ;;  %v13247_v44 = vand.u32 4294901760, %v299_v13 }
 0x533   : > { %v4203_v49 = vadd.f32 %v4202_v25, %v3837_v59  ;;  %v4607_v45 = vpop.f32.mrf.mxu2  ;;  %v4894_v51 = vpop.f32.mrf.mxu3  ;;  %v3842_v60 = vadd.f32 %v3841_v27, %v16776_v23  ;;  %v16777_v27 = vld [vmem:[#allocation421_spill] sm:$0xff] }
 0x534   : > { %5126 = vmatpush.msrb.mxu0 %v13247_v44  ;;  %6427 = vmatpush.msrb.mxu3 %v13247_v44 }
 0x535   : > { %v4608_v35 = vadd.f32 %v4607_v45, %v4203_v49  ;;  %3920 = vmatmul.f32.gmra.mxu0 %v16773_v50  ;;  %4297 = vmatmul.f32.gmra.mxu1 %v16774_v57  ;;  %v16780_v57 = vld [vmem:[#allocation432_spill] sm:$0xff] }
 0x537   : > { %v4895_v5 = vadd.f32 %v4894_v51, %v4608_v35  ;;  %4961 = vmatmul.f32.gmra.mxu3 %v16775_v34  ;;  %v13250_v35 = vsub.f32 %v299_v13, %v13247_v44  ;;  %v16778_v51 = vld [vmem:[#allocation418_spill] sm:$0xff] }
 0x538   : > { %4674 = vmatmul.f32.gmra.mxu2 %v16775_v34 }
 0x539   : > { %9716 = vst [vmem:[%s13121_s21 + $0xc0] sm:$0xff] %v4895_v5  ;;  %6057 = vmatpush.msrb.mxu2 %v13250_v35  ;;  %v15932_v23 = vand.u32 4294901760, %v13250_v35 }
 0x53a   : > { %v3846_v59 = vpop.f32.mrf.mxu0  ;;  %v4208_v53 = vpop.f32.mrf.mxu1 }
 0x53b   : > { %v4209_v25 = vadd.f32 %v4208_v53, %v3842_v60  ;;  %v4611_v49 = vpop.f32.mrf.mxu2  ;;  %v4898_v45 = vpop.f32.mrf.mxu3  ;;  %v16779_v53 = vld [vmem:[#allocation419_spill] sm:$0xff]  ;;  %v5721_v13 = vsub.f32 %v13250_v35, %v15932_v23  ;;  %v3847_v50 = vadd.f32 %v3846_v59, %v16780_v57  ;;  %v16784_v57 = vld [vmem:[#allocation436_spill] sm:$0xff] }
 0x53d   : > { %v4612_v5 = vadd.f32 %v4611_v49, %v4209_v25  ;;  %3925 = vmatmul.f32.gmra.mxu0 %v16777_v27  ;;  %4303 = vmatmul.f32.gmra.mxu1 %v16778_v51  ;;  %v5722_v51 = vand.u32 4294901760, %v5721_v13 }
 0x53f   : > { %v4899_v60 = vadd.f32 %v4898_v45, %v4612_v5  ;;  %4965 = vmatmul.f32.gmra.mxu3 %v16779_v53  ;;  %5723 = vmatpush.msrb.mxu1 %v5722_v51  ;;  %v16781_v5 = vld [vmem:[#allocation425_spill] sm:$0xff] }
 0x540   : > { %4678 = vmatmul.f32.gmra.mxu2 %v16779_v53 }
 0x541   : > { %9718 = vst [vmem:[%s13121_s21 + $0xd0] sm:$0xff] %v4899_v60 }
 0x542   : > { %v3851_v25 = vpop.f32.mrf.mxu0  ;;  %v4214_v49 = vpop.f32.mrf.mxu1 }
 0x543   : > { %v4215_v27 = vadd.f32 %v4214_v49, %v3847_v50  ;;  %v4615_v34 = vpop.f32.mrf.mxu2  ;;  %v4902_v32 = vpop.f32.mrf.mxu3  ;;  %v3852_v59 = vadd.f32 %v3851_v25, %v16784_v57 }
 0x545   : > { %v4616_v45 = vadd.f32 %v4615_v34, %v4215_v27  ;;  %3930 = vmatmul.f32.gmra.mxu0 %v16781_v5  ;;  %4309 = vmatmul.f32.gmra.mxu1 %v16782_v30  ;;  %v16785_v34 = vld [vmem:[#allocation429_spill] sm:$0xff]  ;;  %v16786_v27 = vld [vmem:[#allocation426_spill] sm:$0xff] }
 0x547   : > { %v4903_v53 = vadd.f32 %v4902_v32, %v4616_v45  ;;  %4969 = vmatmul.f32.gmra.mxu3 %v16783_v61  ;;  %v16787_v32 = vld [vmem:[#allocation427_spill] sm:$0xff]  ;;  %v16788_v45 = vld [vmem:[#allocation440_spill] sm:$0xff] }
 0x548   : > { %4682 = vmatmul.f32.gmra.mxu2 %v16783_v61 }
 0x549   : > { %9720 = vst [vmem:[%s13121_s21 + $0xe0] sm:$0xff] %v4903_v53 }
 0x54a   : > { %v3856_v60 = vpop.f32.mrf.mxu0  ;;  %v4220_v13 = vpop.f32.mrf.mxu1 }
 0x54b   : > { %v4221_v50 = vadd.f32 %v4220_v13, %v3852_v59  ;;  %v4619_v49 = vpop.f32.mrf.mxu2  ;;  %v4906_v23 = vpop.f32.mrf.mxu3  ;;  %v3857_v5 = vadd.f32 %v3856_v60, %v16788_v45 }
 0x54d   : > { %v4620_v51 = vadd.f32 %v4619_v49, %v4221_v50  ;;  %3935 = vmatmul.f32.gmra.mxu0 %v16785_v34  ;;  %4315 = vmatmul.f32.gmra.mxu1 %v16786_v27  ;;  %v16789_v50 = vld [vmem:[#allocation433_spill] sm:$0xff]  ;;  %v16790_v49 = vld [vmem:[#allocation430_spill] sm:$0xff] }
 0x54f   : > { %v4907_v30 = vadd.f32 %v4906_v23, %v4620_v51  ;;  %4973 = vmatmul.f32.gmra.mxu3 %v16787_v32  ;;  %v16791_v23 = vld [vmem:[#allocation431_spill] sm:$0xff]  ;;  %v16792_v51 = vld [vmem:[#allocation444_spill] sm:$0xff] }
 0x550   : > { %4686 = vmatmul.f32.gmra.mxu2 %v16787_v32 }
 0x551   : > { %9722 = vst [vmem:[%s13121_s21 + $0xf0] sm:$0xff] %v4907_v30 }
 0x552   : > { %v3861_v53 = vpop.f32.mrf.mxu0  ;;  %v4226_v25 = vpop.f32.mrf.mxu1 }
 0x553   : > { %v4227_v57 = vadd.f32 %v4226_v25, %v3857_v5  ;;  %v4623_v59 = vpop.f32.mrf.mxu2  ;;  %v4910_v13 = vpop.f32.mrf.mxu3  ;;  %v3862_v34 = vadd.f32 %v3861_v53, %v16792_v51  ;;  %v16796_v51 = vld [vmem:[#allocation448_spill] sm:$0xff] }
 0x555   : > { %v4624_v61 = vadd.f32 %v4623_v59, %v4227_v57  ;;  %3940 = vmatmul.f32.gmra.mxu0 %v16789_v50  ;;  %4321 = vmatmul.f32.gmra.mxu1 %v16790_v49  ;;  %v297_v57 = vld [vmem:[%s15079_s1 + $0x68] sm:$0xff]  ;;  %v16794_v49 = vld [vmem:[#allocation434_spill] sm:$0xff] }
 0x556   : > { %v13286_v59 = vand.u32 4294901760, %v297_v57 }
 0x557   : > { %v4911_v27 = vadd.f32 %v4910_v13, %v4624_v61  ;;  %4977 = vmatmul.f32.gmra.mxu3 %v16791_v23  ;;  %v16793_v13 = vld [vmem:[#allocation437_spill] sm:$0xff] }
 0x558   : > { %4690 = vmatmul.f32.gmra.mxu2 %v16791_v23  ;;  %v13291_v53 = vsub.f32 %v297_v57, %v13286_v59  ;;  %5128 = vmatpush.msrb.mxu0 %v13286_v59  ;;  %v16797_v23 = vld [vmem:[#allocation441_spill] sm:$0xff] }
 0x559   : > { %9724 = vst [vmem:[%s13121_s21 + $0x100] sm:$0xff] %v4911_v27  ;;  %6429 = vmatpush.msrb.mxu3 %v13286_v59  ;;  %v16795_v27 = vld [vmem:[#allocation435_spill] sm:$0xff] }
 0x55a   : > { %v3866_v60 = vpop.f32.mrf.mxu0  ;;  %v4232_v30 = vpop.f32.mrf.mxu1  ;;  %6060 = vmatpush.msrb.mxu2 %v13291_v53 }
 0x55b   : > { %v4233_v45 = vadd.f32 %v4232_v30, %v3862_v34  ;;  %v4627_v5 = vpop.f32.mrf.mxu2  ;;  %v4914_v25 = vpop.f32.mrf.mxu3  ;;  %v3867_v30 = vadd.f32 %v3866_v60, %v16796_v51  ;;  %v16799_v51 = vld [vmem:[#allocation439_spill] sm:$0xff] }
 0x55d   : > { %v4628_v61 = vadd.f32 %v4627_v5, %v4233_v45  ;;  %3945 = vmatmul.f32.gmra.mxu0 %v16793_v13  ;;  %4327 = vmatmul.f32.gmra.mxu1 %v16794_v49  ;;  %v15939_v45 = vand.u32 4294901760, %v13291_v53 }
 0x55f   : > { %v4915_v34 = vadd.f32 %v4914_v25, %v4628_v61  ;;  %4981 = vmatmul.f32.gmra.mxu3 %v16795_v27  ;;  %v5727_v25 = vsub.f32 %v13291_v53, %v15939_v45 }
 0x560   : > { %4694 = vmatmul.f32.gmra.mxu2 %v16795_v27  ;;  %v16798_v27 = vld [vmem:[#allocation438_spill] sm:$0xff] }
 0x561   : > { %9726 = vst [vmem:[%s13121_s21 + $0x110] sm:$0xff] %v4915_v34  ;;  %v5728_v60 = vand.u32 4294901760, %v5727_v25  ;;  %v16803_v25 = vld [vmem:[#allocation443_spill] sm:$0xff] }
 0x562   : > { %v3871_v5 = vpop.f32.mrf.mxu0  ;;  %v4238_v57 = vpop.f32.mrf.mxu1 }
 0x563   : > { %v4239_v49 = vadd.f32 %v4238_v57, %v3867_v30  ;;  %v4631_v13 = vpop.f32.mrf.mxu2  ;;  %v4918_v50 = vpop.f32.mrf.mxu3  ;;  %5729 = vmatpush.msrb.mxu1 %v5728_v60  ;;  %v16800_v30 = vld [vmem:[#allocation452_spill] sm:$0xff] }
 0x564   : > { %v3872_v57 = vadd.f32 %v3871_v5, %v16800_v30 }
 0x565   : > { %v4632_v61 = vadd.f32 %v4631_v13, %v4239_v49  ;;  %3950 = vmatmul.f32.gmra.mxu0 %v16797_v23  ;;  %4333 = vmatmul.f32.gmra.mxu1 %v16798_v27  ;;  %v16801_v23 = vld [vmem:[#allocation445_spill] sm:$0xff]  ;;  %v16802_v27 = vld [vmem:[#allocation442_spill] sm:$0xff] }
 0x567   : > { %v4919_v34 = vadd.f32 %v4918_v50, %v4632_v61  ;;  %4985 = vmatmul.f32.gmra.mxu3 %v16799_v51  ;;  %v16804_v61 = vld [vmem:[#allocation456_spill] sm:$0xff] }
 0x568   : > { %4698 = vmatmul.f32.gmra.mxu2 %v16799_v51 }
 0x569   : > { %9728 = vst [vmem:[%s13121_s21 + $0x120] sm:$0xff] %v4919_v34 }
 0x56a   : > { %v3876_v32 = vpop.f32.mrf.mxu0  ;;  %v4244_v63 = vpop.f32.mrf.mxu1 }
 0x56b   : > { %v4245_v6 = vadd.f32 %v4244_v63, %v3872_v57  ;;  %v4635_v45 = vpop.f32.mrf.mxu2  ;;  %v4922_v49 = vpop.f32.mrf.mxu3  ;;  %v3877_v60 = vadd.f32 %v3876_v32, %v16804_v61 }
 0x56d   : > { %v4636_v13 = vadd.f32 %v4635_v45, %v4245_v6  ;;  %3955 = vmatmul.f32.gmra.mxu0 %v16801_v23  ;;  %4339 = vmatmul.f32.gmra.mxu1 %v16802_v27  ;;  %v16805_v6 = vld [vmem:[#allocation449_spill] sm:$0xff]  ;;  %v16806_v45 = vld [vmem:[#allocation446_spill] sm:$0xff] }
 0x56f   : > { %v4923_v50 = vadd.f32 %v4922_v49, %v4636_v13  ;;  %4989 = vmatmul.f32.gmra.mxu3 %v16803_v25  ;;  %v16807_v49 = vld [vmem:[#allocation447_spill] sm:$0xff]  ;;  %v16808_v13 = vld [vmem:[#allocation460_spill] sm:$0xff] }
 0x570   : > { %4702 = vmatmul.f32.gmra.mxu2 %v16803_v25 }
 0x571   : > { %9730 = vst [vmem:[%s13121_s21 + $0x130] sm:$0xff] %v4923_v50 }
 0x572   : > { %v3881_v5 = vpop.f32.mrf.mxu0  ;;  %v4250_v34 = vpop.f32.mrf.mxu1 }
 0x573   : > { %v4251_v30 = vadd.f32 %v4250_v34, %v3877_v60  ;;  %v4639_v63 = vpop.f32.mrf.mxu2  ;;  %v4926_v57 = vpop.f32.mrf.mxu3  ;;  %v3882_v23 = vadd.f32 %v3881_v5, %v16808_v13  ;;  %v16812_v13 = vld [vmem:[#allocation464_spill] sm:$0xff] }
 0x575   : > { %v4640_v51 = vadd.f32 %v4639_v63, %v4251_v30  ;;  %3960 = vmatmul.f32.gmra.mxu0 %v16805_v6  ;;  %4345 = vmatmul.f32.gmra.mxu1 %v16806_v45  ;;  %v295_v30 = vld [vmem:[%s15079_s1 + $0x58] sm:$0xff]  ;;  %v16810_v45 = vld [vmem:[#allocation450_spill] sm:$0xff] }
 0x576   : > { %v13325_v63 = vand.u32 4294901760, %v295_v30 }
 0x577   : > { %v4927_v27 = vadd.f32 %v4926_v57, %v4640_v51  ;;  %4993 = vmatmul.f32.gmra.mxu3 %v16807_v49  ;;  %v16809_v57 = vld [vmem:[#allocation453_spill] sm:$0xff] }
 0x578   : > { %4706 = vmatmul.f32.gmra.mxu2 %v16807_v49  ;;  %v13330_v5 = vsub.f32 %v295_v30, %v13325_v63  ;;  %5130 = vmatpush.msrb.mxu0 %v13325_v63  ;;  %v16813_v49 = vld [vmem:[#allocation457_spill] sm:$0xff] }
 0x579   : > { %9732 = vst [vmem:[%s13121_s21 + $0x140] sm:$0xff] %v4927_v27  ;;  %6431 = vmatpush.msrb.mxu3 %v13325_v63  ;;  %v16811_v27 = vld [vmem:[#allocation451_spill] sm:$0xff] }
 0x57a   : > { %v3886_v32 = vpop.f32.mrf.mxu0  ;;  %v4256_v50 = vpop.f32.mrf.mxu1  ;;  %6063 = vmatpush.msrb.mxu2 %v13330_v5 }
 0x57b   : > { %v4257_v61 = vadd.f32 %v4256_v50, %v3882_v23  ;;  %v4643_v60 = vpop.f32.mrf.mxu2  ;;  %v4930_v34 = vpop.f32.mrf.mxu3  ;;  %v3887_v50 = vadd.f32 %v3886_v32, %v16812_v13  ;;  %v16815_v13 = vld [vmem:[#allocation455_spill] sm:$0xff] }
 0x57d   : > { %v4644_v51 = vadd.f32 %v4643_v60, %v4257_v61  ;;  %3965 = vmatmul.f32.gmra.mxu0 %v16809_v57  ;;  %4351 = vmatmul.f32.gmra.mxu1 %v16810_v45  ;;  %v15945_v61 = vand.u32 4294901760, %v13330_v5 }
 0x57f   : > { %v4931_v23 = vadd.f32 %v4930_v34, %v4644_v51  ;;  %4997 = vmatmul.f32.gmra.mxu3 %v16811_v27  ;;  %v5733_v34 = vsub.f32 %v13330_v5, %v15945_v61 }
 0x580   : > { %4710 = vmatmul.f32.gmra.mxu2 %v16811_v27  ;;  %v16814_v27 = vld [vmem:[#allocation454_spill] sm:$0xff] }
 0x581   : > { %9734 = vst [vmem:[%s13121_s21 + $0x150] sm:$0xff] %v4931_v23  ;;  %v5734_v32 = vand.u32 4294901760, %v5733_v34  ;;  %v16819_v34 = vld [vmem:[#allocation459_spill] sm:$0xff] }
 0x582   : > { %v3891_v60 = vpop.f32.mrf.mxu0  ;;  %v4262_v30 = vpop.f32.mrf.mxu1 }
 0x583   : > { %v4263_v45 = vadd.f32 %v4262_v30, %v3887_v50  ;;  %v4647_v57 = vpop.f32.mrf.mxu2  ;;  %v4934_v6 = vpop.f32.mrf.mxu3  ;;  %5735 = vmatpush.msrb.mxu1 %v5734_v32  ;;  %v16816_v50 = vld [vmem:[#allocation468_spill] sm:$0xff] }
 0x584   : > { %v3892_v30 = vadd.f32 %v3891_v60, %v16816_v50 }
 0x585   : > { %v4648_v51 = vadd.f32 %v4647_v57, %v4263_v45  ;;  %3970 = vmatmul.f32.gmra.mxu0 %v16813_v49  ;;  %4357 = vmatmul.f32.gmra.mxu1 %v16814_v27  ;;  %v16817_v49 = vld [vmem:[#allocation461_spill] sm:$0xff]  ;;  %v16818_v27 = vld [vmem:[#allocation458_spill] sm:$0xff] }
 0x587   : > { %v4935_v23 = vadd.f32 %v4934_v6, %v4648_v51  ;;  %5001 = vmatmul.f32.gmra.mxu3 %v16815_v13  ;;  %v16820_v51 = vld [vmem:[#allocation472_spill] sm:$0xff] }
 0x588   : > { %4714 = vmatmul.f32.gmra.mxu2 %v16815_v13 }
 0x589   : > { %9736 = vst [vmem:[%s13121_s21 + $0x160] sm:$0xff] %v4935_v23 }
 0x58a   : > { %v3896_v25 = vpop.f32.mrf.mxu0  ;;  %v4268_v48 = vpop.f32.mrf.mxu1 }
 0x58b   : > { %v4269_v22 = vadd.f32 %v4268_v48, %v3892_v30  ;;  %v4651_v61 = vpop.f32.mrf.mxu2  ;;  %v4938_v45 = vpop.f32.mrf.mxu3  ;;  %v3897_v32 = vadd.f32 %v3896_v25, %v16820_v51 }
 0x58d   : > { %v4652_v57 = vadd.f32 %v4651_v61, %v4269_v22  ;;  %3975 = vmatmul.f32.gmra.mxu0 %v16817_v49  ;;  %4363 = vmatmul.f32.gmra.mxu1 %v16818_v27  ;;  %v16821_v22 = vld [vmem:[#allocation465_spill] sm:$0xff]  ;;  %v16822_v61 = vld [vmem:[#allocation462_spill] sm:$0xff] }
 0x58f   : > { %v4939_v6 = vadd.f32 %v4938_v45, %v4652_v57  ;;  %5005 = vmatmul.f32.gmra.mxu3 %v16819_v34  ;;  %v16823_v45 = vld [vmem:[#allocation463_spill] sm:$0xff]  ;;  %v16824_v57 = vld [vmem:[#allocation476_spill] sm:$0xff] }
 0x590   : > { %4718 = vmatmul.f32.gmra.mxu2 %v16819_v34 }
 0x591   : > { %9738 = vst [vmem:[%s13121_s21 + $0x170] sm:$0xff] %v4939_v6 }
 0x592   : > { %v3901_v60 = vpop.f32.mrf.mxu0  ;;  %v4274_v23 = vpop.f32.mrf.mxu1 }
 0x593   : > { %v4275_v50 = vadd.f32 %v4274_v23, %v3897_v32  ;;  %v4655_v48 = vpop.f32.mrf.mxu2  ;;  %v4942_v30 = vpop.f32.mrf.mxu3  ;;  %v3902_v49 = vadd.f32 %v3901_v60, %v16824_v57  ;;  %v16827_v60 = vld [vmem:[#allocation467_spill] sm:$0xff] }
 0x595   : > { %v4656_v13 = vadd.f32 %v4655_v48, %v4275_v50  ;;  %3980 = vmatmul.f32.gmra.mxu0 %v16821_v22  ;;  %4369 = vmatmul.f32.gmra.mxu1 %v16822_v61  ;;  %v16825_v50 = vld [vmem:[#allocation469_spill] sm:$0xff]  ;;  %v16826_v48 = vld [vmem:[#allocation466_spill] sm:$0xff] }
 0x596   : > { %v16829_v22 = vld [vmem:[#allocation473_spill] sm:$0xff] }
 0x597   : > { %v4943_v27 = vadd.f32 %v4942_v30, %v4656_v13  ;;  %5009 = vmatmul.f32.gmra.mxu3 %v16823_v45  ;;  %v293_v13 = vld [vmem:[%s15079_s1 + $0x48] sm:$0xff] }
 0x598   : > { %4722 = vmatmul.f32.gmra.mxu2 %v16823_v45  ;;  %v13366_v30 = vand.u32 4294901760, %v293_v13 }
 0x599   : > { %9740 = vst [vmem:[%s13121_s21 + $0x180] sm:$0xff] %v4943_v27  ;;  %v16828_v27 = vld [vmem:[#allocation480_spill] sm:$0xff] }
 0x59a   : > { %v3906_v25 = vpop.f32.mrf.mxu0  ;;  %v4280_v6 = vpop.f32.mrf.mxu1  ;;  %5132 = vmatpush.msrb.mxu0 %v13366_v30  ;;  %6433 = vmatpush.msrb.mxu3 %v13366_v30 }
 0x59b   : > { %v4281_v51 = vadd.f32 %v4280_v6, %v3902_v49  ;;  %v4659_v32 = vpop.f32.mrf.mxu2  ;;  %v4946_v23 = vpop.f32.mrf.mxu3  ;;  %v13371_v49 = vsub.f32 %v293_v13, %v13366_v30  ;;  %v3907_v57 = vadd.f32 %v3906_v25, %v16828_v27 }
 0x59d   : > { %v4660_v34 = vadd.f32 %v4659_v32, %v4281_v51  ;;  %3985 = vmatmul.f32.gmra.mxu0 %v16825_v50  ;;  %4375 = vmatmul.f32.gmra.mxu1 %v16826_v48 }
 0x59e   : > { %6066 = vmatpush.msrb.mxu2 %v13371_v49 }
 0x59f   : > { %v4947_v61 = vadd.f32 %v4946_v23, %v4660_v34  ;;  %5013 = vmatmul.f32.gmra.mxu3 %v16827_v60  ;;  %v15950_v34 = vand.u32 4294901760, %v13371_v49 }
 0x5a0   : > { %4726 = vmatmul.f32.gmra.mxu2 %v16827_v60  ;;  %v16831_v60 = vld [vmem:[#allocation471_spill] sm:$0xff] }
 0x5a1   : > { %9742 = vst [vmem:[%s13121_s21 + $0x190] sm:$0xff] %v4947_v61  ;;  %v5739_v13 = vsub.f32 %v13371_v49, %v15950_v34  ;;  %v16830_v61 = vld [vmem:[#allocation470_spill] sm:$0xff] }
 0x5a2   : > { %v3911_v6 = vpop.f32.mrf.mxu0  ;;  %v4286_v51 = vpop.f32.mrf.mxu1 }
 0x5a3   : > { %v4287_v32 = vadd.f32 %v4286_v51, %v3907_v57  ;;  %v4663_v23 = vpop.f32.mrf.mxu2  ;;  %v4950_v48 = vpop.f32.mrf.mxu3  ;;  %v5740_v25 = vand.u32 4294901760, %v5739_v13  ;;  %v16832_v57 = vld [vmem:[#allocation484_spill] sm:$0xff] }
 0x5a4   : > { %v3912_v51 = vadd.f32 %v3911_v6, %v16832_v57  ;;  %v16836_v13 = vld [vmem:[#allocation488_spill] sm:$0xff] }
 0x5a5   : > { %v4664_v50 = vadd.f32 %v4663_v23, %v4287_v32  ;;  %3990 = vmatmul.f32.gmra.mxu0 %v16829_v22  ;;  %4381 = vmatmul.f32.gmra.mxu1 %v16830_v61  ;;  %v16833_v22 = vld [vmem:[#allocation477_spill] sm:$0xff]  ;;  %v16834_v61 = vld [vmem:[#allocation474_spill] sm:$0xff] }
 0x5a6   : > { %5741 = vmatpush.msrb.mxu1 %v5740_v25 }
 0x5a7   : > { %v4951_v27 = vadd.f32 %v4950_v48, %v4664_v50  ;;  %5017 = vmatmul.f32.gmra.mxu3 %v16831_v60  ;;  %v16835_v48 = vld [vmem:[#allocation475_spill] sm:$0xff] }
 0x5a8   : > { %4730 = vmatmul.f32.gmra.mxu2 %v16831_v60 }
 0x5a9   : > { %9744 = vst [vmem:[%s13121_s21 + $0x1a0] sm:$0xff] %v4951_v27 }
 0x5aa   : > { %v3916_v45 = vpop.f32.mrf.mxu0  ;;  %v4292_v29 = vpop.f32.mrf.mxu1 }
 0x5ab   : > { %v4293_v24 = vadd.f32 %v4292_v29, %v3912_v51  ;;  %v4667_v34 = vpop.f32.mrf.mxu2  ;;  %v4954_v32 = vpop.f32.mrf.mxu3  ;;  %v3917_v25 = vadd.f32 %v3916_v45, %v16836_v13 }
 0x5ad   : > { %v4668_v23 = vadd.f32 %v4667_v34, %v4293_v24  ;;  %3995 = vmatmul.f32.gmra.mxu0 %v16833_v22  ;;  %4387 = vmatmul.f32.gmra.mxu1 %v16834_v61  ;;  %v16837_v24 = vld [vmem:[#allocation481_spill] sm:$0xff]  ;;  %v16838_v34 = vld [vmem:[#allocation478_spill] sm:$0xff] }
 0x5af   : > { %v4955_v50 = vadd.f32 %v4954_v32, %v4668_v23  ;;  %5021 = vmatmul.f32.gmra.mxu3 %v16835_v48  ;;  %v16839_v32 = vld [vmem:[#allocation479_spill] sm:$0xff]  ;;  %v16840_v23 = vld [vmem:[#allocation492_spill] sm:$0xff] }
 0x5b0   : > { %4734 = vmatmul.f32.gmra.mxu2 %v16835_v48 }
 0x5b1   : > { %9746 = vst [vmem:[%s13121_s21 + $0x1b0] sm:$0xff] %v4955_v50 }
 0x5b2   : > { %v3921_v6 = vpop.f32.mrf.mxu0  ;;  %v4298_v27 = vpop.f32.mrf.mxu1 }
 0x5b3   : > { %v4299_v57 = vadd.f32 %v4298_v27, %v3917_v25  ;;  %v4671_v29 = vpop.f32.mrf.mxu2  ;;  %v4958_v51 = vpop.f32.mrf.mxu3  ;;  %v3922_v22 = vadd.f32 %v3921_v6, %v16840_v23  ;;  %v16843_v6 = vld [vmem:[#allocation483_spill] sm:$0xff] }
 0x5b5   : > { %v4672_v60 = vadd.f32 %v4671_v29, %v4299_v57  ;;  %4000 = vmatmul.f32.gmra.mxu0 %v16837_v24  ;;  %4393 = vmatmul.f32.gmra.mxu1 %v16838_v34  ;;  %v16841_v57 = vld [vmem:[#allocation485_spill] sm:$0xff]  ;;  %v16842_v29 = vld [vmem:[#allocation482_spill] sm:$0xff] }
 0x5b6   : > { %v16845_v24 = vld [vmem:[#allocation489_spill] sm:$0xff] }
 0x5b7   : > { %v4959_v61 = vadd.f32 %v4958_v51, %v4672_v60  ;;  %5025 = vmatmul.f32.gmra.mxu3 %v16839_v32  ;;  %v291_v60 = vld [vmem:[%s15079_s1 + $0x38] sm:$0xff] }
 0x5b8   : > { %4738 = vmatmul.f32.gmra.mxu2 %v16839_v32  ;;  %v13405_v51 = vand.u32 4294901760, %v291_v60 }
 0x5b9   : > { %9748 = vst [vmem:[%s13121_s21 + $0x1c0] sm:$0xff] %v4959_v61  ;;  %v16844_v61 = vld [vmem:[#allocation496_spill] sm:$0xff] }
 0x5ba   : > { %v3926_v45 = vpop.f32.mrf.mxu0  ;;  %v4304_v50 = vpop.f32.mrf.mxu1  ;;  %5134 = vmatpush.msrb.mxu0 %v13405_v51  ;;  %6435 = vmatpush.msrb.mxu3 %v13405_v51 }
 0x5bb   : > { %v4305_v13 = vadd.f32 %v4304_v50, %v3922_v22  ;;  %v4675_v25 = vpop.f32.mrf.mxu2  ;;  %v4962_v27 = vpop.f32.mrf.mxu3  ;;  %v13410_v22 = vsub.f32 %v291_v60, %v13405_v51  ;;  %v3927_v23 = vadd.f32 %v3926_v45, %v16844_v61 }
 0x5bd   : > { %v4676_v48 = vadd.f32 %v4675_v25, %v4305_v13  ;;  %4005 = vmatmul.f32.gmra.mxu0 %v16841_v57  ;;  %4399 = vmatmul.f32.gmra.mxu1 %v16842_v29 }
 0x5be   : > { %6069 = vmatpush.msrb.mxu2 %v13410_v22 }
 0x5bf   : > { %v4963_v34 = vadd.f32 %v4962_v27, %v4676_v48  ;;  %5029 = vmatmul.f32.gmra.mxu3 %v16843_v6  ;;  %v15955_v48 = vand.u32 4294901760, %v13410_v22 }
 0x5c0   : > { %4742 = vmatmul.f32.gmra.mxu2 %v16843_v6  ;;  %v16847_v6 = vld [vmem:[#allocation487_spill] sm:$0xff] }
 0x5c1   : > { %9750 = vst [vmem:[%s13121_s21 + $0x1d0] sm:$0xff] %v4963_v34  ;;  %v5745_v60 = vsub.f32 %v13410_v22, %v15955_v48  ;;  %v16846_v34 = vld [vmem:[#allocation486_spill] sm:$0xff] }
 0x5c2   : > { %v3931_v50 = vpop.f32.mrf.mxu0  ;;  %v4310_v13 = vpop.f32.mrf.mxu1 }
 0x5c3   : > { %v4311_v25 = vadd.f32 %v4310_v13, %v3927_v23  ;;  %v4679_v27 = vpop.f32.mrf.mxu2  ;;  %v4966_v29 = vpop.f32.mrf.mxu3  ;;  %v5746_v45 = vand.u32 4294901760, %v5745_v60  ;;  %v16848_v23 = vld [vmem:[#allocation500_spill] sm:$0xff] }
 0x5c4   : > { %v3932_v13 = vadd.f32 %v3931_v50, %v16848_v23  ;;  %v16852_v60 = vld [vmem:[#allocation504_spill] sm:$0xff] }
 0x5c5   : > { %v4680_v57 = vadd.f32 %v4679_v27, %v4311_v25  ;;  %4010 = vmatmul.f32.gmra.mxu0 %v16845_v24  ;;  %4405 = vmatmul.f32.gmra.mxu1 %v16846_v34  ;;  %v16849_v24 = vld [vmem:[#allocation493_spill] sm:$0xff]  ;;  %v16850_v34 = vld [vmem:[#allocation490_spill] sm:$0xff] }
 0x5c6   : > { %5747 = vmatpush.msrb.mxu1 %v5746_v45 }
 0x5c7   : > { %v4967_v61 = vadd.f32 %v4966_v29, %v4680_v57  ;;  %5033 = vmatmul.f32.gmra.mxu3 %v16847_v6  ;;  %v16851_v29 = vld [vmem:[#allocation491_spill] sm:$0xff] }
 0x5c8   : > { %4746 = vmatmul.f32.gmra.mxu2 %v16847_v6 }
 0x5c9   : > { %9752 = vst [vmem:[%s13121_s21 + $0x1e0] sm:$0xff] %v4967_v61 }
 0x5ca   : > { %v3936_v32 = vpop.f32.mrf.mxu0  ;;  %v4316_v39 = vpop.f32.mrf.mxu1 }
 0x5cb   : > { %v4317_v0 = vadd.f32 %v4316_v39, %v3932_v13  ;;  %v4683_v48 = vpop.f32.mrf.mxu2  ;;  %v4970_v25 = vpop.f32.mrf.mxu3  ;;  %v3937_v45 = vadd.f32 %v3936_v32, %v16852_v60 }
 0x5cd   : > { %v4684_v27 = vadd.f32 %v4683_v48, %v4317_v0  ;;  %4015 = vmatmul.f32.gmra.mxu0 %v16849_v24  ;;  %4411 = vmatmul.f32.gmra.mxu1 %v16850_v34  ;;  %v16853_v0 = vld [vmem:[#allocation497_spill] sm:$0xff]  ;;  %v16854_v48 = vld [vmem:[#allocation494_spill] sm:$0xff] }
 0x5cf   : > { %v4971_v57 = vadd.f32 %v4970_v25, %v4684_v27  ;;  %5037 = vmatmul.f32.gmra.mxu3 %v16851_v29  ;;  %v16855_v25 = vld [vmem:[#allocation495_spill] sm:$0xff]  ;;  %v16856_v27 = vld [vmem:[#allocation508_spill] sm:$0xff] }
 0x5d0   : > { %4750 = vmatmul.f32.gmra.mxu2 %v16851_v29 }
 0x5d1   : > { %9754 = vst [vmem:[%s13121_s21 + $0x1f0] sm:$0xff] %v4971_v57 }
 0x5d2   : > { %v3941_v50 = vpop.f32.mrf.mxu0  ;;  %v4322_v61 = vpop.f32.mrf.mxu1 }
 0x5d3   : > { %v4323_v23 = vadd.f32 %v4322_v61, %v3937_v45  ;;  %v4687_v39 = vpop.f32.mrf.mxu2  ;;  %v4974_v13 = vpop.f32.mrf.mxu3  ;;  %v3942_v24 = vadd.f32 %v3941_v50, %v16856_v27 }
 0x5d5   : > { %v4688_v6 = vadd.f32 %v4687_v39, %v4323_v23  ;;  %4020 = vmatmul.f32.gmra.mxu0 %v16853_v0  ;;  %4417 = vmatmul.f32.gmra.mxu1 %v16854_v48  ;;  %v16857_v23 = vld [vmem:[#allocation501_spill] sm:$0xff]  ;;  %v16858_v39 = vld [vmem:[#allocation498_spill] sm:$0xff] }
 0x5d7   : > { %v4975_v34 = vadd.f32 %v4974_v13, %v4688_v6  ;;  %5041 = vmatmul.f32.gmra.mxu3 %v16855_v25  ;;  %v16859_v6 = vld [vmem:[#allocation499_spill] sm:$0xff] }
 0x5d8   : > { %4754 = vmatmul.f32.gmra.mxu2 %v16855_v25 }
 0x5d9   : > { %9756 = vst [vmem:[%s13121_s21 + $0x200] sm:$0xff] %v4975_v34  ;;  %v289_v34 = vld [vmem:[%s15079_s1 + $0x28] sm:$0xff] }
 0x5da   : > { %v3946_v32 = vpop.f32.mrf.mxu0  ;;  %v4328_v57 = vpop.f32.mrf.mxu1  ;;  %v13448_v27 = vand.u32 4294901760, %v289_v34 }
 0x5db   : > { %v4329_v60 = vadd.f32 %v4328_v57, %v3942_v24  ;;  %v4691_v45 = vpop.f32.mrf.mxu2  ;;  %v4978_v61 = vpop.f32.mrf.mxu3  ;;  %v3947_v13 = vadd.f32 %v3946_v32, %v12636_v1 }
 0x5dc   : > { %5136 = vmatpush.msrb.mxu0 %v13448_v27  ;;  %6437 = vmatpush.msrb.mxu3 %v13448_v27 }
 0x5dd   : > { %v4692_v29 = vadd.f32 %v4691_v45, %v4329_v60  ;;  %4025 = vmatmul.f32.gmra.mxu0 %v16857_v23  ;;  %4423 = vmatmul.f32.gmra.mxu1 %v16858_v39 }
 0x5df   : > { %v4979_v48 = vadd.f32 %v4978_v61, %v4692_v29  ;;  %5045 = vmatmul.f32.gmra.mxu3 %v16859_v6  ;;  %v13451_v29 = vsub.f32 %v289_v34, %v13448_v27 }
 0x5e0   : > { %4758 = vmatmul.f32.gmra.mxu2 %v16859_v6 }
 0x5e1   : > { %9758 = vst [vmem:[%s13121_s21 + $0x210] sm:$0xff] %v4979_v48  ;;  %v16860_v48 = vld [vmem:[#allocation502_spill] sm:$0xff]  ;;  %6072 = vmatpush.msrb.mxu2 %v13451_v29  ;;  %v15960_v32 = vand.u32 4294901760, %v13451_v29 }
 0x5e2   : > { %v3951_v24 = vpop.f32.mrf.mxu0  ;;  %v4334_v50 = vpop.f32.mrf.mxu1 }
 0x5e3   : > { %v4335_v57 = vadd.f32 %v4334_v50, %v3947_v13  ;;  %v4695_v60 = vpop.f32.mrf.mxu2  ;;  %v4982_v45 = vpop.f32.mrf.mxu3  ;;  %v16861_v13 = vld [vmem:[#allocation503_spill] sm:$0xff]  ;;  %v5751_v34 = vsub.f32 %v13451_v29, %v15960_v32  ;;  %v3952_v50 = vadd.f32 %v3951_v24, %v12657_v10 }
 0x5e5   : > { %v4696_v1 = vadd.f32 %v4695_v60, %v4335_v57  ;;  %4030 = vmatmul.f32.gmra.mxu0 %v12601_v3  ;;  %4429 = vmatmul.f32.gmra.mxu1 %v16860_v48  ;;  %v5752_v48 = vand.u32 4294901760, %v5751_v34 }
 0x5e7   : > { %v4983_v61 = vadd.f32 %v4982_v45, %v4696_v1  ;;  %5049 = vmatmul.f32.gmra.mxu3 %v16861_v13  ;;  %5753 = vmatpush.msrb.mxu1 %v5752_v48  ;;  %v16862_v1 = vld [vmem:[#allocation506_spill] sm:$0xff] }
 0x5e8   : > { %4762 = vmatmul.f32.gmra.mxu2 %v16861_v13  ;;  %v16863_v13 = vld [vmem:[#allocation507_spill] sm:$0xff] }
 0x5e9   : > { %9760 = vst [vmem:[%s13121_s21 + $0x220] sm:$0xff] %v4983_v61 }
 0x5ea   : > { %v3956_v57 = vpop.f32.mrf.mxu0  ;;  %v4340_v60 = vpop.f32.mrf.mxu1 }
 0x5eb   : > { %v4341_v3 = vadd.f32 %v4340_v60, %v3952_v50  ;;  %v4699_v39 = vpop.f32.mrf.mxu2  ;;  %v4986_v23 = vpop.f32.mrf.mxu3  ;;  %v3957_v10 = vadd.f32 %v3956_v57, %v12678_v19 }
 0x5ed   : > { %v4700_v45 = vadd.f32 %v4699_v39, %v4341_v3  ;;  %4035 = vmatmul.f32.gmra.mxu0 %v12622_v58  ;;  %4435 = vmatmul.f32.gmra.mxu1 %v16862_v1  ;;  %v16864_v3 = vld [vmem:[#allocation510_spill] sm:$0xff]  ;;  %v16872_v1 = vld [vmem:[#allocation523_spill] sm:$0xff] }
 0x5ef   : > { %v4987_v0 = vadd.f32 %v4986_v23, %v4700_v45  ;;  %5053 = vmatmul.f32.gmra.mxu3 %v16863_v13  ;;  %v16865_v23 = vld [vmem:[#allocation511_spill] sm:$0xff] }
 0x5f0   : > { %4766 = vmatmul.f32.gmra.mxu2 %v16863_v13 }
 0x5f1   : > { %9762 = vst [vmem:[%s13121_s21 + $0x230] sm:$0xff] %v4987_v0 }
 0x5f2   : > { %v3961_v24 = vpop.f32.mrf.mxu0  ;;  %v4346_v61 = vpop.f32.mrf.mxu1 }
 0x5f3   : > { %v4347_v34 = vadd.f32 %v4346_v61, %v3957_v10  ;;  %v4703_v50 = vpop.f32.mrf.mxu2  ;;  %v4990_v60 = vpop.f32.mrf.mxu3  ;;  %v3962_v45 = vadd.f32 %v3961_v24, %v12699_v8  ;;  %v287_v8 = vld [vmem:[%s15079_s1 + $0x18] sm:$0xff] }
 0x5f5   : > { %v4704_v48 = vadd.f32 %v4703_v50, %v4347_v34  ;;  %4040 = vmatmul.f32.gmra.mxu0 %v12643_v41  ;;  %4441 = vmatmul.f32.gmra.mxu1 %v16864_v3  ;;  %v16866_v34 = vld [vmem:[#allocation514_spill] sm:$0xff] }
 0x5f6   : > { %v16871_v3 = vld [vmem:[#allocation522_spill] sm:$0xff] }
 0x5f7   : > { %v4991_v39 = vadd.f32 %v4990_v60, %v4704_v48  ;;  %5057 = vmatmul.f32.gmra.mxu3 %v16865_v23  ;;  %v16867_v60 = vld [vmem:[#allocation515_spill] sm:$0xff] }
 0x5f8   : > { %4770 = vmatmul.f32.gmra.mxu2 %v16865_v23 }
 0x5f9   : > { %9764 = vst [vmem:[%s13121_s21 + $0x240] sm:$0xff] %v4991_v39 }
 0x5fa   : > { %v3966_v19 = vpop.f32.mrf.mxu0  ;;  %v4352_v0 = vpop.f32.mrf.mxu1 }
 0x5fb   : > { %v4353_v57 = vadd.f32 %v4352_v0, %v3962_v45  ;;  %v4707_v10 = vpop.f32.mrf.mxu2  ;;  %v4994_v61 = vpop.f32.mrf.mxu3  ;;  %v3967_v48 = vadd.f32 %v3966_v19, %v12720_v33  ;;  %v13487_v45 = vand.u32 4294901760, %v287_v8  ;;  %v16868_v19 = vld [vmem:[#allocation518_spill] sm:$0xff] }
 0x5fd   : > { %v4708_v32 = vadd.f32 %v4707_v10, %v4353_v57  ;;  %4045 = vmatmul.f32.gmra.mxu0 %v12664_v62  ;;  %4447 = vmatmul.f32.gmra.mxu1 %v16866_v34 }
 0x5fe   : > { %5138 = vmatpush.msrb.mxu0 %v13487_v45  ;;  %6439 = vmatpush.msrb.mxu3 %v13487_v45 }
 0x5ff   : > { %v4995_v50 = vadd.f32 %v4994_v61, %v4708_v32  ;;  %5061 = vmatmul.f32.gmra.mxu3 %v16867_v60  ;;  %v13490_v32 = vsub.f32 %v287_v8, %v13487_v45 }
 0x600   : > { %4774 = vmatmul.f32.gmra.mxu2 %v16867_v60 }
 0x601   : > { %9766 = vst [vmem:[%s13121_s21 + $0x250] sm:$0xff] %v4995_v50  ;;  %6075 = vmatpush.msrb.mxu2 %v13490_v32  ;;  %v15964_v61 = vand.u32 4294901760, %v13490_v32 }
 0x602   : > { %v3971_v24 = vpop.f32.mrf.mxu0  ;;  %v4358_v39 = vpop.f32.mrf.mxu1 }
 0x603   : > { %v4359_v0 = vadd.f32 %v4358_v39, %v3967_v48  ;;  %v4711_v57 = vpop.f32.mrf.mxu2  ;;  %v4998_v10 = vpop.f32.mrf.mxu3  ;;  %v16869_v48 = vld [vmem:[#allocation519_spill] sm:$0xff]  ;;  %v5757_v8 = vsub.f32 %v13490_v32, %v15964_v61  ;;  %v3972_v39 = vadd.f32 %v3971_v24, %v12741_v43 }
 0x604   : > { %v16873_v43 = vld [vmem:[#allocation535_spill] sm:$0xff] }
 0x605   : > { %v4712_v33 = vadd.f32 %v4711_v57, %v4359_v0  ;;  %4050 = vmatmul.f32.gmra.mxu0 %v12685_v28  ;;  %4453 = vmatmul.f32.gmra.mxu1 %v16868_v19  ;;  %v5758_v19 = vand.u32 4294901760, %v5757_v8 }
 0x607   : > { %v4999_v50 = vadd.f32 %v4998_v10, %v4712_v33  ;;  %5065 = vmatmul.f32.gmra.mxu3 %v16869_v48  ;;  %5759 = vmatpush.msrb.mxu1 %v5758_v19  ;;  %v16870_v33 = vld [vmem:[#allocation524_spill] sm:$0xff] }
 0x608   : > { %4778 = vmatmul.f32.gmra.mxu2 %v16869_v48 }
 0x609   : > { %9768 = vst [vmem:[%s13121_s21 + $0x260] sm:$0xff] %v4999_v50 }
 0x60a   : > { %v3976_v0 = vpop.f32.mrf.mxu0  ;;  %v4364_v57 = vpop.f32.mrf.mxu1 }
 0x60b   : > { %v4365_v28 = vadd.f32 %v4364_v57, %v3972_v39  ;;  %v4715_v34 = vpop.f32.mrf.mxu2  ;;  %v5002_v62 = vpop.f32.mrf.mxu3  ;;  %v3977_v24 = vadd.f32 %v3976_v0, %v16873_v43 }
 0x60d   : > { %v4716_v10 = vadd.f32 %v4715_v34, %v4365_v28  ;;  %4055 = vmatmul.f32.gmra.mxu0 %v16870_v33  ;;  %4459 = vmatmul.f32.gmra.mxu1 %v16871_v3  ;;  %v16874_v28 = vld [vmem:[#allocation528_spill] sm:$0xff]  ;;  %v16875_v34 = vld [vmem:[#allocation526_spill] sm:$0xff] }
 0x60f   : > { %v5003_v41 = vadd.f32 %v5002_v62, %v4716_v10  ;;  %5069 = vmatmul.f32.gmra.mxu3 %v16872_v1  ;;  %v16876_v62 = vld [vmem:[#allocation527_spill] sm:$0xff] }
 0x610   : > { %4782 = vmatmul.f32.gmra.mxu2 %v16872_v1  ;;  %v16877_v10 = vld [vmem:[#allocation539_spill] sm:$0xff] }
 0x611   : > { %9770 = vst [vmem:[%s13121_s21 + $0x270] sm:$0xff] %v5003_v41 }
 0x612   : > { %v3981_v50 = vpop.f32.mrf.mxu0  ;;  %v4370_v8 = vpop.f32.mrf.mxu1 }
 0x613   : > { %v4371_v39 = vadd.f32 %v4370_v8, %v3977_v24  ;;  %v4719_v57 = vpop.f32.mrf.mxu2  ;;  %v5006_v61 = vpop.f32.mrf.mxu3  ;;  %v3982_v33 = vadd.f32 %v3981_v50, %v16877_v10 }
 0x615   : > { %v4720_v19 = vadd.f32 %v4719_v57, %v4371_v39  ;;  %4060 = vmatmul.f32.gmra.mxu0 %v16874_v28  ;;  %4465 = vmatmul.f32.gmra.mxu1 %v16875_v34  ;;  %v16878_v39 = vld [vmem:[#allocation532_spill] sm:$0xff]  ;;  %v16879_v57 = vld [vmem:[#allocation530_spill] sm:$0xff] }
 0x617   : > { %v5007_v3 = vadd.f32 %v5006_v61, %v4720_v19  ;;  %5073 = vmatmul.f32.gmra.mxu3 %v16876_v62  ;;  %v16880_v61 = vld [vmem:[#allocation531_spill] sm:$0xff] }
 0x618   : > { %4786 = vmatmul.f32.gmra.mxu2 %v16876_v62  ;;  %v16881_v19 = vld [vmem:[#allocation543_spill] sm:$0xff] }
 0x619   : > { %9772 = vst [vmem:[%s13121_s21 + $0x280] sm:$0xff] %v5007_v3  ;;  %v285_v3 = vld [vmem:[%s15079_s1 + $0x8] sm:$0xff] }
 0x61a   : > { %v3986_v41 = vpop.f32.mrf.mxu0  ;;  %v4376_v0 = vpop.f32.mrf.mxu1  ;;  %v13526_v10 = vand.u32 4294901760, %v285_v3 }
 0x61b   : > { %v4377_v43 = vadd.f32 %v4376_v0, %v3982_v33  ;;  %v4723_v24 = vpop.f32.mrf.mxu2  ;;  %v5010_v8 = vpop.f32.mrf.mxu3  ;;  %v3987_v28 = vadd.f32 %v3986_v41, %v16881_v19  ;;  %v16882_v41 = vld [vmem:[#allocation536_spill] sm:$0xff] }
 0x61c   : > { %5140 = vmatpush.msrb.mxu0 %v13526_v10  ;;  %6441 = vmatpush.msrb.mxu3 %v13526_v10 }
 0x61d   : > { %v4724_v58 = vadd.f32 %v4723_v24, %v4377_v43  ;;  %4065 = vmatmul.f32.gmra.mxu0 %v16878_v39  ;;  %4471 = vmatmul.f32.gmra.mxu1 %v16879_v57  ;;  %v16885_v57 = vld [vmem:[#allocation534_spill] sm:$0xff] }
 0x61f   : > { %v5011_v34 = vadd.f32 %v5010_v8, %v4724_v58  ;;  %5077 = vmatmul.f32.gmra.mxu3 %v16880_v61  ;;  %v13529_v58 = vsub.f32 %v285_v3, %v13526_v10  ;;  %v16883_v8 = vld [vmem:[#allocation533_spill] sm:$0xff] }
 0x620   : > { %4790 = vmatmul.f32.gmra.mxu2 %v16880_v61 }
 0x621   : > { %9774 = vst [vmem:[%s13121_s21 + $0x290] sm:$0xff] %v5011_v34  ;;  %6078 = vmatpush.msrb.mxu2 %v13529_v58  ;;  %v15968_v19 = vand.u32 4294901760, %v13529_v58 }
 0x622   : > { %v3991_v33 = vpop.f32.mrf.mxu0  ;;  %v4382_v50 = vpop.f32.mrf.mxu1 }
 0x623   : > { %v4383_v0 = vadd.f32 %v4382_v50, %v3987_v28  ;;  %v4727_v43 = vpop.f32.mrf.mxu2  ;;  %v5014_v24 = vpop.f32.mrf.mxu3  ;;  %v16884_v28 = vand.u32 4294901760, %v12884_v17  ;;  %v5763_v3 = vsub.f32 %v13529_v58, %v15968_v19  ;;  %v16888_v17 = vand.u32 4294901760, %v12993_v7 }
 0x625   : > { %v4728_v34 = vadd.f32 %v4727_v43, %v4383_v0  ;;  %4070 = vmatmul.f32.gmra.mxu0 %v16882_v41  ;;  %4477 = vmatmul.f32.gmra.mxu1 %v16883_v8  ;;  %v16886_v0 = vand.u32 4294901760, %v12950_v2  ;;  %v16887_v43 = vld [vmem:[#allocation547_spill] sm:$0xff]  ;;  %v5764_v61 = vand.u32 4294901760, %v5763_v3  ;;  %v16890_v2 = vld [vmem:[#allocation540_spill] sm:$0xff]  ;;  %v16894_v3 = vld [vmem:[#allocation538_spill] sm:$0xff] }
 0x626   : > { %6842 = vmatpush.msra.mxu0 %v16884_v28  ;;  %v3992_v8 = vadd.f32 %v3991_v33, %v16887_v43  ;;  %v16892_v33 = vld [vmem:[#allocation557_spill] sm:$0xff] }
 0x627   : > { %v5015_v50 = vadd.f32 %v5014_v24, %v4728_v34  ;;  %5081 = vmatmul.f32.gmra.mxu3 %v16885_v57  ;;  %5765 = vmatpush.msrb.mxu1 %v5764_v61 }
 0x628   : > { %4794 = vmatmul.f32.gmra.mxu2 %v16885_v57  ;;  %6846 = vmatpush.msra.mxu0 %v16886_v0  ;;  %v16889_v57 = vand.u32 4294901760, %v13040_v15  ;;  %v16891_v0 = vld [vmem:[#allocation537_spill] sm:$0xff] }
 0x629   : > { %9776 = vst [vmem:[%s13121_s21 + $0x2a0] sm:$0xff] %v5015_v50  ;;  %7169 = vmatpush.msra.mxu1 %v16892_v33  ;;  %v16893_v50 = vand.u32 4294901760, %v13083_v47 }
 0x62a   : > { %v3996_v41 = vpop.f32.mrf.mxu0  ;;  %v4388_v39 = vpop.f32.mrf.mxu1  ;;  %6850 = vmatpush.msra.mxu0 %v16888_v17  ;;  %v16897_v17 = vand.u32 4294901760, %v13172_v18  ;;  %v16902_v18 = vld [vmem:[#allocation555_spill] sm:$0xff] }
 0x62b   : > { %v4389_v24 = vadd.f32 %v4388_v39, %v3992_v8  ;;  %v4731_v34 = vpop.f32.mrf.mxu2  ;;  %v5018_v28 = vpop.f32.mrf.mxu3  ;;  %7171 = vmatpush.msra.mxu1 %v12945_v12  ;;  %v16895_v39 = vld [vmem:[#allocation551_spill] sm:$0xff] }
 0x62c   : > { %6854 = vmatpush.msra.mxu0 %v16889_v57  ;;  %v3997_v15 = vadd.f32 %v3996_v41, %v16895_v39  ;;  %v16896_v57 = vand.u32 4294901760, %v13133_v31  ;;  %v16899_v41 = vld [vmem:[#allocation541_spill] sm:$0xff]  ;;  %v16900_v31 = vand.u32 4294901760, %v13211_v54  ;;  %v16904_v39 = vand.u32 4294901760, %v13291_v53 }
 0x62d   : > { %v4732_v19 = vadd.f32 %v4731_v34, %v4389_v24  ;;  %4075 = vmatmul.f32.gmra.mxu0 %v16890_v2  ;;  %4483 = vmatmul.f32.gmra.mxu1 %v16891_v0  ;;  %v16898_v24 = vld [vmem:[#allocation544_spill] sm:$0xff]  ;;  %v16901_v34 = vld [vmem:[#allocation542_spill] sm:$0xff]  ;;  %v16909_v53 = vld [vmem:[#allocation561_spill] sm:$0xff] }
 0x62e   : > { %6858 = vmatpush.msra.mxu0 %v16893_v50  ;;  %7173 = vmatpush.msra.mxu1 %v12988_v14 }
 0x62f   : > { %v5019_v7 = vadd.f32 %v5018_v28, %v4732_v19  ;;  %5085 = vmatmul.f32.gmra.mxu3 %v16894_v3 }
 0x630   : > { %4798 = vmatmul.f32.gmra.mxu2 %v16894_v3  ;;  %6862 = vmatpush.msra.mxu0 %v16896_v57  ;;  %v16906_v57 = vld [vmem:[#allocation545_spill] sm:$0xff] }
 0x631   : > { %9778 = vst [vmem:[%s13121_s21 + $0x2b0] sm:$0xff] %v5019_v7  ;;  %7175 = vmatpush.msra.mxu1 %v13033_v20  ;;  %v16903_v20 = vand.u32 4294901760, %v13250_v35  ;;  %v16907_v35 = vand.u32 4294901760, %v13330_v5 }
 0x632   : > { %v4001_v61 = vpop.f32.mrf.mxu0  ;;  %v4394_v8 = vpop.f32.mrf.mxu1  ;;  %6866 = vmatpush.msra.mxu0 %v16897_v17 }
 0x633   : > { %v4395_v47 = vadd.f32 %v4394_v8, %v3997_v15  ;;  %v4735_v43 = vpop.f32.mrf.mxu2  ;;  %v5022_v19 = vpop.f32.mrf.mxu3  ;;  %7177 = vmatpush.msra.mxu1 %v13076_v38  ;;  %v4002_v28 = vadd.f32 %v4001_v61, %v16902_v18  ;;  %v16905_v15 = vld [vmem:[#allocation548_spill] sm:$0xff]  ;;  %v16908_v61 = vld [vmem:[#allocation546_spill] sm:$0xff]  ;;  %v16913_v18 = vld [vmem:[#allocation549_spill] sm:$0xff] }
 0x634   : > { %6870 = vmatpush.msra.mxu0 %v16900_v31 }
 0x635   : > { %v4736_v12 = vadd.f32 %v4735_v43, %v4395_v47  ;;  %4080 = vmatmul.f32.gmra.mxu0 %v16898_v24  ;;  %4489 = vmatmul.f32.gmra.mxu1 %v16899_v41  ;;  %v16910_v47 = vand.u32 4294901760, %v13371_v49 }
 0x636   : > { %7179 = vmatpush.msra.mxu1 %v13130_v26  ;;  %6874 = vmatpush.msra.mxu0 %v16903_v20  ;;  %v16915_v20 = vld [vmem:[#allocation550_spill] sm:$0xff] }
 0x637   : > { %v5023_v14 = vadd.f32 %v5022_v19, %v4736_v12  ;;  %5089 = vmatmul.f32.gmra.mxu3 %v16901_v34 }
 0x638   : > { %4802 = vmatmul.f32.gmra.mxu2 %v16901_v34  ;;  %7181 = vmatpush.msra.mxu1 %v13169_v40 }
 0x639   : > { %9780 = vst [vmem:[%s13121_s21 + $0x2c0] sm:$0xff] %v5023_v14  ;;  %6878 = vmatpush.msra.mxu0 %v16904_v39  ;;  %v16912_v14 = vld [vmem:[#allocation552_spill] sm:$0xff] }
 0x63a   : > { %v4006_v33 = vpop.f32.mrf.mxu0  ;;  %v4400_v50 = vpop.f32.mrf.mxu1  ;;  %7183 = vmatpush.msra.mxu1 %v13208_v56  ;;  %v327_v56 = vld [vmem:[%s15079_s1 + $0x158] sm:$0xff] }
 0x63b   : > { %v4401_v38 = vadd.f32 %v4400_v50, %v4002_v28  ;;  %v4739_v54 = vpop.f32.mrf.mxu2  ;;  %v5026_v7 = vpop.f32.mrf.mxu3  ;;  %6882 = vmatpush.msra.mxu0 %v16907_v35  ;;  %v4007_v8 = vadd.f32 %v4006_v33, %v16909_v53  ;;  %v13599_v43 = vand.u32 4294901760, %v327_v56  ;;  %v16916_v50 = vand.u32 4294901760, %v13490_v32 }
 0x63c   : > { %7185 = vmatpush.msra.mxu1 %v13247_v44 }
 0x63d   : > { %v4740_v26 = vadd.f32 %v4739_v54, %v4401_v38  ;;  %4085 = vmatmul.f32.gmra.mxu0 %v16905_v15  ;;  %4495 = vmatmul.f32.gmra.mxu1 %v16906_v57  ;;  %v13606_v31 = vsub.f32 %v327_v56, %v13599_v43 }
 0x63e   : > { %7187 = vmatpush.msra.mxu1 %v13286_v59  ;;  %6886 = vmatpush.msra.mxu0 %v16910_v47  ;;  %v16911_v59 = vand.u32 4294901760, %v13410_v22  ;;  %v16914_v22 = vand.u32 4294901760, %v13451_v29  ;;  %v16919_v47 = vld [vmem:[#allocation566_spill] sm:$0xff] }
 0x63f   : > { %v5027_v40 = vadd.f32 %v5026_v7, %v4740_v26  ;;  %5093 = vmatmul.f32.gmra.mxu3 %v16908_v61  ;;  %7476 = vmatpush.msra.mxu2 %v13599_v43  ;;  %v16917_v26 = vand.u32 4294901760, %v13529_v58 }
 0x640   : > { %4806 = vmatmul.f32.gmra.mxu2 %v16908_v61  ;;  %7189 = vmatpush.msra.mxu1 %v13325_v63  ;;  %v15970_v63 = vand.u32 4294901760, %v13606_v31 }
 0x641   : > { %9782 = vst [vmem:[%s13121_s21 + $0x2d0] sm:$0xff] %v5027_v40  ;;  %6890 = vmatpush.msra.mxu0 %v16911_v59 }
 0x642   : > { %v4011_v44 = vpop.f32.mrf.mxu0  ;;  %v4406_v5 = vpop.f32.mrf.mxu1  ;;  %7191 = vmatpush.msra.mxu1 %v13366_v30  ;;  %v8029_v30 = vsub.f32 %v13606_v31, %v15970_v63 }
 0x643   : > { %v4407_v19 = vadd.f32 %v4406_v5, %v4007_v8  ;;  %v4743_v17 = vpop.f32.mrf.mxu2  ;;  %v5030_v12 = vpop.f32.mrf.mxu3  ;;  %6894 = vmatpush.msra.mxu0 %v16914_v22  ;;  %v4012_v33 = vadd.f32 %v4011_v44, %v12919_v52  ;;  %v16921_v22 = vld [vmem:[#allocation7_spill] sm:$0xff] }
 0x644   : > { %7193 = vmatpush.msra.mxu1 %v13405_v51  ;;  %v8030_v38 = vand.u32 4294901760, %v8029_v30  ;;  %v16922_v30 = vld [vmem:[#allocation4_spill] sm:$0xff] }
 0x645   : > { %v4744_v49 = vadd.f32 %v4743_v17, %v4407_v19  ;;  %4090 = vmatmul.f32.gmra.mxu0 %v16912_v14  ;;  %4501 = vmatmul.f32.gmra.mxu1 %v16913_v18  ;;  %v17012_v18 = vld [vmem:[#allocation87_spill] sm:$0xff]  ;;  %v17015_v14 = vld [vmem:[#allocation82_spill] sm:$0xff] }
 0x646   : > { %7195 = vmatpush.msra.mxu1 %v13448_v27  ;;  %6898 = vmatpush.msra.mxu0 %v16916_v50  ;;  %v16918_v27 = vld [vmem:[#allocation553_spill] sm:$0xff]  ;;  %v16924_v50 = vld [vmem:[#allocation567_spill] sm:$0xff] }
 0x647   : > { %v5031_v28 = vadd.f32 %v5030_v12, %v4744_v49  ;;  %5097 = vmatmul.f32.gmra.mxu3 %v16915_v20  ;;  %v16920_v49 = vld [vmem:[#allocation564_spill] sm:$0xff] }
 0x648   : > { %4810 = vmatmul.f32.gmra.mxu2 %v16915_v20  ;;  %7197 = vmatpush.msra.mxu1 %v13487_v45 }
 0x649   : > { %9784 = vst [vmem:[%s13121_s21 + $0x2e0] sm:$0xff] %v5031_v28  ;;  %6902 = vmatpush.msra.mxu0 %v16917_v26  ;;  %8031 = vmatpush.msra.mxu3 %v8030_v38 }
 0x64a   : > { %v4016_v51 = vpop.f32.mrf.mxu0  ;;  %v4412_v29 = vpop.f32.mrf.mxu1  ;;  %7199 = vmatpush.msra.mxu1 %v13526_v10 }
 0x64b   : > { %v4413_v54 = vadd.f32 %v4412_v29, %v4012_v33  ;;  %v4747_v7 = vpop.f32.mrf.mxu2  ;;  %v5034_v39 = vpop.f32.mrf.mxu3  ;;  %v4017_v45 = vadd.f32 %v4016_v51, %v12930_v11  ;;  %v16923_v33 = vld [vmem:[#allocation3_spill] sm:$0xff] }
 0x64d   : > { %v4748_v52 = vadd.f32 %v4747_v7, %v4413_v54  ;;  %4095 = vmatmul.f32.gmra.mxu0 %v12874_v4  ;;  %4507 = vmatmul.f32.gmra.mxu1 %v16918_v27 }
 0x64f   : > { %v5035_v32 = vadd.f32 %v5034_v39, %v4748_v52  ;;  %5101 = vmatmul.f32.gmra.mxu3 %v12862_v46  ;;  %v16925_v52 = vld [vmem:[#allocation11_spill] sm:$0xff] }
 0x650   : > { %4814 = vmatmul.f32.gmra.mxu2 %v12862_v46 }
 0x651   : > { %9786 = vst [vmem:[%s13121_s21 + $0x2f0] sm:$0xff] %v5035_v32  ;;  %v16926_v32 = vld [vmem:[#allocation2_spill] sm:$0xff] }
 0x652   : > { %v4021_v35 = vpop.f32.mrf.mxu0  ;;  %v4418_v58 = vpop.f32.mrf.mxu1 }
 0x653   : > { %v4419_v40 = vadd.f32 %v4418_v58, %v4017_v45  ;;  %v4751_v53 = vpop.f32.mrf.mxu2  ;;  %v5038_v8 = vpop.f32.mrf.mxu3  ;;  %v4022_v44 = vadd.f32 %v4021_v35, %v16919_v47  ;;  %v16927_v35 = vld [vmem:[#allocation8_spill] sm:$0xff]  ;;  %v16928_v58 = vld [vmem:[#allocation6_spill] sm:$0xff] }
 0x655   : > { %v4752_v10 = vadd.f32 %v4751_v53, %v4419_v40  ;;  %4100 = vmatmul.f32.gmra.mxu0 %v12909_v9  ;;  %4513 = vmatmul.f32.gmra.mxu1 %v12891_v16 }
 0x657   : > { %v5039_v56 = vadd.f32 %v5038_v8, %v4752_v10  ;;  %5105 = vmatmul.f32.gmra.mxu3 %v12893_v37 }
 0x658   : > { %4818 = vmatmul.f32.gmra.mxu2 %v12893_v37 }
 0x659   : > { %9788 = vst [vmem:[%s13121_s21 + $0x300] sm:$0xff] %v5039_v56 }
 0x65a   : > { %v4026_v11 = vpop.f32.mrf.mxu0  ;;  %v4424_v5 = vpop.f32.mrf.mxu1 }
 0x65b   : > { %v4425_v19 = vadd.f32 %v4424_v5, %v4022_v44  ;;  %v4755_v17 = vpop.f32.mrf.mxu2  ;;  %v5042_v12 = vpop.f32.mrf.mxu3  ;;  %v4027_v51 = vadd.f32 %v4026_v11, %v16924_v50  ;;  %v16929_v11 = vld [vmem:[#allocation15_spill] sm:$0xff]  ;;  %v16930_v5 = vld [vmem:[#allocation5_spill] sm:$0xff] }
 0x65d   : > { %v4756_v59 = vadd.f32 %v4755_v17, %v4425_v19  ;;  %4519 = vmatmul.f32.gmra.mxu1 %v16920_v49  ;;  %5146 = vmatmul.f32.vlgmr.msrb.gmra.mxu0 %v16921_v22  ;;  %v16931_v17 = vld [vmem:[#allocation12_spill] sm:$0xff] }
 0x65e   : > { %8339 = vmatpush.msrb.mxu0 %v13606_v31 }
 0x65f   : > { %v5043_v28 = vadd.f32 %v5042_v12, %v4756_v59  ;;  %6445 = vmatmul.f32.vlgmr.msrb.gmra.mxu3 %v16922_v30  ;;  %v16932_v12 = vld [vmem:[#allocation10_spill] sm:$0xff] }
 0x660   : > { %6081 = vmatmul.f32.vlgmr.msrb.gmra.mxu2 %v16923_v33 }
 0x661   : > { %9790 = vst [vmem:[%s13121_s21 + $0x310] sm:$0xff] %v5043_v28 }
 0x662   : > { %v4031_v29 = vpop.f32.mrf.mxu0  ;;  %v4430_v38 = vpop.f32.mrf.mxu1 }
 0x663   : > { %v4431_v54 = vadd.f32 %v4430_v38, %v4027_v51  ;;  %v4759_v7 = vpop.f32.mrf.mxu2  ;;  %v5046_v39 = vpop.f32.mrf.mxu3  ;;  %v4032_v40 = vadd.f32 %v4031_v29, %v12966_v36  ;;  %v16933_v51 = vld [vmem:[#allocation19_spill] sm:$0xff]  ;;  %v16934_v29 = vld [vmem:[#allocation9_spill] sm:$0xff] }
 0x665   : > { %v4760_v26 = vadd.f32 %v4759_v7, %v4431_v54  ;;  %5154 = vmatmul.f32.gmra.mxu0 %v16925_v52  ;;  %5767 = vmatmul.f32.vlgmr.msrb.gmra.mxu1 %v16926_v32  ;;  %v16935_v54 = vld [vmem:[#allocation16_spill] sm:$0xff]  ;;  %v16936_v7 = vld [vmem:[#allocation14_spill] sm:$0xff] }
 0x666   : > { %8697 = vmatpush.msrb.mxu1 %v13599_v43 }
 0x667   : > { %v5047_v45 = vadd.f32 %v5046_v39, %v4760_v26  ;;  %6451 = vmatmul.f32.gmra.mxu3 %v16927_v35  ;;  %v16937_v39 = vld [vmem:[#allocation568_spill] sm:$0xff] }
 0x668   : > { %6086 = vmatmul.f32.gmra.mxu2 %v16928_v58 }
 0x669   : > { %9792 = vst [vmem:[%s13121_s21 + $0x320] sm:$0xff] %v5047_v45 }
 0x66a   : > { %v4036_v53 = vpop.f32.mrf.mxu0  ;;  %v4436_v8 = vpop.f32.mrf.mxu1 }
 0x66b   : > { %v4437_v10 = vadd.f32 %v4436_v8, %v4032_v40  ;;  %v4763_v56 = vpop.f32.mrf.mxu2  ;;  %v5050_v47 = vpop.f32.mrf.mxu3  ;;  %v4037_v59 = vadd.f32 %v4036_v53, %v12973_v42  ;;  %v16938_v53 = vld [vmem:[#allocation23_spill] sm:$0xff]  ;;  %v16939_v8 = vld [vmem:[#allocation13_spill] sm:$0xff] }
 0x66d   : > { %v4764_v44 = vadd.f32 %v4763_v56, %v4437_v10  ;;  %5162 = vmatmul.f32.gmra.mxu0 %v16929_v11  ;;  %5771 = vmatmul.f32.gmra.mxu1 %v16930_v5  ;;  %v16940_v56 = vld [vmem:[#allocation20_spill] sm:$0xff] }
 0x66f   : > { %v5051_v19 = vadd.f32 %v5050_v47, %v4764_v44  ;;  %6457 = vmatmul.f32.gmra.mxu3 %v16931_v17  ;;  %v16941_v47 = vld [vmem:[#allocation18_spill] sm:$0xff]  ;;  %v16942_v44 = vld [vmem:[#allocation569_spill] sm:$0xff] }
 0x670   : > { %6091 = vmatmul.f32.gmra.mxu2 %v16932_v12 }
 0x671   : > { %9794 = vst [vmem:[%s13121_s21 + $0x330] sm:$0xff] %v5051_v19 }
 0x672   : > { %v4041_v36 = vpop.f32.mrf.mxu0  ;;  %v4442_v22 = vpop.f32.mrf.mxu1 }
 0x673   : > { %v4443_v28 = vadd.f32 %v4442_v22, %v4037_v59  ;;  %v4767_v30 = vpop.f32.mrf.mxu2  ;;  %v5054_v33 = vpop.f32.mrf.mxu3  ;;  %v4042_v26 = vadd.f32 %v4041_v36, %v16937_v39 }
 0x675   : > { %v4768_v50 = vadd.f32 %v4767_v30, %v4443_v28  ;;  %5170 = vmatmul.f32.gmra.mxu0 %v16933_v51  ;;  %5775 = vmatmul.f32.gmra.mxu1 %v16934_v29  ;;  %v16943_v28 = vld [vmem:[#allocation27_spill] sm:$0xff]  ;;  %v16944_v30 = vld [vmem:[#allocation17_spill] sm:$0xff]  ;;  %v16946_v51 = vld [vmem:[#allocation22_spill] sm:$0xff] }
 0x677   : > { %v5055_v38 = vadd.f32 %v5054_v33, %v4768_v50  ;;  %6463 = vmatmul.f32.gmra.mxu3 %v16935_v54  ;;  %v16945_v50 = vld [vmem:[#allocation24_spill] sm:$0xff] }
 0x678   : > { %6096 = vmatmul.f32.gmra.mxu2 %v16936_v7 }
 0x679   : > { %9796 = vst [vmem:[%s13121_s21 + $0x340] sm:$0xff] %v5055_v38 }
 0x67a   : > { %v4046_v42 = vpop.f32.mrf.mxu0  ;;  %v4448_v52 = vpop.f32.mrf.mxu1 }
 0x67b   : > { %v4449_v45 = vadd.f32 %v4448_v52, %v4042_v26  ;;  %v4771_v35 = vpop.f32.mrf.mxu2  ;;  %v5058_v58 = vpop.f32.mrf.mxu3  ;;  %v4047_v11 = vadd.f32 %v4046_v42, %v16942_v44 }
 0x67d   : > { %v4772_v40 = vadd.f32 %v4771_v35, %v4449_v45  ;;  %5178 = vmatmul.f32.gmra.mxu0 %v16938_v53  ;;  %5779 = vmatmul.f32.gmra.mxu1 %v16939_v8  ;;  %v16947_v45 = vld [vmem:[#allocation31_spill] sm:$0xff]  ;;  %v16948_v35 = vld [vmem:[#allocation21_spill] sm:$0xff]  ;;  %v16950_v53 = vld [vmem:[#allocation26_spill] sm:$0xff] }
 0x67f   : > { %v5059_v10 = vadd.f32 %v5058_v58, %v4772_v40  ;;  %6469 = vmatmul.f32.gmra.mxu3 %v16940_v56  ;;  %v16949_v40 = vld [vmem:[#allocation28_spill] sm:$0xff] }
 0x680   : > { %6101 = vmatmul.f32.gmra.mxu2 %v16941_v47 }
 0x681   : > { %9798 = vst [vmem:[%s13121_s21 + $0x350] sm:$0xff] %v5059_v10 }
 0x682   : > { %v4051_v19 = vpop.f32.mrf.mxu0  ;;  %v4454_v17 = vpop.f32.mrf.mxu1 }
 0x683   : > { %v4455_v12 = vadd.f32 %v4454_v17, %v4047_v11  ;;  %v4775_v59 = vpop.f32.mrf.mxu2  ;;  %v5062_v36 = vpop.f32.mrf.mxu3  ;;  %v4052_v38 = vadd.f32 %v4051_v19, %v13009_v55  ;;  %v16951_v17 = vld [vmem:[#allocation35_spill] sm:$0xff] }
 0x685   : > { %v4776_v22 = vadd.f32 %v4775_v59, %v4455_v12  ;;  %5186 = vmatmul.f32.gmra.mxu0 %v16943_v28  ;;  %5783 = vmatmul.f32.gmra.mxu1 %v16944_v30  ;;  %v16952_v12 = vld [vmem:[#allocation25_spill] sm:$0xff]  ;;  %v16955_v28 = vld [vmem:[#allocation570_spill] sm:$0xff] }
 0x687   : > { %v5063_v33 = vadd.f32 %v5062_v36, %v4776_v22  ;;  %6475 = vmatmul.f32.gmra.mxu3 %v16945_v50  ;;  %v16953_v36 = vld [vmem:[#allocation32_spill] sm:$0xff]  ;;  %v16954_v22 = vld [vmem:[#allocation30_spill] sm:$0xff] }
 0x688   : > { %6106 = vmatmul.f32.gmra.mxu2 %v16946_v51 }
 0x689   : > { %9800 = vst [vmem:[%s13121_s21 + $0x360] sm:$0xff] %v5063_v33 }
 0x68a   : > { %v4056_v54 = vpop.f32.mrf.mxu0  ;;  %v4460_v7 = vpop.f32.mrf.mxu1 }
 0x68b   : > { %v4461_v39 = vadd.f32 %v4460_v7, %v4052_v38  ;;  %v4779_v26 = vpop.f32.mrf.mxu2  ;;  %v5066_v42 = vpop.f32.mrf.mxu3  ;;  %v4057_v10 = vadd.f32 %v4056_v54, %v13016_v21  ;;  %v325_v21 = vld [vmem:[%s15079_s1 + $0x148] sm:$0xff] }
 0x68c   : > { %v13694_v38 = vand.u32 4294901760, %v325_v21 }
 0x68d   : > { %v4780_v52 = vadd.f32 %v4779_v26, %v4461_v39  ;;  %5194 = vmatmul.f32.gmra.mxu0 %v16947_v45  ;;  %5787 = vmatmul.f32.gmra.mxu1 %v16948_v35  ;;  %v16957_v45 = vld [vmem:[#allocation29_spill] sm:$0xff] }
 0x68e   : > { %7478 = vmatpush.msra.mxu2 %v13694_v38  ;;  %v13698_v26 = vsub.f32 %v325_v21, %v13694_v38  ;;  %8699 = vmatpush.msrb.mxu1 %v13694_v38 }
 0x68f   : > { %v5067_v58 = vadd.f32 %v5066_v42, %v4780_v52  ;;  %6481 = vmatmul.f32.gmra.mxu3 %v16949_v40  ;;  %v16956_v52 = vld [vmem:[#allocation39_spill] sm:$0xff] }
 0x690   : > { %6111 = vmatmul.f32.gmra.mxu2 %v16950_v53  ;;  %8342 = vmatpush.msrb.mxu0 %v13698_v26  ;;  %v16958_v53 = vld [vmem:[#allocation36_spill] sm:$0xff] }
 0x691   : > { %9802 = vst [vmem:[%s13121_s21 + $0x370] sm:$0xff] %v5067_v58  ;;  %v15969_v58 = vand.u32 4294901760, %v13698_v26 }
 0x692   : > { %v4061_v55 = vpop.f32.mrf.mxu0  ;;  %v4466_v56 = vpop.f32.mrf.mxu1 }
 0x693   : > { %v4467_v47 = vadd.f32 %v4466_v56, %v4057_v10  ;;  %v4783_v44 = vpop.f32.mrf.mxu2  ;;  %v5070_v11 = vpop.f32.mrf.mxu3  ;;  %v4062_v33 = vadd.f32 %v4061_v55, %v16955_v28  ;;  %v16959_v10 = vld [vmem:[#allocation34_spill] sm:$0xff]  ;;  %v8035_v55 = vsub.f32 %v13698_v26, %v15969_v58  ;;  %v16960_v56 = vld [vmem:[#allocation571_spill] sm:$0xff] }
 0x694   : > { %v16961_v28 = vld [vmem:[#allocation43_spill] sm:$0xff] }
 0x695   : > { %v4784_v19 = vadd.f32 %v4783_v44, %v4467_v47  ;;  %5202 = vmatmul.f32.gmra.mxu0 %v16951_v17  ;;  %5791 = vmatmul.f32.gmra.mxu1 %v16952_v12 }
 0x697   : > { %v5071_v59 = vadd.f32 %v5070_v11, %v4784_v19  ;;  %6487 = vmatmul.f32.gmra.mxu3 %v16953_v36  ;;  %v8036_v19 = vand.u32 4294901760, %v8035_v55  ;;  %v16966_v55 = vld [vmem:[#allocation47_spill] sm:$0xff] }
 0x698   : > { %6116 = vmatmul.f32.gmra.mxu2 %v16954_v22 }
 0x699   : > { %9804 = vst [vmem:[%s13121_s21 + $0x380] sm:$0xff] %v5071_v59  ;;  %8037 = vmatpush.msra.mxu3 %v8036_v19  ;;  %v16969_v19 = vld [vmem:[#allocation42_spill] sm:$0xff] }
 0x69a   : > { %v4066_v50 = vpop.f32.mrf.mxu0  ;;  %v4472_v51 = vpop.f32.mrf.mxu1 }
 0x69b   : > { %v4473_v54 = vadd.f32 %v4472_v51, %v4062_v33  ;;  %v4787_v7 = vpop.f32.mrf.mxu2  ;;  %v5074_v39 = vpop.f32.mrf.mxu3  ;;  %v4067_v47 = vadd.f32 %v4066_v50, %v16960_v56  ;;  %v16962_v33 = vld [vmem:[#allocation33_spill] sm:$0xff]  ;;  %v16963_v51 = vld [vmem:[#allocation40_spill] sm:$0xff] }
 0x69c   : > { %v16965_v50 = vld [vmem:[#allocation572_spill] sm:$0xff]  ;;  %v16967_v56 = vld [vmem:[#allocation37_spill] sm:$0xff] }
 0x69d   : > { %v4788_v42 = vadd.f32 %v4787_v7, %v4473_v54  ;;  %5210 = vmatmul.f32.gmra.mxu0 %v16956_v52  ;;  %5795 = vmatmul.f32.gmra.mxu1 %v16957_v45  ;;  %v16964_v54 = vld [vmem:[#allocation38_spill] sm:$0xff] }
 0x69f   : > { %v5075_v40 = vadd.f32 %v5074_v39, %v4788_v42  ;;  %6493 = vmatmul.f32.gmra.mxu3 %v16958_v53 }
 0x6a0   : > { %6121 = vmatmul.f32.gmra.mxu2 %v16959_v10 }
 0x6a1   : > { %9806 = vst [vmem:[%s13121_s21 + $0x390] sm:$0xff] %v5075_v40 }
 0x6a2   : > { %v4071_v44 = vpop.f32.mrf.mxu0  ;;  %v4478_v11 = vpop.f32.mrf.mxu1 }
 0x6a3   : > { %v4479_v17 = vadd.f32 %v4478_v11, %v4067_v47  ;;  %v4791_v59 = vpop.f32.mrf.mxu2  ;;  %v5078_v36 = vpop.f32.mrf.mxu3  ;;  %v4072_v7 = vadd.f32 %v4071_v44, %v16965_v50  ;;  %v16968_v11 = vld [vmem:[#allocation44_spill] sm:$0xff]  ;;  %v16972_v50 = vld [vmem:[#allocation41_spill] sm:$0xff] }
 0x6a5   : > { %v4792_v22 = vadd.f32 %v4791_v59, %v4479_v17  ;;  %5218 = vmatmul.f32.gmra.mxu0 %v16961_v28  ;;  %5799 = vmatmul.f32.gmra.mxu1 %v16962_v33  ;;  %v16970_v17 = vld [vmem:[#allocation573_spill] sm:$0xff] }
 0x6a7   : > { %v5079_v21 = vadd.f32 %v5078_v36, %v4792_v22  ;;  %6499 = vmatmul.f32.gmra.mxu3 %v16963_v51 }
 0x6a8   : > { %6126 = vmatmul.f32.gmra.mxu2 %v16964_v54  ;;  %v16971_v54 = vld [vmem:[#allocation51_spill] sm:$0xff] }
 0x6a9   : > { %9808 = vst [vmem:[%s13121_s21 + $0x3a0] sm:$0xff] %v5079_v21 }
 0x6aa   : > { %v4076_v39 = vpop.f32.mrf.mxu0  ;;  %v4484_v42 = vpop.f32.mrf.mxu1 }
 0x6ab   : > { %v4485_v52 = vadd.f32 %v4484_v42, %v4072_v7  ;;  %v4795_v40 = vpop.f32.mrf.mxu2  ;;  %v5082_v53 = vpop.f32.mrf.mxu3  ;;  %v4077_v59 = vadd.f32 %v4076_v39, %v16970_v17  ;;  %v16973_v42 = vld [vmem:[#allocation48_spill] sm:$0xff]  ;;  %v16976_v17 = vld [vmem:[#allocation55_spill] sm:$0xff] }
 0x6ad   : > { %v4796_v10 = vadd.f32 %v4795_v40, %v4485_v52  ;;  %5226 = vmatmul.f32.gmra.mxu0 %v16966_v55  ;;  %5803 = vmatmul.f32.gmra.mxu1 %v16967_v56  ;;  %v16974_v52 = vld [vmem:[#allocation46_spill] sm:$0xff] }
 0x6ae   : > { %v16975_v40 = vld [vmem:[#allocation574_spill] sm:$0xff] }
 0x6af   : > { %v5083_v47 = vadd.f32 %v5082_v53, %v4796_v10  ;;  %6505 = vmatmul.f32.gmra.mxu3 %v16968_v11 }
 0x6b0   : > { %6131 = vmatmul.f32.gmra.mxu2 %v16969_v19 }
 0x6b1   : > { %9810 = vst [vmem:[%s13121_s21 + $0x3b0] sm:$0xff] %v5083_v47 }
 0x6b2   : > { %v4081_v44 = vpop.f32.mrf.mxu0  ;;  %v4490_v36 = vpop.f32.mrf.mxu1 }
 0x6b3   : > { %v4491_v22 = vadd.f32 %v4490_v36, %v4077_v59  ;;  %v4799_v28 = vpop.f32.mrf.mxu2  ;;  %v5086_v21 = vpop.f32.mrf.mxu3  ;;  %v4082_v53 = vadd.f32 %v4081_v44, %v16975_v40  ;;  %v16977_v59 = vld [vmem:[#allocation45_spill] sm:$0xff] }
 0x6b5   : > { %v4800_v51 = vadd.f32 %v4799_v28, %v4491_v22  ;;  %5234 = vmatmul.f32.gmra.mxu0 %v16971_v54  ;;  %5807 = vmatmul.f32.gmra.mxu1 %v16972_v50  ;;  %v16978_v22 = vld [vmem:[#allocation52_spill] sm:$0xff]  ;;  %v16979_v28 = vld [vmem:[#allocation50_spill] sm:$0xff] }
 0x6b7   : > { %v5087_v7 = vadd.f32 %v5086_v21, %v4800_v51  ;;  %6511 = vmatmul.f32.gmra.mxu3 %v16973_v42  ;;  %v16980_v21 = vld [vmem:[#allocation575_spill] sm:$0xff] }
 0x6b8   : > { %6136 = vmatmul.f32.gmra.mxu2 %v16974_v52 }
 0x6b9   : > { %9812 = vst [vmem:[%s13121_s21 + $0x3c0] sm:$0xff] %v5087_v7 }
 0x6ba   : > { %v4086_v39 = vpop.f32.mrf.mxu0  ;;  %v4496_v10 = vpop.f32.mrf.mxu1 }
 0x6bb   : > { %v4497_v55 = vadd.f32 %v4496_v10, %v4082_v53  ;;  %v4803_v47 = vpop.f32.mrf.mxu2  ;;  %v5090_v11 = vpop.f32.mrf.mxu3  ;;  %v4087_v51 = vadd.f32 %v4086_v39, %v16980_v21  ;;  %v16981_v53 = vld [vmem:[#allocation59_spill] sm:$0xff]  ;;  %v16982_v10 = vld [vmem:[#allocation49_spill] sm:$0xff] }
 0x6bd   : > { %v4804_v19 = vadd.f32 %v4803_v47, %v4497_v55  ;;  %5242 = vmatmul.f32.gmra.mxu0 %v16976_v17  ;;  %5811 = vmatmul.f32.gmra.mxu1 %v16977_v59  ;;  %v16983_v47 = vld [vmem:[#allocation56_spill] sm:$0xff] }
 0x6bf   : > { %v5091_v36 = vadd.f32 %v5090_v11, %v4804_v19  ;;  %6517 = vmatmul.f32.gmra.mxu3 %v16978_v22  ;;  %v16984_v11 = vld [vmem:[#allocation54_spill] sm:$0xff]  ;;  %v16985_v19 = vld [vmem:[#allocation576_spill] sm:$0xff] }
 0x6c0   : > { %6141 = vmatmul.f32.gmra.mxu2 %v16979_v28 }
 0x6c1   : > { %9814 = vst [vmem:[%s13121_s21 + $0x3d0] sm:$0xff] %v5091_v36 }
 0x6c2   : > { %v4091_v44 = vpop.f32.mrf.mxu0  ;;  %v4502_v54 = vpop.f32.mrf.mxu1 }
 0x6c3   : > { %v4503_v7 = vadd.f32 %v4502_v54, %v4087_v51  ;;  %v4807_v42 = vpop.f32.mrf.mxu2  ;;  %v5094_v52 = vpop.f32.mrf.mxu3  ;;  %v4092_v17 = vadd.f32 %v4091_v44, %v16985_v19  ;;  %v16986_v54 = vld [vmem:[#allocation63_spill] sm:$0xff] }
 0x6c5   : > { %v4808_v40 = vadd.f32 %v4807_v42, %v4503_v7  ;;  %5250 = vmatmul.f32.gmra.mxu0 %v16981_v53  ;;  %5815 = vmatmul.f32.gmra.mxu1 %v16982_v10  ;;  %v16987_v7 = vld [vmem:[#allocation53_spill] sm:$0xff] }
 0x6c6   : > { %v16990_v53 = vld [vmem:[#allocation577_spill] sm:$0xff] }
 0x6c7   : > { %v5095_v55 = vadd.f32 %v5094_v52, %v4808_v40  ;;  %6523 = vmatmul.f32.gmra.mxu3 %v16983_v47  ;;  %v16988_v52 = vld [vmem:[#allocation60_spill] sm:$0xff]  ;;  %v16989_v40 = vld [vmem:[#allocation58_spill] sm:$0xff] }
 0x6c8   : > { %6146 = vmatmul.f32.gmra.mxu2 %v16984_v11 }
 0x6c9   : > { %9816 = vst [vmem:[%s13121_s21 + $0x3e0] sm:$0xff] %v5095_v55 }
 0x6ca   : > { %v4096_v39 = vpop.f32.mrf.mxu0  ;;  %v4508_v36 = vpop.f32.mrf.mxu1 }
 0x6cb   : > { %v4509_v22 = vadd.f32 %v4508_v36, %v4092_v17  ;;  %v4811_v28 = vpop.f32.mrf.mxu2  ;;  %v5098_v21 = vpop.f32.mrf.mxu3  ;;  %v4097_v47 = vadd.f32 %v4096_v39, %v16990_v53 }
 0x6cd   : > { %v4812_v51 = vadd.f32 %v4811_v28, %v4509_v22  ;;  %5258 = vmatmul.f32.gmra.mxu0 %v16986_v54  ;;  %5819 = vmatmul.f32.gmra.mxu1 %v16987_v7  ;;  %v16991_v22 = vld [vmem:[#allocation67_spill] sm:$0xff]  ;;  %v16992_v28 = vld [vmem:[#allocation57_spill] sm:$0xff] }
 0x6cf   : > { %v5099_v42 = vadd.f32 %v5098_v21, %v4812_v51  ;;  %6529 = vmatmul.f32.gmra.mxu3 %v16988_v52  ;;  %v16993_v21 = vld [vmem:[#allocation64_spill] sm:$0xff]  ;;  %v16994_v51 = vld [vmem:[#allocation62_spill] sm:$0xff] }
 0x6d0   : > { %6151 = vmatmul.f32.gmra.mxu2 %v16989_v40  ;;  %v16995_v52 = vld [vmem:[#allocation578_spill] sm:$0xff] }
 0x6d1   : > { %9818 = vst [vmem:[%s13121_s21 + $0x3f0] sm:$0xff] %v5099_v42 }
 0x6d2   : > { %v4101_v44 = vpop.f32.mrf.mxu0  ;;  %v4514_v55 = vpop.f32.mrf.mxu1 }
 0x6d3   : > { %v4515_v11 = vadd.f32 %v4514_v55, %v4097_v47  ;;  %v4815_v19 = vpop.f32.mrf.mxu2  ;;  %v5102_v17 = vpop.f32.mrf.mxu3  ;;  %v4102_v40 = vadd.f32 %v4101_v44, %v16995_v52 }
 0x6d5   : > { %v4816_v36 = vadd.f32 %v4815_v19, %v4515_v11  ;;  %5266 = vmatmul.f32.gmra.mxu0 %v16991_v22  ;;  %5823 = vmatmul.f32.gmra.mxu1 %v16992_v28  ;;  %v16996_v11 = vld [vmem:[#allocation71_spill] sm:$0xff]  ;;  %v16997_v19 = vld [vmem:[#allocation61_spill] sm:$0xff] }
 0x6d7   : > { %v5103_v54 = vadd.f32 %v5102_v17, %v4816_v36  ;;  %6535 = vmatmul.f32.gmra.mxu3 %v16993_v21  ;;  %v16998_v17 = vld [vmem:[#allocation68_spill] sm:$0xff]  ;;  %v16999_v36 = vld [vmem:[#allocation66_spill] sm:$0xff] }
 0x6d8   : > { %6156 = vmatmul.f32.gmra.mxu2 %v16994_v51 }
 0x6d9   : > { %9820 = vst [vmem:[%s13121_s21 + $0x400] sm:$0xff] %v5103_v54 }
 0x6da   : > { %v4520_v39 = vpop.f32.mrf.mxu1  ;;  %v5147_v42 = vpop.f32.mrf.mxu0 }
 0x6db   : > { %v4521_v53 = vadd.f32 %v4520_v39, %v4102_v40  ;;  %v4819_v47 = vpop.f32.mrf.mxu2  ;;  %v5106_v55 = vpop.f32.mrf.mxu3  ;;  %v17000_v40 = vld [vmem:[#allocation75_spill] sm:$0xff]  ;;  %v17001_v39 = vld [vmem:[#allocation65_spill] sm:$0xff] }
 0x6dd   : > { %v4820_v58 = vadd.f32 %v4819_v47, %v4521_v53  ;;  %5274 = vmatmul.f32.gmra.mxu0 %v16996_v11  ;;  %5827 = vmatmul.f32.gmra.mxu1 %v16997_v19  ;;  %v17002_v47 = vld [vmem:[#allocation72_spill] sm:$0xff] }
 0x6df   : > { %v5107_v22 = vadd.f32 %v5106_v55, %v4820_v58  ;;  %6541 = vmatmul.f32.gmra.mxu3 %v16998_v17  ;;  %v17003_v58 = vld [vmem:[#allocation70_spill] sm:$0xff] }
 0x6e0   : > { %6161 = vmatmul.f32.gmra.mxu2 %v16999_v36 }
 0x6e1   : > { %9822 = vst [vmem:[%s13121_s21 + $0x410] sm:$0xff] %v5107_v22 }
 0x6e2   : > { %v5155_v21 = vpop.f32.mrf.mxu0  ;;  %v5768_v51 = vpop.f32.mrf.mxu1 }
 0x6e3   : > { %v5769_v44 = vadd.f32 %v5768_v51, %v5147_v42  ;;  %v6082_v54 = vpop.f32.mrf.mxu2  ;;  %v6446_v52 = vpop.f32.mrf.mxu3  ;;  %v17004_v42 = vld [vmem:[#allocation79_spill] sm:$0xff]  ;;  %v17005_v51 = vld [vmem:[#allocation69_spill] sm:$0xff] }
 0x6e5   : > { %v6083_v63 = vadd.f32 %v6082_v54, %v5769_v44  ;;  %5282 = vmatmul.f32.gmra.mxu0 %v17000_v40  ;;  %5831 = vmatmul.f32.gmra.mxu1 %v17001_v39  ;;  %v17006_v54 = vld [vmem:[#allocation76_spill] sm:$0xff] }
 0x6e7   : > { %v13761_v53 = vadd.f32 %v6446_v52, %v6083_v63  ;;  %6547 = vmatmul.f32.gmra.mxu3 %v17002_v47  ;;  %v17007_v63 = vld [vmem:[#allocation74_spill] sm:$0xff]  ;;  %v323_v52 = vld [vmem:[%s15079_s1 + $0x138] sm:$0xff] }
 0x6e8   : > { %6166 = vmatmul.f32.gmra.mxu2 %v17003_v58  ;;  %v13774_v40 = vand.u32 4294901760, %v323_v52 }
 0x6ea   : > { %v5163_v55 = vpop.f32.mrf.mxu0  ;;  %v5772_v11 = vpop.f32.mrf.mxu1  ;;  %7480 = vmatpush.msra.mxu2 %v13774_v40  ;;  %8701 = vmatpush.msrb.mxu1 %v13774_v40 }
 0x6eb   : > { %v5773_v17 = vadd.f32 %v5772_v11, %v5155_v21  ;;  %v6087_v22 = vpop.f32.mrf.mxu2  ;;  %v6452_v36 = vpop.f32.mrf.mxu3 }
 0x6ed   : > { %v6088_v49 = vadd.f32 %v6087_v22, %v5773_v17  ;;  %5290 = vmatmul.f32.gmra.mxu0 %v17004_v42  ;;  %5835 = vmatmul.f32.gmra.mxu1 %v17005_v51  ;;  %v17009_v42 = vld [vmem:[#allocation73_spill] sm:$0xff] }
 0x6ef   : > { %v13767_v44 = vadd.f32 %v6452_v36, %v6088_v49  ;;  %6553 = vmatmul.f32.gmra.mxu3 %v17006_v54  ;;  %v13778_v49 = vsub.f32 %v323_v52, %v13774_v40  ;;  %v17008_v36 = vld [vmem:[#allocation83_spill] sm:$0xff] }
 0x6f0   : > { %6171 = vmatmul.f32.gmra.mxu2 %v17007_v63 }
 0x6f1   : > { %v15974_v54 = vand.u32 4294901760, %v13778_v49  ;;  %8345 = vmatpush.msrb.mxu0 %v13778_v49 }
 0x6f2   : > { %v5171_v21 = vpop.f32.mrf.mxu0  ;;  %v5776_v47 = vpop.f32.mrf.mxu1 }
 0x6f3   : > { %v5777_v58 = vadd.f32 %v5776_v47, %v5163_v55  ;;  %v6092_v11 = vpop.f32.mrf.mxu2  ;;  %v6458_v17 = vpop.f32.mrf.mxu3  ;;  %v17010_v55 = vld [vmem:[#allocation80_spill] sm:$0xff]  ;;  %v8041_v52 = vsub.f32 %v13778_v49, %v15974_v54  ;;  %v17011_v47 = vld [vmem:[#allocation78_spill] sm:$0xff] }
 0x6f5   : > { %v6093_v22 = vadd.f32 %v6092_v11, %v5777_v58  ;;  %5298 = vmatmul.f32.gmra.mxu0 %v17008_v36  ;;  %5839 = vmatmul.f32.gmra.mxu1 %v17009_v42  ;;  %v8042_v16 = vand.u32 4294901760, %v8041_v52 }
 0x6f7   : > { %v13785_v63 = vadd.f32 %v6458_v17, %v6093_v22  ;;  %6559 = vmatmul.f32.gmra.mxu3 %v17010_v55  ;;  %v17013_v17 = vld [vmem:[#allocation77_spill] sm:$0xff]  ;;  %v17014_v55 = vld [vmem:[#allocation84_spill] sm:$0xff] }
 0x6f8   : > { %6176 = vmatmul.f32.gmra.mxu2 %v17011_v47  ;;  %8043 = vmatpush.msra.mxu3 %v8042_v16  ;;  %v17017_v16 = vld [vmem:[#allocation81_spill] sm:$0xff] }
 0x6fa   : > { %v5179_v58 = vpop.f32.mrf.mxu0  ;;  %v5780_v11 = vpop.f32.mrf.mxu1 }
 0x6fb   : > { %v5781_v36 = vadd.f32 %v5780_v11, %v5171_v21  ;;  %v6097_v9 = vpop.f32.mrf.mxu2  ;;  %v6464_v27 = vpop.f32.mrf.mxu3  ;;  %v17016_v11 = vld [vmem:[#allocation91_spill] sm:$0xff] }
 0x6fd   : > { %v6098_v4 = vadd.f32 %v6097_v9, %v5781_v36  ;;  %5306 = vmatmul.f32.gmra.mxu0 %v17012_v18  ;;  %5843 = vmatmul.f32.gmra.mxu1 %v17013_v17  ;;  %v17018_v18 = vld [vmem:[#allocation88_spill] sm:$0xff] }
 0x6ff   : > { %v13794_v22 = vadd.f32 %v6464_v27, %v6098_v4  ;;  %6565 = vmatmul.f32.gmra.mxu3 %v17014_v55  ;;  %v17019_v4 = vld [vmem:[#allocation86_spill] sm:$0xff] }
 0x700   : > { %6181 = vmatmul.f32.gmra.mxu2 %v17015_v14 }
 0x702   : > { %v5187_v54 = vpop.f32.mrf.mxu0  ;;  %v5784_v47 = vpop.f32.mrf.mxu1 }
 0x703   : > { %v5785_v52 = vadd.f32 %v5784_v47, %v5179_v58  ;;  %v6102_v57 = vpop.f32.mrf.mxu2  ;;  %v6470_v15 = vpop.f32.mrf.mxu3  ;;  %v17020_v58 = vld [vmem:[#allocation95_spill] sm:$0xff]  ;;  %v17021_v47 = vld [vmem:[#allocation85_spill] sm:$0xff] }
 0x705   : > { %v6103_v21 = vadd.f32 %v6102_v57, %v5785_v52  ;;  %5314 = vmatmul.f32.gmra.mxu0 %v17016_v11  ;;  %5847 = vmatmul.f32.gmra.mxu1 %v17017_v16  ;;  %v17022_v52 = vld [vmem:[#allocation92_spill] sm:$0xff] }
 0x707   : > { %v13800_v9 = vadd.f32 %v6470_v15, %v6103_v21  ;;  %6571 = vmatmul.f32.gmra.mxu3 %v17018_v18  ;;  %v17023_v15 = vld [vmem:[#allocation90_spill] sm:$0xff] }
 0x708   : > { %6186 = vmatmul.f32.gmra.mxu2 %v17019_v4 }
 0x70a   : > { %v5195_v27 = vpop.f32.mrf.mxu0  ;;  %v5788_v36 = vpop.f32.mrf.mxu1 }
 0x70b   : > { %v5789_v55 = vadd.f32 %v5788_v36, %v5187_v54  ;;  %v6107_v14 = vpop.f32.mrf.mxu2  ;;  %v6476_v41 = vpop.f32.mrf.mxu3  ;;  %v17024_v54 = vld [vmem:[#allocation99_spill] sm:$0xff]  ;;  %v17025_v36 = vld [vmem:[#allocation89_spill] sm:$0xff] }
 0x70d   : > { %v6108_v24 = vadd.f32 %v6107_v14, %v5789_v55  ;;  %5322 = vmatmul.f32.gmra.mxu0 %v17020_v58  ;;  %5851 = vmatmul.f32.gmra.mxu1 %v17021_v47  ;;  %v17026_v14 = vld [vmem:[#allocation96_spill] sm:$0xff] }
 0x70f   : > { %v13806_v57 = vadd.f32 %v6476_v41, %v6108_v24  ;;  %6577 = vmatmul.f32.gmra.mxu3 %v17022_v52  ;;  %v17027_v24 = vld [vmem:[#allocation94_spill] sm:$0xff] }
 0x710   : > { %6191 = vmatmul.f32.gmra.mxu2 %v17023_v15 }
 0x712   : > { %v5203_v21 = vpop.f32.mrf.mxu0  ;;  %v5792_v11 = vpop.f32.mrf.mxu1 }
 0x713   : > { %v5793_v18 = vadd.f32 %v5792_v11, %v5195_v27  ;;  %v6112_v4 = vpop.f32.mrf.mxu2  ;;  %v6482_v0 = vpop.f32.mrf.mxu3  ;;  %v17028_v27 = vld [vmem:[#allocation103_spill] sm:$0xff]  ;;  %v17029_v11 = vld [vmem:[#allocation93_spill] sm:$0xff] }
 0x715   : > { %v6113_v2 = vadd.f32 %v6112_v4, %v5793_v18  ;;  %5330 = vmatmul.f32.gmra.mxu0 %v17024_v54  ;;  %5855 = vmatmul.f32.gmra.mxu1 %v17025_v36  ;;  %v17030_v4 = vld [vmem:[#allocation100_spill] sm:$0xff] }
 0x717   : > { %v13812_v55 = vadd.f32 %v6482_v0, %v6113_v2  ;;  %6583 = vmatmul.f32.gmra.mxu3 %v17026_v14  ;;  %v17031_v2 = vld [vmem:[#allocation98_spill] sm:$0xff] }
 0x718   : > { %6196 = vmatmul.f32.gmra.mxu2 %v17027_v24 }
 0x71a   : > { %v5211_v41 = vpop.f32.mrf.mxu0  ;;  %v5796_v58 = vpop.f32.mrf.mxu1 }
 0x71b   : > { %v5797_v52 = vadd.f32 %v5796_v58, %v5203_v21  ;;  %v6117_v15 = vpop.f32.mrf.mxu2  ;;  %v6488_v37 = vpop.f32.mrf.mxu3  ;;  %v17032_v21 = vld [vmem:[#allocation108_spill] sm:$0xff]  ;;  %v17033_v58 = vld [vmem:[#allocation97_spill] sm:$0xff] }
 0x71d   : > { %v6118_v46 = vadd.f32 %v6117_v15, %v5797_v52  ;;  %5338 = vmatmul.f32.gmra.mxu0 %v17028_v27  ;;  %5859 = vmatmul.f32.gmra.mxu1 %v17029_v11  ;;  %v17034_v15 = vld [vmem:[#allocation104_spill] sm:$0xff] }
 0x71f   : > { %v13818_v18 = vadd.f32 %v6488_v37, %v6118_v46  ;;  %6589 = vmatmul.f32.gmra.mxu3 %v17030_v4  ;;  %v17035_v46 = vld [vmem:[#allocation102_spill] sm:$0xff] }
 0x720   : > { %6201 = vmatmul.f32.gmra.mxu2 %v17031_v2 }
 0x722   : > { %v5219_v0 = vpop.f32.mrf.mxu0  ;;  %v5800_v54 = vpop.f32.mrf.mxu1 }
 0x723   : > { %v5801_v14 = vadd.f32 %v5800_v54, %v5211_v41  ;;  %v6122_v24 = vpop.f32.mrf.mxu2  ;;  %v6494_v20 = vpop.f32.mrf.mxu3  ;;  %v17036_v41 = vld [vmem:[#allocation113_spill] sm:$0xff] }
 0x724   : > { %v17037_v54 = vld [vmem:[#allocation101_spill] sm:$0xff] }
 0x725   : > { %v6123_v61 = vadd.f32 %v6122_v24, %v5801_v14  ;;  %5346 = vmatmul.f32.gmra.mxu0 %v17032_v21  ;;  %5863 = vmatmul.f32.gmra.mxu1 %v17033_v58  ;;  %v17038_v24 = vld [vmem:[#allocation109_spill] sm:$0xff] }
 0x727   : > { %v13824_v52 = vadd.f32 %v6494_v20, %v6123_v61  ;;  %6595 = vmatmul.f32.gmra.mxu3 %v17034_v15  ;;  %v17039_v61 = vld [vmem:[#allocation106_spill] sm:$0xff] }
 0x728   : > { %6206 = vmatmul.f32.gmra.mxu2 %v17035_v46 }
 0x72a   : > { %v5227_v37 = vpop.f32.mrf.mxu0  ;;  %v5804_v27 = vpop.f32.mrf.mxu1 }
 0x72b   : > { %v5805_v4 = vadd.f32 %v5804_v27, %v5219_v0  ;;  %v6127_v2 = vpop.f32.mrf.mxu2  ;;  %v6500_v34 = vpop.f32.mrf.mxu3  ;;  %v17040_v0 = vld [vmem:[#allocation118_spill] sm:$0xff]  ;;  %v17041_v27 = vld [vmem:[#allocation105_spill] sm:$0xff] }
 0x72d   : > { %v6128_v3 = vadd.f32 %v6127_v2, %v5805_v4  ;;  %5354 = vmatmul.f32.gmra.mxu0 %v17036_v41  ;;  %5867 = vmatmul.f32.gmra.mxu1 %v17037_v54  ;;  %v17043_v2 = vld [vmem:[#allocation114_spill] sm:$0xff] }
 0x72f   : > { %v13830_v14 = vadd.f32 %v6500_v34, %v6128_v3  ;;  %6601 = vmatmul.f32.gmra.mxu3 %v17038_v24  ;;  %v17044_v3 = vld [vmem:[#allocation111_spill] sm:$0xff] }
 0x730   : > { %6211 = vmatmul.f32.gmra.mxu2 %v17039_v61 }
 0x732   : > { %v5235_v20 = vpop.f32.mrf.mxu0  ;;  %v5808_v21 = vpop.f32.mrf.mxu1 }
 0x733   : > { %v5809_v15 = vadd.f32 %v5808_v21, %v5227_v37  ;;  %v6132_v46 = vpop.f32.mrf.mxu2  ;;  %v6506_v62 = vpop.f32.mrf.mxu3  ;;  %v17045_v37 = vld [vmem:[#allocation123_spill] sm:$0xff]  ;;  %v17046_v21 = vld [vmem:[#allocation110_spill] sm:$0xff] }
 0x735   : > { %v6133_v1 = vadd.f32 %v6132_v46, %v5809_v15  ;;  %5362 = vmatmul.f32.gmra.mxu0 %v17040_v0  ;;  %5871 = vmatmul.f32.gmra.mxu1 %v17041_v27  ;;  %v17048_v46 = vld [vmem:[#allocation119_spill] sm:$0xff] }
 0x737   : > { %v13836_v4 = vadd.f32 %v6506_v62, %v6133_v1  ;;  %6607 = vmatmul.f32.gmra.mxu3 %v17043_v2  ;;  %v17049_v1 = vld [vmem:[#allocation116_spill] sm:$0xff] }
 0x738   : > { %6216 = vmatmul.f32.gmra.mxu2 %v17044_v3 }
 0x739   : > { %17042 = vst [vmem:[#allocation400_spill] sm:$0xff] %v13836_v4 }
 0x73a   : > { %v5243_v34 = vpop.f32.mrf.mxu0  ;;  %v5812_v41 = vpop.f32.mrf.mxu1 }
 0x73b   : > { %v5813_v24 = vadd.f32 %v5812_v41, %v5235_v20  ;;  %v6137_v61 = vpop.f32.mrf.mxu2  ;;  %v6512_v48 = vpop.f32.mrf.mxu3  ;;  %v17050_v20 = vld [vmem:[#allocation128_spill] sm:$0xff]  ;;  %v17051_v41 = vld [vmem:[#allocation115_spill] sm:$0xff] }
 0x73d   : > { %v6138_v60 = vadd.f32 %v6137_v61, %v5813_v24  ;;  %5370 = vmatmul.f32.gmra.mxu0 %v17045_v37  ;;  %5875 = vmatmul.f32.gmra.mxu1 %v17046_v21  ;;  %v17053_v61 = vld [vmem:[#allocation124_spill] sm:$0xff] }
 0x73f   : > { %v13842_v15 = vadd.f32 %v6512_v48, %v6138_v60  ;;  %6613 = vmatmul.f32.gmra.mxu3 %v17048_v46  ;;  %v17054_v60 = vld [vmem:[#allocation121_spill] sm:$0xff]  ;;  %v321_v48 = vld [vmem:[%s15079_s1 + $0x128] sm:$0xff] }
 0x740   : > { %6221 = vmatmul.f32.gmra.mxu2 %v17049_v1  ;;  %v13855_v37 = vand.u32 4294901760, %v321_v48 }
 0x741   : > { %17047 = vst [vmem:[#allocation404_spill] sm:$0xff] %v13842_v15 }
 0x742   : > { %v5251_v62 = vpop.f32.mrf.mxu0  ;;  %v5816_v0 = vpop.f32.mrf.mxu1  ;;  %7482 = vmatpush.msra.mxu2 %v13855_v37  ;;  %8703 = vmatpush.msrb.mxu1 %v13855_v37 }
 0x743   : > { %v5817_v2 = vadd.f32 %v5816_v0, %v5243_v34  ;;  %v6142_v3 = vpop.f32.mrf.mxu2  ;;  %v6518_v23 = vpop.f32.mrf.mxu3 }
 0x745   : > { %v6143_v13 = vadd.f32 %v6142_v3, %v5817_v2  ;;  %5378 = vmatmul.f32.gmra.mxu0 %v17050_v20  ;;  %5879 = vmatmul.f32.gmra.mxu1 %v17051_v41  ;;  %v17055_v3 = vld [vmem:[#allocation133_spill] sm:$0xff]  ;;  %v17056_v20 = vld [vmem:[#allocation120_spill] sm:$0xff]  ;;  %v17060_v41 = vld [vmem:[#allocation138_spill] sm:$0xff] }
 0x747   : > { %v13848_v24 = vadd.f32 %v6518_v23, %v6143_v13  ;;  %6619 = vmatmul.f32.gmra.mxu3 %v17053_v61  ;;  %v13859_v13 = vsub.f32 %v321_v48, %v13855_v37 }
 0x748   : > { %6226 = vmatmul.f32.gmra.mxu2 %v17054_v60 }
 0x749   : > { %17052 = vst [vmem:[#allocation408_spill] sm:$0xff] %v13848_v24  ;;  %v15991_v61 = vand.u32 4294901760, %v13859_v13  ;;  %8348 = vmatpush.msrb.mxu0 %v13859_v13 }
 0x74a   : > { %v5259_v34 = vpop.f32.mrf.mxu0  ;;  %v5820_v46 = vpop.f32.mrf.mxu1 }
 0x74b   : > { %v5821_v1 = vadd.f32 %v5820_v46, %v5251_v62  ;;  %v6147_v0 = vpop.f32.mrf.mxu2  ;;  %v6524_v2 = vpop.f32.mrf.mxu3  ;;  %v17058_v62 = vld [vmem:[#allocation129_spill] sm:$0xff]  ;;  %v8047_v48 = vsub.f32 %v13859_v13, %v15991_v61  ;;  %v17059_v46 = vld [vmem:[#allocation126_spill] sm:$0xff] }
 0x74d   : > { %v6148_v23 = vadd.f32 %v6147_v0, %v5821_v1  ;;  %5386 = vmatmul.f32.gmra.mxu0 %v17055_v3  ;;  %5883 = vmatmul.f32.gmra.mxu1 %v17056_v20  ;;  %v8048_v6 = vand.u32 4294901760, %v8047_v48 }
 0x74f   : > { %v13866_v60 = vadd.f32 %v6524_v2, %v6148_v23  ;;  %6625 = vmatmul.f32.gmra.mxu3 %v17058_v62  ;;  %v17061_v2 = vld [vmem:[#allocation125_spill] sm:$0xff]  ;;  %v17063_v62 = vld [vmem:[#allocation134_spill] sm:$0xff] }
 0x750   : > { %6231 = vmatmul.f32.gmra.mxu2 %v17059_v46  ;;  %8049 = vmatpush.msra.mxu3 %v8048_v6  ;;  %v17066_v6 = vld [vmem:[#allocation130_spill] sm:$0xff] }
 0x751   : > { %17057 = vst [vmem:[#allocation412_spill] sm:$0xff] %v13866_v60  ;;  %v17064_v60 = vld [vmem:[#allocation131_spill] sm:$0xff] }
 0x752   : > { %v5267_v1 = vpop.f32.mrf.mxu0  ;;  %v5824_v0 = vpop.f32.mrf.mxu1 }
 0x753   : > { %v5825_v3 = vadd.f32 %v5824_v0, %v5259_v34  ;;  %v6152_v25 = vpop.f32.mrf.mxu2  ;;  %v6530_v20 = vpop.f32.mrf.mxu3  ;;  %v17065_v0 = vld [vmem:[#allocation143_spill] sm:$0xff] }
 0x755   : > { %v6153_v24 = vadd.f32 %v6152_v25, %v5825_v3  ;;  %5394 = vmatmul.f32.gmra.mxu0 %v17060_v41  ;;  %5887 = vmatmul.f32.gmra.mxu1 %v17061_v2  ;;  %v17068_v41 = vld [vmem:[#allocation139_spill] sm:$0xff] }
 0x757   : > { %v13875_v23 = vadd.f32 %v6530_v20, %v6153_v24  ;;  %6631 = vmatmul.f32.gmra.mxu3 %v17063_v62  ;;  %v17069_v24 = vld [vmem:[#allocation136_spill] sm:$0xff] }
 0x758   : > { %6236 = vmatmul.f32.gmra.mxu2 %v17064_v60 }
 0x759   : > { %17062 = vst [vmem:[#allocation416_spill] sm:$0xff] %v13875_v23 }
 0x75a   : > { %v5275_v61 = vpop.f32.mrf.mxu0  ;;  %v5828_v46 = vpop.f32.mrf.mxu1 }
 0x75b   : > { %v5829_v48 = vadd.f32 %v5828_v46, %v5267_v1  ;;  %v6157_v15 = vpop.f32.mrf.mxu2  ;;  %v6536_v21 = vpop.f32.mrf.mxu3  ;;  %v17070_v1 = vld [vmem:[#allocation148_spill] sm:$0xff]  ;;  %v17071_v46 = vld [vmem:[#allocation135_spill] sm:$0xff] }
 0x75d   : > { %v6158_v34 = vadd.f32 %v6157_v15, %v5829_v48  ;;  %5402 = vmatmul.f32.gmra.mxu0 %v17065_v0  ;;  %5891 = vmatmul.f32.gmra.mxu1 %v17066_v6  ;;  %v17073_v48 = vld [vmem:[#allocation144_spill] sm:$0xff] }
 0x75f   : > { %v13881_v25 = vadd.f32 %v6536_v21, %v6158_v34  ;;  %6637 = vmatmul.f32.gmra.mxu3 %v17068_v41  ;;  %v17074_v21 = vld [vmem:[#allocation141_spill] sm:$0xff] }
 0x760   : > { %6241 = vmatmul.f32.gmra.mxu2 %v17069_v24 }
 0x761   : > { %17067 = vst [vmem:[#allocation420_spill] sm:$0xff] %v13881_v25 }
 0x762   : > { %v5283_v20 = vpop.f32.mrf.mxu0  ;;  %v5832_v3 = vpop.f32.mrf.mxu1 }
 0x763   : > { %v5833_v62 = vadd.f32 %v5832_v3, %v5275_v61  ;;  %v6162_v60 = vpop.f32.mrf.mxu2  ;;  %v6542_v23 = vpop.f32.mrf.mxu3  ;;  %v17075_v61 = vld [vmem:[#allocation153_spill] sm:$0xff]  ;;  %v17076_v3 = vld [vmem:[#allocation140_spill] sm:$0xff] }
 0x765   : > { %v6163_v2 = vadd.f32 %v6162_v60, %v5833_v62  ;;  %5410 = vmatmul.f32.gmra.mxu0 %v17070_v1  ;;  %5895 = vmatmul.f32.gmra.mxu1 %v17071_v46  ;;  %v17078_v60 = vld [vmem:[#allocation149_spill] sm:$0xff] }
 0x767   : > { %v13887_v15 = vadd.f32 %v6542_v23, %v6163_v2  ;;  %6643 = vmatmul.f32.gmra.mxu3 %v17073_v48  ;;  %v17079_v2 = vld [vmem:[#allocation146_spill] sm:$0xff] }
 0x768   : > { %6246 = vmatmul.f32.gmra.mxu2 %v17074_v21 }
 0x769   : > { %17072 = vst [vmem:[#allocation424_spill] sm:$0xff] %v13887_v15 }
 0x76a   : > { %v5291_v34 = vpop.f32.mrf.mxu0  ;;  %v5836_v0 = vpop.f32.mrf.mxu1 }
 0x76b   : > { %v5837_v41 = vadd.f32 %v5836_v0, %v5283_v20  ;;  %v6167_v24 = vpop.f32.mrf.mxu2  ;;  %v6548_v25 = vpop.f32.mrf.mxu3  ;;  %v17080_v20 = vld [vmem:[#allocation158_spill] sm:$0xff]  ;;  %v17081_v0 = vld [vmem:[#allocation145_spill] sm:$0xff] }
 0x76d   : > { %v6168_v6 = vadd.f32 %v6167_v24, %v5837_v41  ;;  %5418 = vmatmul.f32.gmra.mxu0 %v17075_v61  ;;  %5899 = vmatmul.f32.gmra.mxu1 %v17076_v3  ;;  %v17083_v24 = vld [vmem:[#allocation154_spill] sm:$0xff] }
 0x76f   : > { %v13893_v62 = vadd.f32 %v6548_v25, %v6168_v6  ;;  %6649 = vmatmul.f32.gmra.mxu3 %v17078_v60  ;;  %v17084_v6 = vld [vmem:[#allocation151_spill] sm:$0xff] }
 0x770   : > { %6251 = vmatmul.f32.gmra.mxu2 %v17079_v2 }
 0x771   : > { %17077 = vst [vmem:[#allocation428_spill] sm:$0xff] %v13893_v62 }
 0x772   : > { %v5299_v23 = vpop.f32.mrf.mxu0  ;;  %v5840_v1 = vpop.f32.mrf.mxu1 }
 0x773   : > { %v5841_v48 = vadd.f32 %v5840_v1, %v5291_v34  ;;  %v6172_v21 = vpop.f32.mrf.mxu2  ;;  %v6554_v15 = vpop.f32.mrf.mxu3  ;;  %v17085_v34 = vld [vmem:[#allocation163_spill] sm:$0xff]  ;;  %v17086_v1 = vld [vmem:[#allocation150_spill] sm:$0xff] }
 0x775   : > { %v6173_v46 = vadd.f32 %v6172_v21, %v5841_v48  ;;  %5426 = vmatmul.f32.gmra.mxu0 %v17080_v20  ;;  %5903 = vmatmul.f32.gmra.mxu1 %v17081_v0  ;;  %v17088_v21 = vld [vmem:[#allocation159_spill] sm:$0xff] }
 0x777   : > { %v13899_v41 = vadd.f32 %v6554_v15, %v6173_v46  ;;  %6655 = vmatmul.f32.gmra.mxu3 %v17083_v24  ;;  %v17089_v46 = vld [vmem:[#allocation156_spill] sm:$0xff] }
 0x778   : > { %6256 = vmatmul.f32.gmra.mxu2 %v17084_v6 }
 0x779   : > { %17082 = vst [vmem:[#allocation432_spill] sm:$0xff] %v13899_v41 }
 0x77a   : > { %v5307_v25 = vpop.f32.mrf.mxu0  ;;  %v5844_v61 = vpop.f32.mrf.mxu1 }
 0x77b   : > { %v5845_v60 = vadd.f32 %v5844_v61, %v5299_v23  ;;  %v6177_v2 = vpop.f32.mrf.mxu2  ;;  %v6560_v62 = vpop.f32.mrf.mxu3  ;;  %v17090_v23 = vld [vmem:[#allocation168_spill] sm:$0xff]  ;;  %v17091_v61 = vld [vmem:[#allocation155_spill] sm:$0xff] }
 0x77d   : > { %v6178_v3 = vadd.f32 %v6177_v2, %v5845_v60  ;;  %5434 = vmatmul.f32.gmra.mxu0 %v17085_v34  ;;  %5907 = vmatmul.f32.gmra.mxu1 %v17086_v1  ;;  %v17093_v2 = vld [vmem:[#allocation164_spill] sm:$0xff] }
 0x77f   : > { %v13905_v48 = vadd.f32 %v6560_v62, %v6178_v3  ;;  %6661 = vmatmul.f32.gmra.mxu3 %v17088_v21  ;;  %v17094_v3 = vld [vmem:[#allocation161_spill] sm:$0xff] }
 0x780   : > { %6261 = vmatmul.f32.gmra.mxu2 %v17089_v46 }
 0x781   : > { %17087 = vst [vmem:[#allocation436_spill] sm:$0xff] %v13905_v48 }
 0x782   : > { %v5315_v15 = vpop.f32.mrf.mxu0  ;;  %v5848_v20 = vpop.f32.mrf.mxu1 }
 0x783   : > { %v5849_v24 = vadd.f32 %v5848_v20, %v5307_v25  ;;  %v6182_v6 = vpop.f32.mrf.mxu2  ;;  %v6566_v41 = vpop.f32.mrf.mxu3  ;;  %v17095_v25 = vld [vmem:[#allocation173_spill] sm:$0xff]  ;;  %v17096_v20 = vld [vmem:[#allocation160_spill] sm:$0xff] }
 0x785   : > { %v6183_v0 = vadd.f32 %v6182_v6, %v5849_v24  ;;  %5442 = vmatmul.f32.gmra.mxu0 %v17090_v23  ;;  %5911 = vmatmul.f32.gmra.mxu1 %v17091_v61  ;;  %v17098_v6 = vld [vmem:[#allocation169_spill] sm:$0xff] }
 0x787   : > { %v13911_v60 = vadd.f32 %v6566_v41, %v6183_v0  ;;  %6667 = vmatmul.f32.gmra.mxu3 %v17093_v2  ;;  %v17099_v0 = vld [vmem:[#allocation166_spill] sm:$0xff] }
 0x788   : > { %6266 = vmatmul.f32.gmra.mxu2 %v17094_v3 }
 0x789   : > { %17092 = vst [vmem:[#allocation440_spill] sm:$0xff] %v13911_v60 }
 0x78a   : > { %v5323_v62 = vpop.f32.mrf.mxu0  ;;  %v5852_v34 = vpop.f32.mrf.mxu1 }
 0x78b   : > { %v5853_v21 = vadd.f32 %v5852_v34, %v5315_v15  ;;  %v6187_v46 = vpop.f32.mrf.mxu2  ;;  %v6572_v48 = vpop.f32.mrf.mxu3  ;;  %v17100_v15 = vld [vmem:[#allocation178_spill] sm:$0xff]  ;;  %v17101_v34 = vld [vmem:[#allocation165_spill] sm:$0xff] }
 0x78d   : > { %v6188_v1 = vadd.f32 %v6187_v46, %v5853_v21  ;;  %5450 = vmatmul.f32.gmra.mxu0 %v17095_v25  ;;  %5915 = vmatmul.f32.gmra.mxu1 %v17096_v20  ;;  %v17103_v46 = vld [vmem:[#allocation174_spill] sm:$0xff] }
 0x78f   : > { %v13917_v24 = vadd.f32 %v6572_v48, %v6188_v1  ;;  %6673 = vmatmul.f32.gmra.mxu3 %v17098_v6  ;;  %v17104_v1 = vld [vmem:[#allocation171_spill] sm:$0xff] }
 0x790   : > { %6271 = vmatmul.f32.gmra.mxu2 %v17099_v0 }
 0x791   : > { %17097 = vst [vmem:[#allocation444_spill] sm:$0xff] %v13917_v24 }
 0x792   : > { %v5331_v41 = vpop.f32.mrf.mxu0  ;;  %v5856_v23 = vpop.f32.mrf.mxu1 }
 0x793   : > { %v5857_v2 = vadd.f32 %v5856_v23, %v5323_v62  ;;  %v6192_v3 = vpop.f32.mrf.mxu2  ;;  %v6578_v60 = vpop.f32.mrf.mxu3  ;;  %v17105_v62 = vld [vmem:[#allocation183_spill] sm:$0xff]  ;;  %v17106_v23 = vld [vmem:[#allocation170_spill] sm:$0xff] }
 0x795   : > { %v6193_v61 = vadd.f32 %v6192_v3, %v5857_v2  ;;  %5458 = vmatmul.f32.gmra.mxu0 %v17100_v15  ;;  %5919 = vmatmul.f32.gmra.mxu1 %v17101_v34  ;;  %v17108_v3 = vld [vmem:[#allocation179_spill] sm:$0xff]  ;;  %v17115_v34 = vld [vmem:[#allocation193_spill] sm:$0xff] }
 0x797   : > { %v13923_v21 = vadd.f32 %v6578_v60, %v6193_v61  ;;  %6679 = vmatmul.f32.gmra.mxu3 %v17103_v46  ;;  %v17109_v61 = vld [vmem:[#allocation176_spill] sm:$0xff]  ;;  %v319_v60 = vld [vmem:[%s15079_s1 + $0x118] sm:$0xff] }
 0x798   : > { %6276 = vmatmul.f32.gmra.mxu2 %v17104_v1  ;;  %v13936_v15 = vand.u32 4294901760, %v319_v60 }
 0x799   : > { %17102 = vst [vmem:[#allocation448_spill] sm:$0xff] %v13923_v21 }
 0x79a   : > { %v5339_v48 = vpop.f32.mrf.mxu0  ;;  %v5860_v25 = vpop.f32.mrf.mxu1  ;;  %7484 = vmatpush.msra.mxu2 %v13936_v15  ;;  %8705 = vmatpush.msrb.mxu1 %v13936_v15 }
 0x79b   : > { %v5861_v6 = vadd.f32 %v5860_v25, %v5331_v41  ;;  %v6197_v0 = vpop.f32.mrf.mxu2  ;;  %v6584_v24 = vpop.f32.mrf.mxu3 }
 0x79d   : > { %v6198_v20 = vadd.f32 %v6197_v0, %v5861_v6  ;;  %5466 = vmatmul.f32.gmra.mxu0 %v17105_v62  ;;  %5923 = vmatmul.f32.gmra.mxu1 %v17106_v23  ;;  %v17110_v0 = vld [vmem:[#allocation188_spill] sm:$0xff]  ;;  %v17111_v62 = vld [vmem:[#allocation175_spill] sm:$0xff] }
 0x79f   : > { %v13929_v2 = vadd.f32 %v6584_v24, %v6198_v20  ;;  %6685 = vmatmul.f32.gmra.mxu3 %v17108_v3  ;;  %v13940_v20 = vsub.f32 %v319_v60, %v13936_v15 }
 0x7a0   : > { %6281 = vmatmul.f32.gmra.mxu2 %v17109_v61 }
 0x7a1   : > { %17107 = vst [vmem:[#allocation452_spill] sm:$0xff] %v13929_v2  ;;  %v15992_v3 = vand.u32 4294901760, %v13940_v20  ;;  %8351 = vmatpush.msrb.mxu0 %v13940_v20 }
 0x7a2   : > { %v5347_v41 = vpop.f32.mrf.mxu0  ;;  %v5864_v46 = vpop.f32.mrf.mxu1 }
 0x7a3   : > { %v5865_v1 = vadd.f32 %v5864_v46, %v5339_v48  ;;  %v6202_v25 = vpop.f32.mrf.mxu2  ;;  %v6590_v6 = vpop.f32.mrf.mxu3  ;;  %v17113_v48 = vld [vmem:[#allocation184_spill] sm:$0xff]  ;;  %v8053_v60 = vsub.f32 %v13940_v20, %v15992_v3  ;;  %v17114_v46 = vld [vmem:[#allocation181_spill] sm:$0xff] }
 0x7a5   : > { %v6203_v24 = vadd.f32 %v6202_v25, %v5865_v1  ;;  %5474 = vmatmul.f32.gmra.mxu0 %v17110_v0  ;;  %5927 = vmatmul.f32.gmra.mxu1 %v17111_v62  ;;  %v8054_v2 = vand.u32 4294901760, %v8053_v60 }
 0x7a7   : > { %v13947_v61 = vadd.f32 %v6590_v6, %v6203_v24  ;;  %6691 = vmatmul.f32.gmra.mxu3 %v17113_v48  ;;  %v17116_v6 = vld [vmem:[#allocation180_spill] sm:$0xff]  ;;  %v17118_v48 = vld [vmem:[#allocation189_spill] sm:$0xff] }
 0x7a8   : > { %6286 = vmatmul.f32.gmra.mxu2 %v17114_v46  ;;  %8055 = vmatpush.msra.mxu3 %v8054_v2  ;;  %v17121_v2 = vld [vmem:[#allocation185_spill] sm:$0xff] }
 0x7a9   : > { %17112 = vst [vmem:[#allocation456_spill] sm:$0xff] %v13947_v61  ;;  %v17119_v61 = vld [vmem:[#allocation186_spill] sm:$0xff] }
 0x7aa   : > { %v5355_v1 = vpop.f32.mrf.mxu0  ;;  %v5868_v25 = vpop.f32.mrf.mxu1 }
 0x7ab   : > { %v5869_v0 = vadd.f32 %v5868_v25, %v5347_v41  ;;  %v6207_v23 = vpop.f32.mrf.mxu2  ;;  %v6596_v62 = vpop.f32.mrf.mxu3  ;;  %v17120_v25 = vld [vmem:[#allocation198_spill] sm:$0xff] }
 0x7ad   : > { %v6208_v21 = vadd.f32 %v6207_v23, %v5869_v0  ;;  %5482 = vmatmul.f32.gmra.mxu0 %v17115_v34  ;;  %5931 = vmatmul.f32.gmra.mxu1 %v17116_v6  ;;  %v17123_v34 = vld [vmem:[#allocation194_spill] sm:$0xff] }
 0x7af   : > { %v13956_v24 = vadd.f32 %v6596_v62, %v6208_v21  ;;  %6697 = vmatmul.f32.gmra.mxu3 %v17118_v48  ;;  %v17124_v21 = vld [vmem:[#allocation191_spill] sm:$0xff] }
 0x7b0   : > { %6291 = vmatmul.f32.gmra.mxu2 %v17119_v61 }
 0x7b1   : > { %17117 = vst [vmem:[#allocation460_spill] sm:$0xff] %v13956_v24 }
 0x7b2   : > { %v5363_v3 = vpop.f32.mrf.mxu0  ;;  %v5872_v46 = vpop.f32.mrf.mxu1 }
 0x7b3   : > { %v5873_v60 = vadd.f32 %v5872_v46, %v5355_v1  ;;  %v6212_v4 = vpop.f32.mrf.mxu2  ;;  %v6602_v27 = vpop.f32.mrf.mxu3  ;;  %v17125_v1 = vld [vmem:[#allocation203_spill] sm:$0xff]  ;;  %v17126_v46 = vld [vmem:[#allocation190_spill] sm:$0xff] }
 0x7b5   : > { %v6213_v41 = vadd.f32 %v6212_v4, %v5873_v60  ;;  %5490 = vmatmul.f32.gmra.mxu0 %v17120_v25  ;;  %5935 = vmatmul.f32.gmra.mxu1 %v17121_v2  ;;  %v17128_v60 = vld [vmem:[#allocation199_spill] sm:$0xff] }
 0x7b7   : > { %v13962_v23 = vadd.f32 %v6602_v27, %v6213_v41  ;;  %6703 = vmatmul.f32.gmra.mxu3 %v17123_v34  ;;  %v17129_v27 = vld [vmem:[#allocation196_spill] sm:$0xff] }
 0x7b8   : > { %6296 = vmatmul.f32.gmra.mxu2 %v17124_v21 }
 0x7b9   : > { %17122 = vst [vmem:[#allocation464_spill] sm:$0xff] %v13962_v23 }
 0x7ba   : > { %v5371_v62 = vpop.f32.mrf.mxu0  ;;  %v5876_v0 = vpop.f32.mrf.mxu1 }
 0x7bb   : > { %v5877_v48 = vadd.f32 %v5876_v0, %v5363_v3  ;;  %v6217_v61 = vpop.f32.mrf.mxu2  ;;  %v6608_v24 = vpop.f32.mrf.mxu3  ;;  %v17130_v3 = vld [vmem:[#allocation208_spill] sm:$0xff]  ;;  %v17131_v0 = vld [vmem:[#allocation195_spill] sm:$0xff] }
 0x7bd   : > { %v6218_v6 = vadd.f32 %v6217_v61, %v5877_v48  ;;  %5498 = vmatmul.f32.gmra.mxu0 %v17125_v1  ;;  %5939 = vmatmul.f32.gmra.mxu1 %v17126_v46  ;;  %v17133_v61 = vld [vmem:[#allocation204_spill] sm:$0xff] }
 0x7bf   : > { %v13968_v4 = vadd.f32 %v6608_v24, %v6218_v6  ;;  %6709 = vmatmul.f32.gmra.mxu3 %v17128_v60  ;;  %v17134_v6 = vld [vmem:[#allocation201_spill] sm:$0xff] }
 0x7c0   : > { %6301 = vmatmul.f32.gmra.mxu2 %v17129_v27 }
 0x7c1   : > { %17127 = vst [vmem:[#allocation468_spill] sm:$0xff] %v13968_v4 }
 0x7c2   : > { %v5379_v41 = vpop.f32.mrf.mxu0  ;;  %v5880_v25 = vpop.f32.mrf.mxu1 }
 0x7c3   : > { %v5881_v34 = vadd.f32 %v5880_v25, %v5371_v62  ;;  %v6222_v21 = vpop.f32.mrf.mxu2  ;;  %v6614_v23 = vpop.f32.mrf.mxu3  ;;  %v17135_v62 = vld [vmem:[#allocation213_spill] sm:$0xff]  ;;  %v17136_v25 = vld [vmem:[#allocation200_spill] sm:$0xff] }
 0x7c5   : > { %v6223_v2 = vadd.f32 %v6222_v21, %v5881_v34  ;;  %5506 = vmatmul.f32.gmra.mxu0 %v17130_v3  ;;  %5943 = vmatmul.f32.gmra.mxu1 %v17131_v0  ;;  %v17138_v21 = vld [vmem:[#allocation209_spill] sm:$0xff] }
 0x7c7   : > { %v13974_v48 = vadd.f32 %v6614_v23, %v6223_v2  ;;  %6715 = vmatmul.f32.gmra.mxu3 %v17133_v61  ;;  %v17139_v2 = vld [vmem:[#allocation206_spill] sm:$0xff] }
 0x7c8   : > { %6306 = vmatmul.f32.gmra.mxu2 %v17134_v6 }
 0x7c9   : > { %17132 = vst [vmem:[#allocation472_spill] sm:$0xff] %v13974_v48 }
 0x7ca   : > { %v5387_v24 = vpop.f32.mrf.mxu0  ;;  %v5884_v1 = vpop.f32.mrf.mxu1 }
 0x7cb   : > { %v5885_v60 = vadd.f32 %v5884_v1, %v5379_v41  ;;  %v6227_v27 = vpop.f32.mrf.mxu2  ;;  %v6620_v4 = vpop.f32.mrf.mxu3  ;;  %v17140_v41 = vld [vmem:[#allocation218_spill] sm:$0xff]  ;;  %v17141_v1 = vld [vmem:[#allocation205_spill] sm:$0xff] }
 0x7cd   : > { %v6228_v46 = vadd.f32 %v6227_v27, %v5885_v60  ;;  %5514 = vmatmul.f32.gmra.mxu0 %v17135_v62  ;;  %5947 = vmatmul.f32.gmra.mxu1 %v17136_v25  ;;  %v17143_v27 = vld [vmem:[#allocation214_spill] sm:$0xff] }
 0x7cf   : > { %v13980_v34 = vadd.f32 %v6620_v4, %v6228_v46  ;;  %6721 = vmatmul.f32.gmra.mxu3 %v17138_v21  ;;  %v17144_v46 = vld [vmem:[#allocation211_spill] sm:$0xff] }
 0x7d0   : > { %6311 = vmatmul.f32.gmra.mxu2 %v17139_v2 }
 0x7d1   : > { %17137 = vst [vmem:[#allocation476_spill] sm:$0xff] %v13980_v34 }
 0x7d2   : > { %v5395_v23 = vpop.f32.mrf.mxu0  ;;  %v5888_v3 = vpop.f32.mrf.mxu1 }
 0x7d3   : > { %v5889_v61 = vadd.f32 %v5888_v3, %v5387_v24  ;;  %v6232_v6 = vpop.f32.mrf.mxu2  ;;  %v6626_v48 = vpop.f32.mrf.mxu3  ;;  %v17145_v24 = vld [vmem:[#allocation223_spill] sm:$0xff]  ;;  %v17146_v3 = vld [vmem:[#allocation210_spill] sm:$0xff] }
 0x7d5   : > { %v6233_v0 = vadd.f32 %v6232_v6, %v5889_v61  ;;  %5522 = vmatmul.f32.gmra.mxu0 %v17140_v41  ;;  %5951 = vmatmul.f32.gmra.mxu1 %v17141_v1  ;;  %v17148_v6 = vld [vmem:[#allocation219_spill] sm:$0xff] }
 0x7d7   : > { %v13986_v60 = vadd.f32 %v6626_v48, %v6233_v0  ;;  %6727 = vmatmul.f32.gmra.mxu3 %v17143_v27  ;;  %v17149_v0 = vld [vmem:[#allocation216_spill] sm:$0xff] }
 0x7d8   : > { %6316 = vmatmul.f32.gmra.mxu2 %v17144_v46 }
 0x7d9   : > { %17142 = vst [vmem:[#allocation480_spill] sm:$0xff] %v13986_v60 }
 0x7da   : > { %v5403_v4 = vpop.f32.mrf.mxu0  ;;  %v5892_v62 = vpop.f32.mrf.mxu1 }
 0x7db   : > { %v5893_v21 = vadd.f32 %v5892_v62, %v5395_v23  ;;  %v6237_v2 = vpop.f32.mrf.mxu2  ;;  %v6632_v34 = vpop.f32.mrf.mxu3  ;;  %v17150_v23 = vld [vmem:[#allocation228_spill] sm:$0xff]  ;;  %v17151_v62 = vld [vmem:[#allocation215_spill] sm:$0xff] }
 0x7dd   : > { %v6238_v25 = vadd.f32 %v6237_v2, %v5893_v21  ;;  %5530 = vmatmul.f32.gmra.mxu0 %v17145_v24  ;;  %5955 = vmatmul.f32.gmra.mxu1 %v17146_v3  ;;  %v17153_v2 = vld [vmem:[#allocation224_spill] sm:$0xff] }
 0x7df   : > { %v13992_v61 = vadd.f32 %v6632_v34, %v6238_v25  ;;  %6733 = vmatmul.f32.gmra.mxu3 %v17148_v6  ;;  %v17154_v25 = vld [vmem:[#allocation221_spill] sm:$0xff] }
 0x7e0   : > { %6321 = vmatmul.f32.gmra.mxu2 %v17149_v0 }
 0x7e1   : > { %17147 = vst [vmem:[#allocation484_spill] sm:$0xff] %v13992_v61 }
 0x7e2   : > { %v5411_v48 = vpop.f32.mrf.mxu0  ;;  %v5896_v41 = vpop.f32.mrf.mxu1 }
 0x7e3   : > { %v5897_v27 = vadd.f32 %v5896_v41, %v5403_v4  ;;  %v6242_v46 = vpop.f32.mrf.mxu2  ;;  %v6638_v60 = vpop.f32.mrf.mxu3  ;;  %v17155_v4 = vld [vmem:[#allocation233_spill] sm:$0xff]  ;;  %v17156_v41 = vld [vmem:[#allocation220_spill] sm:$0xff] }
 0x7e5   : > { %v6243_v1 = vadd.f32 %v6242_v46, %v5897_v27  ;;  %5538 = vmatmul.f32.gmra.mxu0 %v17150_v23  ;;  %5959 = vmatmul.f32.gmra.mxu1 %v17151_v62  ;;  %v17158_v46 = vld [vmem:[#allocation229_spill] sm:$0xff] }
 0x7e7   : > { %v13998_v21 = vadd.f32 %v6638_v60, %v6243_v1  ;;  %6739 = vmatmul.f32.gmra.mxu3 %v17153_v2  ;;  %v17159_v1 = vld [vmem:[#allocation226_spill] sm:$0xff] }
 0x7e8   : > { %6326 = vmatmul.f32.gmra.mxu2 %v17154_v25 }
 0x7e9   : > { %17152 = vst [vmem:[#allocation488_spill] sm:$0xff] %v13998_v21 }
 0x7ea   : > { %v5419_v34 = vpop.f32.mrf.mxu0  ;;  %v5900_v24 = vpop.f32.mrf.mxu1 }
 0x7eb   : > { %v5901_v6 = vadd.f32 %v5900_v24, %v5411_v48  ;;  %v6247_v0 = vpop.f32.mrf.mxu2  ;;  %v6644_v61 = vpop.f32.mrf.mxu3  ;;  %v17160_v48 = vld [vmem:[#allocation238_spill] sm:$0xff]  ;;  %v17161_v24 = vld [vmem:[#allocation225_spill] sm:$0xff] }
 0x7ed   : > { %v6248_v3 = vadd.f32 %v6247_v0, %v5901_v6  ;;  %5546 = vmatmul.f32.gmra.mxu0 %v17155_v4  ;;  %5963 = vmatmul.f32.gmra.mxu1 %v17156_v41  ;;  %v17163_v0 = vld [vmem:[#allocation234_spill] sm:$0xff] }
 0x7ef   : > { %v14004_v27 = vadd.f32 %v6644_v61, %v6248_v3  ;;  %6745 = vmatmul.f32.gmra.mxu3 %v17158_v46  ;;  %v17164_v3 = vld [vmem:[#allocation231_spill] sm:$0xff] }
 0x7f0   : > { %6331 = vmatmul.f32.gmra.mxu2 %v17159_v1  ;;  %v317_v61 = vld [vmem:[%s15079_s1 + $0x108] sm:$0xff] }
 0x7f1   : > { %17157 = vst [vmem:[#allocation492_spill] sm:$0xff] %v14004_v27  ;;  %v7485_v4 = vand.u32 4294901760, %v317_v61 }
 0x7f2   : > { %v5427_v60 = vpop.f32.mrf.mxu0  ;;  %v5904_v23 = vpop.f32.mrf.mxu1 }
 0x7f3   : > { %v5905_v2 = vadd.f32 %v5904_v23, %v5419_v34  ;;  %v6252_v25 = vpop.f32.mrf.mxu2  ;;  %v6650_v21 = vpop.f32.mrf.mxu3  ;;  %7486 = vmatpush.msra.mxu2 %v7485_v4  ;;  %8707 = vmatpush.msrb.mxu1 %v7485_v4 }
 0x7f5   : > { %v6253_v62 = vadd.f32 %v6252_v25, %v5905_v2  ;;  %5554 = vmatmul.f32.gmra.mxu0 %v17160_v48  ;;  %5967 = vmatmul.f32.gmra.mxu1 %v17161_v24  ;;  %v8057_v25 = vsub.f32 %v317_v61, %v7485_v4  ;;  %v17166_v48 = vld [vmem:[#allocation243_spill] sm:$0xff]  ;;  %v17170_v61 = vld [vmem:[#allocation236_spill] sm:$0xff] }
 0x7f7   : > { %v14010_v6 = vadd.f32 %v6650_v21, %v6253_v62  ;;  %6751 = vmatmul.f32.gmra.mxu3 %v17163_v0  ;;  %v17165_v62 = vand.u32 4294901760, %v13606_v31  ;;  %v17167_v0 = vld [vmem:[#allocation230_spill] sm:$0xff]  ;;  %8354 = vmatpush.msrb.mxu0 %v8057_v25  ;;  %v17171_v31 = vand.u32 4294901760, %v13778_v49  ;;  %v17175_v49 = vand.u32 4294901760, %v13940_v20  ;;  %v17178_v20 = vld [vmem:[#allocation251_spill] sm:$0xff] }
 0x7f8   : > { %6336 = vmatmul.f32.gmra.mxu2 %v17164_v3  ;;  %v8058_v3 = vand.u32 4294901760, %v8057_v25 }
 0x7f9   : > { %17162 = vst [vmem:[#allocation496_spill] sm:$0xff] %v14010_v6  ;;  %9118 = vmatpush.msrb.mxu2 %v17165_v62  ;;  %v17168_v6 = vand.u32 4294901760, %v13698_v26  ;;  %v17172_v26 = vand.u32 4294901760, %v13859_v13 }
 0x7fa   : > { %v5435_v46 = vpop.f32.mrf.mxu0  ;;  %v5908_v34 = vpop.f32.mrf.mxu1 }
 0x7fb   : > { %v5909_v1 = vadd.f32 %v5908_v34, %v5427_v60  ;;  %v6257_v23 = vpop.f32.mrf.mxu2  ;;  %v6656_v2 = vpop.f32.mrf.mxu3  ;;  %9122 = vmatpush.msrb.mxu2 %v17168_v6  ;;  %v17169_v60 = vld [vmem:[#allocation239_spill] sm:$0xff]  ;;  %v8059_v34 = vsub.f32 %v8057_v25, %v8058_v3 }
 0x7fc   : > { %v17174_v25 = vld [vmem:[#allocation235_spill] sm:$0xff] }
 0x7fd   : > { %v6258_v21 = vadd.f32 %v6257_v23, %v5909_v1  ;;  %5562 = vmatmul.f32.gmra.mxu0 %v17166_v48  ;;  %5971 = vmatmul.f32.gmra.mxu1 %v17167_v0  ;;  %v8060_v27 = vand.u32 4294901760, %v8059_v34 }
 0x7fe   : > { %9126 = vmatpush.msrb.mxu2 %v17171_v31 }
 0x7ff   : > { %v14023_v24 = vadd.f32 %v6656_v2, %v6258_v21  ;;  %6757 = vmatmul.f32.gmra.mxu3 %v17169_v60  ;;  %v17173_v2 = vld [vmem:[#allocation247_spill] sm:$0xff] }
 0x800   : > { %6341 = vmatmul.f32.gmra.mxu2 %v17170_v61  ;;  %8061 = vmatpush.msra.mxu3 %v8060_v27  ;;  %v17177_v27 = vld [vmem:[#allocation241_spill] sm:$0xff] }
 0x801   : > { %9130 = vmatpush.msrb.mxu2 %v17172_v26 }
 0x802   : > { %v5443_v1 = vpop.f32.mrf.mxu0  ;;  %v5912_v23 = vpop.f32.mrf.mxu1  ;;  %9415 = vmatpush.msrb.mxu3 %v13599_v43 }
 0x803   : > { %v5913_v62 = vadd.f32 %v5912_v23, %v5435_v46  ;;  %v6262_v48 = vpop.f32.mrf.mxu2  ;;  %v6662_v0 = vpop.f32.mrf.mxu3  ;;  %9134 = vmatpush.msrb.mxu2 %v17175_v49  ;;  %v17176_v46 = vld [vmem:[#allocation244_spill] sm:$0xff] }
 0x804   : > { %9417 = vmatpush.msrb.mxu3 %v13694_v38  ;;  %v17180_v23 = vld [vmem:[#allocation248_spill] sm:$0xff] }
 0x805   : > { %v6263_v6 = vadd.f32 %v6262_v48, %v5913_v62  ;;  %5570 = vmatmul.f32.gmra.mxu0 %v17173_v2  ;;  %5975 = vmatmul.f32.gmra.mxu1 %v17174_v25  ;;  %v17184_v49 = vld [vmem:[#allocation252_spill] sm:$0xff] }
 0x806   : > { %9419 = vmatpush.msrb.mxu3 %v13774_v40  ;;  %9138 = vmatpush.msrb.mxu2 %v8058_v3  ;;  %v17181_v40 = vld [vmem:[#allocation246_spill] sm:$0xff] }
 0x807   : > { %v14037_v21 = vadd.f32 %v6662_v0, %v6263_v6  ;;  %6763 = vmatmul.f32.gmra.mxu3 %v17176_v46  ;;  %v17179_v0 = vld [vmem:[#allocation240_spill] sm:$0xff]  ;;  %v17182_v6 = vld [vmem:[#allocation255_spill] sm:$0xff] }
 0x808   : > { %6346 = vmatmul.f32.gmra.mxu2 %v17177_v27  ;;  %9421 = vmatpush.msrb.mxu3 %v13855_v37 }
 0x80a   : > { %v5451_v43 = vpop.f32.mrf.mxu0  ;;  %v5916_v13 = vpop.f32.mrf.mxu1  ;;  %9423 = vmatpush.msrb.mxu3 %v13936_v15  ;;  %v17183_v15 = vld [vmem:[#allocation245_spill] sm:$0xff] }
 0x80b   : > { %v5917_v60 = vadd.f32 %v5916_v13, %v5443_v1  ;;  %v6267_v34 = vpop.f32.mrf.mxu2  ;;  %v6668_v61 = vpop.f32.mrf.mxu3 }
 0x80c   : > { %9425 = vmatpush.msrb.mxu3 %v7485_v4  ;;  %v17185_v4 = vld [vmem:[#allocation250_spill] sm:$0xff] }
 0x80d   : > { %v6268_v38 = vadd.f32 %v6267_v34, %v5917_v60  ;;  %5578 = vmatmul.f32.gmra.mxu0 %v17178_v20  ;;  %5979 = vmatmul.f32.gmra.mxu1 %v17179_v0 }
 0x80f   : > { %v14046_v31 = vadd.f32 %v6668_v61, %v6268_v38  ;;  %6769 = vmatmul.f32.gmra.mxu3 %v17180_v23  ;;  %v17187_v38 = vld [vmem:[#allocation249_spill] sm:$0xff]  ;;  %v17188_v23 = vld [vmem:[#allocation256_spill] sm:$0xff] }
 0x810   : > { %6351 = vmatmul.f32.gmra.mxu2 %v17181_v40  ;;  %v17189_v40 = vld [vmem:[#allocation254_spill] sm:$0xff] }
 0x812   : > { %v5459_v3 = vpop.f32.mrf.mxu0  ;;  %v5920_v62 = vpop.f32.mrf.mxu1 }
 0x813   : > { %v5921_v37 = vadd.f32 %v5920_v62, %v5451_v43  ;;  %v6272_v1 = vpop.f32.mrf.mxu2  ;;  %v6674_v48 = vpop.f32.mrf.mxu3  ;;  %v17186_v43 = vld [vmem:[#allocation259_spill] sm:$0xff] }
 0x815   : > { %v6273_v26 = vadd.f32 %v6272_v1, %v5921_v37  ;;  %5586 = vmatmul.f32.gmra.mxu0 %v17182_v6  ;;  %5983 = vmatmul.f32.gmra.mxu1 %v17183_v15 }
 0x817   : > { %v14052_v2 = vadd.f32 %v6674_v48, %v6273_v26  ;;  %6775 = vmatmul.f32.gmra.mxu3 %v17184_v49  ;;  %v17191_v49 = vld [vmem:[#allocation253_spill] sm:$0xff] }
 0x818   : > { %6356 = vmatmul.f32.gmra.mxu2 %v17185_v4 }
 0x81a   : > { %v5467_v46 = vpop.f32.mrf.mxu0  ;;  %v5924_v27 = vpop.f32.mrf.mxu1 }
 0x81b   : > { %v5925_v13 = vadd.f32 %v5924_v27, %v5459_v3  ;;  %v6277_v60 = vpop.f32.mrf.mxu2  ;;  %v6680_v34 = vpop.f32.mrf.mxu3  ;;  %v17190_v3 = vld [vmem:[#allocation263_spill] sm:$0xff]  ;;  %v17193_v27 = vld [vmem:[#allocation260_spill] sm:$0xff] }
 0x81d   : > { %v6278_v61 = vadd.f32 %v6277_v60, %v5925_v13  ;;  %5594 = vmatmul.f32.gmra.mxu0 %v17186_v43  ;;  %5987 = vmatmul.f32.gmra.mxu1 %v17187_v38  ;;  %v17194_v13 = vld [vmem:[#allocation258_spill] sm:$0xff] }
 0x81f   : > { %v14058_v20 = vadd.f32 %v6680_v34, %v6278_v61  ;;  %6781 = vmatmul.f32.gmra.mxu3 %v17188_v23 }
 0x820   : > { %6361 = vmatmul.f32.gmra.mxu2 %v17189_v40 }
 0x822   : > { %v5475_v62 = vpop.f32.mrf.mxu0  ;;  %v5928_v37 = vpop.f32.mrf.mxu1 }
 0x823   : > { %v5929_v1 = vadd.f32 %v5928_v37, %v5467_v46  ;;  %v6282_v48 = vpop.f32.mrf.mxu2  ;;  %v6686_v26 = vpop.f32.mrf.mxu3  ;;  %v17195_v46 = vld [vmem:[#allocation268_spill] sm:$0xff]  ;;  %v17196_v37 = vld [vmem:[#allocation257_spill] sm:$0xff] }
 0x825   : > { %v6283_v6 = vadd.f32 %v6282_v48, %v5929_v1  ;;  %5602 = vmatmul.f32.gmra.mxu0 %v17190_v3  ;;  %5991 = vmatmul.f32.gmra.mxu1 %v17191_v49  ;;  %v17198_v48 = vld [vmem:[#allocation264_spill] sm:$0xff] }
 0x827   : > { %v14064_v4 = vadd.f32 %v6686_v26, %v6283_v6  ;;  %6787 = vmatmul.f32.gmra.mxu3 %v17193_v27  ;;  %v17199_v26 = vld [vmem:[#allocation262_spill] sm:$0xff] }
 0x828   : > { %6366 = vmatmul.f32.gmra.mxu2 %v17194_v13 }
 0x829   : > { %17192 = vst [vmem:[#allocation500_spill] sm:$0xff] %v14064_v4 }
 0x82a   : > { %v5483_v60 = vpop.f32.mrf.mxu0  ;;  %v5932_v34 = vpop.f32.mrf.mxu1 }
 0x82b   : > { %v5933_v61 = vadd.f32 %v5932_v34, %v5475_v62  ;;  %v6287_v43 = vpop.f32.mrf.mxu2  ;;  %v6692_v23 = vpop.f32.mrf.mxu3  ;;  %v17200_v62 = vld [vmem:[#allocation273_spill] sm:$0xff] }
 0x82c   : > { %v17201_v34 = vld [vmem:[#allocation261_spill] sm:$0xff] }
 0x82d   : > { %v6288_v40 = vadd.f32 %v6287_v43, %v5933_v61  ;;  %5610 = vmatmul.f32.gmra.mxu0 %v17195_v46  ;;  %5995 = vmatmul.f32.gmra.mxu1 %v17196_v37  ;;  %v17203_v43 = vld [vmem:[#allocation269_spill] sm:$0xff] }
 0x82f   : > { %v14070_v1 = vadd.f32 %v6692_v23, %v6288_v40  ;;  %6793 = vmatmul.f32.gmra.mxu3 %v17198_v48  ;;  %v17204_v23 = vld [vmem:[#allocation266_spill] sm:$0xff] }
 0x830   : > { %6371 = vmatmul.f32.gmra.mxu2 %v17199_v26 }
 0x831   : > { %17197 = vst [vmem:[#allocation504_spill] sm:$0xff] %v14070_v1 }
 0x832   : > { %v5491_v6 = vpop.f32.mrf.mxu0  ;;  %v5936_v3 = vpop.f32.mrf.mxu1 }
 0x833   : > { %v5937_v27 = vadd.f32 %v5936_v3, %v5483_v60  ;;  %v6292_v13 = vpop.f32.mrf.mxu2  ;;  %v6698_v4 = vpop.f32.mrf.mxu3  ;;  %v17205_v60 = vld [vmem:[#allocation278_spill] sm:$0xff]  ;;  %v17206_v3 = vld [vmem:[#allocation265_spill] sm:$0xff] }
 0x835   : > { %v6293_v49 = vadd.f32 %v6292_v13, %v5937_v27  ;;  %5618 = vmatmul.f32.gmra.mxu0 %v17200_v62  ;;  %5999 = vmatmul.f32.gmra.mxu1 %v17201_v34  ;;  %v17208_v13 = vld [vmem:[#allocation274_spill] sm:$0xff] }
 0x837   : > { %v14076_v61 = vadd.f32 %v6698_v4, %v6293_v49  ;;  %6799 = vmatmul.f32.gmra.mxu3 %v17203_v43  ;;  %v17209_v49 = vld [vmem:[#allocation271_spill] sm:$0xff] }
 0x838   : > { %6376 = vmatmul.f32.gmra.mxu2 %v17204_v23 }
 0x839   : > { %17202 = vst [vmem:[#allocation508_spill] sm:$0xff] %v14076_v61 }
 0x83a   : > { %v5499_v40 = vpop.f32.mrf.mxu0  ;;  %v5940_v46 = vpop.f32.mrf.mxu1 }
 0x83b   : > { %v5941_v48 = vadd.f32 %v5940_v46, %v5491_v6  ;;  %v6297_v26 = vpop.f32.mrf.mxu2  ;;  %v6704_v1 = vpop.f32.mrf.mxu3  ;;  %v17210_v6 = vld [vmem:[#allocation283_spill] sm:$0xff]  ;;  %v17211_v46 = vld [vmem:[#allocation270_spill] sm:$0xff] }
 0x83d   : > { %v6298_v37 = vadd.f32 %v6297_v26, %v5941_v48  ;;  %5626 = vmatmul.f32.gmra.mxu0 %v17205_v60  ;;  %6003 = vmatmul.f32.gmra.mxu1 %v17206_v3  ;;  %v17213_v26 = vld [vmem:[#allocation279_spill] sm:$0xff] }
 0x83f   : > { %v14082_v27 = vadd.f32 %v6704_v1, %v6298_v37  ;;  %6805 = vmatmul.f32.gmra.mxu3 %v17208_v13  ;;  %v17214_v37 = vld [vmem:[#allocation276_spill] sm:$0xff] }
 0x840   : > { %6381 = vmatmul.f32.gmra.mxu2 %v17209_v49 }
 0x841   : > { %17207 = vst [vmem:[#allocation535_spill] sm:$0xff] %v14082_v27 }
 0x842   : > { %v5507_v4 = vpop.f32.mrf.mxu0  ;;  %v5944_v62 = vpop.f32.mrf.mxu1 }
 0x843   : > { %v5945_v43 = vadd.f32 %v5944_v62, %v5499_v40  ;;  %v6302_v23 = vpop.f32.mrf.mxu2  ;;  %v6710_v61 = vpop.f32.mrf.mxu3  ;;  %v17215_v40 = vld [vmem:[#allocation288_spill] sm:$0xff]  ;;  %v17216_v62 = vld [vmem:[#allocation275_spill] sm:$0xff] }
 0x845   : > { %v6303_v34 = vadd.f32 %v6302_v23, %v5945_v43  ;;  %5634 = vmatmul.f32.gmra.mxu0 %v17210_v6  ;;  %6007 = vmatmul.f32.gmra.mxu1 %v17211_v46  ;;  %v17218_v23 = vld [vmem:[#allocation284_spill] sm:$0xff] }
 0x847   : > { %v14088_v48 = vadd.f32 %v6710_v61, %v6303_v34  ;;  %6811 = vmatmul.f32.gmra.mxu3 %v17213_v26  ;;  %v17219_v34 = vld [vmem:[#allocation281_spill] sm:$0xff] }
 0x848   : > { %6386 = vmatmul.f32.gmra.mxu2 %v17214_v37 }
 0x849   : > { %17212 = vst [vmem:[#allocation539_spill] sm:$0xff] %v14088_v48 }
 0x84a   : > { %v5515_v1 = vpop.f32.mrf.mxu0  ;;  %v5948_v60 = vpop.f32.mrf.mxu1 }
 0x84b   : > { %v5949_v13 = vadd.f32 %v5948_v60, %v5507_v4  ;;  %v6307_v49 = vpop.f32.mrf.mxu2  ;;  %v6716_v27 = vpop.f32.mrf.mxu3  ;;  %v17220_v4 = vld [vmem:[#allocation293_spill] sm:$0xff]  ;;  %v17221_v60 = vld [vmem:[#allocation280_spill] sm:$0xff] }
 0x84d   : > { %v6308_v3 = vadd.f32 %v6307_v49, %v5949_v13  ;;  %5642 = vmatmul.f32.gmra.mxu0 %v17215_v40  ;;  %6011 = vmatmul.f32.gmra.mxu1 %v17216_v62  ;;  %v17223_v49 = vld [vmem:[#allocation289_spill] sm:$0xff] }
 0x84f   : > { %v14094_v43 = vadd.f32 %v6716_v27, %v6308_v3  ;;  %6817 = vmatmul.f32.gmra.mxu3 %v17218_v23  ;;  %v17224_v3 = vld [vmem:[#allocation286_spill] sm:$0xff] }
 0x850   : > { %6391 = vmatmul.f32.gmra.mxu2 %v17219_v34 }
 0x851   : > { %17217 = vst [vmem:[#allocation543_spill] sm:$0xff] %v14094_v43 }
 0x852   : > { %v5523_v61 = vpop.f32.mrf.mxu0  ;;  %v5952_v6 = vpop.f32.mrf.mxu1 }
 0x853   : > { %v5953_v26 = vadd.f32 %v5952_v6, %v5515_v1  ;;  %v6312_v37 = vpop.f32.mrf.mxu2  ;;  %v6722_v48 = vpop.f32.mrf.mxu3  ;;  %v17225_v1 = vld [vmem:[#allocation297_spill] sm:$0xff] }
 0x854   : > { %v17226_v6 = vld [vmem:[#allocation285_spill] sm:$0xff] }
 0x855   : > { %v6313_v46 = vadd.f32 %v6312_v37, %v5953_v26  ;;  %5650 = vmatmul.f32.gmra.mxu0 %v17220_v4  ;;  %6015 = vmatmul.f32.gmra.mxu1 %v17221_v60  ;;  %v17228_v37 = vld [vmem:[#allocation294_spill] sm:$0xff] }
 0x857   : > { %v14100_v13 = vadd.f32 %v6722_v48, %v6313_v46  ;;  %6823 = vmatmul.f32.gmra.mxu3 %v17223_v49  ;;  %v17229_v46 = vld [vmem:[#allocation291_spill] sm:$0xff] }
 0x858   : > { %6396 = vmatmul.f32.gmra.mxu2 %v17224_v3 }
 0x859   : > { %17222 = vst [vmem:[#allocation547_spill] sm:$0xff] %v14100_v13 }
 0x85a   : > { %v5531_v27 = vpop.f32.mrf.mxu0  ;;  %v5956_v40 = vpop.f32.mrf.mxu1 }
 0x85b   : > { %v5957_v23 = vadd.f32 %v5956_v40, %v5523_v61  ;;  %v6317_v34 = vpop.f32.mrf.mxu2  ;;  %v6728_v43 = vpop.f32.mrf.mxu3  ;;  %v17230_v61 = vld [vmem:[#allocation301_spill] sm:$0xff]  ;;  %v17231_v40 = vld [vmem:[#allocation290_spill] sm:$0xff] }
 0x85d   : > { %v6318_v62 = vadd.f32 %v6317_v34, %v5957_v23  ;;  %5658 = vmatmul.f32.gmra.mxu0 %v17225_v1  ;;  %6019 = vmatmul.f32.gmra.mxu1 %v17226_v6  ;;  %v17233_v34 = vld [vmem:[#allocation298_spill] sm:$0xff] }
 0x85f   : > { %v14106_v26 = vadd.f32 %v6728_v43, %v6318_v62  ;;  %6829 = vmatmul.f32.gmra.mxu3 %v17228_v37  ;;  %v17234_v62 = vld [vmem:[#allocation296_spill] sm:$0xff] }
 0x860   : > { %6401 = vmatmul.f32.gmra.mxu2 %v17229_v46 }
 0x861   : > { %17227 = vst [vmem:[#allocation557_spill] sm:$0xff] %v14106_v26 }
 0x862   : > { %v5539_v48 = vpop.f32.mrf.mxu0  ;;  %v5960_v4 = vpop.f32.mrf.mxu1 }
 0x863   : > { %v5961_v49 = vadd.f32 %v5960_v4, %v5531_v27  ;;  %v6322_v3 = vpop.f32.mrf.mxu2  ;;  %v6734_v13 = vpop.f32.mrf.mxu3  ;;  %v17235_v27 = vld [vmem:[#allocation295_spill] sm:$0xff] }
 0x865   : > { %v6323_v60 = vadd.f32 %v6322_v3, %v5961_v49  ;;  %5666 = vmatmul.f32.gmra.mxu0 %v17230_v61  ;;  %6023 = vmatmul.f32.gmra.mxu1 %v17231_v40  ;;  %v17237_v49 = vld [vmem:[#allocation299_spill] sm:$0xff] }
 0x867   : > { %v14112_v23 = vadd.f32 %v6734_v13, %v6323_v60  ;;  %6835 = vmatmul.f32.gmra.mxu3 %v17233_v34  ;;  %v17238_v60 = vld [vmem:[#allocation305_spill] sm:$0xff] }
 0x868   : > { %6406 = vmatmul.f32.gmra.mxu2 %v17234_v62 }
 0x869   : > { %17232 = vst [vmem:[#allocation551_spill] sm:$0xff] %v14112_v23 }
 0x86a   : > { %v5547_v43 = vpop.f32.mrf.mxu0  ;;  %v5964_v1 = vpop.f32.mrf.mxu1 }
 0x86b   : > { %v5965_v37 = vadd.f32 %v5964_v1, %v5539_v48  ;;  %v6327_v46 = vpop.f32.mrf.mxu2  ;;  %v6740_v26 = vpop.f32.mrf.mxu3  ;;  %v17239_v1 = vld [vmem:[#allocation303_spill] sm:$0xff] }
 0x86d   : > { %v6328_v6 = vadd.f32 %v6327_v46, %v5965_v37  ;;  %6027 = vmatmul.f32.gmra.mxu1 %v17235_v27  ;;  %6904 = vmatmul.f32.vlgmr.msra.gmra.mxu0 %v16926_v32 }
 0x86f   : > { %v14118_v4 = vadd.f32 %v6740_v26, %v6328_v6  ;;  %8063 = vmatmul.f32.vlgmr.msra.gmra.mxu3 %v17237_v49  ;;  %v17240_v6 = vld [vmem:[#allocation309_spill] sm:$0xff] }
 0x870   : > { %7492 = vmatmul.f32.vlgmr.msra.gmra.mxu2 %v17238_v60 }
 0x871   : > { %17236 = vst [vmem:[#allocation555_spill] sm:$0xff] %v14118_v4 }
 0x872   : > { %v5555_v13 = vpop.f32.mrf.mxu0  ;;  %v5968_v3 = vpop.f32.mrf.mxu1 }
 0x873   : > { %v5969_v61 = vadd.f32 %v5968_v3, %v5547_v43  ;;  %v6332_v34 = vpop.f32.mrf.mxu2  ;;  %v6746_v62 = vpop.f32.mrf.mxu3  ;;  %v17241_v3 = vld [vmem:[#allocation307_spill] sm:$0xff] }
 0x875   : > { %v6333_v23 = vadd.f32 %v6332_v34, %v5969_v61  ;;  %6908 = vmatmul.f32.gmra.mxu0 %v16930_v5  ;;  %7201 = vmatmul.f32.vlgmr.msra.gmra.mxu1 %v16926_v32  ;;  %v17242_v32 = vld [vmem:[#allocation313_spill] sm:$0xff] }
 0x877   : > { %v14124_v48 = vadd.f32 %v6746_v62, %v6333_v23  ;;  %8067 = vmatmul.f32.gmra.mxu3 %v17239_v1 }
 0x878   : > { %7500 = vmatmul.f32.gmra.mxu2 %v17240_v6 }
 0x87a   : > { %v5563_v26 = vpop.f32.mrf.mxu0  ;;  %v5972_v37 = vpop.f32.mrf.mxu1 }
 0x87b   : > { %v5973_v46 = vadd.f32 %v5972_v37, %v5555_v13  ;;  %v6337_v60 = vpop.f32.mrf.mxu2  ;;  %v6752_v49 = vpop.f32.mrf.mxu3  ;;  %v17243_v37 = vld [vmem:[#allocation311_spill] sm:$0xff] }
 0x87d   : > { %v6338_v4 = vadd.f32 %v6337_v60, %v5973_v46  ;;  %6912 = vmatmul.f32.gmra.mxu0 %v16934_v29  ;;  %7205 = vmatmul.f32.gmra.mxu1 %v16930_v5  ;;  %v17244_v5 = vld [vmem:[#allocation317_spill] sm:$0xff] }
 0x87f   : > { %v14130_v43 = vadd.f32 %v6752_v49, %v6338_v4  ;;  %8071 = vmatmul.f32.gmra.mxu3 %v17241_v3 }
 0x880   : > { %7508 = vmatmul.f32.gmra.mxu2 %v17242_v32 }
 0x882   : > { %v5571_v23 = vpop.f32.mrf.mxu0  ;;  %v5976_v61 = vpop.f32.mrf.mxu1 }
 0x883   : > { %v5977_v34 = vadd.f32 %v5976_v61, %v5563_v26  ;;  %v6342_v62 = vpop.f32.mrf.mxu2  ;;  %v6758_v6 = vpop.f32.mrf.mxu3  ;;  %v17245_v61 = vld [vmem:[#allocation315_spill] sm:$0xff] }
 0x885   : > { %v6343_v1 = vadd.f32 %v6342_v62, %v5977_v34  ;;  %6916 = vmatmul.f32.gmra.mxu0 %v16939_v8  ;;  %7209 = vmatmul.f32.gmra.mxu1 %v16934_v29  ;;  %v17246_v29 = vld [vmem:[#allocation321_spill] sm:$0xff] }
 0x887   : > { %v14136_v13 = vadd.f32 %v6758_v6, %v6343_v1  ;;  %8075 = vmatmul.f32.gmra.mxu3 %v17243_v37 }
 0x888   : > { %7516 = vmatmul.f32.gmra.mxu2 %v17244_v5 }
 0x88a   : > { %v5579_v4 = vpop.f32.mrf.mxu0  ;;  %v5980_v49 = vpop.f32.mrf.mxu1 }
 0x88b   : > { %v5981_v46 = vadd.f32 %v5980_v49, %v5571_v23  ;;  %v6347_v60 = vpop.f32.mrf.mxu2  ;;  %v6764_v32 = vpop.f32.mrf.mxu3  ;;  %v17247_v49 = vld [vmem:[#allocation319_spill] sm:$0xff] }
 0x88d   : > { %v6348_v3 = vadd.f32 %v6347_v60, %v5981_v46  ;;  %6920 = vmatmul.f32.gmra.mxu0 %v16944_v30  ;;  %7213 = vmatmul.f32.gmra.mxu1 %v16939_v8  ;;  %v17248_v8 = vld [vmem:[#allocation325_spill] sm:$0xff] }
 0x88f   : > { %v14142_v26 = vadd.f32 %v6764_v32, %v6348_v3  ;;  %8079 = vmatmul.f32.gmra.mxu3 %v17245_v61 }
 0x890   : > { %7524 = vmatmul.f32.gmra.mxu2 %v17246_v29 }
 0x892   : > { %v5587_v1 = vpop.f32.mrf.mxu0  ;;  %v5984_v34 = vpop.f32.mrf.mxu1 }
 0x893   : > { %v5985_v62 = vadd.f32 %v5984_v34, %v5579_v4  ;;  %v6352_v6 = vpop.f32.mrf.mxu2  ;;  %v6770_v5 = vpop.f32.mrf.mxu3  ;;  %v17249_v34 = vld [vmem:[#allocation323_spill] sm:$0xff] }
 0x895   : > { %v6353_v37 = vadd.f32 %v6352_v6, %v5985_v62  ;;  %6924 = vmatmul.f32.gmra.mxu0 %v16948_v35  ;;  %7217 = vmatmul.f32.gmra.mxu1 %v16944_v30  ;;  %v17250_v30 = vld [vmem:[#allocation329_spill] sm:$0xff] }
 0x897   : > { %v14148_v23 = vadd.f32 %v6770_v5, %v6353_v37  ;;  %8083 = vmatmul.f32.gmra.mxu3 %v17247_v49 }
 0x898   : > { %7532 = vmatmul.f32.gmra.mxu2 %v17248_v8 }
 0x89a   : > { %v5595_v3 = vpop.f32.mrf.mxu0  ;;  %v5988_v46 = vpop.f32.mrf.mxu1 }
 0x89b   : > { %v5989_v60 = vadd.f32 %v5988_v46, %v5587_v1  ;;  %v6357_v32 = vpop.f32.mrf.mxu2  ;;  %v6776_v29 = vpop.f32.mrf.mxu3  ;;  %v17251_v46 = vld [vmem:[#allocation327_spill] sm:$0xff] }
 0x89d   : > { %v6358_v61 = vadd.f32 %v6357_v32, %v5989_v60  ;;  %6928 = vmatmul.f32.gmra.mxu0 %v16952_v12  ;;  %7221 = vmatmul.f32.gmra.mxu1 %v16948_v35  ;;  %v17252_v35 = vld [vmem:[#allocation333_spill] sm:$0xff] }
 0x89f   : > { %v14154_v4 = vadd.f32 %v6776_v29, %v6358_v61  ;;  %8087 = vmatmul.f32.gmra.mxu3 %v17249_v34 }
 0x8a0   : > { %7540 = vmatmul.f32.gmra.mxu2 %v17250_v30 }
 0x8a2   : > { %v5603_v37 = vpop.f32.mrf.mxu0  ;;  %v5992_v62 = vpop.f32.mrf.mxu1 }
 0x8a3   : > { %v5993_v6 = vadd.f32 %v5992_v62, %v5595_v3  ;;  %v6362_v5 = vpop.f32.mrf.mxu2  ;;  %v6782_v8 = vpop.f32.mrf.mxu3  ;;  %v17253_v62 = vld [vmem:[#allocation331_spill] sm:$0xff] }
 0x8a5   : > { %v6363_v49 = vadd.f32 %v6362_v5, %v5993_v6  ;;  %6932 = vmatmul.f32.gmra.mxu0 %v16957_v45  ;;  %7225 = vmatmul.f32.gmra.mxu1 %v16952_v12  ;;  %v17254_v12 = vld [vmem:[#allocation337_spill] sm:$0xff] }
 0x8a7   : > { %v14160_v1 = vadd.f32 %v6782_v8, %v6363_v49  ;;  %8091 = vmatmul.f32.gmra.mxu3 %v17251_v46 }
 0x8a8   : > { %7548 = vmatmul.f32.gmra.mxu2 %v17252_v35 }
 0x8aa   : > { %v5611_v61 = vpop.f32.mrf.mxu0  ;;  %v5996_v60 = vpop.f32.mrf.mxu1 }
 0x8ab   : > { %v5997_v32 = vadd.f32 %v5996_v60, %v5603_v37  ;;  %v6367_v29 = vpop.f32.mrf.mxu2  ;;  %v6788_v30 = vpop.f32.mrf.mxu3  ;;  %v17255_v60 = vld [vmem:[#allocation335_spill] sm:$0xff] }
 0x8ad   : > { %v6368_v34 = vadd.f32 %v6367_v29, %v5997_v32  ;;  %6936 = vmatmul.f32.gmra.mxu0 %v16962_v33  ;;  %7229 = vmatmul.f32.gmra.mxu1 %v16957_v45  ;;  %v17256_v45 = vld [vmem:[#allocation341_spill] sm:$0xff] }
 0x8af   : > { %v14166_v3 = vadd.f32 %v6788_v30, %v6368_v34  ;;  %8095 = vmatmul.f32.gmra.mxu3 %v17253_v62 }
 0x8b0   : > { %7556 = vmatmul.f32.gmra.mxu2 %v17254_v12 }
 0x8b2   : > { %v5619_v49 = vpop.f32.mrf.mxu0  ;;  %v6000_v6 = vpop.f32.mrf.mxu1 }
 0x8b3   : > { %v6001_v5 = vadd.f32 %v6000_v6, %v5611_v61  ;;  %v6372_v8 = vpop.f32.mrf.mxu2  ;;  %v6794_v35 = vpop.f32.mrf.mxu3  ;;  %v17257_v6 = vld [vmem:[#allocation339_spill] sm:$0xff] }
 0x8b5   : > { %v6373_v46 = vadd.f32 %v6372_v8, %v6001_v5  ;;  %6940 = vmatmul.f32.gmra.mxu0 %v16967_v56  ;;  %7233 = vmatmul.f32.gmra.mxu1 %v16962_v33  ;;  %v17258_v33 = vld [vmem:[#allocation345_spill] sm:$0xff] }
 0x8b7   : > { %v14172_v37 = vadd.f32 %v6794_v35, %v6373_v46  ;;  %8099 = vmatmul.f32.gmra.mxu3 %v17255_v60 }
 0x8b8   : > { %7564 = vmatmul.f32.gmra.mxu2 %v17256_v45 }
 0x8ba   : > { %v5627_v34 = vpop.f32.mrf.mxu0  ;;  %v6004_v32 = vpop.f32.mrf.mxu1 }
 0x8bb   : > { %v6005_v29 = vadd.f32 %v6004_v32, %v5619_v49  ;;  %v6377_v30 = vpop.f32.mrf.mxu2  ;;  %v6800_v12 = vpop.f32.mrf.mxu3  ;;  %v17259_v32 = vld [vmem:[#allocation343_spill] sm:$0xff] }
 0x8bd   : > { %v6378_v62 = vadd.f32 %v6377_v30, %v6005_v29  ;;  %6944 = vmatmul.f32.gmra.mxu0 %v16972_v50  ;;  %7237 = vmatmul.f32.gmra.mxu1 %v16967_v56  ;;  %v17260_v56 = vld [vmem:[#allocation349_spill] sm:$0xff] }
 0x8bf   : > { %v14178_v61 = vadd.f32 %v6800_v12, %v6378_v62  ;;  %8103 = vmatmul.f32.gmra.mxu3 %v17257_v6 }
 0x8c0   : > { %7572 = vmatmul.f32.gmra.mxu2 %v17258_v33 }
 0x8c2   : > { %v5635_v46 = vpop.f32.mrf.mxu0  ;;  %v6008_v5 = vpop.f32.mrf.mxu1 }
 0x8c3   : > { %v6009_v8 = vadd.f32 %v6008_v5, %v5627_v34  ;;  %v6382_v35 = vpop.f32.mrf.mxu2  ;;  %v6806_v45 = vpop.f32.mrf.mxu3  ;;  %v17261_v5 = vld [vmem:[#allocation347_spill] sm:$0xff] }
 0x8c5   : > { %v6383_v60 = vadd.f32 %v6382_v35, %v6009_v8  ;;  %6948 = vmatmul.f32.gmra.mxu0 %v16977_v59  ;;  %7241 = vmatmul.f32.gmra.mxu1 %v16972_v50  ;;  %v17262_v50 = vld [vmem:[#allocation353_spill] sm:$0xff] }
 0x8c7   : > { %v14184_v49 = vadd.f32 %v6806_v45, %v6383_v60  ;;  %8107 = vmatmul.f32.gmra.mxu3 %v17259_v32 }
 0x8c8   : > { %7580 = vmatmul.f32.gmra.mxu2 %v17260_v56 }
 0x8ca   : > { %v5643_v62 = vpop.f32.mrf.mxu0  ;;  %v6012_v29 = vpop.f32.mrf.mxu1 }
 0x8cb   : > { %v6013_v30 = vadd.f32 %v6012_v29, %v5635_v46  ;;  %v6387_v12 = vpop.f32.mrf.mxu2  ;;  %v6812_v33 = vpop.f32.mrf.mxu3  ;;  %v17263_v29 = vld [vmem:[#allocation351_spill] sm:$0xff] }
 0x8cd   : > { %v6388_v6 = vadd.f32 %v6387_v12, %v6013_v30  ;;  %6952 = vmatmul.f32.gmra.mxu0 %v16982_v10  ;;  %7245 = vmatmul.f32.gmra.mxu1 %v16977_v59  ;;  %v17264_v59 = vld [vmem:[#allocation357_spill] sm:$0xff] }
 0x8cf   : > { %v14190_v34 = vadd.f32 %v6812_v33, %v6388_v6  ;;  %8111 = vmatmul.f32.gmra.mxu3 %v17261_v5 }
 0x8d0   : > { %7588 = vmatmul.f32.gmra.mxu2 %v17262_v50 }
 0x8d2   : > { %v5651_v60 = vpop.f32.mrf.mxu0  ;;  %v6016_v8 = vpop.f32.mrf.mxu1 }
 0x8d3   : > { %v6017_v35 = vadd.f32 %v6016_v8, %v5643_v62  ;;  %v6392_v45 = vpop.f32.mrf.mxu2  ;;  %v6818_v56 = vpop.f32.mrf.mxu3  ;;  %v17265_v8 = vld [vmem:[#allocation355_spill] sm:$0xff] }
 0x8d5   : > { %v6393_v32 = vadd.f32 %v6392_v45, %v6017_v35  ;;  %6956 = vmatmul.f32.gmra.mxu0 %v16987_v7  ;;  %7249 = vmatmul.f32.gmra.mxu1 %v16982_v10  ;;  %v17266_v10 = vld [vmem:[#allocation361_spill] sm:$0xff] }
 0x8d7   : > { %v14196_v46 = vadd.f32 %v6818_v56, %v6393_v32  ;;  %8115 = vmatmul.f32.gmra.mxu3 %v17263_v29 }
 0x8d8   : > { %7596 = vmatmul.f32.gmra.mxu2 %v17264_v59 }
 0x8da   : > { %v5659_v6 = vpop.f32.mrf.mxu0  ;;  %v6020_v30 = vpop.f32.mrf.mxu1 }
 0x8db   : > { %v6021_v12 = vadd.f32 %v6020_v30, %v5651_v60  ;;  %v6397_v33 = vpop.f32.mrf.mxu2  ;;  %v6824_v50 = vpop.f32.mrf.mxu3  ;;  %v17267_v30 = vld [vmem:[#allocation359_spill] sm:$0xff] }
 0x8dd   : > { %v6398_v5 = vadd.f32 %v6397_v33, %v6021_v12  ;;  %6960 = vmatmul.f32.gmra.mxu0 %v16992_v28  ;;  %7253 = vmatmul.f32.gmra.mxu1 %v16987_v7  ;;  %v17268_v7 = vld [vmem:[#allocation365_spill] sm:$0xff] }
 0x8df   : > { %v14202_v62 = vadd.f32 %v6824_v50, %v6398_v5  ;;  %8119 = vmatmul.f32.gmra.mxu3 %v17265_v8 }
 0x8e0   : > { %7604 = vmatmul.f32.gmra.mxu2 %v17266_v10 }
 0x8e2   : > { %v5667_v32 = vpop.f32.mrf.mxu0  ;;  %v6024_v35 = vpop.f32.mrf.mxu1 }
 0x8e3   : > { %v6025_v45 = vadd.f32 %v6024_v35, %v5659_v6  ;;  %v6402_v56 = vpop.f32.mrf.mxu2  ;;  %v6830_v59 = vpop.f32.mrf.mxu3  ;;  %v17269_v35 = vld [vmem:[#allocation363_spill] sm:$0xff] }
 0x8e5   : > { %v6403_v29 = vadd.f32 %v6402_v56, %v6025_v45  ;;  %6964 = vmatmul.f32.gmra.mxu0 %v16997_v19  ;;  %7257 = vmatmul.f32.gmra.mxu1 %v16992_v28  ;;  %v17270_v28 = vld [vmem:[#allocation369_spill] sm:$0xff] }
 0x8e7   : > { %v14208_v60 = vadd.f32 %v6830_v59, %v6403_v29  ;;  %8123 = vmatmul.f32.gmra.mxu3 %v17267_v30 }
 0x8e8   : > { %7612 = vmatmul.f32.gmra.mxu2 %v17268_v7 }
 0x8ea   : > { %v6028_v5 = vpop.f32.mrf.mxu1  ;;  %v6905_v12 = vpop.f32.mrf.mxu0 }
 0x8eb   : > { %v6029_v33 = vadd.f32 %v6028_v5, %v5667_v32  ;;  %v6407_v50 = vpop.f32.mrf.mxu2  ;;  %v6836_v10 = vpop.f32.mrf.mxu3  ;;  %v6906_v29 = vadd.f32 %v6905_v12, %v13761_v53 }
 0x8ed   : > { %v6408_v8 = vadd.f32 %v6407_v50, %v6029_v33  ;;  %6968 = vmatmul.f32.gmra.mxu0 %v17001_v39  ;;  %7261 = vmatmul.f32.gmra.mxu1 %v16997_v19  ;;  %v17271_v19 = vld [vmem:[#allocation367_spill] sm:$0xff] }
 0x8ef   : > { %v14214_v6 = vadd.f32 %v6836_v10, %v6408_v8  ;;  %8127 = vmatmul.f32.gmra.mxu3 %v17269_v35  ;;  %v17272_v8 = vld [vmem:[#allocation373_spill] sm:$0xff] }
 0x8f0   : > { %7620 = vmatmul.f32.gmra.mxu2 %v17270_v28 }
 0x8f2   : > { %v6909_v45 = vpop.f32.mrf.mxu0  ;;  %v7202_v56 = vpop.f32.mrf.mxu1 }
 0x8f3   : > { %v7203_v59 = vadd.f32 %v7202_v56, %v6906_v29  ;;  %v7493_v7 = vpop.f32.mrf.mxu2  ;;  %v8064_v32 = vpop.f32.mrf.mxu3  ;;  %v6910_v50 = vadd.f32 %v6909_v45, %v13767_v44 }
 0x8f5   : > { %v7494_v5 = vadd.f32 %v7493_v7, %v7203_v59  ;;  %6972 = vmatmul.f32.gmra.mxu0 %v17005_v51  ;;  %7265 = vmatmul.f32.gmra.mxu1 %v17001_v39  ;;  %v17273_v39 = vld [vmem:[#allocation371_spill] sm:$0xff]  ;;  %v17274_v7 = vld [vmem:[#allocation377_spill] sm:$0xff] }
 0x8f7   : > { %v14221_v33 = vadd.f32 %v8064_v32, %v7494_v5  ;;  %8131 = vmatmul.f32.gmra.mxu3 %v17271_v19 }
 0x8f8   : > { %7628 = vmatmul.f32.gmra.mxu2 %v17272_v8 }
 0x8fa   : > { %v6913_v10 = vpop.f32.mrf.mxu0  ;;  %v7206_v53 = vpop.f32.mrf.mxu1 }
 0x8fb   : > { %v7207_v12 = vadd.f32 %v7206_v53, %v6910_v50  ;;  %v7501_v28 = vpop.f32.mrf.mxu2  ;;  %v8068_v29 = vpop.f32.mrf.mxu3  ;;  %v6914_v32 = vadd.f32 %v6913_v10, %v13785_v63 }
 0x8fd   : > { %v7502_v56 = vadd.f32 %v7501_v28, %v7207_v12  ;;  %6976 = vmatmul.f32.gmra.mxu0 %v17009_v42  ;;  %7269 = vmatmul.f32.gmra.mxu1 %v17005_v51  ;;  %v17275_v51 = vld [vmem:[#allocation375_spill] sm:$0xff]  ;;  %v17276_v28 = vld [vmem:[#allocation381_spill] sm:$0xff] }
 0x8ff   : > { %v14228_v59 = vadd.f32 %v8068_v29, %v7502_v56  ;;  %8135 = vmatmul.f32.gmra.mxu3 %v17273_v39 }
 0x900   : > { %7636 = vmatmul.f32.gmra.mxu2 %v17274_v7 }
 0x902   : > { %v6917_v5 = vpop.f32.mrf.mxu0  ;;  %v7210_v44 = vpop.f32.mrf.mxu1 }
 0x903   : > { %v7211_v45 = vadd.f32 %v7210_v44, %v6914_v32  ;;  %v7509_v8 = vpop.f32.mrf.mxu2  ;;  %v8072_v50 = vpop.f32.mrf.mxu3  ;;  %v6918_v29 = vadd.f32 %v6917_v5, %v13794_v22 }
 0x905   : > { %v7510_v53 = vadd.f32 %v7509_v8, %v7211_v45  ;;  %6980 = vmatmul.f32.gmra.mxu0 %v17013_v17  ;;  %7273 = vmatmul.f32.gmra.mxu1 %v17009_v42  ;;  %v17277_v42 = vld [vmem:[#allocation379_spill] sm:$0xff]  ;;  %v17278_v8 = vld [vmem:[#allocation385_spill] sm:$0xff] }
 0x907   : > { %v14235_v12 = vadd.f32 %v8072_v50, %v7510_v53  ;;  %8139 = vmatmul.f32.gmra.mxu3 %v17275_v51 }
 0x908   : > { %7644 = vmatmul.f32.gmra.mxu2 %v17276_v28 }
 0x90a   : > { %v6921_v56 = vpop.f32.mrf.mxu0  ;;  %v7214_v63 = vpop.f32.mrf.mxu1 }
 0x90b   : > { %v7215_v10 = vadd.f32 %v7214_v63, %v6918_v29  ;;  %v7517_v7 = vpop.f32.mrf.mxu2  ;;  %v8076_v32 = vpop.f32.mrf.mxu3  ;;  %v6922_v50 = vadd.f32 %v6921_v56, %v13800_v9 }
 0x90d   : > { %v7518_v44 = vadd.f32 %v7517_v7, %v7215_v10  ;;  %6984 = vmatmul.f32.gmra.mxu0 %v17017_v16  ;;  %7277 = vmatmul.f32.gmra.mxu1 %v17013_v17  ;;  %v17279_v17 = vld [vmem:[#allocation383_spill] sm:$0xff]  ;;  %v17280_v7 = vld [vmem:[#allocation389_spill] sm:$0xff] }
 0x90f   : > { %v14242_v45 = vadd.f32 %v8076_v32, %v7518_v44  ;;  %8143 = vmatmul.f32.gmra.mxu3 %v17277_v42 }
 0x910   : > { %7652 = vmatmul.f32.gmra.mxu2 %v17278_v8 }
 0x912   : > { %v6925_v53 = vpop.f32.mrf.mxu0  ;;  %v7218_v22 = vpop.f32.mrf.mxu1 }
 0x913   : > { %v7219_v5 = vadd.f32 %v7218_v22, %v6922_v50  ;;  %v7525_v28 = vpop.f32.mrf.mxu2  ;;  %v8080_v29 = vpop.f32.mrf.mxu3  ;;  %v6926_v32 = vadd.f32 %v6925_v53, %v13806_v57 }
 0x915   : > { %v7526_v63 = vadd.f32 %v7525_v28, %v7219_v5  ;;  %6988 = vmatmul.f32.gmra.mxu0 %v17021_v47  ;;  %7281 = vmatmul.f32.gmra.mxu1 %v17017_v16  ;;  %v17281_v16 = vld [vmem:[#allocation387_spill] sm:$0xff]  ;;  %v17282_v28 = vld [vmem:[#allocation393_spill] sm:$0xff] }
 0x917   : > { %v14249_v10 = vadd.f32 %v8080_v29, %v7526_v63  ;;  %8147 = vmatmul.f32.gmra.mxu3 %v17279_v17 }
 0x918   : > { %7660 = vmatmul.f32.gmra.mxu2 %v17280_v7 }
 0x91a   : > { %v6929_v44 = vpop.f32.mrf.mxu0  ;;  %v7222_v9 = vpop.f32.mrf.mxu1 }
 0x91b   : > { %v7223_v56 = vadd.f32 %v7222_v9, %v6926_v32  ;;  %v7533_v8 = vpop.f32.mrf.mxu2  ;;  %v8084_v50 = vpop.f32.mrf.mxu3  ;;  %v6930_v29 = vadd.f32 %v6929_v44, %v13812_v55 }
 0x91d   : > { %v7534_v22 = vadd.f32 %v7533_v8, %v7223_v56  ;;  %6992 = vmatmul.f32.gmra.mxu0 %v17025_v36  ;;  %7285 = vmatmul.f32.gmra.mxu1 %v17021_v47  ;;  %v17283_v47 = vld [vmem:[#allocation391_spill] sm:$0xff]  ;;  %v17284_v8 = vld [vmem:[#allocation397_spill] sm:$0xff] }
 0x91f   : > { %v14256_v5 = vadd.f32 %v8084_v50, %v7534_v22  ;;  %8151 = vmatmul.f32.gmra.mxu3 %v17281_v16 }
 0x920   : > { %7668 = vmatmul.f32.gmra.mxu2 %v17282_v28 }
 0x922   : > { %v6933_v63 = vpop.f32.mrf.mxu0  ;;  %v7226_v57 = vpop.f32.mrf.mxu1 }
 0x923   : > { %v7227_v53 = vadd.f32 %v7226_v57, %v6930_v29  ;;  %v7541_v7 = vpop.f32.mrf.mxu2  ;;  %v8088_v32 = vpop.f32.mrf.mxu3  ;;  %v6934_v50 = vadd.f32 %v6933_v63, %v13818_v18 }
 0x925   : > { %v7542_v9 = vadd.f32 %v7541_v7, %v7227_v53  ;;  %6996 = vmatmul.f32.gmra.mxu0 %v17029_v11  ;;  %7289 = vmatmul.f32.gmra.mxu1 %v17025_v36  ;;  %v17285_v36 = vld [vmem:[#allocation395_spill] sm:$0xff] }
 0x926   : > { %v17286_v7 = vld [vmem:[#allocation107_spill] sm:$0xff] }
 0x927   : > { %v14263_v56 = vadd.f32 %v8088_v32, %v7542_v9  ;;  %8155 = vmatmul.f32.gmra.mxu3 %v17283_v47 }
 0x928   : > { %7676 = vmatmul.f32.gmra.mxu2 %v17284_v8 }
 0x92a   : > { %v6937_v22 = vpop.f32.mrf.mxu0  ;;  %v7230_v55 = vpop.f32.mrf.mxu1 }
 0x92b   : > { %v7231_v44 = vadd.f32 %v7230_v55, %v6934_v50  ;;  %v7549_v28 = vpop.f32.mrf.mxu2  ;;  %v8092_v29 = vpop.f32.mrf.mxu3  ;;  %v6938_v32 = vadd.f32 %v6937_v22, %v13824_v52 }
 0x92d   : > { %v7550_v57 = vadd.f32 %v7549_v28, %v7231_v44  ;;  %7000 = vmatmul.f32.gmra.mxu0 %v17033_v58  ;;  %7293 = vmatmul.f32.gmra.mxu1 %v17029_v11  ;;  %v17288_v11 = vld [vmem:[#allocation399_spill] sm:$0xff]  ;;  %v17289_v28 = vld [vmem:[#allocation112_spill] sm:$0xff] }
 0x92f   : > { %v14270_v53 = vadd.f32 %v8092_v29, %v7550_v57  ;;  %8159 = vmatmul.f32.gmra.mxu3 %v17285_v36  ;;  %v17290_v36 = vld [vmem:[#allocation105_spill] sm:$0xff] }
 0x930   : > { %7684 = vmatmul.f32.gmra.mxu2 %v17286_v7 }
 0x932   : > { %v6941_v9 = vpop.f32.mrf.mxu0  ;;  %v7234_v18 = vpop.f32.mrf.mxu1 }
 0x933   : > { %v7235_v63 = vadd.f32 %v7234_v18, %v6938_v32  ;;  %v7557_v8 = vpop.f32.mrf.mxu2  ;;  %v8096_v50 = vpop.f32.mrf.mxu3  ;;  %v6942_v29 = vadd.f32 %v6941_v9, %v13830_v14 }
 0x935   : > { %v7558_v55 = vadd.f32 %v7557_v8, %v7235_v63  ;;  %7004 = vmatmul.f32.gmra.mxu0 %v17037_v54  ;;  %7297 = vmatmul.f32.gmra.mxu1 %v17033_v58  ;;  %v17292_v58 = vld [vmem:[#allocation403_spill] sm:$0xff]  ;;  %v17293_v8 = vld [vmem:[#allocation117_spill] sm:$0xff] }
 0x937   : > { %v14277_v44 = vadd.f32 %v8096_v50, %v7558_v55  ;;  %8163 = vmatmul.f32.gmra.mxu3 %v17288_v11  ;;  %v17294_v50 = vld [vmem:[#allocation400_spill] sm:$0xff] }
 0x938   : > { %7692 = vmatmul.f32.gmra.mxu2 %v17289_v28 }
 0x939   : > { %17287 = vst [vmem:[#allocation561_spill] sm:$0xff] %v14277_v44  ;;  %v17295_v44 = vld [vmem:[#allocation110_spill] sm:$0xff] }
 0x93a   : > { %v6945_v57 = vpop.f32.mrf.mxu0  ;;  %v7238_v52 = vpop.f32.mrf.mxu1 }
 0x93b   : > { %v7239_v22 = vadd.f32 %v7238_v52, %v6942_v29  ;;  %v7565_v7 = vpop.f32.mrf.mxu2  ;;  %v8100_v32 = vpop.f32.mrf.mxu3  ;;  %v6946_v55 = vadd.f32 %v6945_v57, %v17294_v50 }
 0x93d   : > { %v7566_v18 = vadd.f32 %v7565_v7, %v7239_v22  ;;  %7008 = vmatmul.f32.gmra.mxu0 %v17290_v36  ;;  %7301 = vmatmul.f32.gmra.mxu1 %v17037_v54  ;;  %v17297_v54 = vld [vmem:[#allocation407_spill] sm:$0xff]  ;;  %v17298_v7 = vld [vmem:[#allocation122_spill] sm:$0xff] }
 0x93f   : > { %v14284_v63 = vadd.f32 %v8100_v32, %v7566_v18  ;;  %8167 = vmatmul.f32.gmra.mxu3 %v17292_v58  ;;  %v17299_v32 = vld [vmem:[#allocation404_spill] sm:$0xff] }
 0x940   : > { %7700 = vmatmul.f32.gmra.mxu2 %v17293_v8 }
 0x941   : > { %17291 = vst [vmem:[#allocation566_spill] sm:$0xff] %v14284_v63  ;;  %v17300_v63 = vld [vmem:[#allocation115_spill] sm:$0xff] }
 0x942   : > { %v6949_v28 = vpop.f32.mrf.mxu0  ;;  %v7242_v14 = vpop.f32.mrf.mxu1 }
 0x943   : > { %v7243_v9 = vadd.f32 %v7242_v14, %v6946_v55  ;;  %v7573_v11 = vpop.f32.mrf.mxu2  ;;  %v8104_v29 = vpop.f32.mrf.mxu3  ;;  %v6950_v18 = vadd.f32 %v6949_v28, %v17299_v32 }
 0x945   : > { %v7574_v52 = vadd.f32 %v7573_v11, %v7243_v9  ;;  %7012 = vmatmul.f32.gmra.mxu0 %v17295_v44  ;;  %7305 = vmatmul.f32.gmra.mxu1 %v17290_v36  ;;  %v17302_v36 = vld [vmem:[#allocation411_spill] sm:$0xff] }
 0x946   : > { %v17303_v9 = vld [vmem:[#allocation127_spill] sm:$0xff] }
 0x947   : > { %v14291_v22 = vadd.f32 %v8104_v29, %v7574_v52  ;;  %8171 = vmatmul.f32.gmra.mxu3 %v17297_v54  ;;  %v17304_v29 = vld [vmem:[#allocation408_spill] sm:$0xff] }
 0x948   : > { %7708 = vmatmul.f32.gmra.mxu2 %v17298_v7 }
 0x949   : > { %17296 = vst [vmem:[#allocation7_spill] sm:$0xff] %v14291_v22  ;;  %v17305_v22 = vld [vmem:[#allocation120_spill] sm:$0xff] }
 0x94a   : > { %v6953_v8 = vpop.f32.mrf.mxu0  ;;  %v7246_v57 = vpop.f32.mrf.mxu1 }
 0x94b   : > { %v7247_v50 = vadd.f32 %v7246_v57, %v6950_v18  ;;  %v7581_v58 = vpop.f32.mrf.mxu2  ;;  %v8108_v55 = vpop.f32.mrf.mxu3  ;;  %v6954_v52 = vadd.f32 %v6953_v8, %v17304_v29 }
 0x94d   : > { %v7582_v14 = vadd.f32 %v7581_v58, %v7247_v50  ;;  %7016 = vmatmul.f32.gmra.mxu0 %v17300_v63  ;;  %7309 = vmatmul.f32.gmra.mxu1 %v17295_v44  ;;  %v17307_v44 = vld [vmem:[#allocation415_spill] sm:$0xff]  ;;  %v17308_v50 = vld [vmem:[#allocation132_spill] sm:$0xff] }
 0x94f   : > { %v14298_v11 = vadd.f32 %v8108_v55, %v7582_v14  ;;  %8175 = vmatmul.f32.gmra.mxu3 %v17302_v36  ;;  %v17309_v55 = vld [vmem:[#allocation412_spill] sm:$0xff] }
 0x950   : > { %7716 = vmatmul.f32.gmra.mxu2 %v17303_v9 }
 0x951   : > { %17301 = vst [vmem:[#allocation4_spill] sm:$0xff] %v14298_v11  ;;  %v17310_v11 = vld [vmem:[#allocation125_spill] sm:$0xff] }
 0x952   : > { %v6957_v7 = vpop.f32.mrf.mxu0  ;;  %v7250_v28 = vpop.f32.mrf.mxu1 }
 0x953   : > { %v7251_v32 = vadd.f32 %v7250_v28, %v6954_v52  ;;  %v7589_v54 = vpop.f32.mrf.mxu2  ;;  %v8112_v18 = vpop.f32.mrf.mxu3  ;;  %v6958_v14 = vadd.f32 %v6957_v7, %v17309_v55 }
 0x955   : > { %v7590_v57 = vadd.f32 %v7589_v54, %v7251_v32  ;;  %7020 = vmatmul.f32.gmra.mxu0 %v17305_v22  ;;  %7313 = vmatmul.f32.gmra.mxu1 %v17300_v63  ;;  %v17312_v63 = vld [vmem:[#allocation419_spill] sm:$0xff]  ;;  %v17313_v32 = vld [vmem:[#allocation137_spill] sm:$0xff] }
 0x957   : > { %v14305_v58 = vadd.f32 %v8112_v18, %v7590_v57  ;;  %8179 = vmatmul.f32.gmra.mxu3 %v17307_v44  ;;  %v17314_v18 = vld [vmem:[#allocation416_spill] sm:$0xff] }
 0x958   : > { %7724 = vmatmul.f32.gmra.mxu2 %v17308_v50 }
 0x959   : > { %17306 = vst [vmem:[#allocation3_spill] sm:$0xff] %v14305_v58  ;;  %v17315_v58 = vld [vmem:[#allocation130_spill] sm:$0xff] }
 0x95a   : > { %v6961_v9 = vpop.f32.mrf.mxu0  ;;  %v7254_v8 = vpop.f32.mrf.mxu1 }
 0x95b   : > { %v7255_v29 = vadd.f32 %v7254_v8, %v6958_v14  ;;  %v7597_v36 = vpop.f32.mrf.mxu2  ;;  %v8116_v52 = vpop.f32.mrf.mxu3  ;;  %v6962_v57 = vadd.f32 %v6961_v9, %v17314_v18 }
 0x95d   : > { %v7598_v28 = vadd.f32 %v7597_v36, %v7255_v29  ;;  %7024 = vmatmul.f32.gmra.mxu0 %v17310_v11  ;;  %7317 = vmatmul.f32.gmra.mxu1 %v17305_v22  ;;  %v17317_v22 = vld [vmem:[#allocation423_spill] sm:$0xff]  ;;  %v17318_v29 = vld [vmem:[#allocation142_spill] sm:$0xff] }
 0x95f   : > { %v14312_v54 = vadd.f32 %v8116_v52, %v7598_v28  ;;  %8183 = vmatmul.f32.gmra.mxu3 %v17312_v63  ;;  %v17319_v52 = vld [vmem:[#allocation420_spill] sm:$0xff] }
 0x960   : > { %7732 = vmatmul.f32.gmra.mxu2 %v17313_v32 }
 0x961   : > { %17311 = vst [vmem:[#allocation567_spill] sm:$0xff] %v14312_v54  ;;  %v17320_v54 = vld [vmem:[#allocation135_spill] sm:$0xff] }
 0x962   : > { %v6965_v50 = vpop.f32.mrf.mxu0  ;;  %v7258_v7 = vpop.f32.mrf.mxu1 }
 0x963   : > { %v7259_v55 = vadd.f32 %v7258_v7, %v6962_v57  ;;  %v7605_v44 = vpop.f32.mrf.mxu2  ;;  %v8120_v14 = vpop.f32.mrf.mxu3  ;;  %v6966_v28 = vadd.f32 %v6965_v50, %v17319_v52 }
 0x965   : > { %v7606_v8 = vadd.f32 %v7605_v44, %v7259_v55  ;;  %7028 = vmatmul.f32.gmra.mxu0 %v17315_v58  ;;  %7321 = vmatmul.f32.gmra.mxu1 %v17310_v11  ;;  %v17322_v11 = vld [vmem:[#allocation427_spill] sm:$0xff] }
 0x966   : > { %v17323_v55 = vld [vmem:[#allocation147_spill] sm:$0xff] }
 0x967   : > { %v14319_v36 = vadd.f32 %v8120_v14, %v7606_v8  ;;  %8187 = vmatmul.f32.gmra.mxu3 %v17317_v22  ;;  %v17324_v14 = vld [vmem:[#allocation424_spill] sm:$0xff] }
 0x968   : > { %7740 = vmatmul.f32.gmra.mxu2 %v17318_v29 }
 0x969   : > { %17316 = vst [vmem:[#allocation11_spill] sm:$0xff] %v14319_v36  ;;  %v17325_v36 = vld [vmem:[#allocation140_spill] sm:$0xff] }
 0x96a   : > { %v6969_v32 = vpop.f32.mrf.mxu0  ;;  %v7262_v9 = vpop.f32.mrf.mxu1 }
 0x96b   : > { %v7263_v18 = vadd.f32 %v7262_v9, %v6966_v28  ;;  %v7613_v63 = vpop.f32.mrf.mxu2  ;;  %v8124_v57 = vpop.f32.mrf.mxu3  ;;  %v6970_v8 = vadd.f32 %v6969_v32, %v17324_v14 }
 0x96d   : > { %v7614_v7 = vadd.f32 %v7613_v63, %v7263_v18  ;;  %7032 = vmatmul.f32.gmra.mxu0 %v17320_v54  ;;  %7325 = vmatmul.f32.gmra.mxu1 %v17315_v58  ;;  %v17327_v58 = vld [vmem:[#allocation431_spill] sm:$0xff]  ;;  %v17328_v18 = vld [vmem:[#allocation152_spill] sm:$0xff] }
 0x96f   : > { %v14326_v44 = vadd.f32 %v8124_v57, %v7614_v7  ;;  %8191 = vmatmul.f32.gmra.mxu3 %v17322_v11  ;;  %v17329_v57 = vld [vmem:[#allocation428_spill] sm:$0xff] }
 0x970   : > { %7748 = vmatmul.f32.gmra.mxu2 %v17323_v55 }
 0x971   : > { %17321 = vst [vmem:[#allocation2_spill] sm:$0xff] %v14326_v44  ;;  %v17330_v44 = vld [vmem:[#allocation145_spill] sm:$0xff] }
 0x972   : > { %v6973_v29 = vpop.f32.mrf.mxu0  ;;  %v7266_v50 = vpop.f32.mrf.mxu1 }
 0x973   : > { %v7267_v52 = vadd.f32 %v7266_v50, %v6970_v8  ;;  %v7621_v22 = vpop.f32.mrf.mxu2  ;;  %v8128_v28 = vpop.f32.mrf.mxu3  ;;  %v6974_v7 = vadd.f32 %v6973_v29, %v17329_v57 }
 0x975   : > { %v7622_v9 = vadd.f32 %v7621_v22, %v7267_v52  ;;  %7036 = vmatmul.f32.gmra.mxu0 %v17325_v36  ;;  %7329 = vmatmul.f32.gmra.mxu1 %v17320_v54  ;;  %v17332_v54 = vld [vmem:[#allocation435_spill] sm:$0xff]  ;;  %v17333_v52 = vld [vmem:[#allocation157_spill] sm:$0xff] }
 0x977   : > { %v14333_v63 = vadd.f32 %v8128_v28, %v7622_v9  ;;  %8195 = vmatmul.f32.gmra.mxu3 %v17327_v58  ;;  %v17334_v28 = vld [vmem:[#allocation432_spill] sm:$0xff] }
 0x978   : > { %7756 = vmatmul.f32.gmra.mxu2 %v17328_v18 }
 0x979   : > { %17326 = vst [vmem:[#allocation8_spill] sm:$0xff] %v14333_v63  ;;  %v17335_v63 = vld [vmem:[#allocation150_spill] sm:$0xff] }
 0x97a   : > { %v6977_v55 = vpop.f32.mrf.mxu0  ;;  %v7270_v32 = vpop.f32.mrf.mxu1 }
 0x97b   : > { %v7271_v14 = vadd.f32 %v7270_v32, %v6974_v7  ;;  %v7629_v11 = vpop.f32.mrf.mxu2  ;;  %v8132_v8 = vpop.f32.mrf.mxu3  ;;  %v6978_v9 = vadd.f32 %v6977_v55, %v17334_v28 }
 0x97d   : > { %v7630_v50 = vadd.f32 %v7629_v11, %v7271_v14  ;;  %7040 = vmatmul.f32.gmra.mxu0 %v17330_v44  ;;  %7333 = vmatmul.f32.gmra.mxu1 %v17325_v36  ;;  %v17337_v36 = vld [vmem:[#allocation439_spill] sm:$0xff]  ;;  %v17338_v14 = vld [vmem:[#allocation162_spill] sm:$0xff] }
 0x97f   : > { %v14340_v22 = vadd.f32 %v8132_v8, %v7630_v50  ;;  %8199 = vmatmul.f32.gmra.mxu3 %v17332_v54  ;;  %v17339_v8 = vld [vmem:[#allocation436_spill] sm:$0xff] }
 0x980   : > { %7764 = vmatmul.f32.gmra.mxu2 %v17333_v52 }
 0x981   : > { %17331 = vst [vmem:[#allocation6_spill] sm:$0xff] %v14340_v22  ;;  %v17340_v22 = vld [vmem:[#allocation155_spill] sm:$0xff] }
 0x982   : > { %v6981_v18 = vpop.f32.mrf.mxu0  ;;  %v7274_v29 = vpop.f32.mrf.mxu1 }
 0x983   : > { %v7275_v57 = vadd.f32 %v7274_v29, %v6978_v9  ;;  %v7637_v58 = vpop.f32.mrf.mxu2  ;;  %v8136_v7 = vpop.f32.mrf.mxu3  ;;  %v6982_v50 = vadd.f32 %v6981_v18, %v17339_v8 }
 0x985   : > { %v7638_v32 = vadd.f32 %v7637_v58, %v7275_v57  ;;  %7044 = vmatmul.f32.gmra.mxu0 %v17335_v63  ;;  %7337 = vmatmul.f32.gmra.mxu1 %v17330_v44  ;;  %v17342_v44 = vld [vmem:[#allocation443_spill] sm:$0xff] }
 0x986   : > { %v17343_v57 = vld [vmem:[#allocation167_spill] sm:$0xff] }
 0x987   : > { %v14347_v11 = vadd.f32 %v8136_v7, %v7638_v32  ;;  %8203 = vmatmul.f32.gmra.mxu3 %v17337_v36  ;;  %v17344_v7 = vld [vmem:[#allocation440_spill] sm:$0xff] }
 0x988   : > { %7772 = vmatmul.f32.gmra.mxu2 %v17338_v14 }
 0x989   : > { %17336 = vst [vmem:[#allocation15_spill] sm:$0xff] %v14347_v11  ;;  %v17345_v11 = vld [vmem:[#allocation160_spill] sm:$0xff] }
 0x98a   : > { %v6985_v52 = vpop.f32.mrf.mxu0  ;;  %v7278_v55 = vpop.f32.mrf.mxu1 }
 0x98b   : > { %v7279_v28 = vadd.f32 %v7278_v55, %v6982_v50  ;;  %v7645_v54 = vpop.f32.mrf.mxu2  ;;  %v8140_v9 = vpop.f32.mrf.mxu3  ;;  %v6986_v32 = vadd.f32 %v6985_v52, %v17344_v7 }
 0x98d   : > { %v7646_v29 = vadd.f32 %v7645_v54, %v7279_v28  ;;  %7048 = vmatmul.f32.gmra.mxu0 %v17340_v22  ;;  %7341 = vmatmul.f32.gmra.mxu1 %v17335_v63  ;;  %v17347_v63 = vld [vmem:[#allocation447_spill] sm:$0xff]  ;;  %v17348_v28 = vld [vmem:[#allocation172_spill] sm:$0xff] }
 0x98f   : > { %v14354_v58 = vadd.f32 %v8140_v9, %v7646_v29  ;;  %8207 = vmatmul.f32.gmra.mxu3 %v17342_v44  ;;  %v17349_v9 = vld [vmem:[#allocation444_spill] sm:$0xff] }
 0x990   : > { %7780 = vmatmul.f32.gmra.mxu2 %v17343_v57 }
 0x991   : > { %17341 = vst [vmem:[#allocation5_spill] sm:$0xff] %v14354_v58  ;;  %v17350_v58 = vld [vmem:[#allocation165_spill] sm:$0xff] }
 0x992   : > { %v6989_v14 = vpop.f32.mrf.mxu0  ;;  %v7282_v18 = vpop.f32.mrf.mxu1 }
 0x993   : > { %v7283_v8 = vadd.f32 %v7282_v18, %v6986_v32  ;;  %v7653_v36 = vpop.f32.mrf.mxu2  ;;  %v8144_v50 = vpop.f32.mrf.mxu3  ;;  %v6990_v29 = vadd.f32 %v6989_v14, %v17349_v9 }
 0x995   : > { %v7654_v55 = vadd.f32 %v7653_v36, %v7283_v8  ;;  %7052 = vmatmul.f32.gmra.mxu0 %v17345_v11  ;;  %7345 = vmatmul.f32.gmra.mxu1 %v17340_v22  ;;  %v17352_v22 = vld [vmem:[#allocation451_spill] sm:$0xff]  ;;  %v17353_v8 = vld [vmem:[#allocation177_spill] sm:$0xff] }
 0x997   : > { %v14361_v54 = vadd.f32 %v8144_v50, %v7654_v55  ;;  %8211 = vmatmul.f32.gmra.mxu3 %v17347_v63  ;;  %v17354_v50 = vld [vmem:[#allocation448_spill] sm:$0xff] }
 0x998   : > { %7788 = vmatmul.f32.gmra.mxu2 %v17348_v28 }
 0x999   : > { %17346 = vst [vmem:[#allocation12_spill] sm:$0xff] %v14361_v54  ;;  %v17355_v54 = vld [vmem:[#allocation170_spill] sm:$0xff] }
 0x99a   : > { %v6993_v57 = vpop.f32.mrf.mxu0  ;;  %v7286_v52 = vpop.f32.mrf.mxu1 }
 0x99b   : > { %v7287_v7 = vadd.f32 %v7286_v52, %v6990_v29  ;;  %v7661_v44 = vpop.f32.mrf.mxu2  ;;  %v8148_v32 = vpop.f32.mrf.mxu3  ;;  %v6994_v55 = vadd.f32 %v6993_v57, %v17354_v50 }
 0x99d   : > { %v7662_v18 = vadd.f32 %v7661_v44, %v7287_v7  ;;  %7056 = vmatmul.f32.gmra.mxu0 %v17350_v58  ;;  %7349 = vmatmul.f32.gmra.mxu1 %v17345_v11  ;;  %v17357_v11 = vld [vmem:[#allocation455_spill] sm:$0xff]  ;;  %v17358_v7 = vld [vmem:[#allocation182_spill] sm:$0xff] }
 0x99f   : > { %v14368_v36 = vadd.f32 %v8148_v32, %v7662_v18  ;;  %8215 = vmatmul.f32.gmra.mxu3 %v17352_v22  ;;  %v17359_v32 = vld [vmem:[#allocation452_spill] sm:$0xff] }
 0x9a0   : > { %7796 = vmatmul.f32.gmra.mxu2 %v17353_v8 }
 0x9a1   : > { %17351 = vst [vmem:[#allocation10_spill] sm:$0xff] %v14368_v36  ;;  %v17360_v36 = vld [vmem:[#allocation175_spill] sm:$0xff] }
 0x9a2   : > { %v6997_v28 = vpop.f32.mrf.mxu0  ;;  %v7290_v14 = vpop.f32.mrf.mxu1 }
 0x9a3   : > { %v7291_v9 = vadd.f32 %v7290_v14, %v6994_v55  ;;  %v7669_v63 = vpop.f32.mrf.mxu2  ;;  %v8152_v29 = vpop.f32.mrf.mxu3  ;;  %v6998_v18 = vadd.f32 %v6997_v28, %v17359_v32 }
 0x9a5   : > { %v7670_v52 = vadd.f32 %v7669_v63, %v7291_v9  ;;  %7060 = vmatmul.f32.gmra.mxu0 %v17355_v54  ;;  %7353 = vmatmul.f32.gmra.mxu1 %v17350_v58  ;;  %v17362_v58 = vld [vmem:[#allocation459_spill] sm:$0xff] }
 0x9a6   : > { %v17363_v9 = vld [vmem:[#allocation187_spill] sm:$0xff] }
 0x9a7   : > { %v14375_v44 = vadd.f32 %v8152_v29, %v7670_v52  ;;  %8219 = vmatmul.f32.gmra.mxu3 %v17357_v11  ;;  %v17364_v29 = vld [vmem:[#allocation456_spill] sm:$0xff] }
 0x9a8   : > { %7804 = vmatmul.f32.gmra.mxu2 %v17358_v7 }
 0x9a9   : > { %17356 = vst [vmem:[#allocation19_spill] sm:$0xff] %v14375_v44  ;;  %v17365_v44 = vld [vmem:[#allocation180_spill] sm:$0xff] }
 0x9aa   : > { %v7001_v8 = vpop.f32.mrf.mxu0  ;;  %v7294_v57 = vpop.f32.mrf.mxu1 }
 0x9ab   : > { %v7295_v50 = vadd.f32 %v7294_v57, %v6998_v18  ;;  %v7677_v22 = vpop.f32.mrf.mxu2  ;;  %v8156_v55 = vpop.f32.mrf.mxu3  ;;  %v7002_v52 = vadd.f32 %v7001_v8, %v17364_v29 }
 0x9ad   : > { %v7678_v14 = vadd.f32 %v7677_v22, %v7295_v50  ;;  %7064 = vmatmul.f32.gmra.mxu0 %v17360_v36  ;;  %7357 = vmatmul.f32.gmra.mxu1 %v17355_v54  ;;  %v17367_v54 = vld [vmem:[#allocation463_spill] sm:$0xff]  ;;  %v17368_v50 = vld [vmem:[#allocation192_spill] sm:$0xff] }
 0x9af   : > { %v14382_v63 = vadd.f32 %v8156_v55, %v7678_v14  ;;  %8223 = vmatmul.f32.gmra.mxu3 %v17362_v58  ;;  %v17369_v55 = vld [vmem:[#allocation460_spill] sm:$0xff] }
 0x9b0   : > { %7812 = vmatmul.f32.gmra.mxu2 %v17363_v9 }
 0x9b1   : > { %17361 = vst [vmem:[#allocation9_spill] sm:$0xff] %v14382_v63  ;;  %v17370_v63 = vld [vmem:[#allocation185_spill] sm:$0xff] }
 0x9b2   : > { %v7005_v7 = vpop.f32.mrf.mxu0  ;;  %v7298_v28 = vpop.f32.mrf.mxu1 }
 0x9b3   : > { %v7299_v32 = vadd.f32 %v7298_v28, %v7002_v52  ;;  %v7685_v11 = vpop.f32.mrf.mxu2  ;;  %v8160_v18 = vpop.f32.mrf.mxu3  ;;  %v7006_v14 = vadd.f32 %v7005_v7, %v17369_v55 }
 0x9b5   : > { %v7686_v57 = vadd.f32 %v7685_v11, %v7299_v32  ;;  %7068 = vmatmul.f32.gmra.mxu0 %v17365_v44  ;;  %7361 = vmatmul.f32.gmra.mxu1 %v17360_v36  ;;  %v17372_v36 = vld [vmem:[#allocation467_spill] sm:$0xff]  ;;  %v17373_v32 = vld [vmem:[#allocation197_spill] sm:$0xff] }
 0x9b7   : > { %v14389_v22 = vadd.f32 %v8160_v18, %v7686_v57  ;;  %8227 = vmatmul.f32.gmra.mxu3 %v17367_v54  ;;  %v17374_v18 = vld [vmem:[#allocation464_spill] sm:$0xff] }
 0x9b8   : > { %7820 = vmatmul.f32.gmra.mxu2 %v17368_v50 }
 0x9b9   : > { %17366 = vst [vmem:[#allocation16_spill] sm:$0xff] %v14389_v22  ;;  %v17375_v22 = vld [vmem:[#allocation190_spill] sm:$0xff] }
 0x9ba   : > { %v7009_v9 = vpop.f32.mrf.mxu0  ;;  %v7302_v8 = vpop.f32.mrf.mxu1 }
 0x9bb   : > { %v7303_v29 = vadd.f32 %v7302_v8, %v7006_v14  ;;  %v7693_v58 = vpop.f32.mrf.mxu2  ;;  %v8164_v52 = vpop.f32.mrf.mxu3  ;;  %v7010_v57 = vadd.f32 %v7009_v9, %v17374_v18 }
 0x9bd   : > { %v7694_v28 = vadd.f32 %v7693_v58, %v7303_v29  ;;  %7072 = vmatmul.f32.gmra.mxu0 %v17370_v63  ;;  %7365 = vmatmul.f32.gmra.mxu1 %v17365_v44  ;;  %v17377_v44 = vld [vmem:[#allocation471_spill] sm:$0xff]  ;;  %v17378_v29 = vld [vmem:[#allocation202_spill] sm:$0xff] }
 0x9bf   : > { %v14396_v11 = vadd.f32 %v8164_v52, %v7694_v28  ;;  %8231 = vmatmul.f32.gmra.mxu3 %v17372_v36  ;;  %v17379_v52 = vld [vmem:[#allocation468_spill] sm:$0xff] }
 0x9c0   : > { %7828 = vmatmul.f32.gmra.mxu2 %v17373_v32 }
 0x9c1   : > { %17371 = vst [vmem:[#allocation14_spill] sm:$0xff] %v14396_v11  ;;  %v17380_v11 = vld [vmem:[#allocation195_spill] sm:$0xff] }
 0x9c2   : > { %v7013_v50 = vpop.f32.mrf.mxu0  ;;  %v7306_v7 = vpop.f32.mrf.mxu1 }
 0x9c3   : > { %v7307_v55 = vadd.f32 %v7306_v7, %v7010_v57  ;;  %v7701_v54 = vpop.f32.mrf.mxu2  ;;  %v8168_v14 = vpop.f32.mrf.mxu3  ;;  %v7014_v28 = vadd.f32 %v7013_v50, %v17379_v52 }
 0x9c5   : > { %v7702_v8 = vadd.f32 %v7701_v54, %v7307_v55  ;;  %7076 = vmatmul.f32.gmra.mxu0 %v17375_v22  ;;  %7369 = vmatmul.f32.gmra.mxu1 %v17370_v63  ;;  %v17382_v63 = vld [vmem:[#allocation475_spill] sm:$0xff] }
 0x9c6   : > { %v17383_v55 = vld [vmem:[#allocation207_spill] sm:$0xff] }
 0x9c7   : > { %v14403_v58 = vadd.f32 %v8168_v14, %v7702_v8  ;;  %8235 = vmatmul.f32.gmra.mxu3 %v17377_v44  ;;  %v17384_v14 = vld [vmem:[#allocation472_spill] sm:$0xff] }
 0x9c8   : > { %7836 = vmatmul.f32.gmra.mxu2 %v17378_v29 }
 0x9c9   : > { %17376 = vst [vmem:[#allocation568_spill] sm:$0xff] %v14403_v58  ;;  %v17385_v58 = vld [vmem:[#allocation200_spill] sm:$0xff] }
 0x9ca   : > { %v7017_v32 = vpop.f32.mrf.mxu0  ;;  %v7310_v9 = vpop.f32.mrf.mxu1 }
 0x9cb   : > { %v7311_v18 = vadd.f32 %v7310_v9, %v7014_v28  ;;  %v7709_v36 = vpop.f32.mrf.mxu2  ;;  %v8172_v57 = vpop.f32.mrf.mxu3  ;;  %v7018_v8 = vadd.f32 %v7017_v32, %v17384_v14 }
 0x9cd   : > { %v7710_v7 = vadd.f32 %v7709_v36, %v7311_v18  ;;  %7080 = vmatmul.f32.gmra.mxu0 %v17380_v11  ;;  %7373 = vmatmul.f32.gmra.mxu1 %v17375_v22  ;;  %v17387_v22 = vld [vmem:[#allocation479_spill] sm:$0xff]  ;;  %v17388_v18 = vld [vmem:[#allocation212_spill] sm:$0xff] }
 0x9cf   : > { %v14410_v54 = vadd.f32 %v8172_v57, %v7710_v7  ;;  %8239 = vmatmul.f32.gmra.mxu3 %v17382_v63  ;;  %v17389_v57 = vld [vmem:[#allocation476_spill] sm:$0xff] }
 0x9d0   : > { %7844 = vmatmul.f32.gmra.mxu2 %v17383_v55 }
 0x9d1   : > { %17381 = vst [vmem:[#allocation23_spill] sm:$0xff] %v14410_v54  ;;  %v17390_v54 = vld [vmem:[#allocation205_spill] sm:$0xff] }
 0x9d2   : > { %v7021_v29 = vpop.f32.mrf.mxu0  ;;  %v7314_v50 = vpop.f32.mrf.mxu1 }
 0x9d3   : > { %v7315_v52 = vadd.f32 %v7314_v50, %v7018_v8  ;;  %v7717_v44 = vpop.f32.mrf.mxu2  ;;  %v8176_v28 = vpop.f32.mrf.mxu3  ;;  %v7022_v7 = vadd.f32 %v7021_v29, %v17389_v57 }
 0x9d5   : > { %v7718_v9 = vadd.f32 %v7717_v44, %v7315_v52  ;;  %7084 = vmatmul.f32.gmra.mxu0 %v17385_v58  ;;  %7377 = vmatmul.f32.gmra.mxu1 %v17380_v11  ;;  %v17392_v11 = vld [vmem:[#allocation483_spill] sm:$0xff]  ;;  %v17393_v52 = vld [vmem:[#allocation217_spill] sm:$0xff] }
 0x9d7   : > { %v14417_v36 = vadd.f32 %v8176_v28, %v7718_v9  ;;  %8243 = vmatmul.f32.gmra.mxu3 %v17387_v22  ;;  %v17394_v28 = vld [vmem:[#allocation480_spill] sm:$0xff] }
 0x9d8   : > { %7852 = vmatmul.f32.gmra.mxu2 %v17388_v18 }
 0x9d9   : > { %17386 = vst [vmem:[#allocation13_spill] sm:$0xff] %v14417_v36  ;;  %v17395_v36 = vld [vmem:[#allocation210_spill] sm:$0xff] }
 0x9da   : > { %v7025_v55 = vpop.f32.mrf.mxu0  ;;  %v7318_v32 = vpop.f32.mrf.mxu1 }
 0x9db   : > { %v7319_v14 = vadd.f32 %v7318_v32, %v7022_v7  ;;  %v7725_v63 = vpop.f32.mrf.mxu2  ;;  %v8180_v8 = vpop.f32.mrf.mxu3  ;;  %v7026_v9 = vadd.f32 %v7025_v55, %v17394_v28 }
 0x9dd   : > { %v7726_v50 = vadd.f32 %v7725_v63, %v7319_v14  ;;  %7088 = vmatmul.f32.gmra.mxu0 %v17390_v54  ;;  %7381 = vmatmul.f32.gmra.mxu1 %v17385_v58  ;;  %v17396_v58 = vld [vmem:[#allocation487_spill] sm:$0xff]  ;;  %v17397_v14 = vld [vmem:[#allocation222_spill] sm:$0xff] }
 0x9df   : > { %v14424_v44 = vadd.f32 %v8180_v8, %v7726_v50  ;;  %8247 = vmatmul.f32.gmra.mxu3 %v17392_v11  ;;  %v17398_v8 = vld [vmem:[#allocation484_spill] sm:$0xff] }
 0x9e0   : > { %7860 = vmatmul.f32.gmra.mxu2 %v17393_v52 }
 0x9e1   : > { %17391 = vst [vmem:[#allocation20_spill] sm:$0xff] %v14424_v44  ;;  %v17399_v44 = vld [vmem:[#allocation215_spill] sm:$0xff] }
 0x9e2   : > { %v7029_v18 = vpop.f32.mrf.mxu0  ;;  %v7322_v29 = vpop.f32.mrf.mxu1 }
 0x9e3   : > { %v7323_v57 = vadd.f32 %v7322_v29, %v7026_v9  ;;  %v7733_v22 = vpop.f32.mrf.mxu2  ;;  %v8184_v7 = vpop.f32.mrf.mxu3  ;;  %v7030_v50 = vadd.f32 %v7029_v18, %v17398_v8 }
 0x9e5   : > { %v7734_v32 = vadd.f32 %v7733_v22, %v7323_v57  ;;  %7092 = vmatmul.f32.gmra.mxu0 %v17395_v36  ;;  %7385 = vmatmul.f32.gmra.mxu1 %v17390_v54  ;;  %v17401_v54 = vld [vmem:[#allocation491_spill] sm:$0xff] }
 0x9e6   : > { %v17402_v57 = vld [vmem:[#allocation227_spill] sm:$0xff] }
 0x9e7   : > { %v14431_v63 = vadd.f32 %v8184_v7, %v7734_v32  ;;  %8251 = vmatmul.f32.gmra.mxu3 %v17396_v58  ;;  %v17403_v7 = vld [vmem:[#allocation488_spill] sm:$0xff] }
 0x9e8   : > { %7868 = vmatmul.f32.gmra.mxu2 %v17397_v14 }
 0x9ea   : > { %v7033_v52 = vpop.f32.mrf.mxu0  ;;  %v7326_v55 = vpop.f32.mrf.mxu1 }
 0x9eb   : > { %v7327_v28 = vadd.f32 %v7326_v55, %v7030_v50  ;;  %v7741_v11 = vpop.f32.mrf.mxu2  ;;  %v8188_v9 = vpop.f32.mrf.mxu3  ;;  %v7034_v32 = vadd.f32 %v7033_v52, %v17403_v7 }
 0x9ed   : > { %v7742_v29 = vadd.f32 %v7741_v11, %v7327_v28  ;;  %7096 = vmatmul.f32.gmra.mxu0 %v17399_v44  ;;  %7389 = vmatmul.f32.gmra.mxu1 %v17395_v36  ;;  %v17405_v36 = vld [vmem:[#allocation495_spill] sm:$0xff]  ;;  %v17406_v28 = vld [vmem:[#allocation232_spill] sm:$0xff] }
 0x9ef   : > { %v14438_v22 = vadd.f32 %v8188_v9, %v7742_v29  ;;  %8255 = vmatmul.f32.gmra.mxu3 %v17401_v54  ;;  %v17407_v9 = vld [vmem:[#allocation492_spill] sm:$0xff] }
 0x9f0   : > { %7876 = vmatmul.f32.gmra.mxu2 %v17402_v57 }
 0x9f1   : > { %17400 = vst [vmem:[#allocation18_spill] sm:$0xff] %v14438_v22  ;;  %v17408_v22 = vld [vmem:[#allocation225_spill] sm:$0xff] }
 0x9f2   : > { %v7037_v14 = vpop.f32.mrf.mxu0  ;;  %v7330_v18 = vpop.f32.mrf.mxu1 }
 0x9f3   : > { %v7331_v8 = vadd.f32 %v7330_v18, %v7034_v32  ;;  %v7749_v58 = vpop.f32.mrf.mxu2  ;;  %v8192_v50 = vpop.f32.mrf.mxu3  ;;  %v7038_v29 = vadd.f32 %v7037_v14, %v17407_v9 }
 0x9f5   : > { %v7750_v55 = vadd.f32 %v7749_v58, %v7331_v8  ;;  %7100 = vmatmul.f32.gmra.mxu0 %v17156_v41  ;;  %7393 = vmatmul.f32.gmra.mxu1 %v17399_v44  ;;  %v17409_v44 = vld [vmem:[#allocation499_spill] sm:$0xff]  ;;  %v17410_v8 = vld [vmem:[#allocation237_spill] sm:$0xff] }
 0x9f7   : > { %v14445_v11 = vadd.f32 %v8192_v50, %v7750_v55  ;;  %8259 = vmatmul.f32.gmra.mxu3 %v17405_v36  ;;  %v17411_v50 = vld [vmem:[#allocation496_spill] sm:$0xff] }
 0x9f8   : > { %7884 = vmatmul.f32.gmra.mxu2 %v17406_v28 }
 0x9f9   : > { %17404 = vst [vmem:[#allocation569_spill] sm:$0xff] %v14445_v11  ;;  %v17412_v11 = vld [vmem:[#allocation230_spill] sm:$0xff] }
 0x9fa   : > { %v7041_v57 = vpop.f32.mrf.mxu0  ;;  %v7334_v52 = vpop.f32.mrf.mxu1 }
 0x9fb   : > { %v7335_v7 = vadd.f32 %v7334_v52, %v7038_v29  ;;  %v7757_v54 = vpop.f32.mrf.mxu2  ;;  %v8196_v32 = vpop.f32.mrf.mxu3  ;;  %v7042_v55 = vadd.f32 %v7041_v57, %v17411_v50 }
 0x9fd   : > { %v7758_v18 = vadd.f32 %v7757_v54, %v7335_v7  ;;  %7104 = vmatmul.f32.gmra.mxu0 %v17408_v22  ;;  %7397 = vmatmul.f32.gmra.mxu1 %v17156_v41  ;;  %v17413_v41 = vld [vmem:[#allocation503_spill] sm:$0xff]  ;;  %v17414_v7 = vld [vmem:[#allocation242_spill] sm:$0xff] }
 0x9ff   : > { %v14452_v58 = vadd.f32 %v8196_v32, %v7758_v18  ;;  %8263 = vmatmul.f32.gmra.mxu3 %v17409_v44 }
 0xa00   : > { %7892 = vmatmul.f32.gmra.mxu2 %v17410_v8 }
 0xa02   : > { %v7045_v28 = vpop.f32.mrf.mxu0  ;;  %v7338_v14 = vpop.f32.mrf.mxu1 }
 0xa03   : > { %v7339_v9 = vadd.f32 %v7338_v14, %v7042_v55  ;;  %v7765_v36 = vpop.f32.mrf.mxu2  ;;  %v8200_v29 = vpop.f32.mrf.mxu3  ;;  %v7046_v32 = vadd.f32 %v7045_v28, %v14023_v24 }
 0xa05   : > { %v7766_v52 = vadd.f32 %v7765_v36, %v7339_v9  ;;  %7108 = vmatmul.f32.gmra.mxu0 %v17412_v11  ;;  %7401 = vmatmul.f32.gmra.mxu1 %v17408_v22  ;;  %v17415_v22 = vld [vmem:[#allocation507_spill] sm:$0xff]  ;;  %v17416_v9 = vld [vmem:[#allocation513_spill] sm:$0xff] }
 0xa07   : > { %v14459_v54 = vadd.f32 %v8200_v29, %v7766_v52  ;;  %8267 = vmatmul.f32.gmra.mxu3 %v17413_v41 }
 0xa08   : > { %7900 = vmatmul.f32.gmra.mxu2 %v17414_v7 }
 0xa0a   : > { %v7049_v18 = vpop.f32.mrf.mxu0  ;;  %v7342_v57 = vpop.f32.mrf.mxu1 }
 0xa0b   : > { %v7343_v8 = vadd.f32 %v7342_v57, %v7046_v32  ;;  %v7773_v50 = vpop.f32.mrf.mxu2  ;;  %v8204_v55 = vpop.f32.mrf.mxu3  ;;  %v7050_v29 = vadd.f32 %v7049_v18, %v14037_v21 }
 0xa0d   : > { %v7774_v14 = vadd.f32 %v7773_v50, %v7343_v8  ;;  %7112 = vmatmul.f32.gmra.mxu0 %v17174_v25  ;;  %7405 = vmatmul.f32.gmra.mxu1 %v17412_v11  ;;  %v17417_v11 = vld [vmem:[#allocation511_spill] sm:$0xff]  ;;  %v17418_v50 = vld [vmem:[#allocation517_spill] sm:$0xff] }
 0xa0f   : > { %v14466_v36 = vadd.f32 %v8204_v55, %v7774_v14  ;;  %8271 = vmatmul.f32.gmra.mxu3 %v17415_v22 }
 0xa10   : > { %7908 = vmatmul.f32.gmra.mxu2 %v17416_v9 }
 0xa12   : > { %v7053_v52 = vpop.f32.mrf.mxu0  ;;  %v7346_v24 = vpop.f32.mrf.mxu1 }
 0xa13   : > { %v7347_v28 = vadd.f32 %v7346_v24, %v7050_v29  ;;  %v7781_v7 = vpop.f32.mrf.mxu2  ;;  %v8208_v32 = vpop.f32.mrf.mxu3  ;;  %v7054_v55 = vadd.f32 %v7053_v52, %v14046_v31 }
 0xa15   : > { %v7782_v57 = vadd.f32 %v7781_v7, %v7347_v28  ;;  %7116 = vmatmul.f32.gmra.mxu0 %v17179_v0  ;;  %7409 = vmatmul.f32.gmra.mxu1 %v17174_v25  ;;  %v17419_v25 = vld [vmem:[#allocation515_spill] sm:$0xff]  ;;  %v17420_v7 = vld [vmem:[#allocation521_spill] sm:$0xff] }
 0xa17   : > { %v14473_v8 = vadd.f32 %v8208_v32, %v7782_v57  ;;  %8275 = vmatmul.f32.gmra.mxu3 %v17417_v11 }
 0xa18   : > { %7916 = vmatmul.f32.gmra.mxu2 %v17418_v50 }
 0xa1a   : > { %v7057_v14 = vpop.f32.mrf.mxu0  ;;  %v7350_v21 = vpop.f32.mrf.mxu1 }
 0xa1b   : > { %v7351_v18 = vadd.f32 %v7350_v21, %v7054_v55  ;;  %v7789_v9 = vpop.f32.mrf.mxu2  ;;  %v8212_v29 = vpop.f32.mrf.mxu3  ;;  %v7058_v32 = vadd.f32 %v7057_v14, %v14052_v2 }
 0xa1d   : > { %v7790_v24 = vadd.f32 %v7789_v9, %v7351_v18  ;;  %7120 = vmatmul.f32.gmra.mxu0 %v17183_v15  ;;  %7413 = vmatmul.f32.gmra.mxu1 %v17179_v0  ;;  %v17422_v0 = vld [vmem:[#allocation519_spill] sm:$0xff]  ;;  %v17423_v9 = vld [vmem:[#allocation525_spill] sm:$0xff] }
 0xa1f   : > { %v14480_v28 = vadd.f32 %v8212_v29, %v7790_v24  ;;  %8279 = vmatmul.f32.gmra.mxu3 %v17419_v25  ;;  %v17424_v25 = vld [vmem:[#allocation253_spill] sm:$0xff] }
 0xa20   : > { %7924 = vmatmul.f32.gmra.mxu2 %v17420_v7 }
 0xa22   : > { %v7061_v57 = vpop.f32.mrf.mxu0  ;;  %v7354_v31 = vpop.f32.mrf.mxu1 }
 0xa23   : > { %v7355_v52 = vadd.f32 %v7354_v31, %v7058_v32  ;;  %v7797_v50 = vpop.f32.mrf.mxu2  ;;  %v8216_v55 = vpop.f32.mrf.mxu3  ;;  %v7062_v29 = vadd.f32 %v7061_v57, %v14058_v20 }
 0xa25   : > { %v7798_v21 = vadd.f32 %v7797_v50, %v7355_v52  ;;  %7124 = vmatmul.f32.gmra.mxu0 %v17187_v38  ;;  %7417 = vmatmul.f32.gmra.mxu1 %v17183_v15  ;;  %v17426_v15 = vld [vmem:[#allocation523_spill] sm:$0xff]  ;;  %v17427_v50 = vld [vmem:[#allocation529_spill] sm:$0xff] }
 0xa27   : > { %v14487_v18 = vadd.f32 %v8216_v55, %v7798_v21  ;;  %8283 = vmatmul.f32.gmra.mxu3 %v17422_v0  ;;  %v17428_v55 = vld [vmem:[#allocation500_spill] sm:$0xff] }
 0xa28   : > { %7932 = vmatmul.f32.gmra.mxu2 %v17423_v9 }
 0xa29   : > { %17421 = vst [vmem:[#allocation27_spill] sm:$0xff] %v14487_v18  ;;  %v17429_v18 = vld [vmem:[#allocation257_spill] sm:$0xff] }
 0xa2a   : > { %v7065_v24 = vpop.f32.mrf.mxu0  ;;  %v7358_v2 = vpop.f32.mrf.mxu1 }
 0xa2b   : > { %v7359_v14 = vadd.f32 %v7358_v2, %v7062_v29  ;;  %v7805_v7 = vpop.f32.mrf.mxu2  ;;  %v8220_v32 = vpop.f32.mrf.mxu3  ;;  %v7066_v21 = vadd.f32 %v7065_v24, %v17428_v55 }
 0xa2d   : > { %v7806_v31 = vadd.f32 %v7805_v7, %v7359_v14  ;;  %7128 = vmatmul.f32.gmra.mxu0 %v17424_v25  ;;  %7421 = vmatmul.f32.gmra.mxu1 %v17187_v38  ;;  %v17431_v38 = vld [vmem:[#allocation527_spill] sm:$0xff] }
 0xa2e   : > { %v17432_v7 = vld [vmem:[#allocation267_spill] sm:$0xff] }
 0xa2f   : > { %v14494_v52 = vadd.f32 %v8220_v32, %v7806_v31  ;;  %8287 = vmatmul.f32.gmra.mxu3 %v17426_v15  ;;  %v17433_v32 = vld [vmem:[#allocation504_spill] sm:$0xff] }
 0xa30   : > { %7940 = vmatmul.f32.gmra.mxu2 %v17427_v50 }
 0xa31   : > { %17425 = vst [vmem:[#allocation17_spill] sm:$0xff] %v14494_v52  ;;  %v17434_v52 = vld [vmem:[#allocation261_spill] sm:$0xff] }
 0xa32   : > { %v7069_v9 = vpop.f32.mrf.mxu0  ;;  %v7362_v20 = vpop.f32.mrf.mxu1 }
 0xa33   : > { %v7363_v57 = vadd.f32 %v7362_v20, %v7066_v21  ;;  %v7813_v0 = vpop.f32.mrf.mxu2  ;;  %v8224_v29 = vpop.f32.mrf.mxu3  ;;  %v7070_v31 = vadd.f32 %v7069_v9, %v17433_v32 }
 0xa35   : > { %v7814_v2 = vadd.f32 %v7813_v0, %v7363_v57  ;;  %7132 = vmatmul.f32.gmra.mxu0 %v17429_v18  ;;  %7425 = vmatmul.f32.gmra.mxu1 %v17424_v25  ;;  %v17436_v25 = vld [vmem:[#allocation531_spill] sm:$0xff]  ;;  %v17437_v57 = vld [vmem:[#allocation272_spill] sm:$0xff] }
 0xa37   : > { %v14501_v14 = vadd.f32 %v8224_v29, %v7814_v2  ;;  %8291 = vmatmul.f32.gmra.mxu3 %v17431_v38  ;;  %v17438_v29 = vld [vmem:[#allocation508_spill] sm:$0xff] }
 0xa38   : > { %7948 = vmatmul.f32.gmra.mxu2 %v17432_v7 }
 0xa39   : > { %17430 = vst [vmem:[#allocation24_spill] sm:$0xff] %v14501_v14  ;;  %v17439_v14 = vld [vmem:[#allocation265_spill] sm:$0xff] }
 0xa3a   : > { %v7073_v50 = vpop.f32.mrf.mxu0  ;;  %v7366_v24 = vpop.f32.mrf.mxu1 }
 0xa3b   : > { %v7367_v55 = vadd.f32 %v7366_v24, %v7070_v31  ;;  %v7821_v15 = vpop.f32.mrf.mxu2  ;;  %v8228_v21 = vpop.f32.mrf.mxu3  ;;  %v7074_v2 = vadd.f32 %v7073_v50, %v17438_v29 }
 0xa3d   : > { %v7822_v20 = vadd.f32 %v7821_v15, %v7367_v55  ;;  %7136 = vmatmul.f32.gmra.mxu0 %v17434_v52  ;;  %7429 = vmatmul.f32.gmra.mxu1 %v17429_v18  ;;  %v17441_v18 = vld [vmem:[#allocation534_spill] sm:$0xff]  ;;  %v17442_v55 = vld [vmem:[#allocation277_spill] sm:$0xff] }
 0xa3f   : > { %v14508_v0 = vadd.f32 %v8228_v21, %v7822_v20  ;;  %8295 = vmatmul.f32.gmra.mxu3 %v17436_v25  ;;  %v17443_v21 = vld [vmem:[#allocation535_spill] sm:$0xff] }
 0xa40   : > { %7956 = vmatmul.f32.gmra.mxu2 %v17437_v57 }
 0xa41   : > { %17435 = vst [vmem:[#allocation22_spill] sm:$0xff] %v14508_v0  ;;  %v17444_v0 = vld [vmem:[#allocation270_spill] sm:$0xff] }
 0xa42   : > { %v7077_v7 = vpop.f32.mrf.mxu0  ;;  %v7370_v9 = vpop.f32.mrf.mxu1 }
 0xa43   : > { %v7371_v32 = vadd.f32 %v7370_v9, %v7074_v2  ;;  %v7829_v38 = vpop.f32.mrf.mxu2  ;;  %v8232_v31 = vpop.f32.mrf.mxu3  ;;  %v7078_v20 = vadd.f32 %v7077_v7, %v17443_v21 }
 0xa45   : > { %v7830_v24 = vadd.f32 %v7829_v38, %v7371_v32  ;;  %7140 = vmatmul.f32.gmra.mxu0 %v17439_v14  ;;  %7433 = vmatmul.f32.gmra.mxu1 %v17434_v52  ;;  %v17446_v52 = vld [vmem:[#allocation538_spill] sm:$0xff] }
 0xa46   : > { %v17447_v32 = vld [vmem:[#allocation282_spill] sm:$0xff] }
 0xa47   : > { %v14515_v15 = vadd.f32 %v8232_v31, %v7830_v24  ;;  %8299 = vmatmul.f32.gmra.mxu3 %v17441_v18  ;;  %v17448_v31 = vld [vmem:[#allocation539_spill] sm:$0xff] }
 0xa48   : > { %7964 = vmatmul.f32.gmra.mxu2 %v17442_v55 }
 0xa49   : > { %17440 = vst [vmem:[#allocation31_spill] sm:$0xff] %v14515_v15  ;;  %v17449_v15 = vld [vmem:[#allocation275_spill] sm:$0xff] }
 0xa4a   : > { %v7081_v57 = vpop.f32.mrf.mxu0  ;;  %v7374_v50 = vpop.f32.mrf.mxu1 }
 0xa4b   : > { %v7375_v29 = vadd.f32 %v7374_v50, %v7078_v20  ;;  %v7837_v25 = vpop.f32.mrf.mxu2  ;;  %v8236_v2 = vpop.f32.mrf.mxu3  ;;  %v7082_v24 = vadd.f32 %v7081_v57, %v17448_v31 }
 0xa4d   : > { %v7838_v9 = vadd.f32 %v7837_v25, %v7375_v29  ;;  %7144 = vmatmul.f32.gmra.mxu0 %v17444_v0  ;;  %7437 = vmatmul.f32.gmra.mxu1 %v17439_v14  ;;  %v17451_v14 = vld [vmem:[#allocation542_spill] sm:$0xff]  ;;  %v17452_v29 = vld [vmem:[#allocation287_spill] sm:$0xff] }
 0xa4f   : > { %v14522_v38 = vadd.f32 %v8236_v2, %v7838_v9  ;;  %8303 = vmatmul.f32.gmra.mxu3 %v17446_v52  ;;  %v17453_v2 = vld [vmem:[#allocation543_spill] sm:$0xff] }
 0xa50   : > { %7972 = vmatmul.f32.gmra.mxu2 %v17447_v32 }
 0xa51   : > { %17445 = vst [vmem:[#allocation21_spill] sm:$0xff] %v14522_v38  ;;  %v17454_v38 = vld [vmem:[#allocation280_spill] sm:$0xff] }
 0xa52   : > { %v7085_v55 = vpop.f32.mrf.mxu0  ;;  %v7378_v7 = vpop.f32.mrf.mxu1 }
 0xa53   : > { %v7379_v21 = vadd.f32 %v7378_v7, %v7082_v24  ;;  %v7845_v18 = vpop.f32.mrf.mxu2  ;;  %v8240_v20 = vpop.f32.mrf.mxu3  ;;  %v7086_v9 = vadd.f32 %v7085_v55, %v17453_v2 }
 0xa55   : > { %v7846_v50 = vadd.f32 %v7845_v18, %v7379_v21  ;;  %7148 = vmatmul.f32.gmra.mxu0 %v17449_v15  ;;  %7441 = vmatmul.f32.gmra.mxu1 %v17444_v0  ;;  %v17455_v0 = vld [vmem:[#allocation546_spill] sm:$0xff]  ;;  %v17456_v21 = vld [vmem:[#allocation292_spill] sm:$0xff] }
 0xa57   : > { %v14529_v25 = vadd.f32 %v8240_v20, %v7846_v50  ;;  %8307 = vmatmul.f32.gmra.mxu3 %v17451_v14  ;;  %v17457_v20 = vld [vmem:[#allocation547_spill] sm:$0xff] }
 0xa58   : > { %7980 = vmatmul.f32.gmra.mxu2 %v17452_v29 }
 0xa59   : > { %17450 = vst [vmem:[#allocation28_spill] sm:$0xff] %v14529_v25  ;;  %v17458_v25 = vld [vmem:[#allocation285_spill] sm:$0xff] }
 0xa5a   : > { %v7089_v32 = vpop.f32.mrf.mxu0  ;;  %v7382_v57 = vpop.f32.mrf.mxu1 }
 0xa5b   : > { %v7383_v31 = vadd.f32 %v7382_v57, %v7086_v9  ;;  %v7853_v52 = vpop.f32.mrf.mxu2  ;;  %v8244_v24 = vpop.f32.mrf.mxu3  ;;  %v7090_v50 = vadd.f32 %v7089_v32, %v17457_v20 }
 0xa5d   : > { %v7854_v7 = vadd.f32 %v7853_v52, %v7383_v31  ;;  %7152 = vmatmul.f32.gmra.mxu0 %v17454_v38  ;;  %7445 = vmatmul.f32.gmra.mxu1 %v17449_v15  ;;  %v17459_v15 = vld [vmem:[#allocation550_spill] sm:$0xff] }
 0xa5e   : > { %v17460_v31 = vld [vmem:[#allocation558_spill] sm:$0xff] }
 0xa5f   : > { %v14536_v18 = vadd.f32 %v8244_v24, %v7854_v7  ;;  %8311 = vmatmul.f32.gmra.mxu3 %v17455_v0  ;;  %v17461_v24 = vld [vmem:[#allocation557_spill] sm:$0xff] }
 0xa60   : > { %7988 = vmatmul.f32.gmra.mxu2 %v17456_v21 }
 0xa62   : > { %v7093_v29 = vpop.f32.mrf.mxu0  ;;  %v7386_v55 = vpop.f32.mrf.mxu1 }
 0xa63   : > { %v7387_v2 = vadd.f32 %v7386_v55, %v7090_v50  ;;  %v7861_v14 = vpop.f32.mrf.mxu2  ;;  %v8248_v9 = vpop.f32.mrf.mxu3  ;;  %v7094_v7 = vadd.f32 %v7093_v29, %v17461_v24 }
 0xa65   : > { %v7862_v57 = vadd.f32 %v7861_v14, %v7387_v2  ;;  %7156 = vmatmul.f32.gmra.mxu0 %v17458_v25  ;;  %7449 = vmatmul.f32.gmra.mxu1 %v17454_v38  ;;  %v17462_v38 = vld [vmem:[#allocation554_spill] sm:$0xff]  ;;  %v17463_v2 = vld [vmem:[#allocation563_spill] sm:$0xff] }
 0xa67   : > { %v14543_v52 = vadd.f32 %v8248_v9, %v7862_v57  ;;  %8315 = vmatmul.f32.gmra.mxu3 %v17459_v15  ;;  %v17464_v9 = vld [vmem:[#allocation551_spill] sm:$0xff] }
 0xa68   : > { %7996 = vmatmul.f32.gmra.mxu2 %v17460_v31 }
 0xa6a   : > { %v7097_v21 = vpop.f32.mrf.mxu0  ;;  %v7390_v32 = vpop.f32.mrf.mxu1 }
 0xa6b   : > { %v7391_v20 = vadd.f32 %v7390_v32, %v7094_v7  ;;  %v7869_v0 = vpop.f32.mrf.mxu2  ;;  %v8252_v50 = vpop.f32.mrf.mxu3  ;;  %v7098_v57 = vadd.f32 %v7097_v21, %v17464_v9 }
 0xa6d   : > { %v7870_v55 = vadd.f32 %v7869_v0, %v7391_v20  ;;  %7160 = vmatmul.f32.gmra.mxu0 %v17231_v40  ;;  %7453 = vmatmul.f32.gmra.mxu1 %v17458_v25  ;;  %v17465_v25 = vld [vmem:[#allocation560_spill] sm:$0xff]  ;;  %v17466_v20 = vld [vmem:[#allocation565_spill] sm:$0xff] }
 0xa6f   : > { %v14550_v14 = vadd.f32 %v8252_v50, %v7870_v55  ;;  %8319 = vmatmul.f32.gmra.mxu3 %v17462_v38  ;;  %v17467_v50 = vld [vmem:[#allocation555_spill] sm:$0xff] }
 0xa70   : > { %8004 = vmatmul.f32.gmra.mxu2 %v17463_v2 }
 0xa72   : > { %v7101_v31 = vpop.f32.mrf.mxu0  ;;  %v7394_v29 = vpop.f32.mrf.mxu1 }
 0xa73   : > { %v7395_v24 = vadd.f32 %v7394_v29, %v7098_v57  ;;  %v7877_v15 = vpop.f32.mrf.mxu2  ;;  %v8256_v7 = vpop.f32.mrf.mxu3  ;;  %v7102_v55 = vadd.f32 %v7101_v31, %v17467_v50 }
 0xa75   : > { %v7878_v32 = vadd.f32 %v7877_v15, %v7395_v24  ;;  %7164 = vmatmul.f32.gmra.mxu0 %v17235_v27  ;;  %7457 = vmatmul.f32.gmra.mxu1 %v17231_v40  ;;  %v17468_v15 = vld [vmem:[#allocation300_spill] sm:$0xff]  ;;  %v17469_v40 = vld [vmem:[#allocation299_spill] sm:$0xff] }
 0xa77   : > { %v14557_v0 = vadd.f32 %v8256_v7, %v7878_v32  ;;  %8323 = vmatmul.f32.gmra.mxu3 %v17465_v25  ;;  %v17470_v25 = vld [vmem:[#allocation304_spill] sm:$0xff] }
 0xa78   : > { %8012 = vmatmul.f32.gmra.mxu2 %v17466_v20 }
 0xa7a   : > { %v7105_v2 = vpop.f32.mrf.mxu0  ;;  %v7398_v21 = vpop.f32.mrf.mxu1 }
 0xa7b   : > { %v7399_v9 = vadd.f32 %v7398_v21, %v7102_v55  ;;  %v7885_v38 = vpop.f32.mrf.mxu2  ;;  %v8260_v57 = vpop.f32.mrf.mxu3  ;;  %v7106_v7 = vadd.f32 %v7105_v2, %v14124_v48 }
 0xa7d   : > { %v7886_v29 = vadd.f32 %v7885_v38, %v7399_v9  ;;  %7461 = vmatmul.f32.gmra.mxu1 %v17235_v27  ;;  %8357 = vmatmul.f32.vlgmr.msrb.gmra.mxu0 %v17468_v15  ;;  %v17471_v38 = vld [vmem:[#allocation302_spill] sm:$0xff]  ;;  %v17472_v9 = vld [vmem:[#allocation303_spill] sm:$0xff] }
 0xa7f   : > { %v14564_v24 = vadd.f32 %v8260_v57, %v7886_v29  ;;  %9427 = vmatmul.f32.vlgmr.msrb.gmra.mxu3 %v17469_v40 }
 0xa80   : > { %9140 = vmatmul.f32.vlgmr.msrb.gmra.mxu2 %v17469_v40 }
 0xa82   : > { %v7109_v32 = vpop.f32.mrf.mxu0  ;;  %v7402_v31 = vpop.f32.mrf.mxu1 }
 0xa83   : > { %v7403_v20 = vadd.f32 %v7402_v31, %v7106_v7  ;;  %v7893_v50 = vpop.f32.mrf.mxu2  ;;  %v8264_v55 = vpop.f32.mrf.mxu3  ;;  %v7110_v57 = vadd.f32 %v7109_v32, %v14130_v43  ;;  %v17473_v31 = vld [vmem:[#allocation308_spill] sm:$0xff] }
 0xa85   : > { %v7894_v21 = vadd.f32 %v7893_v50, %v7403_v20  ;;  %8362 = vmatmul.f32.gmra.mxu0 %v17470_v25  ;;  %8711 = vmatmul.f32.vlgmr.msrb.gmra.mxu1 %v17471_v38  ;;  %v17474_v20 = vld [vmem:[#allocation306_spill] sm:$0xff]  ;;  %v17475_v50 = vld [vmem:[#allocation307_spill] sm:$0xff] }
 0xa87   : > { %v14571_v27 = vadd.f32 %v8264_v55, %v7894_v21  ;;  %9431 = vmatmul.f32.gmra.mxu3 %v17472_v9 }
 0xa88   : > { %9144 = vmatmul.f32.gmra.mxu2 %v17472_v9 }
 0xa8a   : > { %v7113_v29 = vpop.f32.mrf.mxu0  ;;  %v7406_v48 = vpop.f32.mrf.mxu1 }
 0xa8b   : > { %v7407_v2 = vadd.f32 %v7406_v48, %v7110_v57  ;;  %v7901_v15 = vpop.f32.mrf.mxu2  ;;  %v8268_v40 = vpop.f32.mrf.mxu3  ;;  %v7114_v55 = vadd.f32 %v7113_v29, %v14136_v13  ;;  %v17476_v48 = vld [vmem:[#allocation312_spill] sm:$0xff] }
 0xa8d   : > { %v7902_v7 = vadd.f32 %v7901_v15, %v7407_v2  ;;  %8367 = vmatmul.f32.gmra.mxu0 %v17473_v31  ;;  %8717 = vmatmul.f32.gmra.mxu1 %v17474_v20  ;;  %v17477_v2 = vld [vmem:[#allocation310_spill] sm:$0xff] }
 0xa8f   : > { %v14578_v25 = vadd.f32 %v8268_v40, %v7902_v7  ;;  %9435 = vmatmul.f32.gmra.mxu3 %v17475_v50  ;;  %v17478_v40 = vld [vmem:[#allocation311_spill] sm:$0xff] }
 0xa90   : > { %9148 = vmatmul.f32.gmra.mxu2 %v17475_v50 }
 0xa92   : > { %v7117_v21 = vpop.f32.mrf.mxu0  ;;  %v7410_v43 = vpop.f32.mrf.mxu1 }
 0xa93   : > { %v7411_v32 = vadd.f32 %v7410_v43, %v7114_v55  ;;  %v7909_v38 = vpop.f32.mrf.mxu2  ;;  %v8272_v9 = vpop.f32.mrf.mxu3  ;;  %v7118_v7 = vadd.f32 %v7117_v21, %v14142_v26  ;;  %v17479_v43 = vld [vmem:[#allocation316_spill] sm:$0xff] }
 0xa95   : > { %v7910_v57 = vadd.f32 %v7909_v38, %v7411_v32  ;;  %8372 = vmatmul.f32.gmra.mxu0 %v17476_v48  ;;  %8723 = vmatmul.f32.gmra.mxu1 %v17477_v2  ;;  %v17480_v32 = vld [vmem:[#allocation314_spill] sm:$0xff] }
 0xa97   : > { %v14585_v15 = vadd.f32 %v8272_v9, %v7910_v57  ;;  %9439 = vmatmul.f32.gmra.mxu3 %v17478_v40  ;;  %v17481_v9 = vld [vmem:[#allocation315_spill] sm:$0xff] }
 0xa98   : > { %9152 = vmatmul.f32.gmra.mxu2 %v17478_v40 }
 0xa9a   : > { %v7121_v31 = vpop.f32.mrf.mxu0  ;;  %v7414_v13 = vpop.f32.mrf.mxu1 }
 0xa9b   : > { %v7415_v29 = vadd.f32 %v7414_v13, %v7118_v7  ;;  %v7917_v20 = vpop.f32.mrf.mxu2  ;;  %v8276_v50 = vpop.f32.mrf.mxu3  ;;  %v7122_v57 = vadd.f32 %v7121_v31, %v14148_v23  ;;  %v17482_v13 = vld [vmem:[#allocation320_spill] sm:$0xff] }
 0xa9d   : > { %v7918_v55 = vadd.f32 %v7917_v20, %v7415_v29  ;;  %8377 = vmatmul.f32.gmra.mxu0 %v17479_v43  ;;  %8729 = vmatmul.f32.gmra.mxu1 %v17480_v32  ;;  %v17483_v29 = vld [vmem:[#allocation318_spill] sm:$0xff] }
 0xa9f   : > { %v14592_v38 = vadd.f32 %v8276_v50, %v7918_v55  ;;  %9443 = vmatmul.f32.gmra.mxu3 %v17481_v9  ;;  %v17484_v50 = vld [vmem:[#allocation319_spill] sm:$0xff] }
 0xaa0   : > { %9156 = vmatmul.f32.gmra.mxu2 %v17481_v9 }
 0xaa2   : > { %v7125_v48 = vpop.f32.mrf.mxu0  ;;  %v7418_v26 = vpop.f32.mrf.mxu1 }
 0xaa3   : > { %v7419_v21 = vadd.f32 %v7418_v26, %v7122_v57  ;;  %v7925_v2 = vpop.f32.mrf.mxu2  ;;  %v8280_v40 = vpop.f32.mrf.mxu3  ;;  %v7126_v55 = vadd.f32 %v7125_v48, %v14154_v4  ;;  %v17485_v26 = vld [vmem:[#allocation324_spill] sm:$0xff] }
 0xaa5   : > { %v7926_v7 = vadd.f32 %v7925_v2, %v7419_v21  ;;  %8382 = vmatmul.f32.gmra.mxu0 %v17482_v13  ;;  %8735 = vmatmul.f32.gmra.mxu1 %v17483_v29  ;;  %v17486_v21 = vld [vmem:[#allocation322_spill] sm:$0xff] }
 0xaa7   : > { %v14599_v20 = vadd.f32 %v8280_v40, %v7926_v7  ;;  %9447 = vmatmul.f32.gmra.mxu3 %v17484_v50  ;;  %v17487_v40 = vld [vmem:[#allocation323_spill] sm:$0xff] }
 0xaa8   : > { %9160 = vmatmul.f32.gmra.mxu2 %v17484_v50 }
 0xaaa   : > { %v7129_v43 = vpop.f32.mrf.mxu0  ;;  %v7422_v23 = vpop.f32.mrf.mxu1 }
 0xaab   : > { %v7423_v31 = vadd.f32 %v7422_v23, %v7126_v55  ;;  %v7933_v32 = vpop.f32.mrf.mxu2  ;;  %v8284_v9 = vpop.f32.mrf.mxu3  ;;  %v7130_v7 = vadd.f32 %v7129_v43, %v14160_v1  ;;  %v17488_v23 = vld [vmem:[#allocation328_spill] sm:$0xff] }
 0xaad   : > { %v7934_v57 = vadd.f32 %v7933_v32, %v7423_v31  ;;  %8387 = vmatmul.f32.gmra.mxu0 %v17485_v26  ;;  %8741 = vmatmul.f32.gmra.mxu1 %v17486_v21  ;;  %v17489_v31 = vld [vmem:[#allocation326_spill] sm:$0xff] }
 0xaaf   : > { %v14606_v2 = vadd.f32 %v8284_v9, %v7934_v57  ;;  %9451 = vmatmul.f32.gmra.mxu3 %v17487_v40  ;;  %v17490_v9 = vld [vmem:[#allocation327_spill] sm:$0xff] }
 0xab0   : > { %9164 = vmatmul.f32.gmra.mxu2 %v17487_v40 }
 0xab2   : > { %v7133_v13 = vpop.f32.mrf.mxu0  ;;  %v7426_v4 = vpop.f32.mrf.mxu1 }
 0xab3   : > { %v7427_v48 = vadd.f32 %v7426_v4, %v7130_v7  ;;  %v7941_v29 = vpop.f32.mrf.mxu2  ;;  %v8288_v50 = vpop.f32.mrf.mxu3  ;;  %v7134_v57 = vadd.f32 %v7133_v13, %v14166_v3  ;;  %v17491_v4 = vld [vmem:[#allocation332_spill] sm:$0xff] }
 0xab5   : > { %v7942_v55 = vadd.f32 %v7941_v29, %v7427_v48  ;;  %8392 = vmatmul.f32.gmra.mxu0 %v17488_v23  ;;  %8747 = vmatmul.f32.gmra.mxu1 %v17489_v31  ;;  %v17492_v48 = vld [vmem:[#allocation330_spill] sm:$0xff] }
 0xab7   : > { %v14613_v32 = vadd.f32 %v8288_v50, %v7942_v55  ;;  %9455 = vmatmul.f32.gmra.mxu3 %v17490_v9  ;;  %v17493_v50 = vld [vmem:[#allocation331_spill] sm:$0xff] }
 0xab8   : > { %9168 = vmatmul.f32.gmra.mxu2 %v17490_v9 }
 0xaba   : > { %v7137_v26 = vpop.f32.mrf.mxu0  ;;  %v7430_v1 = vpop.f32.mrf.mxu1 }
 0xabb   : > { %v7431_v43 = vadd.f32 %v7430_v1, %v7134_v57  ;;  %v7949_v21 = vpop.f32.mrf.mxu2  ;;  %v8292_v40 = vpop.f32.mrf.mxu3  ;;  %v7138_v55 = vadd.f32 %v7137_v26, %v14172_v37  ;;  %v17494_v1 = vld [vmem:[#allocation336_spill] sm:$0xff] }
 0xabd   : > { %v7950_v7 = vadd.f32 %v7949_v21, %v7431_v43  ;;  %8397 = vmatmul.f32.gmra.mxu0 %v17491_v4  ;;  %8753 = vmatmul.f32.gmra.mxu1 %v17492_v48  ;;  %v17495_v43 = vld [vmem:[#allocation334_spill] sm:$0xff] }
 0xabf   : > { %v14620_v29 = vadd.f32 %v8292_v40, %v7950_v7  ;;  %9459 = vmatmul.f32.gmra.mxu3 %v17493_v50  ;;  %v17496_v40 = vld [vmem:[#allocation335_spill] sm:$0xff] }
 0xac0   : > { %9172 = vmatmul.f32.gmra.mxu2 %v17493_v50 }
 0xac2   : > { %v7141_v23 = vpop.f32.mrf.mxu0  ;;  %v7434_v3 = vpop.f32.mrf.mxu1 }
 0xac3   : > { %v7435_v13 = vadd.f32 %v7434_v3, %v7138_v55  ;;  %v7957_v31 = vpop.f32.mrf.mxu2  ;;  %v8296_v9 = vpop.f32.mrf.mxu3  ;;  %v7142_v7 = vadd.f32 %v7141_v23, %v14178_v61  ;;  %v17497_v3 = vld [vmem:[#allocation340_spill] sm:$0xff] }
 0xac5   : > { %v7958_v57 = vadd.f32 %v7957_v31, %v7435_v13  ;;  %8402 = vmatmul.f32.gmra.mxu0 %v17494_v1  ;;  %8759 = vmatmul.f32.gmra.mxu1 %v17495_v43  ;;  %v17498_v13 = vld [vmem:[#allocation338_spill] sm:$0xff] }
 0xac7   : > { %v14627_v21 = vadd.f32 %v8296_v9, %v7958_v57  ;;  %9463 = vmatmul.f32.gmra.mxu3 %v17496_v40  ;;  %v17499_v9 = vld [vmem:[#allocation339_spill] sm:$0xff] }
 0xac8   : > { %9176 = vmatmul.f32.gmra.mxu2 %v17496_v40 }
 0xaca   : > { %v7145_v4 = vpop.f32.mrf.mxu0  ;;  %v7438_v37 = vpop.f32.mrf.mxu1 }
 0xacb   : > { %v7439_v26 = vadd.f32 %v7438_v37, %v7142_v7  ;;  %v7965_v48 = vpop.f32.mrf.mxu2  ;;  %v8300_v50 = vpop.f32.mrf.mxu3  ;;  %v7146_v57 = vadd.f32 %v7145_v4, %v14184_v49  ;;  %v17500_v37 = vld [vmem:[#allocation344_spill] sm:$0xff] }
 0xacd   : > { %v7966_v55 = vadd.f32 %v7965_v48, %v7439_v26  ;;  %8407 = vmatmul.f32.gmra.mxu0 %v17497_v3  ;;  %8765 = vmatmul.f32.gmra.mxu1 %v17498_v13  ;;  %v17501_v26 = vld [vmem:[#allocation342_spill] sm:$0xff] }
 0xacf   : > { %v14634_v31 = vadd.f32 %v8300_v50, %v7966_v55  ;;  %9467 = vmatmul.f32.gmra.mxu3 %v17499_v9  ;;  %v17502_v50 = vld [vmem:[#allocation343_spill] sm:$0xff] }
 0xad0   : > { %9180 = vmatmul.f32.gmra.mxu2 %v17499_v9 }
 0xad2   : > { %v7149_v1 = vpop.f32.mrf.mxu0  ;;  %v7442_v61 = vpop.f32.mrf.mxu1 }
 0xad3   : > { %v7443_v23 = vadd.f32 %v7442_v61, %v7146_v57  ;;  %v7973_v43 = vpop.f32.mrf.mxu2  ;;  %v8304_v40 = vpop.f32.mrf.mxu3  ;;  %v7150_v55 = vadd.f32 %v7149_v1, %v14190_v34  ;;  %v17503_v61 = vld [vmem:[#allocation348_spill] sm:$0xff] }
 0xad5   : > { %v7974_v7 = vadd.f32 %v7973_v43, %v7443_v23  ;;  %8412 = vmatmul.f32.gmra.mxu0 %v17500_v37  ;;  %8771 = vmatmul.f32.gmra.mxu1 %v17501_v26  ;;  %v17504_v23 = vld [vmem:[#allocation346_spill] sm:$0xff] }
 0xad7   : > { %v14641_v48 = vadd.f32 %v8304_v40, %v7974_v7  ;;  %9471 = vmatmul.f32.gmra.mxu3 %v17502_v50  ;;  %v17505_v40 = vld [vmem:[#allocation347_spill] sm:$0xff] }
 0xad8   : > { %9184 = vmatmul.f32.gmra.mxu2 %v17502_v50 }
 0xada   : > { %v7153_v3 = vpop.f32.mrf.mxu0  ;;  %v7446_v49 = vpop.f32.mrf.mxu1 }
 0xadb   : > { %v7447_v4 = vadd.f32 %v7446_v49, %v7150_v55  ;;  %v7981_v13 = vpop.f32.mrf.mxu2  ;;  %v8308_v9 = vpop.f32.mrf.mxu3  ;;  %v7154_v7 = vadd.f32 %v7153_v3, %v14196_v46  ;;  %v17506_v49 = vld [vmem:[#allocation352_spill] sm:$0xff] }
 0xadd   : > { %v7982_v57 = vadd.f32 %v7981_v13, %v7447_v4  ;;  %8417 = vmatmul.f32.gmra.mxu0 %v17503_v61  ;;  %8777 = vmatmul.f32.gmra.mxu1 %v17504_v23  ;;  %v17507_v4 = vld [vmem:[#allocation350_spill] sm:$0xff] }
 0xadf   : > { %v14648_v43 = vadd.f32 %v8308_v9, %v7982_v57  ;;  %9475 = vmatmul.f32.gmra.mxu3 %v17505_v40  ;;  %v17508_v9 = vld [vmem:[#allocation351_spill] sm:$0xff] }
 0xae0   : > { %9188 = vmatmul.f32.gmra.mxu2 %v17505_v40 }
 0xae2   : > { %v7157_v37 = vpop.f32.mrf.mxu0  ;;  %v7450_v34 = vpop.f32.mrf.mxu1 }
 0xae3   : > { %v7451_v1 = vadd.f32 %v7450_v34, %v7154_v7  ;;  %v7989_v26 = vpop.f32.mrf.mxu2  ;;  %v8312_v50 = vpop.f32.mrf.mxu3  ;;  %v7158_v57 = vadd.f32 %v7157_v37, %v14202_v62  ;;  %v17509_v34 = vld [vmem:[#allocation356_spill] sm:$0xff] }
 0xae5   : > { %v7990_v55 = vadd.f32 %v7989_v26, %v7451_v1  ;;  %8422 = vmatmul.f32.gmra.mxu0 %v17506_v49  ;;  %8783 = vmatmul.f32.gmra.mxu1 %v17507_v4  ;;  %v17510_v1 = vld [vmem:[#allocation354_spill] sm:$0xff] }
 0xae7   : > { %v14655_v13 = vadd.f32 %v8312_v50, %v7990_v55  ;;  %9479 = vmatmul.f32.gmra.mxu3 %v17508_v9  ;;  %v17511_v50 = vld [vmem:[#allocation355_spill] sm:$0xff] }
 0xae8   : > { %9192 = vmatmul.f32.gmra.mxu2 %v17508_v9 }
 0xaea   : > { %v7161_v61 = vpop.f32.mrf.mxu0  ;;  %v7454_v46 = vpop.f32.mrf.mxu1 }
 0xaeb   : > { %v7455_v3 = vadd.f32 %v7454_v46, %v7158_v57  ;;  %v7997_v23 = vpop.f32.mrf.mxu2  ;;  %v8316_v40 = vpop.f32.mrf.mxu3  ;;  %v7162_v55 = vadd.f32 %v7161_v61, %v14208_v60  ;;  %v17512_v46 = vld [vmem:[#allocation360_spill] sm:$0xff] }
 0xaed   : > { %v7998_v7 = vadd.f32 %v7997_v23, %v7455_v3  ;;  %8427 = vmatmul.f32.gmra.mxu0 %v17509_v34  ;;  %8789 = vmatmul.f32.gmra.mxu1 %v17510_v1  ;;  %v17513_v3 = vld [vmem:[#allocation358_spill] sm:$0xff] }
 0xaef   : > { %v14662_v26 = vadd.f32 %v8316_v40, %v7998_v7  ;;  %9483 = vmatmul.f32.gmra.mxu3 %v17511_v50 }
 0xaf0   : > { %9196 = vmatmul.f32.gmra.mxu2 %v17511_v50 }
 0xaf2   : > { %v7165_v49 = vpop.f32.mrf.mxu0  ;;  %v7458_v62 = vpop.f32.mrf.mxu1 }
 0xaf3   : > { %v7459_v37 = vadd.f32 %v7458_v62, %v7162_v55  ;;  %v8005_v4 = vpop.f32.mrf.mxu2  ;;  %v8320_v9 = vpop.f32.mrf.mxu3  ;;  %v7166_v40 = vadd.f32 %v7165_v49, %v14214_v6  ;;  %v17514_v55 = vld [vmem:[#allocation364_spill] sm:$0xff]  ;;  %v17515_v62 = vld [vmem:[#allocation362_spill] sm:$0xff] }
 0xaf5   : > { %v8006_v57 = vadd.f32 %v8005_v4, %v7459_v37  ;;  %8432 = vmatmul.f32.gmra.mxu0 %v17512_v46  ;;  %8795 = vmatmul.f32.gmra.mxu1 %v17513_v3  ;;  %v17516_v3 = vld [vmem:[#allocation368_spill] sm:$0xff] }
 0xaf7   : > { %v14669_v23 = vadd.f32 %v8320_v9, %v8006_v57  ;;  %9487 = vmatmul.f32.gmra.mxu3 %v17267_v30 }
 0xaf8   : > { %9200 = vmatmul.f32.gmra.mxu2 %v17267_v30 }
 0xafa   : > { %v7462_v7 = vpop.f32.mrf.mxu1  ;;  %v8358_v60 = vpop.f32.mrf.mxu0 }
 0xafb   : > { %v7463_v61 = vadd.f32 %v7462_v7, %v7166_v40  ;;  %v8013_v34 = vpop.f32.mrf.mxu2  ;;  %v8324_v1 = vpop.f32.mrf.mxu3  ;;  %v8359_v30 = vadd.f32 %v8358_v60, %v14221_v33  ;;  %v17517_v40 = vld [vmem:[#allocation366_spill] sm:$0xff] }
 0xafd   : > { %v8014_v50 = vadd.f32 %v8013_v34, %v7463_v61  ;;  %8437 = vmatmul.f32.gmra.mxu0 %v17514_v55  ;;  %8801 = vmatmul.f32.gmra.mxu1 %v17515_v62  ;;  %v17518_v55 = vld [vmem:[#allocation372_spill] sm:$0xff]  ;;  %v17519_v62 = vld [vmem:[#allocation370_spill] sm:$0xff] }
 0xaff   : > { %v14676_v37 = vadd.f32 %v8324_v1, %v8014_v50  ;;  %9491 = vmatmul.f32.gmra.mxu3 %v17269_v35 }
 0xb00   : > { %9204 = vmatmul.f32.gmra.mxu2 %v17269_v35 }
 0xb02   : > { %v8363_v6 = vpop.f32.mrf.mxu0  ;;  %v8712_v49 = vpop.f32.mrf.mxu1 }
 0xb03   : > { %v8713_v4 = vadd.f32 %v8712_v49, %v8359_v30  ;;  %v9141_v9 = vpop.f32.mrf.mxu2  ;;  %v9428_v57 = vpop.f32.mrf.mxu3  ;;  %v8364_v35 = vadd.f32 %v8363_v6, %v14228_v59 }
 0xb05   : > { %v9142_v46 = vadd.f32 %v9141_v9, %v8713_v4  ;;  %8442 = vmatmul.f32.gmra.mxu0 %v17516_v3  ;;  %8807 = vmatmul.f32.gmra.mxu1 %v17517_v40  ;;  %v17521_v3 = vld [vmem:[#allocation374_spill] sm:$0xff] }
 0xb07   : > { %v9429_v7 = vadd.f32 %v9428_v57, %v9142_v46  ;;  %9495 = vmatmul.f32.gmra.mxu3 %v17271_v19  ;;  %v17520_v46 = vld [vmem:[#allocation376_spill] sm:$0xff] }
 0xb08   : > { %9208 = vmatmul.f32.gmra.mxu2 %v17271_v19 }
 0xb09   : > { %9693 = vst.msk [vmem:[%s13121_s21 + $0x8] sm:$0xff] %vm9692_vm1, %v9429_v7 }
 0xb0a   : > { %v8368_v33 = vpop.f32.mrf.mxu0  ;;  %v8718_v60 = vpop.f32.mrf.mxu1 }
 0xb0b   : > { %v8719_v61 = vadd.f32 %v8718_v60, %v8364_v35  ;;  %v9145_v34 = vpop.f32.mrf.mxu2  ;;  %v9432_v1 = vpop.f32.mrf.mxu3  ;;  %v8369_v19 = vadd.f32 %v8368_v33, %v14235_v12 }
 0xb0d   : > { %v9146_v50 = vadd.f32 %v9145_v34, %v8719_v61  ;;  %8447 = vmatmul.f32.gmra.mxu0 %v17518_v55  ;;  %8813 = vmatmul.f32.gmra.mxu1 %v17519_v62  ;;  %v17522_v34 = vld [vmem:[#allocation380_spill] sm:$0xff] }
 0xb0f   : > { %v9433_v30 = vadd.f32 %v9432_v1, %v9146_v50  ;;  %9499 = vmatmul.f32.gmra.mxu3 %v17273_v39  ;;  %v17523_v1 = vld [vmem:[#allocation378_spill] sm:$0xff] }
 0xb10   : > { %9212 = vmatmul.f32.gmra.mxu2 %v17273_v39 }
 0xb11   : > { %9695 = vst.msk [vmem:[%s13121_s21 + $0x18] sm:$0xff] %vm9692_vm1, %v9433_v30 }
 0xb12   : > { %v8373_v59 = vpop.f32.mrf.mxu0  ;;  %v8724_v6 = vpop.f32.mrf.mxu1 }
 0xb13   : > { %v8725_v49 = vadd.f32 %v8724_v6, %v8369_v19  ;;  %v9149_v4 = vpop.f32.mrf.mxu2  ;;  %v9436_v9 = vpop.f32.mrf.mxu3  ;;  %v8374_v39 = vadd.f32 %v8373_v59, %v14242_v45  ;;  %v17524_v6 = vld [vmem:[#allocation384_spill] sm:$0xff] }
 0xb15   : > { %v9150_v57 = vadd.f32 %v9149_v4, %v8725_v49  ;;  %8452 = vmatmul.f32.gmra.mxu0 %v17520_v46  ;;  %8819 = vmatmul.f32.gmra.mxu1 %v17521_v3  ;;  %v17525_v49 = vld [vmem:[#allocation382_spill] sm:$0xff] }
 0xb17   : > { %v9437_v40 = vadd.f32 %v9436_v9, %v9150_v57  ;;  %9503 = vmatmul.f32.gmra.mxu3 %v17275_v51 }
 0xb18   : > { %9216 = vmatmul.f32.gmra.mxu2 %v17275_v51 }
 0xb19   : > { %9697 = vst.msk [vmem:[%s13121_s21 + $0x28] sm:$0xff] %vm9692_vm1, %v9437_v40 }
 0xb1a   : > { %v8378_v12 = vpop.f32.mrf.mxu0  ;;  %v8730_v7 = vpop.f32.mrf.mxu1 }
 0xb1b   : > { %v8731_v35 = vadd.f32 %v8730_v7, %v8374_v39  ;;  %v9153_v33 = vpop.f32.mrf.mxu2  ;;  %v9440_v60 = vpop.f32.mrf.mxu3  ;;  %v8379_v51 = vadd.f32 %v8378_v12, %v14249_v10  ;;  %v17526_v39 = vld [vmem:[#allocation388_spill] sm:$0xff]  ;;  %v17527_v12 = vld [vmem:[#allocation386_spill] sm:$0xff] }
 0xb1d   : > { %v9154_v61 = vadd.f32 %v9153_v33, %v8731_v35  ;;  %8457 = vmatmul.f32.gmra.mxu0 %v17522_v34  ;;  %8825 = vmatmul.f32.gmra.mxu1 %v17523_v1  ;;  %v17528_v1 = vld [vmem:[#allocation392_spill] sm:$0xff] }
 0xb1f   : > { %v9441_v50 = vadd.f32 %v9440_v60, %v9154_v61  ;;  %9507 = vmatmul.f32.gmra.mxu3 %v17277_v42 }
 0xb20   : > { %9220 = vmatmul.f32.gmra.mxu2 %v17277_v42 }
 0xb21   : > { %9699 = vst.msk [vmem:[%s13121_s21 + $0x38] sm:$0xff] %vm9692_vm1, %v9441_v50  ;;  %v17529_v50 = vld [vmem:[#allocation390_spill] sm:$0xff] }
 0xb22   : > { %v8383_v45 = vpop.f32.mrf.mxu0  ;;  %v8736_v55 = vpop.f32.mrf.mxu1 }
 0xb23   : > { %v8737_v62 = vadd.f32 %v8736_v55, %v8379_v51  ;;  %v9157_v30 = vpop.f32.mrf.mxu2  ;;  %v9444_v19 = vpop.f32.mrf.mxu3  ;;  %v8384_v42 = vadd.f32 %v8383_v45, %v14256_v5 }
 0xb25   : > { %v9158_v59 = vadd.f32 %v9157_v30, %v8737_v62  ;;  %8462 = vmatmul.f32.gmra.mxu0 %v17524_v6  ;;  %8831 = vmatmul.f32.gmra.mxu1 %v17525_v49  ;;  %v17531_v6 = vld [vmem:[#allocation394_spill] sm:$0xff] }
 0xb27   : > { %v9445_v4 = vadd.f32 %v9444_v19, %v9158_v59  ;;  %9511 = vmatmul.f32.gmra.mxu3 %v17279_v17  ;;  %v17530_v59 = vld [vmem:[#allocation396_spill] sm:$0xff] }
 0xb28   : > { %9224 = vmatmul.f32.gmra.mxu2 %v17279_v17 }
 0xb29   : > { %9701 = vst.msk [vmem:[%s13121_s21 + $0x48] sm:$0xff] %vm9692_vm1, %v9445_v4  ;;  %v17532_v4 = vld [vmem:[#allocation395_spill] sm:$0xff] }
 0xb2a   : > { %v8388_v10 = vpop.f32.mrf.mxu0  ;;  %v8742_v9 = vpop.f32.mrf.mxu1 }
 0xb2b   : > { %v8743_v57 = vadd.f32 %v8742_v9, %v8384_v42  ;;  %v9161_v46 = vpop.f32.mrf.mxu2  ;;  %v9448_v3 = vpop.f32.mrf.mxu3  ;;  %v8389_v17 = vadd.f32 %v8388_v10, %v14263_v56 }
 0xb2d   : > { %v9162_v40 = vadd.f32 %v9161_v46, %v8743_v57  ;;  %8467 = vmatmul.f32.gmra.mxu0 %v17526_v39  ;;  %8837 = vmatmul.f32.gmra.mxu1 %v17527_v12  ;;  %v17535_v39 = vld [vmem:[#allocation398_spill] sm:$0xff] }
 0xb2f   : > { %v9449_v7 = vadd.f32 %v9448_v3, %v9162_v40  ;;  %9515 = vmatmul.f32.gmra.mxu3 %v17281_v16  ;;  %v17534_v40 = vld [vmem:[#allocation401_spill] sm:$0xff] }
 0xb30   : > { %9228 = vmatmul.f32.gmra.mxu2 %v17281_v16 }
 0xb31   : > { %9703 = vst.msk [vmem:[%s13121_s21 + $0x58] sm:$0xff] %vm9692_vm1, %v9449_v7  ;;  %v17536_v7 = vld [vmem:[#allocation399_spill] sm:$0xff] }
 0xb32   : > { %v8393_v5 = vpop.f32.mrf.mxu0  ;;  %v8748_v35 = vpop.f32.mrf.mxu1 }
 0xb33   : > { %v8749_v33 = vadd.f32 %v8748_v35, %v8389_v17  ;;  %v9165_v60 = vpop.f32.mrf.mxu2  ;;  %v9452_v61 = vpop.f32.mrf.mxu3  ;;  %v8394_v16 = vadd.f32 %v8393_v5, %v14270_v53  ;;  %v17537_v17 = vld [vmem:[#allocation566_spill] sm:$0xff] }
 0xb35   : > { %v9166_v34 = vadd.f32 %v9165_v60, %v8749_v33  ;;  %8472 = vmatmul.f32.gmra.mxu0 %v17528_v1  ;;  %8843 = vmatmul.f32.gmra.mxu1 %v17529_v50  ;;  %v17538_v50 = vld [vmem:[#allocation405_spill] sm:$0xff] }
 0xb37   : > { %v9453_v51 = vadd.f32 %v9452_v61, %v9166_v34  ;;  %9519 = vmatmul.f32.gmra.mxu3 %v17283_v47 }
 0xb38   : > { %9232 = vmatmul.f32.gmra.mxu2 %v17283_v47  ;;  %v17533_v47 = vld [vmem:[#allocation561_spill] sm:$0xff] }
 0xb39   : > { %9705 = vst.msk [vmem:[%s13121_s21 + $0x68] sm:$0xff] %vm9692_vm1, %v9453_v51  ;;  %v17539_v51 = vld [vmem:[#allocation402_spill] sm:$0xff] }
 0xb3a   : > { %v8398_v56 = vpop.f32.mrf.mxu0  ;;  %v8754_v45 = vpop.f32.mrf.mxu1 }
 0xb3b   : > { %v8755_v55 = vadd.f32 %v8754_v45, %v8394_v16  ;;  %v9169_v62 = vpop.f32.mrf.mxu2  ;;  %v9456_v30 = vpop.f32.mrf.mxu3  ;;  %v8399_v53 = vadd.f32 %v8398_v56, %v17533_v47  ;;  %v17540_v56 = vld [vmem:[#allocation403_spill] sm:$0xff]  ;;  %v17543_v47 = vld [vmem:[#allocation406_spill] sm:$0xff] }
 0xb3c   : > { %v17541_v45 = vld [vmem:[#allocation7_spill] sm:$0xff] }
 0xb3d   : > { %v9170_v19 = vadd.f32 %v9169_v62, %v8755_v55  ;;  %8477 = vmatmul.f32.gmra.mxu0 %v17530_v59  ;;  %8849 = vmatmul.f32.gmra.mxu1 %v17531_v6 }
 0xb3f   : > { %v9457_v49 = vadd.f32 %v9456_v30, %v9170_v19  ;;  %9523 = vmatmul.f32.gmra.mxu3 %v17532_v4 }
 0xb40   : > { %9236 = vmatmul.f32.gmra.mxu2 %v17532_v4  ;;  %v17542_v4 = vld [vmem:[#allocation409_spill] sm:$0xff] }
 0xb41   : > { %9707 = vst.msk [vmem:[%s13121_s21 + $0x78] sm:$0xff] %vm9692_vm1, %v9457_v49 }
 0xb42   : > { %v8403_v42 = vpop.f32.mrf.mxu0  ;;  %v8760_v10 = vpop.f32.mrf.mxu1 }
 0xb43   : > { %v8761_v9 = vadd.f32 %v8760_v10, %v8399_v53  ;;  %v9173_v57 = vpop.f32.mrf.mxu2  ;;  %v9460_v46 = vpop.f32.mrf.mxu3  ;;  %v8404_v5 = vadd.f32 %v8403_v42, %v17537_v17  ;;  %v17544_v42 = vld [vmem:[#allocation407_spill] sm:$0xff]  ;;  %v17545_v10 = vld [vmem:[#allocation4_spill] sm:$0xff]  ;;  %v17547_v17 = vld [vmem:[#allocation410_spill] sm:$0xff] }
 0xb45   : > { %v9174_v3 = vadd.f32 %v9173_v57, %v8761_v9  ;;  %8482 = vmatmul.f32.gmra.mxu0 %v17534_v40  ;;  %8855 = vmatmul.f32.gmra.mxu1 %v17535_v39 }
 0xb47   : > { %v9461_v12 = vadd.f32 %v9460_v46, %v9174_v3  ;;  %9527 = vmatmul.f32.gmra.mxu3 %v17536_v7 }
 0xb48   : > { %9240 = vmatmul.f32.gmra.mxu2 %v17536_v7  ;;  %v17546_v7 = vld [vmem:[#allocation413_spill] sm:$0xff] }
 0xb49   : > { %9709 = vst.msk [vmem:[%s13121_s21 + $0x88] sm:$0xff] %vm9692_vm1, %v9461_v12 }
 0xb4a   : > { %v8408_v35 = vpop.f32.mrf.mxu0  ;;  %v8766_v33 = vpop.f32.mrf.mxu1 }
 0xb4b   : > { %v8767_v60 = vadd.f32 %v8766_v33, %v8404_v5  ;;  %v9177_v61 = vpop.f32.mrf.mxu2  ;;  %v9464_v34 = vpop.f32.mrf.mxu3  ;;  %v8409_v55 = vadd.f32 %v8408_v35, %v17541_v45  ;;  %v17548_v35 = vld [vmem:[#allocation411_spill] sm:$0xff]  ;;  %v17551_v45 = vld [vmem:[#allocation414_spill] sm:$0xff] }
 0xb4c   : > { %v17549_v33 = vld [vmem:[#allocation3_spill] sm:$0xff] }
 0xb4d   : > { %v9178_v1 = vadd.f32 %v9177_v61, %v8767_v60  ;;  %8487 = vmatmul.f32.gmra.mxu0 %v17538_v50  ;;  %8861 = vmatmul.f32.gmra.mxu1 %v17539_v51 }
 0xb4f   : > { %v9465_v16 = vadd.f32 %v9464_v34, %v9178_v1  ;;  %9531 = vmatmul.f32.gmra.mxu3 %v17540_v56 }
 0xb50   : > { %9244 = vmatmul.f32.gmra.mxu2 %v17540_v56  ;;  %v17550_v56 = vld [vmem:[#allocation417_spill] sm:$0xff] }
 0xb51   : > { %9711 = vst.msk [vmem:[%s13121_s21 + $0x98] sm:$0xff] %vm9692_vm1, %v9465_v16 }
 0xb52   : > { %v8413_v62 = vpop.f32.mrf.mxu0  ;;  %v8772_v30 = vpop.f32.mrf.mxu1 }
 0xb53   : > { %v8773_v19 = vadd.f32 %v8772_v30, %v8409_v55  ;;  %v9181_v59 = vpop.f32.mrf.mxu2  ;;  %v9468_v6 = vpop.f32.mrf.mxu3  ;;  %v8414_v9 = vadd.f32 %v8413_v62, %v17545_v10  ;;  %v17552_v62 = vld [vmem:[#allocation415_spill] sm:$0xff]  ;;  %v17555_v10 = vld [vmem:[#allocation418_spill] sm:$0xff] }
 0xb54   : > { %v17553_v30 = vld [vmem:[#allocation567_spill] sm:$0xff] }
 0xb55   : > { %v9182_v49 = vadd.f32 %v9181_v59, %v8773_v19  ;;  %8492 = vmatmul.f32.gmra.mxu0 %v17542_v4  ;;  %8867 = vmatmul.f32.gmra.mxu1 %v17543_v47 }
 0xb57   : > { %v9469_v53 = vadd.f32 %v9468_v6, %v9182_v49  ;;  %9535 = vmatmul.f32.gmra.mxu3 %v17544_v42 }
 0xb58   : > { %9248 = vmatmul.f32.gmra.mxu2 %v17544_v42  ;;  %v17554_v42 = vld [vmem:[#allocation421_spill] sm:$0xff] }
 0xb59   : > { %9713 = vst.msk [vmem:[%s13121_s21 + $0xa8] sm:$0xff] %vm9692_vm1, %v9469_v53 }
 0xb5a   : > { %v8418_v57 = vpop.f32.mrf.mxu0  ;;  %v8778_v46 = vpop.f32.mrf.mxu1 }
 0xb5b   : > { %v8779_v3 = vadd.f32 %v8778_v46, %v8414_v9  ;;  %v9185_v40 = vpop.f32.mrf.mxu2  ;;  %v9472_v39 = vpop.f32.mrf.mxu3  ;;  %v8419_v60 = vadd.f32 %v8418_v57, %v17549_v33  ;;  %v17556_v57 = vld [vmem:[#allocation419_spill] sm:$0xff]  ;;  %v17559_v33 = vld [vmem:[#allocation422_spill] sm:$0xff] }
 0xb5c   : > { %v17557_v46 = vld [vmem:[#allocation11_spill] sm:$0xff] }
 0xb5d   : > { %v9186_v12 = vadd.f32 %v9185_v40, %v8779_v3  ;;  %8497 = vmatmul.f32.gmra.mxu0 %v17546_v7  ;;  %8873 = vmatmul.f32.gmra.mxu1 %v17547_v17 }
 0xb5f   : > { %v9473_v5 = vadd.f32 %v9472_v39, %v9186_v12  ;;  %9539 = vmatmul.f32.gmra.mxu3 %v17548_v35 }
 0xb60   : > { %9252 = vmatmul.f32.gmra.mxu2 %v17548_v35  ;;  %v17558_v35 = vld [vmem:[#allocation425_spill] sm:$0xff] }
 0xb61   : > { %9715 = vst.msk [vmem:[%s13121_s21 + $0xb8] sm:$0xff] %vm9692_vm1, %v9473_v5 }
 0xb62   : > { %v8423_v61 = vpop.f32.mrf.mxu0  ;;  %v8784_v34 = vpop.f32.mrf.mxu1 }
 0xb63   : > { %v8785_v1 = vadd.f32 %v8784_v34, %v8419_v60  ;;  %v9189_v50 = vpop.f32.mrf.mxu2  ;;  %v9476_v51 = vpop.f32.mrf.mxu3  ;;  %v8424_v19 = vadd.f32 %v8423_v61, %v17553_v30  ;;  %v17560_v61 = vld [vmem:[#allocation423_spill] sm:$0xff]  ;;  %v17561_v34 = vld [vmem:[#allocation2_spill] sm:$0xff] }
 0xb64   : > { %v17563_v30 = vld [vmem:[#allocation426_spill] sm:$0xff] }
 0xb65   : > { %v9190_v16 = vadd.f32 %v9189_v50, %v8785_v1  ;;  %8502 = vmatmul.f32.gmra.mxu0 %v17550_v56  ;;  %8879 = vmatmul.f32.gmra.mxu1 %v17551_v45 }
 0xb67   : > { %v9477_v55 = vadd.f32 %v9476_v51, %v9190_v16  ;;  %9543 = vmatmul.f32.gmra.mxu3 %v17552_v62 }
 0xb68   : > { %9256 = vmatmul.f32.gmra.mxu2 %v17552_v62  ;;  %v17562_v62 = vld [vmem:[#allocation429_spill] sm:$0xff] }
 0xb69   : > { %9717 = vst.msk [vmem:[%s13121_s21 + $0xc8] sm:$0xff] %vm9692_vm1, %v9477_v55 }
 0xb6a   : > { %v8428_v59 = vpop.f32.mrf.mxu0  ;;  %v8790_v6 = vpop.f32.mrf.mxu1 }
 0xb6b   : > { %v8791_v49 = vadd.f32 %v8790_v6, %v8424_v19  ;;  %v9193_v4 = vpop.f32.mrf.mxu2  ;;  %v9480_v47 = vpop.f32.mrf.mxu3  ;;  %v8429_v3 = vadd.f32 %v8428_v59, %v17557_v46  ;;  %v17564_v59 = vld [vmem:[#allocation427_spill] sm:$0xff]  ;;  %v17565_v6 = vld [vmem:[#allocation8_spill] sm:$0xff]  ;;  %v17567_v46 = vld [vmem:[#allocation430_spill] sm:$0xff] }
 0xb6d   : > { %v9194_v53 = vadd.f32 %v9193_v4, %v8791_v49  ;;  %8507 = vmatmul.f32.gmra.mxu0 %v17554_v42  ;;  %8885 = vmatmul.f32.gmra.mxu1 %v17555_v10 }
 0xb6f   : > { %v9481_v9 = vadd.f32 %v9480_v47, %v9194_v53  ;;  %9547 = vmatmul.f32.gmra.mxu3 %v17556_v57 }
 0xb70   : > { %9260 = vmatmul.f32.gmra.mxu2 %v17556_v57  ;;  %v17566_v57 = vld [vmem:[#allocation433_spill] sm:$0xff] }
 0xb71   : > { %9719 = vst.msk [vmem:[%s13121_s21 + $0xd8] sm:$0xff] %vm9692_vm1, %v9481_v9 }
 0xb72   : > { %v8433_v40 = vpop.f32.mrf.mxu0  ;;  %v8796_v39 = vpop.f32.mrf.mxu1 }
 0xb73   : > { %v8797_v12 = vadd.f32 %v8796_v39, %v8429_v3  ;;  %v9197_v7 = vpop.f32.mrf.mxu2  ;;  %v9484_v17 = vpop.f32.mrf.mxu3  ;;  %v8434_v1 = vadd.f32 %v8433_v40, %v17561_v34  ;;  %v17568_v40 = vld [vmem:[#allocation431_spill] sm:$0xff]  ;;  %v17569_v39 = vld [vmem:[#allocation6_spill] sm:$0xff] }
 0xb74   : > { %v17571_v34 = vld [vmem:[#allocation434_spill] sm:$0xff] }
 0xb75   : > { %v9198_v5 = vadd.f32 %v9197_v7, %v8797_v12  ;;  %8512 = vmatmul.f32.gmra.mxu0 %v17558_v35  ;;  %8891 = vmatmul.f32.gmra.mxu1 %v17559_v33 }
 0xb77   : > { %v9485_v60 = vadd.f32 %v9484_v17, %v9198_v5  ;;  %9551 = vmatmul.f32.gmra.mxu3 %v17560_v61 }
 0xb78   : > { %9264 = vmatmul.f32.gmra.mxu2 %v17560_v61  ;;  %v17570_v61 = vld [vmem:[#allocation437_spill] sm:$0xff] }
 0xb79   : > { %9721 = vst.msk [vmem:[%s13121_s21 + $0xe8] sm:$0xff] %vm9692_vm1, %v9485_v60 }
 0xb7a   : > { %v8438_v50 = vpop.f32.mrf.mxu0  ;;  %v8802_v51 = vpop.f32.mrf.mxu1 }
 0xb7b   : > { %v8803_v16 = vadd.f32 %v8802_v51, %v8434_v1  ;;  %v9201_v56 = vpop.f32.mrf.mxu2  ;;  %v9488_v45 = vpop.f32.mrf.mxu3  ;;  %v8439_v49 = vadd.f32 %v8438_v50, %v17565_v6  ;;  %v17572_v50 = vld [vmem:[#allocation435_spill] sm:$0xff]  ;;  %v17575_v6 = vld [vmem:[#allocation438_spill] sm:$0xff] }
 0xb7c   : > { %v17573_v51 = vld [vmem:[#allocation15_spill] sm:$0xff] }
 0xb7d   : > { %v9202_v55 = vadd.f32 %v9201_v56, %v8803_v16  ;;  %8517 = vmatmul.f32.gmra.mxu0 %v17562_v62  ;;  %8897 = vmatmul.f32.gmra.mxu1 %v17563_v30 }
 0xb7f   : > { %v9489_v19 = vadd.f32 %v9488_v45, %v9202_v55  ;;  %9555 = vmatmul.f32.gmra.mxu3 %v17564_v59 }
 0xb80   : > { %9268 = vmatmul.f32.gmra.mxu2 %v17564_v59  ;;  %v17574_v59 = vld [vmem:[#allocation441_spill] sm:$0xff] }
 0xb81   : > { %9723 = vst.msk [vmem:[%s13121_s21 + $0xf8] sm:$0xff] %vm9692_vm1, %v9489_v19 }
 0xb82   : > { %v8443_v4 = vpop.f32.mrf.mxu0  ;;  %v8808_v47 = vpop.f32.mrf.mxu1 }
 0xb83   : > { %v8809_v53 = vadd.f32 %v8808_v47, %v8439_v49  ;;  %v9205_v42 = vpop.f32.mrf.mxu2  ;;  %v9492_v10 = vpop.f32.mrf.mxu3  ;;  %v8444_v12 = vadd.f32 %v8443_v4, %v17569_v39  ;;  %v17576_v4 = vld [vmem:[#allocation439_spill] sm:$0xff]  ;;  %v17577_v47 = vld [vmem:[#allocation5_spill] sm:$0xff]  ;;  %v17579_v39 = vld [vmem:[#allocation442_spill] sm:$0xff] }
 0xb85   : > { %v9206_v9 = vadd.f32 %v9205_v42, %v8809_v53  ;;  %8522 = vmatmul.f32.gmra.mxu0 %v17566_v57  ;;  %8903 = vmatmul.f32.gmra.mxu1 %v17567_v46 }
 0xb87   : > { %v9493_v3 = vadd.f32 %v9492_v10, %v9206_v9  ;;  %9559 = vmatmul.f32.gmra.mxu3 %v17568_v40 }
 0xb88   : > { %9272 = vmatmul.f32.gmra.mxu2 %v17568_v40  ;;  %v17578_v40 = vld [vmem:[#allocation445_spill] sm:$0xff] }
 0xb89   : > { %9725 = vst.msk [vmem:[%s13121_s21 + $0x108] sm:$0xff] %vm9692_vm1, %v9493_v3 }
 0xb8a   : > { %v8448_v7 = vpop.f32.mrf.mxu0  ;;  %v8814_v17 = vpop.f32.mrf.mxu1 }
 0xb8b   : > { %v8815_v5 = vadd.f32 %v8814_v17, %v8444_v12  ;;  %v9209_v35 = vpop.f32.mrf.mxu2  ;;  %v9496_v33 = vpop.f32.mrf.mxu3  ;;  %v8449_v16 = vadd.f32 %v8448_v7, %v17573_v51  ;;  %v17580_v7 = vld [vmem:[#allocation443_spill] sm:$0xff]  ;;  %v17581_v17 = vld [vmem:[#allocation12_spill] sm:$0xff]  ;;  %v17583_v51 = vld [vmem:[#allocation446_spill] sm:$0xff] }
 0xb8d   : > { %v9210_v60 = vadd.f32 %v9209_v35, %v8815_v5  ;;  %8527 = vmatmul.f32.gmra.mxu0 %v17570_v61  ;;  %8909 = vmatmul.f32.gmra.mxu1 %v17571_v34 }
 0xb8f   : > { %v9497_v1 = vadd.f32 %v9496_v33, %v9210_v60  ;;  %9563 = vmatmul.f32.gmra.mxu3 %v17572_v50 }
 0xb90   : > { %9276 = vmatmul.f32.gmra.mxu2 %v17572_v50  ;;  %v17582_v50 = vld [vmem:[#allocation449_spill] sm:$0xff] }
 0xb91   : > { %9727 = vst.msk [vmem:[%s13121_s21 + $0x118] sm:$0xff] %vm9692_vm1, %v9497_v1 }
 0xb92   : > { %v8453_v56 = vpop.f32.mrf.mxu0  ;;  %v8820_v45 = vpop.f32.mrf.mxu1 }
 0xb93   : > { %v8821_v55 = vadd.f32 %v8820_v45, %v8449_v16  ;;  %v9213_v62 = vpop.f32.mrf.mxu2  ;;  %v9500_v30 = vpop.f32.mrf.mxu3  ;;  %v8454_v53 = vadd.f32 %v8453_v56, %v17577_v47  ;;  %v17584_v56 = vld [vmem:[#allocation447_spill] sm:$0xff]  ;;  %v17585_v45 = vld [vmem:[#allocation10_spill] sm:$0xff] }
 0xb94   : > { %v17587_v47 = vld [vmem:[#allocation450_spill] sm:$0xff] }
 0xb95   : > { %v9214_v19 = vadd.f32 %v9213_v62, %v8821_v55  ;;  %8532 = vmatmul.f32.gmra.mxu0 %v17574_v59  ;;  %8915 = vmatmul.f32.gmra.mxu1 %v17575_v6 }
 0xb97   : > { %v9501_v49 = vadd.f32 %v9500_v30, %v9214_v19  ;;  %9567 = vmatmul.f32.gmra.mxu3 %v17576_v4 }
 0xb98   : > { %9280 = vmatmul.f32.gmra.mxu2 %v17576_v4  ;;  %v17586_v4 = vld [vmem:[#allocation453_spill] sm:$0xff] }
 0xb99   : > { %9729 = vst.msk [vmem:[%s13121_s21 + $0x128] sm:$0xff] %vm9692_vm1, %v9501_v49 }
 0xb9a   : > { %v8458_v42 = vpop.f32.mrf.mxu0  ;;  %v8826_v10 = vpop.f32.mrf.mxu1 }
 0xb9b   : > { %v8827_v9 = vadd.f32 %v8826_v10, %v8454_v53  ;;  %v9217_v57 = vpop.f32.mrf.mxu2  ;;  %v9504_v46 = vpop.f32.mrf.mxu3  ;;  %v8459_v5 = vadd.f32 %v8458_v42, %v17581_v17  ;;  %v17588_v42 = vld [vmem:[#allocation451_spill] sm:$0xff]  ;;  %v17591_v17 = vld [vmem:[#allocation454_spill] sm:$0xff] }
 0xb9c   : > { %v17589_v10 = vld [vmem:[#allocation19_spill] sm:$0xff] }
 0xb9d   : > { %v9218_v3 = vadd.f32 %v9217_v57, %v8827_v9  ;;  %8537 = vmatmul.f32.gmra.mxu0 %v17578_v40  ;;  %8921 = vmatmul.f32.gmra.mxu1 %v17579_v39 }
 0xb9f   : > { %v9505_v12 = vadd.f32 %v9504_v46, %v9218_v3  ;;  %9571 = vmatmul.f32.gmra.mxu3 %v17580_v7 }
 0xba0   : > { %9284 = vmatmul.f32.gmra.mxu2 %v17580_v7  ;;  %v17590_v7 = vld [vmem:[#allocation457_spill] sm:$0xff] }
 0xba1   : > { %9731 = vst.msk [vmem:[%s13121_s21 + $0x138] sm:$0xff] %vm9692_vm1, %v9505_v12 }
 0xba2   : > { %v8463_v35 = vpop.f32.mrf.mxu0  ;;  %v8832_v33 = vpop.f32.mrf.mxu1 }
 0xba3   : > { %v8833_v60 = vadd.f32 %v8832_v33, %v8459_v5  ;;  %v9221_v61 = vpop.f32.mrf.mxu2  ;;  %v9508_v34 = vpop.f32.mrf.mxu3  ;;  %v8464_v55 = vadd.f32 %v8463_v35, %v17585_v45  ;;  %v17592_v35 = vld [vmem:[#allocation455_spill] sm:$0xff]  ;;  %v17593_v33 = vld [vmem:[#allocation9_spill] sm:$0xff]  ;;  %v17595_v45 = vld [vmem:[#allocation458_spill] sm:$0xff] }
 0xba5   : > { %v9222_v1 = vadd.f32 %v9221_v61, %v8833_v60  ;;  %8542 = vmatmul.f32.gmra.mxu0 %v17582_v50  ;;  %8927 = vmatmul.f32.gmra.mxu1 %v17583_v51 }
 0xba7   : > { %v9509_v16 = vadd.f32 %v9508_v34, %v9222_v1  ;;  %9575 = vmatmul.f32.gmra.mxu3 %v17584_v56 }
 0xba8   : > { %9288 = vmatmul.f32.gmra.mxu2 %v17584_v56  ;;  %v17594_v56 = vld [vmem:[#allocation461_spill] sm:$0xff] }
 0xba9   : > { %9733 = vst.msk [vmem:[%s13121_s21 + $0x148] sm:$0xff] %vm9692_vm1, %v9509_v16 }
 0xbaa   : > { %v8468_v62 = vpop.f32.mrf.mxu0  ;;  %v8838_v30 = vpop.f32.mrf.mxu1 }
 0xbab   : > { %v8839_v19 = vadd.f32 %v8838_v30, %v8464_v55  ;;  %v9225_v59 = vpop.f32.mrf.mxu2  ;;  %v9512_v6 = vpop.f32.mrf.mxu3  ;;  %v8469_v9 = vadd.f32 %v8468_v62, %v17589_v10  ;;  %v17596_v62 = vld [vmem:[#allocation459_spill] sm:$0xff]  ;;  %v17597_v30 = vld [vmem:[#allocation16_spill] sm:$0xff]  ;;  %v17599_v10 = vld [vmem:[#allocation462_spill] sm:$0xff] }
 0xbad   : > { %v9226_v49 = vadd.f32 %v9225_v59, %v8839_v19  ;;  %8547 = vmatmul.f32.gmra.mxu0 %v17586_v4  ;;  %8933 = vmatmul.f32.gmra.mxu1 %v17587_v47 }
 0xbaf   : > { %v9513_v53 = vadd.f32 %v9512_v6, %v9226_v49  ;;  %9579 = vmatmul.f32.gmra.mxu3 %v17588_v42 }
 0xbb0   : > { %9292 = vmatmul.f32.gmra.mxu2 %v17588_v42  ;;  %v17598_v42 = vld [vmem:[#allocation465_spill] sm:$0xff] }
 0xbb1   : > { %9735 = vst.msk [vmem:[%s13121_s21 + $0x158] sm:$0xff] %vm9692_vm1, %v9513_v53 }
 0xbb2   : > { %v8473_v57 = vpop.f32.mrf.mxu0  ;;  %v8844_v46 = vpop.f32.mrf.mxu1 }
 0xbb3   : > { %v8845_v3 = vadd.f32 %v8844_v46, %v8469_v9  ;;  %v9229_v40 = vpop.f32.mrf.mxu2  ;;  %v9516_v39 = vpop.f32.mrf.mxu3  ;;  %v8474_v60 = vadd.f32 %v8473_v57, %v17593_v33  ;;  %v17600_v57 = vld [vmem:[#allocation463_spill] sm:$0xff]  ;;  %v17601_v46 = vld [vmem:[#allocation14_spill] sm:$0xff] }
 0xbb4   : > { %v17603_v33 = vld [vmem:[#allocation466_spill] sm:$0xff] }
 0xbb5   : > { %v9230_v12 = vadd.f32 %v9229_v40, %v8845_v3  ;;  %8552 = vmatmul.f32.gmra.mxu0 %v17590_v7  ;;  %8939 = vmatmul.f32.gmra.mxu1 %v17591_v17 }
 0xbb7   : > { %v9517_v5 = vadd.f32 %v9516_v39, %v9230_v12  ;;  %9583 = vmatmul.f32.gmra.mxu3 %v17592_v35 }
 0xbb8   : > { %9296 = vmatmul.f32.gmra.mxu2 %v17592_v35  ;;  %v17602_v35 = vld [vmem:[#allocation469_spill] sm:$0xff] }
 0xbb9   : > { %9737 = vst.msk [vmem:[%s13121_s21 + $0x168] sm:$0xff] %vm9692_vm1, %v9517_v5 }
 0xbba   : > { %v8478_v61 = vpop.f32.mrf.mxu0  ;;  %v8850_v34 = vpop.f32.mrf.mxu1 }
 0xbbb   : > { %v8851_v1 = vadd.f32 %v8850_v34, %v8474_v60  ;;  %v9233_v50 = vpop.f32.mrf.mxu2  ;;  %v9520_v51 = vpop.f32.mrf.mxu3  ;;  %v8479_v19 = vadd.f32 %v8478_v61, %v17597_v30  ;;  %v17604_v61 = vld [vmem:[#allocation467_spill] sm:$0xff]  ;;  %v17605_v34 = vld [vmem:[#allocation568_spill] sm:$0xff]  ;;  %v17607_v30 = vld [vmem:[#allocation470_spill] sm:$0xff] }
 0xbbd   : > { %v9234_v16 = vadd.f32 %v9233_v50, %v8851_v1  ;;  %8557 = vmatmul.f32.gmra.mxu0 %v17594_v56  ;;  %8945 = vmatmul.f32.gmra.mxu1 %v17595_v45 }
 0xbbf   : > { %v9521_v55 = vadd.f32 %v9520_v51, %v9234_v16  ;;  %9587 = vmatmul.f32.gmra.mxu3 %v17596_v62 }
 0xbc0   : > { %9300 = vmatmul.f32.gmra.mxu2 %v17596_v62  ;;  %v17606_v62 = vld [vmem:[#allocation473_spill] sm:$0xff] }
 0xbc1   : > { %9739 = vst.msk [vmem:[%s13121_s21 + $0x178] sm:$0xff] %vm9692_vm1, %v9521_v55 }
 0xbc2   : > { %v8483_v59 = vpop.f32.mrf.mxu0  ;;  %v8856_v6 = vpop.f32.mrf.mxu1 }
 0xbc3   : > { %v8857_v49 = vadd.f32 %v8856_v6, %v8479_v19  ;;  %v9237_v4 = vpop.f32.mrf.mxu2  ;;  %v9524_v47 = vpop.f32.mrf.mxu3  ;;  %v8484_v3 = vadd.f32 %v8483_v59, %v17601_v46  ;;  %v17608_v59 = vld [vmem:[#allocation471_spill] sm:$0xff]  ;;  %v17611_v46 = vld [vmem:[#allocation474_spill] sm:$0xff] }
 0xbc4   : > { %v17609_v6 = vld [vmem:[#allocation23_spill] sm:$0xff] }
 0xbc5   : > { %v9238_v53 = vadd.f32 %v9237_v4, %v8857_v49  ;;  %8562 = vmatmul.f32.gmra.mxu0 %v17598_v42  ;;  %8951 = vmatmul.f32.gmra.mxu1 %v17599_v10 }
 0xbc7   : > { %v9525_v9 = vadd.f32 %v9524_v47, %v9238_v53  ;;  %9591 = vmatmul.f32.gmra.mxu3 %v17600_v57 }
 0xbc8   : > { %9304 = vmatmul.f32.gmra.mxu2 %v17600_v57  ;;  %v17610_v57 = vld [vmem:[#allocation477_spill] sm:$0xff] }
 0xbc9   : > { %9741 = vst.msk [vmem:[%s13121_s21 + $0x188] sm:$0xff] %vm9692_vm1, %v9525_v9 }
 0xbca   : > { %v8488_v40 = vpop.f32.mrf.mxu0  ;;  %v8862_v39 = vpop.f32.mrf.mxu1 }
 0xbcb   : > { %v8863_v12 = vadd.f32 %v8862_v39, %v8484_v3  ;;  %v9241_v7 = vpop.f32.mrf.mxu2  ;;  %v9528_v17 = vpop.f32.mrf.mxu3  ;;  %v8489_v1 = vadd.f32 %v8488_v40, %v17605_v34  ;;  %v17612_v40 = vld [vmem:[#allocation475_spill] sm:$0xff]  ;;  %v17613_v39 = vld [vmem:[#allocation13_spill] sm:$0xff]  ;;  %v17615_v34 = vld [vmem:[#allocation478_spill] sm:$0xff] }
 0xbcd   : > { %v9242_v5 = vadd.f32 %v9241_v7, %v8863_v12  ;;  %8567 = vmatmul.f32.gmra.mxu0 %v17602_v35  ;;  %8957 = vmatmul.f32.gmra.mxu1 %v17603_v33 }
 0xbcf   : > { %v9529_v60 = vadd.f32 %v9528_v17, %v9242_v5  ;;  %9595 = vmatmul.f32.gmra.mxu3 %v17604_v61 }
 0xbd0   : > { %9308 = vmatmul.f32.gmra.mxu2 %v17604_v61  ;;  %v17614_v61 = vld [vmem:[#allocation481_spill] sm:$0xff] }
 0xbd1   : > { %9743 = vst.msk [vmem:[%s13121_s21 + $0x198] sm:$0xff] %vm9692_vm1, %v9529_v60 }
 0xbd2   : > { %v8493_v50 = vpop.f32.mrf.mxu0  ;;  %v8868_v51 = vpop.f32.mrf.mxu1 }
 0xbd3   : > { %v8869_v16 = vadd.f32 %v8868_v51, %v8489_v1  ;;  %v9245_v56 = vpop.f32.mrf.mxu2  ;;  %v9532_v45 = vpop.f32.mrf.mxu3  ;;  %v8494_v49 = vadd.f32 %v8493_v50, %v17609_v6  ;;  %v17616_v50 = vld [vmem:[#allocation479_spill] sm:$0xff]  ;;  %v17617_v51 = vld [vmem:[#allocation20_spill] sm:$0xff]  ;;  %v17619_v6 = vld [vmem:[#allocation482_spill] sm:$0xff] }
 0xbd5   : > { %v9246_v55 = vadd.f32 %v9245_v56, %v8869_v16  ;;  %8572 = vmatmul.f32.gmra.mxu0 %v17606_v62  ;;  %8963 = vmatmul.f32.gmra.mxu1 %v17607_v30 }
 0xbd7   : > { %v9533_v19 = vadd.f32 %v9532_v45, %v9246_v55  ;;  %9599 = vmatmul.f32.gmra.mxu3 %v17608_v59 }
 0xbd8   : > { %9312 = vmatmul.f32.gmra.mxu2 %v17608_v59  ;;  %v17618_v59 = vld [vmem:[#allocation485_spill] sm:$0xff] }
 0xbd9   : > { %9745 = vst.msk [vmem:[%s13121_s21 + $0x1a8] sm:$0xff] %vm9692_vm1, %v9533_v19 }
 0xbda   : > { %v8498_v4 = vpop.f32.mrf.mxu0  ;;  %v8874_v47 = vpop.f32.mrf.mxu1 }
 0xbdb   : > { %v8875_v53 = vadd.f32 %v8874_v47, %v8494_v49  ;;  %v9249_v42 = vpop.f32.mrf.mxu2  ;;  %v9536_v10 = vpop.f32.mrf.mxu3  ;;  %v8499_v12 = vadd.f32 %v8498_v4, %v17613_v39  ;;  %v17620_v4 = vld [vmem:[#allocation483_spill] sm:$0xff] }
 0xbdd   : > { %v9250_v9 = vadd.f32 %v9249_v42, %v8875_v53  ;;  %8577 = vmatmul.f32.gmra.mxu0 %v17610_v57  ;;  %8969 = vmatmul.f32.gmra.mxu1 %v17611_v46 }
 0xbdf   : > { %v9537_v3 = vadd.f32 %v9536_v10, %v9250_v9  ;;  %9603 = vmatmul.f32.gmra.mxu3 %v17612_v40 }
 0xbe0   : > { %9316 = vmatmul.f32.gmra.mxu2 %v17612_v40  ;;  %v17622_v40 = vld [vmem:[#allocation486_spill] sm:$0xff] }
 0xbe1   : > { %9747 = vst.msk [vmem:[%s13121_s21 + $0x1b8] sm:$0xff] %vm9692_vm1, %v9537_v3  ;;  %v17621_v3 = vld [vmem:[#allocation489_spill] sm:$0xff] }
 0xbe2   : > { %v8503_v7 = vpop.f32.mrf.mxu0  ;;  %v8880_v17 = vpop.f32.mrf.mxu1 }
 0xbe3   : > { %v8881_v5 = vadd.f32 %v8880_v17, %v8499_v12  ;;  %v9253_v35 = vpop.f32.mrf.mxu2  ;;  %v9540_v33 = vpop.f32.mrf.mxu3  ;;  %v8504_v16 = vadd.f32 %v8503_v7, %v17617_v51  ;;  %v17623_v12 = vld [vmem:[#allocation487_spill] sm:$0xff]  ;;  %v17624_v7 = vld [vmem:[#allocation18_spill] sm:$0xff] }
 0xbe4   : > { %v17627_v51 = vld [vmem:[#allocation491_spill] sm:$0xff] }
 0xbe5   : > { %v9254_v60 = vadd.f32 %v9253_v35, %v8881_v5  ;;  %8582 = vmatmul.f32.gmra.mxu0 %v17614_v61  ;;  %8975 = vmatmul.f32.gmra.mxu1 %v17615_v34  ;;  %v17625_v34 = vld [vmem:[#allocation493_spill] sm:$0xff] }
 0xbe7   : > { %v9541_v1 = vadd.f32 %v9540_v33, %v9254_v60  ;;  %9607 = vmatmul.f32.gmra.mxu3 %v17616_v50 }
 0xbe8   : > { %9320 = vmatmul.f32.gmra.mxu2 %v17616_v50 }
 0xbe9   : > { %9749 = vst.msk [vmem:[%s13121_s21 + $0x1c8] sm:$0xff] %vm9692_vm1, %v9541_v1  ;;  %v17626_v1 = vld [vmem:[#allocation490_spill] sm:$0xff] }
 0xbea   : > { %v8508_v56 = vpop.f32.mrf.mxu0  ;;  %v8886_v45 = vpop.f32.mrf.mxu1 }
 0xbeb   : > { %v8887_v55 = vadd.f32 %v8886_v45, %v8504_v16  ;;  %v9257_v62 = vpop.f32.mrf.mxu2  ;;  %v9544_v30 = vpop.f32.mrf.mxu3  ;;  %v8509_v47 = vadd.f32 %v8508_v56, %v14431_v63  ;;  %v17628_v16 = vld [vmem:[#allocation569_spill] sm:$0xff] }
 0xbed   : > { %v9258_v19 = vadd.f32 %v9257_v62, %v8887_v55  ;;  %8587 = vmatmul.f32.gmra.mxu0 %v17618_v59  ;;  %8981 = vmatmul.f32.gmra.mxu1 %v17619_v6  ;;  %v17629_v6 = vld [vmem:[#allocation497_spill] sm:$0xff] }
 0xbef   : > { %v9545_v49 = vadd.f32 %v9544_v30, %v9258_v19  ;;  %9611 = vmatmul.f32.gmra.mxu3 %v17620_v4 }
 0xbf0   : > { %9324 = vmatmul.f32.gmra.mxu2 %v17620_v4 }
 0xbf1   : > { %9751 = vst.msk [vmem:[%s13121_s21 + $0x1d8] sm:$0xff] %vm9692_vm1, %v9545_v49  ;;  %v17630_v49 = vld [vmem:[#allocation494_spill] sm:$0xff] }
 0xbf2   : > { %v8513_v53 = vpop.f32.mrf.mxu0  ;;  %v8892_v42 = vpop.f32.mrf.mxu1 }
 0xbf3   : > { %v8893_v10 = vadd.f32 %v8892_v42, %v8509_v47  ;;  %v9261_v9 = vpop.f32.mrf.mxu2  ;;  %v9548_v57 = vpop.f32.mrf.mxu3  ;;  %v8514_v63 = vadd.f32 %v8513_v53, %v17624_v7  ;;  %v17631_v47 = vld [vmem:[#allocation495_spill] sm:$0xff] }
 0xbf5   : > { %v9262_v46 = vadd.f32 %v9261_v9, %v8893_v10  ;;  %8592 = vmatmul.f32.gmra.mxu0 %v17621_v3  ;;  %8987 = vmatmul.f32.gmra.mxu1 %v17622_v40  ;;  %v17632_v40 = vld [vmem:[#allocation501_spill] sm:$0xff] }
 0xbf7   : > { %v9549_v39 = vadd.f32 %v9548_v57, %v9262_v46  ;;  %9615 = vmatmul.f32.gmra.mxu3 %v17623_v12 }
 0xbf8   : > { %9328 = vmatmul.f32.gmra.mxu2 %v17623_v12 }
 0xbf9   : > { %9753 = vst.msk [vmem:[%s13121_s21 + $0x1e8] sm:$0xff] %vm9692_vm1, %v9549_v39  ;;  %v17633_v39 = vld [vmem:[#allocation498_spill] sm:$0xff] }
 0xbfa   : > { %v8518_v17 = vpop.f32.mrf.mxu0  ;;  %v8898_v5 = vpop.f32.mrf.mxu1 }
 0xbfb   : > { %v8899_v35 = vadd.f32 %v8898_v5, %v8514_v63  ;;  %v9265_v33 = vpop.f32.mrf.mxu2  ;;  %v9552_v60 = vpop.f32.mrf.mxu3  ;;  %v8519_v56 = vadd.f32 %v8518_v17, %v17628_v16 }
 0xbfd   : > { %v9266_v61 = vadd.f32 %v9265_v33, %v8899_v35  ;;  %8597 = vmatmul.f32.gmra.mxu0 %v17625_v34  ;;  %8993 = vmatmul.f32.gmra.mxu1 %v17626_v1 }
 0xbff   : > { %v9553_v50 = vadd.f32 %v9552_v60, %v9266_v61  ;;  %9619 = vmatmul.f32.gmra.mxu3 %v17627_v51  ;;  %v17634_v60 = vld [vmem:[#allocation505_spill] sm:$0xff]  ;;  %v17635_v61 = vld [vmem:[#allocation502_spill] sm:$0xff] }
 0xc00   : > { %9332 = vmatmul.f32.gmra.mxu2 %v17627_v51 }
 0xc01   : > { %9755 = vst.msk [vmem:[%s13121_s21 + $0x1f8] sm:$0xff] %vm9692_vm1, %v9553_v50 }
 0xc02   : > { %v8523_v45 = vpop.f32.mrf.mxu0  ;;  %v8904_v55 = vpop.f32.mrf.mxu1 }
 0xc03   : > { %v8905_v62 = vadd.f32 %v8904_v55, %v8519_v56  ;;  %v9269_v30 = vpop.f32.mrf.mxu2  ;;  %v9556_v19 = vpop.f32.mrf.mxu3  ;;  %v8524_v53 = vadd.f32 %v8523_v45, %v14452_v58  ;;  %v17636_v45 = vld [vmem:[#allocation509_spill] sm:$0xff]  ;;  %v17637_v55 = vld [vmem:[#allocation506_spill] sm:$0xff] }
 0xc05   : > { %v9270_v59 = vadd.f32 %v9269_v30, %v8905_v62  ;;  %8602 = vmatmul.f32.gmra.mxu0 %v17629_v6  ;;  %8999 = vmatmul.f32.gmra.mxu1 %v17630_v49 }
 0xc07   : > { %v9557_v4 = vadd.f32 %v9556_v19, %v9270_v59  ;;  %9623 = vmatmul.f32.gmra.mxu3 %v17631_v47 }
 0xc08   : > { %9336 = vmatmul.f32.gmra.mxu2 %v17631_v47  ;;  %v17639_v47 = vld [vmem:[#allocation510_spill] sm:$0xff] }
 0xc09   : > { %9757 = vst.msk [vmem:[%s13121_s21 + $0x208] sm:$0xff] %vm9692_vm1, %v9557_v4  ;;  %v17638_v4 = vld [vmem:[#allocation512_spill] sm:$0xff] }
 0xc0a   : > { %v8528_v42 = vpop.f32.mrf.mxu0  ;;  %v8910_v10 = vpop.f32.mrf.mxu1 }
 0xc0b   : > { %v8911_v9 = vadd.f32 %v8910_v10, %v8524_v53  ;;  %v9273_v57 = vpop.f32.mrf.mxu2  ;;  %v9560_v46 = vpop.f32.mrf.mxu3  ;;  %v8529_v58 = vadd.f32 %v8528_v42, %v14459_v54 }
 0xc0d   : > { %v9274_v3 = vadd.f32 %v9273_v57, %v8911_v9  ;;  %8607 = vmatmul.f32.gmra.mxu0 %v17632_v40  ;;  %9005 = vmatmul.f32.gmra.mxu1 %v17633_v39  ;;  %v17641_v40 = vld [vmem:[#allocation514_spill] sm:$0xff] }
 0xc0f   : > { %v9561_v12 = vadd.f32 %v9560_v46, %v9274_v3  ;;  %9627 = vmatmul.f32.gmra.mxu3 %v17409_v44  ;;  %v17640_v3 = vld [vmem:[#allocation516_spill] sm:$0xff] }
 0xc10   : > { %9340 = vmatmul.f32.gmra.mxu2 %v17409_v44 }
 0xc11   : > { %9759 = vst.msk [vmem:[%s13121_s21 + $0x218] sm:$0xff] %vm9692_vm1, %v9561_v12  ;;  %v17642_v12 = vld [vmem:[#allocation515_spill] sm:$0xff] }
 0xc12   : > { %v8533_v7 = vpop.f32.mrf.mxu0  ;;  %v8916_v63 = vpop.f32.mrf.mxu1 }
 0xc13   : > { %v8917_v17 = vadd.f32 %v8916_v63, %v8529_v58  ;;  %v9277_v5 = vpop.f32.mrf.mxu2  ;;  %v9564_v35 = vpop.f32.mrf.mxu3  ;;  %v8534_v44 = vadd.f32 %v8533_v7, %v14466_v36 }
 0xc15   : > { %v9278_v33 = vadd.f32 %v9277_v5, %v8917_v17  ;;  %8612 = vmatmul.f32.gmra.mxu0 %v17634_v60  ;;  %9011 = vmatmul.f32.gmra.mxu1 %v17635_v61  ;;  %v17645_v60 = vld [vmem:[#allocation518_spill] sm:$0xff] }
 0xc17   : > { %v9565_v34 = vadd.f32 %v9564_v35, %v9278_v33  ;;  %9631 = vmatmul.f32.gmra.mxu3 %v17413_v41  ;;  %v17644_v33 = vld [vmem:[#allocation520_spill] sm:$0xff] }
 0xc18   : > { %9344 = vmatmul.f32.gmra.mxu2 %v17413_v41 }
 0xc19   : > { %9761 = vst.msk [vmem:[%s13121_s21 + $0x228] sm:$0xff] %vm9692_vm1, %v9565_v34  ;;  %v17646_v34 = vld [vmem:[#allocation519_spill] sm:$0xff] }
 0xc1a   : > { %v8538_v54 = vpop.f32.mrf.mxu0  ;;  %v8922_v1 = vpop.f32.mrf.mxu1 }
 0xc1b   : > { %v8923_v50 = vadd.f32 %v8922_v1, %v8534_v44  ;;  %v9281_v51 = vpop.f32.mrf.mxu2  ;;  %v9568_v16 = vpop.f32.mrf.mxu3  ;;  %v8539_v41 = vadd.f32 %v8538_v54, %v14473_v8  ;;  %v17647_v44 = vld [vmem:[#allocation17_spill] sm:$0xff] }
 0xc1d   : > { %v9282_v56 = vadd.f32 %v9281_v51, %v8923_v50  ;;  %8617 = vmatmul.f32.gmra.mxu0 %v17636_v45  ;;  %9017 = vmatmul.f32.gmra.mxu1 %v17637_v55  ;;  %v17648_v55 = vld [vmem:[#allocation524_spill] sm:$0xff] }
 0xc1f   : > { %v9569_v62 = vadd.f32 %v9568_v16, %v9282_v56  ;;  %9635 = vmatmul.f32.gmra.mxu3 %v17415_v22 }
 0xc20   : > { %9348 = vmatmul.f32.gmra.mxu2 %v17415_v22 }
 0xc21   : > { %9763 = vst.msk [vmem:[%s13121_s21 + $0x238] sm:$0xff] %vm9692_vm1, %v9569_v62  ;;  %v17649_v62 = vld [vmem:[#allocation522_spill] sm:$0xff] }
 0xc22   : > { %v8543_v36 = vpop.f32.mrf.mxu0  ;;  %v8928_v30 = vpop.f32.mrf.mxu1 }
 0xc23   : > { %v8929_v19 = vadd.f32 %v8928_v30, %v8539_v41  ;;  %v9285_v59 = vpop.f32.mrf.mxu2  ;;  %v9572_v6 = vpop.f32.mrf.mxu3  ;;  %v8544_v22 = vadd.f32 %v8543_v36, %v14480_v28  ;;  %v17650_v36 = vld [vmem:[#allocation523_spill] sm:$0xff]  ;;  %v17651_v30 = vld [vmem:[#allocation24_spill] sm:$0xff] }
 0xc25   : > { %v9286_v49 = vadd.f32 %v9285_v59, %v8929_v19  ;;  %8622 = vmatmul.f32.gmra.mxu0 %v17638_v4  ;;  %9023 = vmatmul.f32.gmra.mxu1 %v17639_v47 }
 0xc27   : > { %v9573_v53 = vadd.f32 %v9572_v6, %v9286_v49  ;;  %9639 = vmatmul.f32.gmra.mxu3 %v17417_v11 }
 0xc28   : > { %9352 = vmatmul.f32.gmra.mxu2 %v17417_v11  ;;  %v17643_v11 = vld [vmem:[#allocation27_spill] sm:$0xff] }
 0xc29   : > { %9765 = vst.msk [vmem:[%s13121_s21 + $0x248] sm:$0xff] %vm9692_vm1, %v9573_v53 }
 0xc2a   : > { %v8548_v8 = vpop.f32.mrf.mxu0  ;;  %v8934_v42 = vpop.f32.mrf.mxu1 }
 0xc2b   : > { %v8935_v10 = vadd.f32 %v8934_v42, %v8544_v22  ;;  %v9289_v9 = vpop.f32.mrf.mxu2  ;;  %v9576_v57 = vpop.f32.mrf.mxu3  ;;  %v8549_v28 = vadd.f32 %v8548_v8, %v17643_v11  ;;  %v17652_v22 = vld [vmem:[#allocation528_spill] sm:$0xff]  ;;  %v17653_v8 = vld [vmem:[#allocation526_spill] sm:$0xff] }
 0xc2d   : > { %v9290_v46 = vadd.f32 %v9289_v9, %v8935_v10  ;;  %8627 = vmatmul.f32.gmra.mxu0 %v17640_v3  ;;  %9029 = vmatmul.f32.gmra.mxu1 %v17641_v40  ;;  %v17654_v10 = vld [vmem:[#allocation527_spill] sm:$0xff]  ;;  %v17655_v9 = vld [vmem:[#allocation22_spill] sm:$0xff] }
 0xc2f   : > { %v9577_v39 = vadd.f32 %v9576_v57, %v9290_v46  ;;  %9643 = vmatmul.f32.gmra.mxu3 %v17642_v12 }
 0xc30   : > { %9356 = vmatmul.f32.gmra.mxu2 %v17642_v12 }
 0xc31   : > { %9767 = vst.msk [vmem:[%s13121_s21 + $0x258] sm:$0xff] %vm9692_vm1, %v9577_v39 }
 0xc32   : > { %v8553_v58 = vpop.f32.mrf.mxu0  ;;  %v8940_v7 = vpop.f32.mrf.mxu1 }
 0xc33   : > { %v8941_v63 = vadd.f32 %v8940_v7, %v8549_v28  ;;  %v9293_v17 = vpop.f32.mrf.mxu2  ;;  %v9580_v5 = vpop.f32.mrf.mxu3  ;;  %v8554_v54 = vadd.f32 %v8553_v58, %v17647_v44  ;;  %v17656_v28 = vld [vmem:[#allocation532_spill] sm:$0xff]  ;;  %v17657_v58 = vld [vmem:[#allocation530_spill] sm:$0xff] }
 0xc35   : > { %v9294_v35 = vadd.f32 %v9293_v17, %v8941_v63  ;;  %8632 = vmatmul.f32.gmra.mxu0 %v17644_v33  ;;  %9035 = vmatmul.f32.gmra.mxu1 %v17645_v60  ;;  %v17658_v63 = vld [vmem:[#allocation531_spill] sm:$0xff] }
 0xc36   : > { %v17659_v17 = vld [vmem:[#allocation31_spill] sm:$0xff] }
 0xc37   : > { %v9581_v61 = vadd.f32 %v9580_v5, %v9294_v35  ;;  %9647 = vmatmul.f32.gmra.mxu3 %v17646_v34 }
 0xc38   : > { %9360 = vmatmul.f32.gmra.mxu2 %v17646_v34 }
 0xc39   : > { %9769 = vst.msk [vmem:[%s13121_s21 + $0x268] sm:$0xff] %vm9692_vm1, %v9581_v61 }
 0xc3a   : > { %v8558_v1 = vpop.f32.mrf.mxu0  ;;  %v8946_v50 = vpop.f32.mrf.mxu1 }
 0xc3b   : > { %v8947_v51 = vadd.f32 %v8946_v50, %v8554_v54  ;;  %v9297_v16 = vpop.f32.mrf.mxu2  ;;  %v9584_v56 = vpop.f32.mrf.mxu3  ;;  %v8559_v19 = vadd.f32 %v8558_v1, %v17651_v30  ;;  %v17660_v54 = vld [vmem:[#allocation536_spill] sm:$0xff]  ;;  %v17661_v1 = vld [vmem:[#allocation533_spill] sm:$0xff] }
 0xc3d   : > { %v9298_v45 = vadd.f32 %v9297_v16, %v8947_v51  ;;  %8637 = vmatmul.f32.gmra.mxu0 %v17648_v55  ;;  %9041 = vmatmul.f32.gmra.mxu1 %v17649_v62  ;;  %v17662_v51 = vld [vmem:[#allocation534_spill] sm:$0xff]  ;;  %v17663_v16 = vld [vmem:[#allocation21_spill] sm:$0xff] }
 0xc3f   : > { %v9585_v41 = vadd.f32 %v9584_v56, %v9298_v45  ;;  %9651 = vmatmul.f32.gmra.mxu3 %v17650_v36 }
 0xc40   : > { %9364 = vmatmul.f32.gmra.mxu2 %v17650_v36 }
 0xc41   : > { %9771 = vst.msk [vmem:[%s13121_s21 + $0x278] sm:$0xff] %vm9692_vm1, %v9585_v41 }
 0xc42   : > { %v8563_v59 = vpop.f32.mrf.mxu0  ;;  %v8952_v6 = vpop.f32.mrf.mxu1 }
 0xc43   : > { %v8953_v49 = vadd.f32 %v8952_v6, %v8559_v19  ;;  %v9301_v4 = vpop.f32.mrf.mxu2  ;;  %v9588_v47 = vpop.f32.mrf.mxu3  ;;  %v8564_v57 = vadd.f32 %v8563_v59, %v17655_v9  ;;  %v17664_v19 = vld [vmem:[#allocation540_spill] sm:$0xff]  ;;  %v17665_v59 = vld [vmem:[#allocation537_spill] sm:$0xff] }
 0xc45   : > { %v9302_v53 = vadd.f32 %v9301_v4, %v8953_v49  ;;  %8642 = vmatmul.f32.gmra.mxu0 %v17652_v22  ;;  %9047 = vmatmul.f32.gmra.mxu1 %v17653_v8  ;;  %v17666_v49 = vld [vmem:[#allocation538_spill] sm:$0xff]  ;;  %v17667_v4 = vld [vmem:[#allocation28_spill] sm:$0xff] }
 0xc47   : > { %v9589_v42 = vadd.f32 %v9588_v47, %v9302_v53  ;;  %9655 = vmatmul.f32.gmra.mxu3 %v17654_v10 }
 0xc48   : > { %9368 = vmatmul.f32.gmra.mxu2 %v17654_v10 }
 0xc49   : > { %9773 = vst.msk [vmem:[%s13121_s21 + $0x288] sm:$0xff] %vm9692_vm1, %v9589_v42 }
 0xc4a   : > { %v8568_v46 = vpop.f32.mrf.mxu0  ;;  %v8958_v3 = vpop.f32.mrf.mxu1 }
 0xc4b   : > { %v8959_v40 = vadd.f32 %v8958_v3, %v8564_v57  ;;  %v9305_v39 = vpop.f32.mrf.mxu2  ;;  %v9592_v12 = vpop.f32.mrf.mxu3  ;;  %v8569_v5 = vadd.f32 %v8568_v46, %v17659_v17  ;;  %v17668_v57 = vld [vmem:[#allocation544_spill] sm:$0xff]  ;;  %v17669_v46 = vld [vmem:[#allocation541_spill] sm:$0xff] }
 0xc4c   : > { %v17671_v17 = vld [vmem:[#allocation548_spill] sm:$0xff] }
 0xc4d   : > { %v9306_v11 = vadd.f32 %v9305_v39, %v8959_v40  ;;  %8647 = vmatmul.f32.gmra.mxu0 %v17656_v28  ;;  %9053 = vmatmul.f32.gmra.mxu1 %v17657_v58  ;;  %v17670_v40 = vld [vmem:[#allocation542_spill] sm:$0xff] }
 0xc4f   : > { %v9593_v7 = vadd.f32 %v9592_v12, %v9306_v11  ;;  %9659 = vmatmul.f32.gmra.mxu3 %v17658_v63 }
 0xc50   : > { %9372 = vmatmul.f32.gmra.mxu2 %v17658_v63 }
 0xc51   : > { %9775 = vst.msk [vmem:[%s13121_s21 + $0x298] sm:$0xff] %vm9692_vm1, %v9593_v7 }
 0xc52   : > { %v8573_v35 = vpop.f32.mrf.mxu0  ;;  %v8964_v33 = vpop.f32.mrf.mxu1 }
 0xc53   : > { %v8965_v60 = vadd.f32 %v8964_v33, %v8569_v5  ;;  %v9309_v61 = vpop.f32.mrf.mxu2  ;;  %v9596_v34 = vpop.f32.mrf.mxu3  ;;  %v8574_v56 = vadd.f32 %v8573_v35, %v17663_v16  ;;  %v17672_v5 = vld [vmem:[#allocation545_spill] sm:$0xff]  ;;  %v17673_v33 = vld [vmem:[#allocation546_spill] sm:$0xff] }
 0xc55   : > { %v9310_v44 = vadd.f32 %v9309_v61, %v8965_v60  ;;  %8652 = vmatmul.f32.gmra.mxu0 %v17660_v54  ;;  %9059 = vmatmul.f32.gmra.mxu1 %v17661_v1 }
 0xc57   : > { %v9597_v50 = vadd.f32 %v9596_v34, %v9310_v44  ;;  %9663 = vmatmul.f32.gmra.mxu3 %v17662_v51 }
 0xc58   : > { %9376 = vmatmul.f32.gmra.mxu2 %v17662_v51  ;;  %v17675_v51 = vld [vmem:[#allocation549_spill] sm:$0xff] }
 0xc59   : > { %9777 = vst.msk [vmem:[%s13121_s21 + $0x2a8] sm:$0xff] %vm9692_vm1, %v9597_v50  ;;  %v17674_v50 = vld [vmem:[#allocation552_spill] sm:$0xff] }
 0xc5a   : > { %v8578_v45 = vpop.f32.mrf.mxu0  ;;  %v8970_v55 = vpop.f32.mrf.mxu1 }
 0xc5b   : > { %v8971_v62 = vadd.f32 %v8970_v55, %v8574_v56  ;;  %v9313_v41 = vpop.f32.mrf.mxu2  ;;  %v9600_v36 = vpop.f32.mrf.mxu3  ;;  %v8579_v47 = vadd.f32 %v8578_v45, %v17667_v4  ;;  %v17676_v56 = vld [vmem:[#allocation550_spill] sm:$0xff] }
 0xc5d   : > { %v9314_v30 = vadd.f32 %v9313_v41, %v8971_v62  ;;  %8657 = vmatmul.f32.gmra.mxu0 %v17664_v19  ;;  %9065 = vmatmul.f32.gmra.mxu1 %v17665_v59  ;;  %v17677_v19 = vld [vmem:[#allocation556_spill] sm:$0xff]  ;;  %v17678_v59 = vld [vmem:[#allocation553_spill] sm:$0xff] }
 0xc5f   : > { %v9601_v6 = vadd.f32 %v9600_v36, %v9314_v30  ;;  %9667 = vmatmul.f32.gmra.mxu3 %v17666_v49 }
 0xc60   : > { %9380 = vmatmul.f32.gmra.mxu2 %v17666_v49  ;;  %v17679_v49 = vld [vmem:[#allocation554_spill] sm:$0xff] }
 0xc61   : > { %9779 = vst.msk [vmem:[%s13121_s21 + $0x2b8] sm:$0xff] %vm9692_vm1, %v9601_v6 }
 0xc62   : > { %v8583_v53 = vpop.f32.mrf.mxu0  ;;  %v8976_v22 = vpop.f32.mrf.mxu1 }
 0xc63   : > { %v8977_v8 = vadd.f32 %v8976_v22, %v8579_v47  ;;  %v9317_v42 = vpop.f32.mrf.mxu2  ;;  %v9604_v10 = vpop.f32.mrf.mxu3  ;;  %v8584_v39 = vadd.f32 %v8583_v53, %v14536_v18 }
 0xc65   : > { %v9318_v9 = vadd.f32 %v9317_v42, %v8977_v8  ;;  %8662 = vmatmul.f32.gmra.mxu0 %v17668_v57  ;;  %9071 = vmatmul.f32.gmra.mxu1 %v17669_v46  ;;  %v17682_v46 = vld [vmem:[#allocation560_spill] sm:$0xff] }
 0xc67   : > { %v9605_v3 = vadd.f32 %v9604_v10, %v9318_v9  ;;  %9671 = vmatmul.f32.gmra.mxu3 %v17670_v40  ;;  %v17680_v10 = vld [vmem:[#allocation562_spill] sm:$0xff]  ;;  %v17681_v9 = vld [vmem:[#allocation559_spill] sm:$0xff] }
 0xc68   : > { %9384 = vmatmul.f32.gmra.mxu2 %v17670_v40 }
 0xc69   : > { %9781 = vst.msk [vmem:[%s13121_s21 + $0x2c8] sm:$0xff] %vm9692_vm1, %v9605_v3 }
 0xc6a   : > { %v8588_v12 = vpop.f32.mrf.mxu0  ;;  %v8982_v11 = vpop.f32.mrf.mxu1 }
 0xc6b   : > { %v8983_v28 = vadd.f32 %v8982_v11, %v8584_v39  ;;  %v9321_v58 = vpop.f32.mrf.mxu2  ;;  %v9608_v7 = vpop.f32.mrf.mxu3  ;;  %v8589_v18 = vadd.f32 %v8588_v12, %v14543_v52 }
 0xc6d   : > { %v9322_v63 = vadd.f32 %v9321_v58, %v8983_v28  ;;  %8667 = vmatmul.f32.gmra.mxu0 %v17671_v17  ;;  %9077 = vmatmul.f32.gmra.mxu1 %v17672_v5  ;;  %v17683_v58 = vld [vmem:[#allocation564_spill] sm:$0xff] }
 0xc6f   : > { %v9609_v35 = vadd.f32 %v9608_v7, %v9322_v63  ;;  %9675 = vmatmul.f32.gmra.mxu3 %v17673_v33 }
 0xc70   : > { %9388 = vmatmul.f32.gmra.mxu2 %v17673_v33 }
 0xc71   : > { %9783 = vst.msk [vmem:[%s13121_s21 + $0x2d8] sm:$0xff] %vm9692_vm1, %v9609_v35 }
 0xc72   : > { %v8593_v60 = vpop.f32.mrf.mxu0  ;;  %v8988_v61 = vpop.f32.mrf.mxu1 }
 0xc73   : > { %v8989_v34 = vadd.f32 %v8988_v61, %v8589_v18  ;;  %v9325_v44 = vpop.f32.mrf.mxu2  ;;  %v9612_v54 = vpop.f32.mrf.mxu3  ;;  %v8594_v52 = vadd.f32 %v8593_v60, %v14550_v14 }
 0xc75   : > { %v9326_v1 = vadd.f32 %v9325_v44, %v8989_v34  ;;  %8672 = vmatmul.f32.gmra.mxu0 %v17674_v50  ;;  %9083 = vmatmul.f32.gmra.mxu1 %v17675_v51 }
 0xc77   : > { %v9613_v16 = vadd.f32 %v9612_v54, %v9326_v1  ;;  %9679 = vmatmul.f32.gmra.mxu3 %v17676_v56 }
 0xc78   : > { %9392 = vmatmul.f32.gmra.mxu2 %v17676_v56 }
 0xc79   : > { %9785 = vst.msk [vmem:[%s13121_s21 + $0x2e8] sm:$0xff] %vm9692_vm1, %v9613_v16 }
 0xc7a   : > { %v8598_v45 = vpop.f32.mrf.mxu0  ;;  %v8994_v55 = vpop.f32.mrf.mxu1 }
 0xc7b   : > { %v8995_v62 = vadd.f32 %v8994_v55, %v8594_v52  ;;  %v9329_v41 = vpop.f32.mrf.mxu2  ;;  %v9616_v36 = vpop.f32.mrf.mxu3  ;;  %v8599_v14 = vadd.f32 %v8598_v45, %v14557_v0 }
 0xc7d   : > { %v9330_v30 = vadd.f32 %v9329_v41, %v8995_v62  ;;  %8677 = vmatmul.f32.gmra.mxu0 %v17677_v19  ;;  %9089 = vmatmul.f32.gmra.mxu1 %v17678_v59 }
 0xc7f   : > { %v9617_v6 = vadd.f32 %v9616_v36, %v9330_v30  ;;  %9683 = vmatmul.f32.gmra.mxu3 %v17679_v49 }
 0xc80   : > { %9396 = vmatmul.f32.gmra.mxu2 %v17679_v49 }
 0xc81   : > { %9787 = vst.msk [vmem:[%s13121_s21 + $0x2f8] sm:$0xff] %vm9692_vm1, %v9617_v6 }
 0xc82   : > { %v8603_v4 = vpop.f32.mrf.mxu0  ;;  %v9000_v47 = vpop.f32.mrf.mxu1 }
 0xc83   : > { %v9001_v53 = vadd.f32 %v9000_v47, %v8599_v14  ;;  %v9333_v22 = vpop.f32.mrf.mxu2  ;;  %v9620_v8 = vpop.f32.mrf.mxu3  ;;  %v8604_v0 = vadd.f32 %v8603_v4, %v14564_v24 }
 0xc85   : > { %v9334_v42 = vadd.f32 %v9333_v22, %v9001_v53  ;;  %8682 = vmatmul.f32.gmra.mxu0 %v17680_v10  ;;  %9095 = vmatmul.f32.gmra.mxu1 %v17681_v9 }
 0xc87   : > { %v9621_v57 = vadd.f32 %v9620_v8, %v9334_v42  ;;  %9687 = vmatmul.f32.gmra.mxu3 %v17682_v46 }
 0xc88   : > { %9400 = vmatmul.f32.gmra.mxu2 %v17682_v46 }
 0xc89   : > { %9789 = vst.msk [vmem:[%s13121_s21 + $0x308] sm:$0xff] %vm9692_vm1, %v9621_v57 }
 0xc8a   : > { %v8608_v3 = vpop.f32.mrf.mxu0  ;;  %v9006_v40 = vpop.f32.mrf.mxu1 }
 0xc8b   : > { %v9007_v39 = vadd.f32 %v9006_v40, %v8604_v0  ;;  %v9337_v12 = vpop.f32.mrf.mxu2  ;;  %v9624_v11 = vpop.f32.mrf.mxu3  ;;  %v8609_v63 = vadd.f32 %v8608_v3, %v14571_v27 }
 0xc8d   : > { %v9338_v28 = vadd.f32 %v9337_v12, %v9007_v39  ;;  %9101 = vmatmul.f32.gmra.mxu1 %v17683_v58 }
 0xc8f   : > { %v9625_v7 = vadd.f32 %v9624_v11, %v9338_v28 }
 0xc91   : > { %9791 = vst.msk [vmem:[%s13121_s21 + $0x318] sm:$0xff] %vm9692_vm1, %v9625_v7 }
 0xc92   : > { %v8613_v17 = vpop.f32.mrf.mxu0  ;;  %v9012_v5 = vpop.f32.mrf.mxu1 }
 0xc93   : > { %v9013_v24 = vadd.f32 %v9012_v5, %v8609_v63  ;;  %v9341_v35 = vpop.f32.mrf.mxu2  ;;  %v9628_v33 = vpop.f32.mrf.mxu3  ;;  %v8614_v61 = vadd.f32 %v8613_v17, %v14578_v25 }
 0xc95   : > { %v9342_v18 = vadd.f32 %v9341_v35, %v9013_v24 }
 0xc97   : > { %v9629_v60 = vadd.f32 %v9628_v33, %v9342_v18 }
 0xc99   : > { %9793 = vst.msk [vmem:[%s13121_s21 + $0x328] sm:$0xff] %vm9692_vm1, %v9629_v60 }
 0xc9a   : > { %v8618_v34 = vpop.f32.mrf.mxu0  ;;  %v9018_v44 = vpop.f32.mrf.mxu1 }
 0xc9b   : > { %v9019_v54 = vadd.f32 %v9018_v44, %v8614_v61  ;;  %v9345_v1 = vpop.f32.mrf.mxu2  ;;  %v9632_v27 = vpop.f32.mrf.mxu3  ;;  %v8619_v16 = vadd.f32 %v8618_v34, %v14585_v15 }
 0xc9d   : > { %v9346_v50 = vadd.f32 %v9345_v1, %v9019_v54 }
 0xc9f   : > { %v9633_v51 = vadd.f32 %v9632_v27, %v9346_v50 }
 0xca1   : > { %9795 = vst.msk [vmem:[%s13121_s21 + $0x338] sm:$0xff] %vm9692_vm1, %v9633_v51 }
 0xca2   : > { %v8623_v56 = vpop.f32.mrf.mxu0  ;;  %v9024_v52 = vpop.f32.mrf.mxu1 }
 0xca3   : > { %v9025_v45 = vadd.f32 %v9024_v52, %v8619_v16  ;;  %v9349_v55 = vpop.f32.mrf.mxu2  ;;  %v9636_v25 = vpop.f32.mrf.mxu3  ;;  %v8624_v36 = vadd.f32 %v8623_v56, %v14592_v38 }
 0xca5   : > { %v9350_v62 = vadd.f32 %v9349_v55, %v9025_v45 }
 0xca7   : > { %v9637_v41 = vadd.f32 %v9636_v25, %v9350_v62 }
 0xca9   : > { %9797 = vst.msk [vmem:[%s13121_s21 + $0x348] sm:$0xff] %vm9692_vm1, %v9637_v41 }
 0xcaa   : > { %v8628_v30 = vpop.f32.mrf.mxu0  ;;  %v9030_v19 = vpop.f32.mrf.mxu1 }
 0xcab   : > { %v9031_v59 = vadd.f32 %v9030_v19, %v8624_v36  ;;  %v9353_v6 = vpop.f32.mrf.mxu2  ;;  %v9640_v15 = vpop.f32.mrf.mxu3  ;;  %v8629_v4 = vadd.f32 %v8628_v30, %v14599_v20 }
 0xcad   : > { %v9354_v49 = vadd.f32 %v9353_v6, %v9031_v59 }
 0xcaf   : > { %v9641_v14 = vadd.f32 %v9640_v15, %v9354_v49 }
 0xcb1   : > { %9799 = vst.msk [vmem:[%s13121_s21 + $0x358] sm:$0xff] %vm9692_vm1, %v9641_v14 }
 0xcb2   : > { %v8633_v47 = vpop.f32.mrf.mxu0  ;;  %v9036_v53 = vpop.f32.mrf.mxu1 }
 0xcb3   : > { %v9037_v22 = vadd.f32 %v9036_v53, %v8629_v4  ;;  %v9357_v8 = vpop.f32.mrf.mxu2  ;;  %v9644_v38 = vpop.f32.mrf.mxu3  ;;  %v8634_v9 = vadd.f32 %v8633_v47, %v14606_v2 }
 0xcb5   : > { %v9358_v42 = vadd.f32 %v9357_v8, %v9037_v22 }
 0xcb7   : > { %v9645_v10 = vadd.f32 %v9644_v38, %v9358_v42 }
 0xcb9   : > { %9801 = vst.msk [vmem:[%s13121_s21 + $0x368] sm:$0xff] %vm9692_vm1, %v9645_v10 }
 0xcba   : > { %v8638_v57 = vpop.f32.mrf.mxu0  ;;  %v9042_v46 = vpop.f32.mrf.mxu1 }
 0xcbb   : > { %v9043_v0 = vadd.f32 %v9042_v46, %v8634_v9  ;;  %v9361_v3 = vpop.f32.mrf.mxu2  ;;  %v9648_v20 = vpop.f32.mrf.mxu3  ;;  %v8639_v12 = vadd.f32 %v8638_v57, %v14613_v32 }
 0xcbd   : > { %v9362_v40 = vadd.f32 %v9361_v3, %v9043_v0 }
 0xcbf   : > { %v9649_v39 = vadd.f32 %v9648_v20, %v9362_v40 }
 0xcc1   : > { %9803 = vst.msk [vmem:[%s13121_s21 + $0x378] sm:$0xff] %vm9692_vm1, %v9649_v39 }
 0xcc2   : > { %v8643_v11 = vpop.f32.mrf.mxu0  ;;  %v9048_v28 = vpop.f32.mrf.mxu1 }
 0xcc3   : > { %v9049_v58 = vadd.f32 %v9048_v28, %v8639_v12  ;;  %v9365_v7 = vpop.f32.mrf.mxu2  ;;  %v9652_v2 = vpop.f32.mrf.mxu3  ;;  %v8644_v5 = vadd.f32 %v8643_v11, %v14620_v29 }
 0xcc5   : > { %v9366_v63 = vadd.f32 %v9365_v7, %v9049_v58 }
 0xcc7   : > { %v9653_v17 = vadd.f32 %v9652_v2, %v9366_v63 }
 0xcc9   : > { %9805 = vst.msk [vmem:[%s13121_s21 + $0x388] sm:$0xff] %vm9692_vm1, %v9653_v17 }
 0xcca   : > { %v8648_v24 = vpop.f32.mrf.mxu0  ;;  %v9054_v35 = vpop.f32.mrf.mxu1 }
 0xccb   : > { %v9055_v33 = vadd.f32 %v9054_v35, %v8644_v5  ;;  %v9369_v18 = vpop.f32.mrf.mxu2  ;;  %v9656_v32 = vpop.f32.mrf.mxu3  ;;  %v8649_v34 = vadd.f32 %v8648_v24, %v14627_v21 }
 0xccd   : > { %v9370_v60 = vadd.f32 %v9369_v18, %v9055_v33 }
 0xccf   : > { %v9657_v61 = vadd.f32 %v9656_v32, %v9370_v60 }
 0xcd1   : > { %9807 = vst.msk [vmem:[%s13121_s21 + $0x398] sm:$0xff] %vm9692_vm1, %v9657_v61 }
 0xcd2   : > { %v8653_v44 = vpop.f32.mrf.mxu0  ;;  %v9060_v54 = vpop.f32.mrf.mxu1 }
 0xcd3   : > { %v9061_v1 = vadd.f32 %v9060_v54, %v8649_v34  ;;  %v9373_v27 = vpop.f32.mrf.mxu2  ;;  %v9660_v29 = vpop.f32.mrf.mxu3  ;;  %v8654_v16 = vadd.f32 %v8653_v44, %v14634_v31 }
 0xcd5   : > { %v9374_v50 = vadd.f32 %v9373_v27, %v9061_v1 }
 0xcd7   : > { %v9661_v51 = vadd.f32 %v9660_v29, %v9374_v50 }
 0xcd9   : > { %9809 = vst.msk [vmem:[%s13121_s21 + $0x3a8] sm:$0xff] %vm9692_vm1, %v9661_v51 }
 0xcda   : > { %v8658_v56 = vpop.f32.mrf.mxu0  ;;  %v9066_v52 = vpop.f32.mrf.mxu1 }
 0xcdb   : > { %v9067_v45 = vadd.f32 %v9066_v52, %v8654_v16  ;;  %v9377_v55 = vpop.f32.mrf.mxu2  ;;  %v9664_v21 = vpop.f32.mrf.mxu3  ;;  %v8659_v41 = vadd.f32 %v8658_v56, %v14641_v48 }
 0xcdd   : > { %v9378_v25 = vadd.f32 %v9377_v55, %v9067_v45 }
 0xcdf   : > { %v9665_v62 = vadd.f32 %v9664_v21, %v9378_v25 }
 0xce1   : > { %9811 = vst.msk [vmem:[%s13121_s21 + $0x3b8] sm:$0xff] %vm9692_vm1, %v9665_v62 }
 0xce2   : > { %v8663_v36 = vpop.f32.mrf.mxu0  ;;  %v9072_v30 = vpop.f32.mrf.mxu1 }
 0xce3   : > { %v9073_v19 = vadd.f32 %v9072_v30, %v8659_v41  ;;  %v9381_v59 = vpop.f32.mrf.mxu2  ;;  %v9668_v31 = vpop.f32.mrf.mxu3  ;;  %v8664_v49 = vadd.f32 %v8663_v36, %v14648_v43 }
 0xce5   : > { %v9382_v6 = vadd.f32 %v9381_v59, %v9073_v19 }
 0xce7   : > { %v9669_v15 = vadd.f32 %v9668_v31, %v9382_v6 }
 0xce9   : > { %9813 = vst.msk [vmem:[%s13121_s21 + $0x3c8] sm:$0xff] %vm9692_vm1, %v9669_v15 }
 0xcea   : > { %v8668_v14 = vpop.f32.mrf.mxu0  ;;  %v9078_v4 = vpop.f32.mrf.mxu1 }
 0xceb   : > { %v9079_v47 = vadd.f32 %v9078_v4, %v8664_v49  ;;  %v9385_v53 = vpop.f32.mrf.mxu2  ;;  %v9672_v48 = vpop.f32.mrf.mxu3  ;;  %v8669_v38 = vadd.f32 %v8668_v14, %v14655_v13 }
 0xced   : > { %v9386_v22 = vadd.f32 %v9385_v53, %v9079_v47 }
 0xcef   : > { %v9673_v8 = vadd.f32 %v9672_v48, %v9386_v22 }
 0xcf1   : > { %9815 = vst.msk [vmem:[%s13121_s21 + $0x3d8] sm:$0xff] %vm9692_vm1, %v9673_v8 }
 0xcf2   : > { %v8673_v42 = vpop.f32.mrf.mxu0  ;;  %v9084_v10 = vpop.f32.mrf.mxu1 }
 0xcf3   : > { %v9085_v9 = vadd.f32 %v9084_v10, %v8669_v38  ;;  %v9389_v57 = vpop.f32.mrf.mxu2  ;;  %v9676_v43 = vpop.f32.mrf.mxu3  ;;  %v8674_v3 = vadd.f32 %v8673_v42, %v14662_v26 }
 0xcf5   : > { %v9390_v46 = vadd.f32 %v9389_v57, %v9085_v9 }
 0xcf7   : > { %v9677_v0 = vadd.f32 %v9676_v43, %v9390_v46 }
 0xcf9   : > { %9817 = vst.msk [vmem:[%s13121_s21 + $0x3e8] sm:$0xff] %vm9692_vm1, %v9677_v0 }
 0xcfa   : > { %v9090_v20 = vpop.f32.mrf.mxu1  ;;  %v8678_v13 = vpop.f32.mrf.mxu0 }
 0xcfb   : > { %v9091_v40 = vadd.f32 %v9090_v20, %v8674_v3  ;;  %v9393_v39 = vpop.f32.mrf.mxu2  ;;  %v9680_v12 = vpop.f32.mrf.mxu3  ;;  %v8679_v58 = vadd.f32 %v8678_v13, %v14669_v23 }
 0xcfd   : > { %v9394_v11 = vadd.f32 %v9393_v39, %v9091_v40 }
 0xcff   : > { %v9681_v28 = vadd.f32 %v9680_v12, %v9394_v11 }
 0xd01   : > { %9819 = vst.msk [vmem:[%s13121_s21 + $0x3f8] sm:$0xff] %vm9692_vm1, %v9681_v28 }
 0xd02   : > { %v9096_v7 = vpop.f32.mrf.mxu1  ;;  %v8683_v5 = vpop.f32.mrf.mxu0 }
 0xd03   : > { %v9097_v2 = vadd.f32 %v9096_v7, %v8679_v58  ;;  %v9397_v63 = vpop.f32.mrf.mxu2  ;;  %v9684_v17 = vpop.f32.mrf.mxu3  ;;  %v8684_v35 = vadd.f32 %v8683_v5, %v14676_v37 }
 0xd05   : > { %v9398_v26 = vadd.f32 %v9397_v63, %v9097_v2 }
 0xd07   : > { %v9685_v24 = vadd.f32 %v9684_v17, %v9398_v26 }
 0xd09   : > { %9821 = vst.msk [vmem:[%s13121_s21 + $0x408] sm:$0xff] %vm9692_vm1, %v9685_v24 }
 0xd0a   : > { %v9102_v33 = vpop.f32.mrf.mxu1 }
 0xd0b   : > { %v9103_v18 = vadd.f32 %v9102_v33, %v8684_v35  ;;  %v9401_v32 = vpop.f32.mrf.mxu2  ;;  %v9688_v60 = vpop.f32.mrf.mxu3 }
 0xd0d   : > { %v9402_v61 = vadd.f32 %v9401_v32, %v9103_v18 }
 0xd0f   : > { %v9689_v23 = vadd.f32 %v9688_v60, %v9402_v61 }
 0xd11   : > { %9823 = vst.msk [vmem:[%s13121_s21 + $0x418] sm:$0xff] %vm9692_vm1, %v9689_v23 }
 0xd12 PF: > { %s12_s9 = sadd.s32 1, %s9909_s9  }
 0xd13   : > { %p9_p4 = scmp.ge.s32.totalorder %s12_s9, 4  }
 0xd15   :  { %11 = sbr.rel (!%p9_p4) target bundleno = 1 (0x1), region = 58 }

</bundles_post_ra>
